<compile_context>
chip_gen: v7x
topology: tpu7x:2x2x1
jax: 0.10.0
libtpu: 0.0.40
codegen_flags: <defaults>
</compile_context>

<pallas_src>
import functools

import jax
import jax.numpy as jnp
from jax.experimental import pallas as pl
from jax.experimental.pallas import tpu as pltpu

EPS = 1e-5


# ----------------------------- hardware-aware sizing -----------------------------

def _vmem_capacity_bytes():
    try:
        return int(pltpu.get_tpu_info().vmem_capacity_bytes)
    except Exception:
        return 64 * 1024 * 1024  # conservative (v7x per-TC VMEM)


def _device_kind():
    try:
        return jax.devices()[0].device_kind.lower()
    except Exception:
        return ""


def _default_bm_target():
    kind = _device_kind()
    if "v5e" in kind or "v5 lite" in kind or "v5litepod" in kind:
        return 256  # v5e: lowest HBM BW, smaller MXU -> 256 is enough
    if _vmem_capacity_bytes() >= 96 * 1024 * 1024:
        return 512  # v6e: 128 MiB VMEM -> big slabs reach ~85% of HBM roofline
    return 256      # v7x: 64 MiB VMEM -> leave room for resident weight slabs


def _pick_bm(batch, target):
    """Largest multiple-of-8 divisor of `batch` <= target, keeping >= 2 tiles if possible."""
    cap = min(target, max(8, (batch // 2) // 8 * 8))
    best = 0
    for d in range(8, cap + 1, 8):
        if batch % d == 0:
            best = d
    # TODO(synk): pad the batch (and mask padded rows out of the stats) instead of falling
    # back to a single gridless tile when B has no multiple-of-8 divisor.
    return best if best else batch


def _pick_tn(k, n, budget_bytes):
    """Largest multiple-of-128 divisor of n whose (k, tn) bf16 weight slab fits the budget."""
    if n % 128 != 0:
        return n
    best = 0
    for tn in range(128, n + 1, 128):
        if n % tn == 0 and k * tn * 2 <= budget_bytes:
            best = tn
    # TODO(synk): stream K via pltpu.emit_pipeline if even a single 128-wide column slab
    # exceeds the VMEM budget (only for extremely large in_dim).
    return best if best else 128


# ----------------------------------- kernels -----------------------------------

def _make_kernel(fuse_bn_prologue, emit_stats):
    """[optional fused BN(scale,shift)+ReLU in f32] -> bf16 MXU matmul (f32 acc) + bias
       [-> single full-tile store of a (2, tn) sum / sum-of-squares stats slab]."""

    def kernel(*refs):
        if fuse_bn_prologue:
            x_ref, scale_ref, shift_ref, w_ref, b_ref = refs[:5]
            outs = refs[5:]
            # BatchNorm folded to per-feature scale/shift + ReLU. Elementwise math stays in
            # f32 (v5e has no bf16 VPU/EUP path); only the MXU operands are bf16.
            a = jnp.maximum(
                x_ref[...].astype(jnp.float32) * scale_ref[...] + shift_ref[...], 0.0)
        else:
            x_ref, w_ref, b_ref = refs[:3]
            outs = refs[3:]
            a = x_ref[...].astype(jnp.float32)

        # bf16 MXU matmul with f32 accumulation; bias add in f32.
        h = jnp.dot(a.astype(jnp.bfloat16), w_ref[...],
                    preferred_element_type=jnp.float32) + b_ref[...]

        if emit_stats:
            h_ref, stat_ref = outs
            # BN statistics are taken from the f32 accumulator *before* the bf16 cast,
            # and written with one full-tile store (no zero-fill / masked row stores).
            stat_ref[...] = jnp.concatenate(
                [jnp.sum(h, axis=0, keepdims=True),
                 jnp.sum(h * h, axis=0, keepdims=True)], axis=0)
        else:
            (h_ref,) = outs
        h_ref[...] = h.astype(h_ref.dtype)

    return kernel


def _resident_spec(block_shape, index_map, single_buffer):
    """BlockSpec for blocks whose index is constant along the inner (batch) grid axis:
    they are DMA'd once per outer step, so a second pipeline buffer only wastes VMEM."""
    if single_buffer:
        return pl.BlockSpec(block_shape, index_map, pipeline_mode=pl.Buffered(1))
    return pl.BlockSpec(block_shape, index_map)


def _linear_layer(x, w, b, *, scale=None, shift=None, collect_stats=False,
                  out_dtype=jnp.float32, bm, vmem_cap, single_buffer_resident=True):
    """y = [BN/ReLU](x) @ W + b over a (N-tiles, batch-tiles) parallel grid (+ optional stats)."""
    B, K = x.shape
    w = jnp.asarray(w, jnp.bfloat16)
    N = w.shape[1]
    assert B % bm == 0, (B, bm)
    bt = B // bm
    # Resident weight column slab budget (well below the scoped-VMEM cap).
    tn = _pick_tn(K, N, budget_bytes=max(4 * 1024 * 1024, vmem_cap // 3))
    nt = N // tn
    fuse = scale is not None

    operands = [x]
    in_specs = [pl.BlockSpec((bm, K), lambda j, i: (i, 0))]
    if fuse:
        operands += [scale, shift]
        in_specs += [_resident_spec((1, K), lambda j, i: (0, 0), single_buffer_resident),
                     _resident_spec((1, K), lambda j, i: (0, 0), single_buffer_resident)]
    operands += [w, b]
    # N-tile index is the outer grid axis, so the weight slab stays VMEM-resident across
    # the inner batch tiles.
    in_specs += [_resident_spec((K, tn), lambda j, i: (0, j), single_buffer_resident),
                 _resident_spec((1, tn), lambda j, i: (0, j), single_buffer_resident)]

    h_shape = jax.ShapeDtypeStruct((B, N), out_dtype)
    h_spec = pl.BlockSpec((bm, tn), lambda j, i: (i, j))
    if collect_stats:
        out_shape = (h_shape, jax.ShapeDtypeStruct((bt, 2, N), jnp.float32))
        out_specs = (h_spec, pl.BlockSpec((None, 2, tn), lambda j, i: (i, 0, j)))
    else:
        out_shape = h_shape
        out_specs = h_spec

    # Explicit per-buffer VMEM footprint: 2x for pipelined activation/stats blocks,
    # 1x for single-buffered resident blocks.
    res = 1 if single_buffer_resident else 2
    x_bytes = x.dtype.itemsize
    out_bytes = jnp.dtype(out_dtype).itemsize
    footprint = (2 * bm * K * x_bytes
                 + 2 * bm * tn * out_bytes
                 + (2 * 2 * tn * 4 if collect_stats else 0)
                 + res * (K * tn * 2 + tn * 4)
                 + (res * 2 * K * 4 if fuse else 0))
    vmem_limit = int(min(vmem_cap, max(int(1.25 * footprint) + (4 << 20), 16 << 20)))

    cost = pl.CostEstimate(
        flops=2 * B * K * N,
        transcendentals=0,
        bytes_accessed=(nt * x.size * x_bytes + w.size * 2 + b.size * 4
                        + B * N * out_bytes
                        + (bt * 2 * N * 4 if collect_stats else 0)
                        + (2 * K * 4 if fuse else 0)),
    )

    return pl.pallas_call(
        _make_kernel(fuse, collect_stats),
        out_shape=out_shape,
        grid=(nt, bt),
        in_specs=in_specs,
        out_specs=out_specs,
        compiler_params=pltpu.CompilerParams(
            dimension_semantics=("parallel", "parallel"),
            vmem_limit_bytes=vmem_limit),
        cost_estimate=cost,
    )(*operands)


def _bn_fold(stats, batch, gamma, beta):
    """Cross-tile reduce of per-tile (sum, sum_sq) -> folded BN scale/shift (train-mode BN)."""
    total = jnp.sum(stats[:, 0, :], axis=0)
    total_sq = jnp.sum(stats[:, 1, :], axis=0)
    mean = total / batch
    var = jnp.maximum(total_sq / batch - mean * mean, 0.0)  # biased var (PyTorch train mode)
    # TODO(synk): for activations with |mean| >> std, switch to centered/Welford folding to
    # avoid one-pass cancellation.
    inv = jax.lax.rsqrt(var + EPS)
    n = stats.shape[-1]
    sc = (gamma.reshape(-1) * inv).reshape(1, n).astype(jnp.float32)
    sh = (beta.reshape(-1) - mean * sc.reshape(-1)).reshape(1, n).astype(jnp.float32)
    return sc, sh


def projection_head(x, params, *, bm=None, single_buffer_resident=True):
    """x: (B, in_dim) f32 -> (B, out_dim) f32, matching ProjectionHead.forward (train-mode BN)."""
    B = x.shape[0]
    if bm is None:
        bm = _pick_bm(B, _default_bm_target())
    vmem_cap = (3 * _vmem_capacity_bytes()) // 4  # ~48 MiB on v7x, ~96 MiB on v5e/v6e

    kw = dict(bm=bm, vmem_cap=vmem_cap, single_buffer_resident=single_buffer_resident)
    # Layers 1/2 store bf16 intermediates; BN stats are taken from the f32 accumulator.
    h1, st1 = _linear_layer(x, params["w1"], params["b1"], collect_stats=True,
                            out_dtype=jnp.bfloat16, **kw)
    sc1, sh1 = _bn_fold(st1, B, params["g1"], params["be1"])
    h2, st2 = _linear_layer(h1, params["w2"], params["b2"], scale=sc1, shift=sh1,
                            collect_stats=True, out_dtype=jnp.bfloat16, **kw)
    sc2, sh2 = _bn_fold(st2, B, params["g2"], params["be2"])
    out = _linear_layer(h2, params["w3"], params["b3"], scale=sc2, shift=sh2,
                        collect_stats=False, out_dtype=jnp.float32, **kw)
    return out


# ------------------------------- params / reference -------------------------------

def init_params(key, in_dim, out_dim):
    """Synthetic params matching nn.Linear / nn.BatchNorm1d shapes.

    Linear weights are stored pre-transposed as (in, out) in bfloat16 (MXU-native);
    biases and BN affine params stay float32.
    """
    ks = jax.random.split(key, 6)
    s1 = 1.0 / jnp.sqrt(in_dim)

    def lin_w(k, i, o):
        return jax.random.uniform(k, (i, o), jnp.float32, -s1, s1).astype(jnp.bfloat16)

    return {
        "w1": lin_w(ks[0], in_dim, in_dim),
        "b1": jax.random.uniform(ks[1], (1, in_dim), jnp.float32, -s1, s1),
        "g1": jnp.ones((1, in_dim), jnp.float32),
        "be1": jnp.zeros((1, in_dim), jnp.float32),
        "w2": lin_w(ks[2], in_dim, in_dim),
        "b2": jax.random.uniform(ks[3], (1, in_dim), jnp.float32, -s1, s1),
        "g2": jnp.ones((1, in_dim), jnp.float32),
        "be2": jnp.zeros((1, in_dim), jnp.float32),
        "w3": lin_w(ks[4], in_dim, out_dim),
        "b3": jax.random.uniform(ks[5], (1, out_dim), jnp.float32, -s1, s1),
    }


def projection_head_ref(x, params):
    """Pure-JAX reference mirroring the kernel precision policy: bf16 MXU operands with f32
    accumulation, bf16 inter-layer activations, BN stats from the f32 pre-cast values."""

    def lin(a, w, b):
        return jnp.dot(a.astype(jnp.bfloat16), w.astype(jnp.bfloat16),
                       preferred_element_type=jnp.float32) + b

    def bn_relu(h, g, be):
        m = jnp.mean(h, axis=0, keepdims=True)
        v = jnp.maximum(jnp.mean(h * h, axis=0, keepdims=True) - m * m, 0.0)
        hq = h.astype(jnp.bfloat16).astype(jnp.float32)  # stored inter-layer dtype
        return jnp.maximum((hq - m) * jax.lax.rsqrt(v + EPS) * g + be, 0.0)

    h = lin(x, params["w1"], params["b1"])
    h = bn_relu(h, params["g1"], params["be1"])
    h = lin(h, params["w2"], params["b2"])
    h = bn_relu(h, params["g2"], params["be2"])
    return lin(h, params["w3"], params["b3"])


if __name__ == "__main__":
    # Small but tiling-exercising shapes: multiple batch tiles (bm >= 256 on all gens),
    # 128-aligned feature dims.
    B, IN_DIM, OUT_DIM = 512, 256, 128

    key = jax.random.PRNGKey(0)
    kx, kp = jax.random.split(key)
    x = jax.random.normal(kx, (B, IN_DIM), jnp.float32)
    params = init_params(kp, IN_DIM, OUT_DIM)

    fwd = jax.jit(projection_head)
    try:
        out = jax.block_until_ready(fwd(x, params))
    except Exception:
        # Fallback for Pallas builds that reject pipeline_mode=pl.Buffered(1):
        # identical kernels with default double-buffered resident blocks.
        fwd = jax.jit(functools.partial(projection_head, single_buffer_resident=False))
        out = jax.block_until_ready(fwd(x, params))

    ref = jax.block_until_ready(projection_head_ref(x, params))

    assert out.shape == (B, OUT_DIM), out.shape
    max_err = float(jnp.max(jnp.abs(out - ref)))
    assert jnp.allclose(out, ref, atol=1e-2, rtol=1e-2), max_err

    print("KERNEL_OK")
</pallas_src>

<mosaic_0001>
module attributes {stable_mosaic.version = 11 : i64} {
  func.func @kernel(%arg0: i32, %arg1: i32, %arg2: memref<256x256xf32, #tpu.memory_space<vmem>>, %arg3: memref<256x256xbf16, #tpu.memory_space<vmem>>, %arg4: memref<1x256xf32, #tpu.memory_space<vmem>>, %arg5: memref<256x256xbf16, #tpu.memory_space<vmem>>, %arg6: memref<1x2x256xf32, #tpu.memory_space<vmem>>) attributes {dimension_semantics = [#tpu.dimension_semantics<parallel>, #tpu.dimension_semantics<parallel>], iteration_bounds = array<i64: 1, 2>, scalar_prefetch = 0 : i64, scratch_operands = 0 : i64, tpu.core_type = #tpu.core_type<tc>, window_params = [{transform_indices = @transform_0, window_bounds = array<i64: 256, 256>}, {pipeline_mode = #tpu.pipeline_mode<synchronous>, transform_indices = @transform_1, window_bounds = array<i64: 256, 256>}, {pipeline_mode = #tpu.pipeline_mode<synchronous>, transform_indices = @transform_2, window_bounds = array<i64: 1, 256>}, {transform_indices = @transform_3, window_bounds = array<i64: 256, 256>}, {transform_indices = @transform_4, window_bounds = array<i64: 1, 2, 256>}]} {
    %c0 = arith.constant 0 : index
    %c0_0 = arith.constant 0 : index
    %0 = vector.load %arg2[%c0, %c0_0] : memref<256x256xf32, #tpu.memory_space<vmem>>, vector<256x256xf32>
    %1 = arith.truncf %0 : vector<256x256xf32> to vector<256x256xbf16>
    %c0_1 = arith.constant 0 : index
    %c0_2 = arith.constant 0 : index
    %2 = vector.load %arg3[%c0_1, %c0_2] : memref<256x256xbf16, #tpu.memory_space<vmem>>, vector<256x256xbf16>
    %cst = arith.constant dense<0.000000e+00> : vector<256x256xf32>
    %3 = tpu.matmul %1, %2, %cst {dimension_numbers = #tpu.dot_dimension_numbers<[1], [0], [0], [1], [0, 0, 1, 1], [], []>} : vector<256x256xbf16>, vector<256x256xbf16>, vector<256x256xf32> -> vector<256x256xf32>
    %c0_3 = arith.constant 0 : index
    %c0_4 = arith.constant 0 : index
    %4 = vector.load %arg4[%c0_3, %c0_4] : memref<1x256xf32, #tpu.memory_space<vmem>>, vector<1x256xf32>
    %5 = vector.broadcast %4 : vector<1x256xf32> to vector<256x256xf32>
    %6 = arith.addf %3, %5 : vector<256x256xf32>
    %cst_5 = arith.constant dense<0.000000e+00> : vector<256xf32>
    %7 = vector.multi_reduction <add>, %6, %cst_5 [0] : vector<256x256xf32> to vector<256xf32>
    %8 = vector.shape_cast %7 : vector<256xf32> to vector<1x256xf32>
    %9 = arith.mulf %6, %6 : vector<256x256xf32>
    %cst_6 = arith.constant dense<0.000000e+00> : vector<256xf32>
    %10 = vector.multi_reduction <add>, %9, %cst_6 [0] : vector<256x256xf32> to vector<256xf32>
    %11 = vector.shape_cast %10 : vector<256xf32> to vector<1x256xf32>
    %12 = tpu.concatenate %8, %11 in 0 : vector<1x256xf32>, vector<1x256xf32> -> vector<2x256xf32>
    %c0_7 = arith.constant 0 : index
    %c0_8 = arith.constant 0 : index
    %c0_9 = arith.constant 0 : index
    %13 = vector.load %arg6[%c0_7, %c0_8, %c0_9] : memref<1x2x256xf32, #tpu.memory_space<vmem>>, vector<1x2x256xf32>
    %14 = vector.shape_cast %13 : vector<1x2x256xf32> to vector<2x256xf32>
    %15 = vector.shape_cast %12 : vector<2x256xf32> to vector<1x2x256xf32>
    tpu.vector_store %arg6[%c0_7, %c0_8, %c0_9], %15 {strides = array<i32>} : memref<1x2x256xf32, #tpu.memory_space<vmem>>, vector<1x2x256xf32>,
    %16 = arith.truncf %6 : vector<256x256xf32> to vector<256x256xbf16>
    %c0_10 = arith.constant 0 : index
    %c0_11 = arith.constant 0 : index
    %17 = vector.load %arg5[%c0_10, %c0_11] : memref<256x256xbf16, #tpu.memory_space<vmem>>, vector<256x256xbf16>
    tpu.vector_store %arg5[%c0_10, %c0_11], %16 {strides = array<i32>} : memref<256x256xbf16, #tpu.memory_space<vmem>>, vector<256x256xbf16>,
    return
  }
  func.func @transform_0(%arg0: i32, %arg1: i32) -> (i32, i32) {
    %c0_i32 = arith.constant 0 : i32
    %c0_i32_0 = arith.constant 0 : i32
    return %arg1, %c0_i32 : i32, i32
  }
  func.func @transform_1(%arg0: i32, %arg1: i32) -> (i32, i32) {
    %c0_i32 = arith.constant 0 : i32
    %c0_i32_0 = arith.constant 0 : i32
    return %c0_i32, %arg0 : i32, i32
  }
  func.func @transform_2(%arg0: i32, %arg1: i32) -> (i32, i32) {
    %c0_i32 = arith.constant 0 : i32
    %c0_i32_0 = arith.constant 0 : i32
    return %c0_i32, %arg0 : i32, i32
  }
  func.func @transform_3(%arg0: i32, %arg1: i32) -> (i32, i32) {
    %c0_i32 = arith.constant 0 : i32
    return %arg1, %arg0 : i32, i32
  }
  func.func @transform_4(%arg0: i32, %arg1: i32) -> (i32, i32, i32) {
    %c0_i32 = arith.constant 0 : i32
    %c0_i32_0 = arith.constant 0 : i32
    return %arg1, %c0_i32, %arg0 : i32, i32, i32
  }
}

module attributes {stable_mosaic.version = 11 : i64} {
  func.func @kernel(%arg0: i32, %arg1: i32, %arg2: memref<256x256xbf16, #tpu.memory_space<vmem>>, %arg3: memref<1x256xf32, #tpu.memory_space<vmem>>, %arg4: memref<1x256xf32, #tpu.memory_space<vmem>>, %arg5: memref<256x128xbf16, #tpu.memory_space<vmem>>, %arg6: memref<1x128xf32, #tpu.memory_space<vmem>>, %arg7: memref<256x128xf32, #tpu.memory_space<vmem>>) attributes {dimension_semantics = [#tpu.dimension_semantics<parallel>, #tpu.dimension_semantics<parallel>], iteration_bounds = array<i64: 1, 2>, scalar_prefetch = 0 : i64, scratch_operands = 0 : i64, tpu.core_type = #tpu.core_type<tc>, window_params = [{transform_indices = @transform_0, window_bounds = array<i64: 256, 256>}, {pipeline_mode = #tpu.pipeline_mode<synchronous>, transform_indices = @transform_1, window_bounds = array<i64: 1, 256>}, {pipeline_mode = #tpu.pipeline_mode<synchronous>, transform_indices = @transform_2, window_bounds = array<i64: 1, 256>}, {pipeline_mode = #tpu.pipeline_mode<synchronous>, transform_indices = @transform_3, window_bounds = array<i64: 256, 128>}, {pipeline_mode = #tpu.pipeline_mode<synchronous>, transform_indices = @transform_4, window_bounds = array<i64: 1, 128>}, {transform_indices = @transform_5, window_bounds = array<i64: 256, 128>}]} {
    %c0 = arith.constant 0 : index
    %c0_0 = arith.constant 0 : index
    %0 = vector.load %arg2[%c0, %c0_0] : memref<256x256xbf16, #tpu.memory_space<vmem>>, vector<256x256xbf16>
    %1 = arith.extf %0 : vector<256x256xbf16> to vector<256x256xf32>
    %c0_1 = arith.constant 0 : index
    %c0_2 = arith.constant 0 : index
    %2 = vector.load %arg3[%c0_1, %c0_2] : memref<1x256xf32, #tpu.memory_space<vmem>>, vector<1x256xf32>
    %3 = vector.broadcast %2 : vector<1x256xf32> to vector<256x256xf32>
    %4 = arith.mulf %1, %3 : vector<256x256xf32>
    %c0_3 = arith.constant 0 : index
    %c0_4 = arith.constant 0 : index
    %5 = vector.load %arg4[%c0_3, %c0_4] : memref<1x256xf32, #tpu.memory_space<vmem>>, vector<1x256xf32>
    %6 = vector.broadcast %5 : vector<1x256xf32> to vector<256x256xf32>
    %7 = arith.addf %4, %6 : vector<256x256xf32>
    %cst = arith.constant 0.000000e+00 : f32
    %8 = vector.broadcast %cst : f32 to vector<256x256xf32>
    %9 = arith.maximumf %7, %8 : vector<256x256xf32>
    %10 = arith.truncf %9 : vector<256x256xf32> to vector<256x256xbf16>
    %c0_5 = arith.constant 0 : index
    %c0_6 = arith.constant 0 : index
    %11 = vector.load %arg5[%c0_5, %c0_6] : memref<256x128xbf16, #tpu.memory_space<vmem>>, vector<256x128xbf16>
    %cst_7 = arith.constant dense<0.000000e+00> : vector<256x128xf32>
    %12 = tpu.matmul %10, %11, %cst_7 {dimension_numbers = #tpu.dot_dimension_numbers<[1], [0], [0], [1], [0, 0, 1, 1], [], []>} : vector<256x256xbf16>, vector<256x128xbf16>, vector<256x128xf32> -> vector<256x128xf32>
    %c0_8 = arith.constant 0 : index
    %c0_9 = arith.constant 0 : index
    %13 = vector.load %arg6[%c0_8, %c0_9] : memref<1x128xf32, #tpu.memory_space<vmem>>, vector<1x128xf32>
    %14 = vector.broadcast %13 : vector<1x128xf32> to vector<256x128xf32>
    %15 = arith.addf %12, %14 : vector<256x128xf32>
    %c0_10 = arith.constant 0 : index
    %c0_11 = arith.constant 0 : index
    %16 = vector.load %arg7[%c0_10, %c0_11] : memref<256x128xf32, #tpu.memory_space<vmem>>, vector<256x128xf32>
    tpu.vector_store %arg7[%c0_10, %c0_11], %15 {strides = array<i32>} : memref<256x128xf32, #tpu.memory_space<vmem>>, vector<256x128xf32>,
    return
  }
  func.func @transform_0(%arg0: i32, %arg1: i32) -> (i32, i32) {
    %c0_i32 = arith.constant 0 : i32
    %c0_i32_0 = arith.constant 0 : i32
    return %arg1, %c0_i32 : i32, i32
  }
  func.func @transform_1(%arg0: i32, %arg1: i32) -> (i32, i32) {
    %c0_i32 = arith.constant 0 : i32
    %c0_i32_0 = arith.constant 0 : i32
    %c0_i32_1 = arith.constant 0 : i32
    return %c0_i32, %c0_i32_0 : i32, i32
  }
  func.func @transform_2(%arg0: i32, %arg1: i32) -> (i32, i32) {
    %c0_i32 = arith.constant 0 : i32
    %c0_i32_0 = arith.constant 0 : i32
    %c0_i32_1 = arith.constant 0 : i32
    return %c0_i32, %c0_i32_0 : i32, i32
  }
  func.func @transform_3(%arg0: i32, %arg1: i32) -> (i32, i32) {
    %c0_i32 = arith.constant 0 : i32
    %c0_i32_0 = arith.constant 0 : i32
    return %c0_i32, %arg0 : i32, i32
  }
  func.func @transform_4(%arg0: i32, %arg1: i32) -> (i32, i32) {
    %c0_i32 = arith.constant 0 : i32
    %c0_i32_0 = arith.constant 0 : i32
    return %c0_i32, %arg0 : i32, i32
  }
  func.func @transform_5(%arg0: i32, %arg1: i32) -> (i32, i32) {
    %c0_i32 = arith.constant 0 : i32
    return %arg1, %arg0 : i32, i32
  }
}

module attributes {stable_mosaic.version = 11 : i64} {
  func.func @kernel(%arg0: i32, %arg1: i32, %arg2: memref<256x256xbf16, #tpu.memory_space<vmem>>, %arg3: memref<1x256xf32, #tpu.memory_space<vmem>>, %arg4: memref<1x256xf32, #tpu.memory_space<vmem>>, %arg5: memref<256x256xbf16, #tpu.memory_space<vmem>>, %arg6: memref<1x256xf32, #tpu.memory_space<vmem>>, %arg7: memref<256x256xbf16, #tpu.memory_space<vmem>>, %arg8: memref<1x2x256xf32, #tpu.memory_space<vmem>>) attributes {dimension_semantics = [#tpu.dimension_semantics<parallel>, #tpu.dimension_semantics<parallel>], iteration_bounds = array<i64: 1, 2>, scalar_prefetch = 0 : i64, scratch_operands = 0 : i64, tpu.core_type = #tpu.core_type<tc>, window_params = [{transform_indices = @transform_0, window_bounds = array<i64: 256, 256>}, {pipeline_mode = #tpu.pipeline_mode<synchronous>, transform_indices = @transform_1, window_bounds = array<i64: 1, 256>}, {pipeline_mode = #tpu.pipeline_mode<synchronous>, transform_indices = @transform_2, window_bounds = array<i64: 1, 256>}, {pipeline_mode = #tpu.pipeline_mode<synchronous>, transform_indices = @transform_3, window_bounds = array<i64: 256, 256>}, {pipeline_mode = #tpu.pipeline_mode<synchronous>, transform_indices = @transform_4, window_bounds = array<i64: 1, 256>}, {transform_indices = @transform_5, window_bounds = array<i64: 256, 256>}, {transform_indices = @transform_6, window_bounds = array<i64: 1, 2, 256>}]} {
    %c0 = arith.constant 0 : index
    %c0_0 = arith.constant 0 : index
    %0 = vector.load %arg2[%c0, %c0_0] : memref<256x256xbf16, #tpu.memory_space<vmem>>, vector<256x256xbf16>
    %1 = arith.extf %0 : vector<256x256xbf16> to vector<256x256xf32>
    %c0_1 = arith.constant 0 : index
    %c0_2 = arith.constant 0 : index
    %2 = vector.load %arg3[%c0_1, %c0_2] : memref<1x256xf32, #tpu.memory_space<vmem>>, vector<1x256xf32>
    %3 = vector.broadcast %2 : vector<1x256xf32> to vector<256x256xf32>
    %4 = arith.mulf %1, %3 : vector<256x256xf32>
    %c0_3 = arith.constant 0 : index
    %c0_4 = arith.constant 0 : index
    %5 = vector.load %arg4[%c0_3, %c0_4] : memref<1x256xf32, #tpu.memory_space<vmem>>, vector<1x256xf32>
    %6 = vector.broadcast %5 : vector<1x256xf32> to vector<256x256xf32>
    %7 = arith.addf %4, %6 : vector<256x256xf32>
    %cst = arith.constant 0.000000e+00 : f32
    %8 = vector.broadcast %cst : f32 to vector<256x256xf32>
    %9 = arith.maximumf %7, %8 : vector<256x256xf32>
    %10 = arith.truncf %9 : vector<256x256xf32> to vector<256x256xbf16>
    %c0_5 = arith.constant 0 : index
    %c0_6 = arith.constant 0 : index
    %11 = vector.load %arg5[%c0_5, %c0_6] : memref<256x256xbf16, #tpu.memory_space<vmem>>, vector<256x256xbf16>
    %cst_7 = arith.constant dense<0.000000e+00> : vector<256x256xf32>
    %12 = tpu.matmul %10, %11, %cst_7 {dimension_numbers = #tpu.dot_dimension_numbers<[1], [0], [0], [1], [0, 0, 1, 1], [], []>} : vector<256x256xbf16>, vector<256x256xbf16>, vector<256x256xf32> -> vector<256x256xf32>
    %c0_8 = arith.constant 0 : index
    %c0_9 = arith.constant 0 : index
    %13 = vector.load %arg6[%c0_8, %c0_9] : memref<1x256xf32, #tpu.memory_space<vmem>>, vector<1x256xf32>
    %14 = vector.broadcast %13 : vector<1x256xf32> to vector<256x256xf32>
    %15 = arith.addf %12, %14 : vector<256x256xf32>
    %cst_10 = arith.constant dense<0.000000e+00> : vector<256xf32>
    %16 = vector.multi_reduction <add>, %15, %cst_10 [0] : vector<256x256xf32> to vector<256xf32>
    %17 = vector.shape_cast %16 : vector<256xf32> to vector<1x256xf32>
    %18 = arith.mulf %15, %15 : vector<256x256xf32>
    %cst_11 = arith.constant dense<0.000000e+00> : vector<256xf32>
    %19 = vector.multi_reduction <add>, %18, %cst_11 [0] : vector<256x256xf32> to vector<256xf32>
    %20 = vector.shape_cast %19 : vector<256xf32> to vector<1x256xf32>
    %21 = tpu.concatenate %17, %20 in 0 : vector<1x256xf32>, vector<1x256xf32> -> vector<2x256xf32>
    %c0_12 = arith.constant 0 : index
    %c0_13 = arith.constant 0 : index
    %c0_14 = arith.constant 0 : index
    %22 = vector.load %arg8[%c0_12, %c0_13, %c0_14] : memref<1x2x256xf32, #tpu.memory_space<vmem>>, vector<1x2x256xf32>
    %23 = vector.shape_cast %22 : vector<1x2x256xf32> to vector<2x256xf32>
    %24 = vector.shape_cast %21 : vector<2x256xf32> to vector<1x2x256xf32>
    tpu.vector_store %arg8[%c0_12, %c0_13, %c0_14], %24 {strides = array<i32>} : memref<1x2x256xf32, #tpu.memory_space<vmem>>, vector<1x2x256xf32>,
    %25 = arith.truncf %15 : vector<256x256xf32> to vector<256x256xbf16>
    %c0_15 = arith.constant 0 : index
    %c0_16 = arith.constant 0 : index
    %26 = vector.load %arg7[%c0_15, %c0_16] : memref<256x256xbf16, #tpu.memory_space<vmem>>, vector<256x256xbf16>
    tpu.vector_store %arg7[%c0_15, %c0_16], %25 {strides = array<i32>} : memref<256x256xbf16, #tpu.memory_space<vmem>>, vector<256x256xbf16>,
    return
  }
  func.func @transform_0(%arg0: i32, %arg1: i32) -> (i32, i32) {
    %c0_i32 = arith.constant 0 : i32
    %c0_i32_0 = arith.constant 0 : i32
    return %arg1, %c0_i32 : i32, i32
  }
  func.func @transform_1(%arg0: i32, %arg1: i32) -> (i32, i32) {
    %c0_i32 = arith.constant 0 : i32
    %c0_i32_0 = arith.constant 0 : i32
    %c0_i32_1 = arith.constant 0 : i32
    return %c0_i32, %c0_i32_0 : i32, i32
  }
  func.func @transform_2(%arg0: i32, %arg1: i32) -> (i32, i32) {
    %c0_i32 = arith.constant 0 : i32
    %c0_i32_0 = arith.constant 0 : i32
    %c0_i32_1 = arith.constant 0 : i32
    return %c0_i32, %c0_i32_0 : i32, i32
  }
  func.func @transform_3(%arg0: i32, %arg1: i32) -> (i32, i32) {
    %c0_i32 = arith.constant 0 : i32
    %c0_i32_0 = arith.constant 0 : i32
    return %c0_i32, %arg0 : i32, i32
  }
  func.func @transform_4(%arg0: i32, %arg1: i32) -> (i32, i32) {
    %c0_i32 = arith.constant 0 : i32
    %c0_i32_0 = arith.constant 0 : i32
    return %c0_i32, %arg0 : i32, i32
  }
  func.func @transform_5(%arg0: i32, %arg1: i32) -> (i32, i32) {
    %c0_i32 = arith.constant 0 : i32
    return %arg1, %arg0 : i32, i32
  }
  func.func @transform_6(%arg0: i32, %arg1: i32) -> (i32, i32, i32) {
    %c0_i32 = arith.constant 0 : i32
    %c0_i32_0 = arith.constant 0 : i32
    return %arg1, %c0_i32, %arg0 : i32, i32, i32
  }
}

module attributes {stable_mosaic.version = 11 : i64} {
  func.func @kernel(%arg0: i32, %arg1: i32, %arg2: memref<256x256xf32, #tpu.memory_space<vmem>>, %arg3: memref<256x256xbf16, #tpu.memory_space<vmem>>, %arg4: memref<1x256xf32, #tpu.memory_space<vmem>>, %arg5: memref<256x256xbf16, #tpu.memory_space<vmem>>, %arg6: memref<1x2x256xf32, #tpu.memory_space<vmem>>) attributes {dimension_semantics = [#tpu.dimension_semantics<parallel>, #tpu.dimension_semantics<parallel>], iteration_bounds = array<i64: 1, 2>, scalar_prefetch = 0 : i64, scratch_operands = 0 : i64, tpu.core_type = #tpu.core_type<tc>, window_params = [{transform_indices = @transform_0, window_bounds = array<i64: 256, 256>}, {transform_indices = @transform_1, window_bounds = array<i64: 256, 256>}, {transform_indices = @transform_2, window_bounds = array<i64: 1, 256>}, {transform_indices = @transform_3, window_bounds = array<i64: 256, 256>}, {transform_indices = @transform_4, window_bounds = array<i64: 1, 2, 256>}]} {
    %c0 = arith.constant 0 : index
    %c0_0 = arith.constant 0 : index
    %0 = vector.load %arg2[%c0, %c0_0] : memref<256x256xf32, #tpu.memory_space<vmem>>, vector<256x256xf32>
    %1 = arith.truncf %0 : vector<256x256xf32> to vector<256x256xbf16>
    %c0_1 = arith.constant 0 : index
    %c0_2 = arith.constant 0 : index
    %2 = vector.load %arg3[%c0_1, %c0_2] : memref<256x256xbf16, #tpu.memory_space<vmem>>, vector<256x256xbf16>
    %cst = arith.constant dense<0.000000e+00> : vector<256x256xf32>
    %3 = tpu.matmul %1, %2, %cst {dimension_numbers = #tpu.dot_dimension_numbers<[1], [0], [0], [1], [0, 0, 1, 1], [], []>} : vector<256x256xbf16>, vector<256x256xbf16>, vector<256x256xf32> -> vector<256x256xf32>
    %c0_3 = arith.constant 0 : index
    %c0_4 = arith.constant 0 : index
    %4 = vector.load %arg4[%c0_3, %c0_4] : memref<1x256xf32, #tpu.memory_space<vmem>>, vector<1x256xf32>
    %5 = vector.broadcast %4 : vector<1x256xf32> to vector<256x256xf32>
    %6 = arith.addf %3, %5 : vector<256x256xf32>
    %cst_5 = arith.constant dense<0.000000e+00> : vector<256xf32>
    %7 = vector.multi_reduction <add>, %6, %cst_5 [0] : vector<256x256xf32> to vector<256xf32>
    %8 = vector.shape_cast %7 : vector<256xf32> to vector<1x256xf32>
    %9 = arith.mulf %6, %6 : vector<256x256xf32>
    %cst_6 = arith.constant dense<0.000000e+00> : vector<256xf32>
    %10 = vector.multi_reduction <add>, %9, %cst_6 [0] : vector<256x256xf32> to vector<256xf32>
    %11 = vector.shape_cast %10 : vector<256xf32> to vector<1x256xf32>
    %12 = tpu.concatenate %8, %11 in 0 : vector<1x256xf32>, vector<1x256xf32> -> vector<2x256xf32>
    %c0_7 = arith.constant 0 : index
    %c0_8 = arith.constant 0 : index
    %c0_9 = arith.constant 0 : index
    %13 = vector.load %arg6[%c0_7, %c0_8, %c0_9] : memref<1x2x256xf32, #tpu.memory_space<vmem>>, vector<1x2x256xf32>
    %14 = vector.shape_cast %13 : vector<1x2x256xf32> to vector<2x256xf32>
    %15 = vector.shape_cast %12 : vector<2x256xf32> to vector<1x2x256xf32>
    tpu.vector_store %arg6[%c0_7, %c0_8, %c0_9], %15 {strides = array<i32>} : memref<1x2x256xf32, #tpu.memory_space<vmem>>, vector<1x2x256xf32>,
    %16 = arith.truncf %6 : vector<256x256xf32> to vector<256x256xbf16>
    %c0_10 = arith.constant 0 : index
    %c0_11 = arith.constant 0 : index
    %17 = vector.load %arg5[%c0_10, %c0_11] : memref<256x256xbf16, #tpu.memory_space<vmem>>, vector<256x256xbf16>
    tpu.vector_store %arg5[%c0_10, %c0_11], %16 {strides = array<i32>} : memref<256x256xbf16, #tpu.memory_space<vmem>>, vector<256x256xbf16>,
    return
  }
  func.func @transform_0(%arg0: i32, %arg1: i32) -> (i32, i32) {
    %c0_i32 = arith.constant 0 : i32
    %c0_i32_0 = arith.constant 0 : i32
    return %arg1, %c0_i32 : i32, i32
  }
  func.func @transform_1(%arg0: i32, %arg1: i32) -> (i32, i32) {
    %c0_i32 = arith.constant 0 : i32
    %c0_i32_0 = arith.constant 0 : i32
    return %c0_i32, %arg0 : i32, i32
  }
  func.func @transform_2(%arg0: i32, %arg1: i32) -> (i32, i32) {
    %c0_i32 = arith.constant 0 : i32
    %c0_i32_0 = arith.constant 0 : i32
    return %c0_i32, %arg0 : i32, i32
  }
  func.func @transform_3(%arg0: i32, %arg1: i32) -> (i32, i32) {
    %c0_i32 = arith.constant 0 : i32
    return %arg1, %arg0 : i32, i32
  }
  func.func @transform_4(%arg0: i32, %arg1: i32) -> (i32, i32, i32) {
    %c0_i32 = arith.constant 0 : i32
    %c0_i32_0 = arith.constant 0 : i32
    return %arg1, %c0_i32, %arg0 : i32, i32, i32
  }
}

module attributes {stable_mosaic.version = 11 : i64} {
  func.func @kernel(%arg0: i32, %arg1: i32, %arg2: memref<256x256xbf16, #tpu.memory_space<vmem>>, %arg3: memref<1x256xf32, #tpu.memory_space<vmem>>, %arg4: memref<1x256xf32, #tpu.memory_space<vmem>>, %arg5: memref<256x256xbf16, #tpu.memory_space<vmem>>, %arg6: memref<1x256xf32, #tpu.memory_space<vmem>>, %arg7: memref<256x256xbf16, #tpu.memory_space<vmem>>, %arg8: memref<1x2x256xf32, #tpu.memory_space<vmem>>) attributes {dimension_semantics = [#tpu.dimension_semantics<parallel>, #tpu.dimension_semantics<parallel>], iteration_bounds = array<i64: 1, 2>, scalar_prefetch = 0 : i64, scratch_operands = 0 : i64, tpu.core_type = #tpu.core_type<tc>, window_params = [{transform_indices = @transform_0, window_bounds = array<i64: 256, 256>}, {pipeline_mode = #tpu.pipeline_mode<synchronous>, transform_indices = @transform_1, window_bounds = array<i64: 1, 256>}, {pipeline_mode = #tpu.pipeline_mode<synchronous>, transform_indices = @transform_2, window_bounds = array<i64: 1, 256>}, {transform_indices = @transform_3, window_bounds = array<i64: 256, 256>}, {transform_indices = @transform_4, window_bounds = array<i64: 1, 256>}, {transform_indices = @transform_5, window_bounds = array<i64: 256, 256>}, {transform_indices = @transform_6, window_bounds = array<i64: 1, 2, 256>}]} {
    %c0 = arith.constant 0 : index
    %c0_0 = arith.constant 0 : index
    %0 = vector.load %arg2[%c0, %c0_0] : memref<256x256xbf16, #tpu.memory_space<vmem>>, vector<256x256xbf16>
    %1 = arith.extf %0 : vector<256x256xbf16> to vector<256x256xf32>
    %c0_1 = arith.constant 0 : index
    %c0_2 = arith.constant 0 : index
    %2 = vector.load %arg3[%c0_1, %c0_2] : memref<1x256xf32, #tpu.memory_space<vmem>>, vector<1x256xf32>
    %3 = vector.broadcast %2 : vector<1x256xf32> to vector<256x256xf32>
    %4 = arith.mulf %1, %3 : vector<256x256xf32>
    %c0_3 = arith.constant 0 : index
    %c0_4 = arith.constant 0 : index
    %5 = vector.load %arg4[%c0_3, %c0_4] : memref<1x256xf32, #tpu.memory_space<vmem>>, vector<1x256xf32>
    %6 = vector.broadcast %5 : vector<1x256xf32> to vector<256x256xf32>
    %7 = arith.addf %4, %6 : vector<256x256xf32>
    %cst = arith.constant 0.000000e+00 : f32
    %8 = vector.broadcast %cst : f32 to vector<256x256xf32>
    %9 = arith.maximumf %7, %8 : vector<256x256xf32>
    %10 = arith.truncf %9 : vector<256x256xf32> to vector<256x256xbf16>
    %c0_5 = arith.constant 0 : index
    %c0_6 = arith.constant 0 : index
    %11 = vector.load %arg5[%c0_5, %c0_6] : memref<256x256xbf16, #tpu.memory_space<vmem>>, vector<256x256xbf16>
    %cst_7 = arith.constant dense<0.000000e+00> : vector<256x256xf32>
    %12 = tpu.matmul %10, %11, %cst_7 {dimension_numbers = #tpu.dot_dimension_numbers<[1], [0], [0], [1], [0, 0, 1, 1], [], []>} : vector<256x256xbf16>, vector<256x256xbf16>, vector<256x256xf32> -> vector<256x256xf32>
    %c0_8 = arith.constant 0 : index
    %c0_9 = arith.constant 0 : index
    %13 = vector.load %arg6[%c0_8, %c0_9] : memref<1x256xf32, #tpu.memory_space<vmem>>, vector<1x256xf32>
    %14 = vector.broadcast %13 : vector<1x256xf32> to vector<256x256xf32>
    %15 = arith.addf %12, %14 : vector<256x256xf32>
    %cst_10 = arith.constant dense<0.000000e+00> : vector<256xf32>
    %16 = vector.multi_reduction <add>, %15, %cst_10 [0] : vector<256x256xf32> to vector<256xf32>
    %17 = vector.shape_cast %16 : vector<256xf32> to vector<1x256xf32>
    %18 = arith.mulf %15, %15 : vector<256x256xf32>
    %cst_11 = arith.constant dense<0.000000e+00> : vector<256xf32>
    %19 = vector.multi_reduction <add>, %18, %cst_11 [0] : vector<256x256xf32> to vector<256xf32>
    %20 = vector.shape_cast %19 : vector<256xf32> to vector<1x256xf32>
    %21 = tpu.concatenate %17, %20 in 0 : vector<1x256xf32>, vector<1x256xf32> -> vector<2x256xf32>
    %c0_12 = arith.constant 0 : index
    %c0_13 = arith.constant 0 : index
    %c0_14 = arith.constant 0 : index
    %22 = vector.load %arg8[%c0_12, %c0_13, %c0_14] : memref<1x2x256xf32, #tpu.memory_space<vmem>>, vector<1x2x256xf32>
    %23 = vector.shape_cast %22 : vector<1x2x256xf32> to vector<2x256xf32>
    %24 = vector.shape_cast %21 : vector<2x256xf32> to vector<1x2x256xf32>
    tpu.vector_store %arg8[%c0_12, %c0_13, %c0_14], %24 {strides = array<i32>} : memref<1x2x256xf32, #tpu.memory_space<vmem>>, vector<1x2x256xf32>,
    %25 = arith.truncf %15 : vector<256x256xf32> to vector<256x256xbf16>
    %c0_15 = arith.constant 0 : index
    %c0_16 = arith.constant 0 : index
    %26 = vector.load %arg7[%c0_15, %c0_16] : memref<256x256xbf16, #tpu.memory_space<vmem>>, vector<256x256xbf16>
    tpu.vector_store %arg7[%c0_15, %c0_16], %25 {strides = array<i32>} : memref<256x256xbf16, #tpu.memory_space<vmem>>, vector<256x256xbf16>,
    return
  }
  func.func @transform_0(%arg0: i32, %arg1: i32) -> (i32, i32) {
    %c0_i32 = arith.constant 0 : i32
    %c0_i32_0 = arith.constant 0 : i32
    return %arg1, %c0_i32 : i32, i32
  }
  func.func @transform_1(%arg0: i32, %arg1: i32) -> (i32, i32) {
    %c0_i32 = arith.constant 0 : i32
    %c0_i32_0 = arith.constant 0 : i32
    %c0_i32_1 = arith.constant 0 : i32
    return %c0_i32, %c0_i32_0 : i32, i32
  }
  func.func @transform_2(%arg0: i32, %arg1: i32) -> (i32, i32) {
    %c0_i32 = arith.constant 0 : i32
    %c0_i32_0 = arith.constant 0 : i32
    %c0_i32_1 = arith.constant 0 : i32
    return %c0_i32, %c0_i32_0 : i32, i32
  }
  func.func @transform_3(%arg0: i32, %arg1: i32) -> (i32, i32) {
    %c0_i32 = arith.constant 0 : i32
    %c0_i32_0 = arith.constant 0 : i32
    return %c0_i32, %arg0 : i32, i32
  }
  func.func @transform_4(%arg0: i32, %arg1: i32) -> (i32, i32) {
    %c0_i32 = arith.constant 0 : i32
    %c0_i32_0 = arith.constant 0 : i32
    return %c0_i32, %arg0 : i32, i32
  }
  func.func @transform_5(%arg0: i32, %arg1: i32) -> (i32, i32) {
    %c0_i32 = arith.constant 0 : i32
    return %arg1, %arg0 : i32, i32
  }
  func.func @transform_6(%arg0: i32, %arg1: i32) -> (i32, i32, i32) {
    %c0_i32 = arith.constant 0 : i32
    %c0_i32_0 = arith.constant 0 : i32
    return %arg1, %c0_i32, %arg0 : i32, i32, i32
  }
}

module attributes {stable_mosaic.version = 11 : i64} {
  func.func @kernel(%arg0: i32, %arg1: i32, %arg2: memref<256x256xbf16, #tpu.memory_space<vmem>>, %arg3: memref<1x256xf32, #tpu.memory_space<vmem>>, %arg4: memref<1x256xf32, #tpu.memory_space<vmem>>, %arg5: memref<256x128xbf16, #tpu.memory_space<vmem>>, %arg6: memref<1x128xf32, #tpu.memory_space<vmem>>, %arg7: memref<256x128xf32, #tpu.memory_space<vmem>>) attributes {dimension_semantics = [#tpu.dimension_semantics<parallel>, #tpu.dimension_semantics<parallel>], iteration_bounds = array<i64: 1, 2>, scalar_prefetch = 0 : i64, scratch_operands = 0 : i64, tpu.core_type = #tpu.core_type<tc>, window_params = [{transform_indices = @transform_0, window_bounds = array<i64: 256, 256>}, {pipeline_mode = #tpu.pipeline_mode<synchronous>, transform_indices = @transform_1, window_bounds = array<i64: 1, 256>}, {pipeline_mode = #tpu.pipeline_mode<synchronous>, transform_indices = @transform_2, window_bounds = array<i64: 1, 256>}, {transform_indices = @transform_3, window_bounds = array<i64: 256, 128>}, {transform_indices = @transform_4, window_bounds = array<i64: 1, 128>}, {transform_indices = @transform_5, window_bounds = array<i64: 256, 128>}]} {
    %c0 = arith.constant 0 : index
    %c0_0 = arith.constant 0 : index
    %0 = vector.load %arg2[%c0, %c0_0] : memref<256x256xbf16, #tpu.memory_space<vmem>>, vector<256x256xbf16>
    %1 = arith.extf %0 : vector<256x256xbf16> to vector<256x256xf32>
    %c0_1 = arith.constant 0 : index
    %c0_2 = arith.constant 0 : index
    %2 = vector.load %arg3[%c0_1, %c0_2] : memref<1x256xf32, #tpu.memory_space<vmem>>, vector<1x256xf32>
    %3 = vector.broadcast %2 : vector<1x256xf32> to vector<256x256xf32>
    %4 = arith.mulf %1, %3 : vector<256x256xf32>
    %c0_3 = arith.constant 0 : index
    %c0_4 = arith.constant 0 : index
    %5 = vector.load %arg4[%c0_3, %c0_4] : memref<1x256xf32, #tpu.memory_space<vmem>>, vector<1x256xf32>
    %6 = vector.broadcast %5 : vector<1x256xf32> to vector<256x256xf32>
    %7 = arith.addf %4, %6 : vector<256x256xf32>
    %cst = arith.constant 0.000000e+00 : f32
    %8 = vector.broadcast %cst : f32 to vector<256x256xf32>
    %9 = arith.maximumf %7, %8 : vector<256x256xf32>
    %10 = arith.truncf %9 : vector<256x256xf32> to vector<256x256xbf16>
    %c0_5 = arith.constant 0 : index
    %c0_6 = arith.constant 0 : index
    %11 = vector.load %arg5[%c0_5, %c0_6] : memref<256x128xbf16, #tpu.memory_space<vmem>>, vector<256x128xbf16>
    %cst_7 = arith.constant dense<0.000000e+00> : vector<256x128xf32>
    %12 = tpu.matmul %10, %11, %cst_7 {dimension_numbers = #tpu.dot_dimension_numbers<[1], [0], [0], [1], [0, 0, 1, 1], [], []>} : vector<256x256xbf16>, vector<256x128xbf16>, vector<256x128xf32> -> vector<256x128xf32>
    %c0_8 = arith.constant 0 : index
    %c0_9 = arith.constant 0 : index
    %13 = vector.load %arg6[%c0_8, %c0_9] : memref<1x128xf32, #tpu.memory_space<vmem>>, vector<1x128xf32>
    %14 = vector.broadcast %13 : vector<1x128xf32> to vector<256x128xf32>
    %15 = arith.addf %12, %14 : vector<256x128xf32>
    %c0_10 = arith.constant 0 : index
    %c0_11 = arith.constant 0 : index
    %16 = vector.load %arg7[%c0_10, %c0_11] : memref<256x128xf32, #tpu.memory_space<vmem>>, vector<256x128xf32>
    tpu.vector_store %arg7[%c0_10, %c0_11], %15 {strides = array<i32>} : memref<256x128xf32, #tpu.memory_space<vmem>>, vector<256x128xf32>,
    return
  }
  func.func @transform_0(%arg0: i32, %arg1: i32) -> (i32, i32) {
    %c0_i32 = arith.constant 0 : i32
    %c0_i32_0 = arith.constant 0 : i32
    return %arg1, %c0_i32 : i32, i32
  }
  func.func @transform_1(%arg0: i32, %arg1: i32) -> (i32, i32) {
    %c0_i32 = arith.constant 0 : i32
    %c0_i32_0 = arith.constant 0 : i32
    %c0_i32_1 = arith.constant 0 : i32
    return %c0_i32, %c0_i32_0 : i32, i32
  }
  func.func @transform_2(%arg0: i32, %arg1: i32) -> (i32, i32) {
    %c0_i32 = arith.constant 0 : i32
    %c0_i32_0 = arith.constant 0 : i32
    %c0_i32_1 = arith.constant 0 : i32
    return %c0_i32, %c0_i32_0 : i32, i32
  }
  func.func @transform_3(%arg0: i32, %arg1: i32) -> (i32, i32) {
    %c0_i32 = arith.constant 0 : i32
    %c0_i32_0 = arith.constant 0 : i32
    return %c0_i32, %arg0 : i32, i32
  }
  func.func @transform_4(%arg0: i32, %arg1: i32) -> (i32, i32) {
    %c0_i32 = arith.constant 0 : i32
    %c0_i32_0 = arith.constant 0 : i32
    return %c0_i32, %arg0 : i32, i32
  }
  func.func @transform_5(%arg0: i32, %arg1: i32) -> (i32, i32) {
    %c0_i32 = arith.constant 0 : i32
    return %arg1, %arg0 : i32, i32
  }
}

</mosaic_0001>

<bundles_post_ra>
// kernel: projection_head.3
= control target key start
LH: loop header
LB: loop body
LE: loop exit
PB: predicated region body
PF: predicated region fallthrough
CT: control target
= control target key end

     0   :  { %10 = vsyncpa [#allocation3], 0  ;;  %s2367_s0 = inlined_call_operand.hbm [shape: f32[512,256], index: 0, kind: input, shape index: {}]   ;;  %s2368_s1 = inlined_call_operand.hbm [shape: bf16[256,256], index: 1, kind: input, shape index: {}]   ;;  %s2369_s2 = inlined_call_operand.vmem [shape: f32[1,256], index: 2, kind: input, shape index: {}]   ;;  %s2370_s3 = inlined_call_operand.vmem [shape: bf16[512,256], index: 3, kind: output, shape index: {0}]   ;;  %s2371_s4 = inlined_call_operand.vmem [shape: f32[2,2,256], index: 4, kind: output, shape index: {1}]  }
   0x1   :  { %12 = vsyncpa [#allocation3 + $0x1], 0 }
   0x2   :  { %13 = vsyncpa [#allocation5], 0  ;;  %s1842_s15 = smov 0   ;;  %s1844_s16 = smov 0  }
   0x3   :  { %s1846_s17 = smov 0   ;;  %s1848_s18 = smov 0  }
   0x4   :  { %s1850_s19 = smov 0   ;;  %s1852_s20 = smov 0  }
   0x5 LB: > { %s1426_s21 = sadd.s32 4294967295, %s1809_s20   ;;  %p51_p0 = scmp.ne.s32.totalorder %s1793_s16, %s1789_s15  ;;  %s1809_s20 = sphi %s1852_s20, %s19_s20   ;;  %s1805_s19 = sphi %s1850_s19, %s2388_s19   ;;  %s1801_s18 = sphi %s1848_s18, %s2387_s18   ;;  %s1797_s17 = sphi %s1846_s17, %s2386_s17   ;;  %s1793_s16 = sphi %s1844_s16, %s2385_s16   ;;  %s1789_s15 = sphi %s1842_s15, %s2384_s15  }
   0x6   : > { %p1872_p1 = scmp.eq.s32.totalorder %s1426_s21, 0  ;;  %p1428_p2 = scmp.ge.s32.totalorder %s1809_s20, 1 }
   0x7   : > { %p170_p3 = scmp.lt.s32.totalorder %s1809_s20, 3  ;;  %s1811_s25 = smov [#allocation4]  }
   0x8   : > { %s2376_s22 = scalar_select %p1872_p1, 1, 0 }
   0x9   : > { %p1880_p4 = por %p1872_p1, %p51_p0  ;;  %p1884_p5 = pnand %p1428_p2, %p170_p3 }
   0xa   : > { %s185_s26 = sshll.u32 %s1811_s25, 4  ;;  %s28_s28 = sadd.s32 1, %s1805_s19  ;;  %s186_s26 = int_to_ptr.vmem [resolvable:$true] %s185_s26 }
   0xb   : > { %s2377_s23 = scalar_select %p1880_p4, 1, 0 }
   0xc   : > { %s2378_s24 = scalar_select %p1884_p5, 1, 0 }
   0xd   : > { %p1585_p6 = pneg %p1884_p5  ;;  %s1697_s5 = scalar_lea.hbm %s2368_s1, 4096 }
   0xe   : > { %p1698_p8 = scmp.ne.s32.totalorder %s2368_s1, %s1697_s5  ;;  %p1704_p12 = scmp.lt.u32.totalorder %s1697_s5, %s2368_s1 }
   0xf   : > { %p1892_p7 = pnand %p1585_p6, %p1872_p1 }
  0x11   : > { %p1699_p9 = pneg %p1892_p7 }
  0x13   : > { %p1700_p10 = pnand %p1699_p9, %p1698_p8 }
  0x15   : > { %p1701_p11 = pneg %p1700_p10 }
  0x17   : > { %p1706_p13 = pnand %p1704_p12, %p1701_p11 }
  0x19   : > { %1709 = shalt.err (!%p1706_p13)
}
  0x1a   : > { %s1710_s10 = scalar_lea.vmem %s186_s26, 4096  ;;  %p1718_p6 = scmp.lt.s32.totalorder %s186_s26, %s186_s26 }
  0x1b   : > { %p1711_p0 = scmp.ne.s32.totalorder %s186_s26, %s1710_s10  ;;  %p1719_p1 = scmp.lt.s32.totalorder %s1710_s10, %s1710_s10 }
  0x1d   : > { %p1713_p2 = pnand %p1711_p0, %p1699_p9  ;;  %p1720_p4 = por %p1719_p1, %p1718_p6 }
  0x1f   : > { %p1714_p3 = pneg %p1713_p2 }
  0x21   : > { %p1721_p5 = pnand %p1720_p4, %p1714_p3 }
  0x23   : > { %1724 = shalt.err (!%p1721_p5)
}
  0x24   : > { %s1812_s11 = smov 128   ;;  %s1813_s12 = smov 8  }
  0x25   : > { %1588 = dma.hbm_to_vmem [thread:$0]  (!%p1892_p7), %s2368_s1, 4096, %s186_s26, [#allocation5], %s1812_s11, %s1812_s11, %s1813_s12  }
  0x26   : > { %p29_p1 = scmp.ge.s32.totalorder %s28_s28, 2  ;;  %s38_s15 = sadd.s32 1, %s1797_s17 }
  0x27   : > { %p45_p4 = scmp.ne.s32.totalorder %s1797_s17, %s1793_s16  ;;  %p46_p5 = scmp.eq.s32.totalorder %s1809_s20, 0 }
  0x28   : > { %s2390_s28 = smov (%p29_p1, %s28_s28), 0  ;;  %p1594_p9 = scmp.lt.s32.totalorder %s1809_s20, 2 }
  0x29   : > { %p47_p8 = por %p46_p5, %p45_p4  ;;  %s35_s21 = ssub.s32 %s1805_s19, %s2390_s28 }
  0x2a   : > { %s207_s25 = sand.u32 1, %s1797_s17   ;;  %p36_p10 = scmp.eq.s32.totalorder %s35_s21, 0 }
  0x2b   : > { %s1432_s29 = sshll.u32 %s207_s25, 9  ;;  %s1512_s30 = sshll.u32 %s1805_s19, 13 }
  0x2c   : > { %s1925_s5 = scalar_select %p36_p10, %s1797_s17, %s38_s15  }
  0x2d   : > { %s1930_s26 = scalar_lea.hbm %s2367_s0, %s1512_s30  ;;  %s211_s7 = scalar_lea.vmem [#allocation2], %s1432_s29 }
  0x2e   : > { %s219_s8 = sshll.u32 %s211_s7, 4  ;;  %p1932_p7 = pnand %p1594_p9, %p47_p8  ;;  %s1936_s8 = int_to_ptr.vmem [resolvable:$true] %s219_s8 }
  0x2f   : > { %s1938_s10 = scalar_lea.sflag [#allocation3], %s207_s25  ;;  %s1725_s11 = scalar_lea.hbm %s1930_s26, 8192 }
  0x30   : > { %p1726_p11 = scmp.ne.s32.totalorder %s1930_s26, %s1725_s11  ;;  %p1727_p12 = pneg %p1932_p7 }
  0x31   : > { %s1730_s14 = scalar_lea.hbm %s2367_s0, 16384  ;;  %p1731_p2 = scmp.lt.u32.totalorder %s1930_s26, %s2367_s0 }
  0x32   : > { %p1728_p13 = pnand %p1727_p12, %p1726_p11  ;;  %p1732_p3 = scmp.lt.u32.totalorder %s1730_s14, %s1725_s11 }
  0x33   : > { %p1734_p1 = scmp.lt.u32.totalorder %s1725_s11, %s1930_s26 }
  0x34   : > { %p1729_p0 = pneg %p1728_p13  ;;  %p1733_p6 = por %p1732_p3, %p1731_p2 }
  0x36   : > { %p1735_p4 = por %p1734_p1, %p1733_p6 }
  0x38   : > { %p1736_p5 = pnand %p1735_p4, %p1729_p0 }
  0x3a   : > { %1739 = shalt.err (!%p1736_p5)
}
  0x3b   : > { %s1740_s25 = scalar_lea.vmem %s1936_s8, 8192  ;;  %s1814_s29 = smov [#allocation2]  }
  0x3c   : > { %p1741_p8 = scmp.ne.s32.totalorder %s1936_s8, %s1740_s25  ;;  %s1745_s30 = sshll.u32 %s1814_s29, 4  ;;  %s1746_s30 = int_to_ptr.vmem [resolvable:$false] %s1745_s30 }
  0x3d   : > { %s1747_s27 = scalar_lea.vmem %s1746_s30, 16384  ;;  %p1748_p11 = scmp.lt.s32.totalorder %s1936_s8, %s1746_s30 }
  0x3e   : > { %p1743_p9 = pnand %p1741_p8, %p1727_p12  ;;  %p1749_p13 = scmp.lt.s32.totalorder %s1747_s27, %s1740_s25 }
  0x40   : > { %p1744_p10 = pneg %p1743_p9  ;;  %p1750_p2 = por %p1749_p13, %p1748_p11 }
  0x42   : > { %p1751_p3 = pnand %p1750_p2, %p1744_p10 }
  0x44   : > { %1754 = shalt.err (!%p1751_p3)
}
  0x45   : > { %s1815_s6 = smov 256   ;;  %s1816_s7 = smov 16  }
  0x46   : > { %1592 = dma.hbm_to_vmem [thread:$0]  (!%p1932_p7), %s1930_s26, 8192, %s1936_s8, %s1938_s10, %s1815_s6, %s1815_s6, %s1816_s7  }
  0x47   : > { %p2381_p12 = scmp.ne.s32.totalorder %s2378_s24, 0 }
  0x48   : > { %s233_s11 = sand.u32 (!%p2381_p12), 1, %s1793_s16   ;;  %p2382_p0 = scmp.ne.s32.totalorder (!%p2381_p12), %s2377_s23, 0 }
  0x49   : > { %231 = sbr.rel (%p2381_p12) target bundleno = 474 (0x1da), region = 32  ;;  %s1437_s12 = sshll.u32 (!%p2381_p12), %s233_s11, 9 }
  0x4a   : > { %s234_s13 = scalar_lea.sflag (!%p2381_p12), [#allocation3], %s233_s11  ;;  %s1969_s14 = scalar_lea.vmem (!%p2381_p12), [#allocation2], %s1437_s12 }
  0x50   : > { %1780 = dma.done.wait (%p2382_p0), %s234_s13, 8192  }
  0x51   : > { %1782 = vsyncadd (%p2382_p0), %s234_s13, 4294959104  ;;  %p2383_p6 = scmp.ne.s32.totalorder %s2376_s22, 0 }
  0x53   : > { %1784 = dma.done.wait (%p2383_p6), [#allocation5], 4096  }
  0x54   : > { %1786 = vsyncadd (%p2383_p6), [#allocation5], 4294963200  ;;  %v1649_v0 = vld [vmem:[#allocation4 + $0x4] ss:$8 sps:$4 sm:$0xff]   ;;  %v1651_v1 = vld [vmem:[#allocation4] ss:$8 sps:$4 sm:$0xff]  }
  0x55   : > { %613 = vmatprep.subr.bf16.mxu0 %v1649_v0  ;;  %v1652_v2 = vld [vmem:[#allocation4 + $0x14] ss:$8 sps:$4 sm:$0xff]   ;;  %1547 = vmatprep.subr.bf16.mxu1 %v1649_v0  ;;  %v1654_v3 = vld [vmem:[#allocation4 + $0x10] ss:$8 sps:$4 sm:$0xff]   ;;  %v1655_v4 = vld [vmem:[#allocation4 + $0x24] ss:$8 sps:$4 sm:$0xff]  }
  0x56   : > { %614 = vmatpush1.bf16.msra.mxu0 %v1651_v1  ;;  %1563 = vmatpush1.bf16.msra.mxu1 %v1651_v1  ;;  %v1657_v5 = vld [vmem:[#allocation4 + $0x20] ss:$8 sps:$4 sm:$0xff]   ;;  %v1658_v6 = vld [vmem:[#allocation4 + $0x34] ss:$8 sps:$4 sm:$0xff]   ;;  %v1660_v7 = vld [vmem:[#allocation4 + $0x30] ss:$8 sps:$4 sm:$0xff]  }
  0x57   : > { %615 = vmatprep.subr.bf16.mxu0 %v1652_v2  ;;  %1548 = vmatprep.subr.bf16.mxu1 %v1652_v2  ;;  %v1661_v8 = vld [vmem:[#allocation4 + $0x44] ss:$8 sps:$4 sm:$0xff]   ;;  %v1663_v9 = vld [vmem:[#allocation4 + $0x40] ss:$8 sps:$4 sm:$0xff]   ;;  %v1664_v10 = vld [vmem:[#allocation4 + $0x54] ss:$8 sps:$4 sm:$0xff]  }
  0x58   : > { %v1666_v11 = vld [vmem:[#allocation4 + $0x50] ss:$8 sps:$4 sm:$0xff]   ;;  %v1667_v12 = vld [vmem:[#allocation4 + $0x64] ss:$8 sps:$4 sm:$0xff]   ;;  %v1669_v16 = vld [vmem:[#allocation4 + $0x60] ss:$8 sps:$4 sm:$0xff]  }
  0x59   : > { %v314_v13 = vld [vmem:[%s1969_s14 + $0x8] sm:$0xff]  ;;  %v316_v14 = vld [vmem:[%s1969_s14 + $0x18] sm:$0xff]  ;;  %v313_v38 = vld [vmem:[%s1969_s14] sm:$0xff]  ;;  %s1439_s22 = sshll.u32 %s1801_s18, 5  ;;  %p304_p1 = scmp.lt.s32.totalorder %s1801_s18, 1  ;;  %vm1018_vm0 = vcmask 1040384  }
  0x5a   : > { %616 = vmatpush1.bf16.msra.mxu0 %v1654_v3  ;;  %1564 = vmatpush1.bf16.msra.mxu1 %v1654_v3  ;;  %v378_v15 = vpack.c.bf16 %v316_v14, %v314_v13  ;;  %v1670_v17 = vld [vmem:[#allocation4 + $0x74] ss:$8 sps:$4 sm:$0xff]   ;;  %v346_v18 = vld [vmem:[%s1969_s14 + $0x108] sm:$0xff]  ;;  %v1672_v19 = vld [vmem:[#allocation4 + $0x70] ss:$8 sps:$4 sm:$0xff]   ;;  %p293_p7 = scmp.lt.s32.totalorder %s1439_s22, 63 }
  0x5b   : > { %617 = vmatprep.subr.bf16.mxu0 %v1655_v4  ;;  %1549 = vmatprep.subr.bf16.mxu1 %v1655_v4  ;;  %v348_v20 = vld [vmem:[%s1969_s14 + $0x118] sm:$0xff]  ;;  %v1673_v21 = vld [vmem:[#allocation4 + $0x84] ss:$8 sps:$4 sm:$0xff]   ;;  %v1675_v23 = vld [vmem:[#allocation4 + $0x80] ss:$8 sps:$4 sm:$0xff]   ;;  %s2394_s18 = smov (!%p304_p1, %s1801_s18), 1 }
  0x5c   : > { %645 = vmatprep.mubr.bf16.mxu0 %v378_v15  ;;  %v394_v22 = vpack.c.bf16 %v348_v20, %v346_v18  ;;  %v1676_v24 = vld [vmem:[#allocation4 + $0x94] ss:$8 sps:$4 sm:$0xff]   ;;  %v1678_v25 = vld [vmem:[#allocation4 + $0x90] ss:$8 sps:$4 sm:$0xff]   ;;  %v1679_v26 = vld [vmem:[#allocation4 + $0xa4] ss:$8 sps:$4 sm:$0xff]  }
  0x5d   : > { %v1681_v27 = vld [vmem:[#allocation4 + $0xa0] ss:$8 sps:$4 sm:$0xff]   ;;  %v1682_v28 = vld [vmem:[#allocation4 + $0xb4] ss:$8 sps:$4 sm:$0xff]   ;;  %v1684_v29 = vld [vmem:[#allocation4 + $0xb0] ss:$8 sps:$4 sm:$0xff]  }
  0x5e   : > { %618 = vmatpush1.bf16.msra.mxu0 %v1657_v5  ;;  %1565 = vmatpush1.bf16.msra.mxu1 %v1657_v5  ;;  %v1685_v30 = vld [vmem:[#allocation4 + $0xc4] ss:$8 sps:$4 sm:$0xff]   ;;  %v1687_v31 = vld [vmem:[#allocation4 + $0xc0] ss:$8 sps:$4 sm:$0xff]   ;;  %v1688_v32 = vld [vmem:[#allocation4 + $0xd4] ss:$8 sps:$4 sm:$0xff]  }
  0x5f   : > { %619 = vmatprep.subr.bf16.mxu0 %v1658_v6  ;;  %1550 = vmatprep.subr.bf16.mxu1 %v1658_v6  ;;  %v1690_v33 = vld [vmem:[#allocation4 + $0xd0] ss:$8 sps:$4 sm:$0xff]   ;;  %v1691_v34 = vld [vmem:[#allocation4 + $0xe4] ss:$8 sps:$4 sm:$0xff]   ;;  %v1693_v35 = vld [vmem:[#allocation4 + $0xe0] ss:$8 sps:$4 sm:$0xff]  }
  0x60   : > { %725 = vmatprep.mubr.bf16.mxu1 %v394_v22  ;;  %v1694_v36 = vld [vmem:[#allocation4 + $0xf4] ss:$8 sps:$4 sm:$0xff]   ;;  %v1696_v37 = vld [vmem:[#allocation4 + $0xf0] ss:$8 sps:$4 sm:$0xff]   ;;  %v318_v40 = vld [vmem:[%s1969_s14 + $0x28] sm:$0xff]  ;;  %s2392_s22 = smov (!%p293_p7, %s1439_s22), 63 }
  0x61   : > { %v315_v39 = vld [vmem:[%s1969_s14 + $0x10] sm:$0xff]  ;;  %v345_v41 = vld [vmem:[%s1969_s14 + $0x100] sm:$0xff]  ;;  %v320_v43 = vld [vmem:[%s1969_s14 + $0x38] sm:$0xff]  ;;  %s1513_s26 = sshll.u32 %s2392_s22, 3  ;;  %s1514_s15 = sshll.u32 %s2394_s18, 2 }
  0x62   : > { %620 = vmatpush1.bf16.msra.mxu0 %v1660_v7  ;;  %1566 = vmatpush1.bf16.msra.mxu1 %v1660_v7  ;;  %v347_v42 = vld [vmem:[%s1969_s14 + $0x110] sm:$0xff]  ;;  %v350_v44 = vld [vmem:[%s1969_s14 + $0x128] sm:$0xff]  ;;  %v352_v45 = vld [vmem:[%s1969_s14 + $0x138] sm:$0xff]  ;;  %v377_v46 = vpack.c.bf16 %v315_v39, %v313_v38  ;;  %v380_v48 = vpack.c.bf16 %v320_v43, %v318_v40  ;;  %s2062_s10 = scalar_lea.vmem %s2370_s3, %s1513_s26  ;;  %s311_s29 = scalar_lea.vmem %s2371_s4, %s1514_s15 }
  0x63   : > { %621 = vmatprep.subr.bf16.mxu0 %v1661_v8  ;;  %1551 = vmatprep.subr.bf16.mxu1 %v1661_v8  ;;  %v393_v47 = vpack.c.bf16 %v347_v42, %v345_v41  ;;  %v396_v49 = vpack.c.bf16 %v352_v45, %v350_v44  ;;  %v317_v50 = vld [vmem:[%s1969_s14 + $0x20] sm:$0xff]  ;;  %v319_v51 = vld [vmem:[%s1969_s14 + $0x30] sm:$0xff]  ;;  %v322_v52 = vld [vmem:[%s1969_s14 + $0x48] sm:$0xff] }
  0x64   : > { %v349_v53 = vld [vmem:[%s1969_s14 + $0x120] sm:$0xff]  ;;  %v351_v54 = vld [vmem:[%s1969_s14 + $0x130] sm:$0xff]  ;;  %v324_v55 = vld [vmem:[%s1969_s14 + $0x58] sm:$0xff]  ;;  %v379_v58 = vpack.c.bf16 %v319_v51, %v317_v50 }
  0x65   : > { %v354_v56 = vld [vmem:[%s1969_s14 + $0x148] sm:$0xff]  ;;  %v356_v57 = vld [vmem:[%s1969_s14 + $0x158] sm:$0xff]  ;;  %v395_v59 = vpack.c.bf16 %v351_v54, %v349_v53  ;;  %v382_v60 = vpack.c.bf16 %v324_v55, %v322_v52  ;;  %v321_v62 = vld [vmem:[%s1969_s14 + $0x40] sm:$0xff] }
  0x66   : > { %622 = vmatpush1.bf16.msra.mxu0 %v1663_v9  ;;  %1567 = vmatpush1.bf16.msra.mxu1 %v1663_v9  ;;  %v398_v61 = vpack.c.bf16 %v356_v57, %v354_v56  ;;  %v323_v63 = vld [vmem:[%s1969_s14 + $0x50] sm:$0xff]  ;;  %v326_v0 = vld [vmem:[%s1969_s14 + $0x68] sm:$0xff]  ;;  %v353_v1 = vld [vmem:[%s1969_s14 + $0x140] sm:$0xff] }
  0x67   : > { %623 = vmatprep.subr.bf16.mxu0 %v1664_v10  ;;  %1552 = vmatprep.subr.bf16.mxu1 %v1664_v10  ;;  %v355_v2 = vld [vmem:[%s1969_s14 + $0x150] sm:$0xff]  ;;  %v328_v3 = vld [vmem:[%s1969_s14 + $0x78] sm:$0xff]  ;;  %v358_v4 = vld [vmem:[%s1969_s14 + $0x168] sm:$0xff]  ;;  %v381_v6 = vpack.c.bf16 %v323_v63, %v321_v62 }
  0x68   : > { %v360_v5 = vld [vmem:[%s1969_s14 + $0x178] sm:$0xff]  ;;  %v397_v7 = vpack.c.bf16 %v355_v2, %v353_v1  ;;  %v384_v8 = vpack.c.bf16 %v328_v3, %v326_v0  ;;  %v325_v10 = vld [vmem:[%s1969_s14 + $0x60] sm:$0xff]  ;;  %v359_v14 = vld [vmem:[%s1969_s14 + $0x170] sm:$0xff]  ;;  %v443_v0 = vlaneseq }
  0x69   : > { %v400_v9 = vpack.c.bf16 %v360_v5, %v358_v4  ;;  %v357_v13 = vld [vmem:[%s1969_s14 + $0x160] sm:$0xff]  ;;  %v332_v15 = vld [vmem:[%s1969_s14 + $0x98] sm:$0xff]  ;;  %v367_v38 = vld [vmem:[%s1969_s14 + $0x1b0] sm:$0xff] }
  0x6a   : > { %624 = vmatpush1.bf16.msra.mxu0 %v1666_v11  ;;  %1568 = vmatpush1.bf16.msra.mxu1 %v1666_v11  ;;  %v327_v11 = vld [vmem:[%s1969_s14 + $0x70] sm:$0xff]  ;;  %v329_v22 = vld [vmem:[%s1969_s14 + $0x80] sm:$0xff]  ;;  %v340_v39 = vld [vmem:[%s1969_s14 + $0xd8] sm:$0xff]  ;;  %v444_v1 = vshrl.u32 %v443_v0, 7 }
  0x6b   : > { %625 = vmatprep.subr.bf16.mxu0 %v1667_v12  ;;  %1553 = vmatprep.subr.bf16.mxu1 %v1667_v12  ;;  %v330_v12 = vld [vmem:[%s1969_s14 + $0x88] sm:$0xff]  ;;  %v383_v18 = vpack.c.bf16 %v327_v11, %v325_v10  ;;  %v372_v41 = vld [vmem:[%s1969_s14 + $0x1d8] sm:$0xff]  ;;  %v371_v50 = vld [vmem:[%s1969_s14 + $0x1d0] sm:$0xff] }
  0x6c   : > { %v386_v20 = vpack.c.bf16 %v332_v15, %v330_v12  ;;  %v370_v40 = vld [vmem:[%s1969_s14 + $0x1c8] sm:$0xff]  ;;  %v344_v51 = vld [vmem:[%s1969_s14 + $0xf8] sm:$0xff]  ;;  %v445_v2 = vsub.s32 0, %v444_v1  ;;  %v441_v3 = vld [vmem:[%s2369_s2] sm:$0x3]  ;;  %v449_v4 = vsub.s32 1, %v444_v1 }
  0x6d   : > { %v406_v45 = vpack.c.bf16 %v372_v41, %v370_v40  ;;  %v374_v52 = vld [vmem:[%s1969_s14 + $0x1e8] sm:$0xff]  ;;  %v376_v53 = vld [vmem:[%s1969_s14 + $0x1f8] sm:$0xff] }
  0x6e   : > { %626 = vmatpush1.bf16.msra.mxu0 %v1669_v16  ;;  %1569 = vmatpush1.bf16.msra.mxu1 %v1669_v16  ;;  %v362_v16 = vld [vmem:[%s1969_s14 + $0x188] sm:$0xff]  ;;  %v408_v57 = vpack.c.bf16 %v376_v53, %v374_v52  ;;  %v2047_v5 = vrot.slane %v441_v3, %v445_v2 }
  0x6f   : > { %627 = vmatprep.subr.bf16.mxu0 %v1670_v17  ;;  %1554 = vmatprep.subr.bf16.mxu1 %v1670_v17  ;;  %v364_v17 = vld [vmem:[%s1969_s14 + $0x198] sm:$0xff] }
  0x72   : > { %628 = vmatpush1.bf16.msra.mxu0 %v1672_v19  ;;  %1570 = vmatpush1.bf16.msra.mxu1 %v1672_v19  ;;  %v399_v19 = vpack.c.bf16 %v359_v14, %v357_v13 }
  0x73   : > { %629 = vmatprep.subr.bf16.mxu0 %v1673_v21  ;;  %1555 = vmatprep.subr.bf16.mxu1 %v1673_v21  ;;  %v402_v21 = vpack.c.bf16 %v364_v17, %v362_v16 }
  0x76   : > { %630 = vmatpush1.bf16.msra.mxu0 %v1675_v23  ;;  %1571 = vmatpush1.bf16.msra.mxu1 %v1675_v23  ;;  %v331_v23 = vld [vmem:[%s1969_s14 + $0x90] sm:$0xff] }
  0x77   : > { %631 = vmatprep.subr.bf16.mxu0 %v1676_v24  ;;  %1556 = vmatprep.subr.bf16.mxu1 %v1676_v24  ;;  %v334_v24 = vld [vmem:[%s1969_s14 + $0xa8] sm:$0xff] }
  0x7a   : > { %632 = vmatpush1.bf16.msra.mxu0 %v1678_v25  ;;  %1572 = vmatpush1.bf16.msra.mxu1 %v1678_v25  ;;  %v361_v25 = vld [vmem:[%s1969_s14 + $0x180] sm:$0xff] }
  0x7b   : > { %633 = vmatprep.subr.bf16.mxu0 %v1679_v26  ;;  %1557 = vmatprep.subr.bf16.mxu1 %v1679_v26  ;;  %v363_v26 = vld [vmem:[%s1969_s14 + $0x190] sm:$0xff] }
  0x7e   : > { %634 = vmatpush1.bf16.msra.mxu0 %v1681_v27  ;;  %1573 = vmatpush1.bf16.msra.mxu1 %v1681_v27  ;;  %v336_v27 = vld [vmem:[%s1969_s14 + $0xb8] sm:$0xff] }
  0x7f   : > { %635 = vmatprep.subr.bf16.mxu0 %v1682_v28  ;;  %1558 = vmatprep.subr.bf16.mxu1 %v1682_v28  ;;  %v366_v28 = vld [vmem:[%s1969_s14 + $0x1a8] sm:$0xff] }
  0x82   : > { %636 = vmatpush1.bf16.msra.mxu0 %v1684_v29  ;;  %1574 = vmatpush1.bf16.msra.mxu1 %v1684_v29  ;;  %v368_v29 = vld [vmem:[%s1969_s14 + $0x1b8] sm:$0xff] }
  0x83   : > { %637 = vmatprep.subr.bf16.mxu0 %v1685_v30  ;;  %1559 = vmatprep.subr.bf16.mxu1 %v1685_v30  ;;  %v385_v30 = vpack.c.bf16 %v331_v23, %v329_v22 }
  0x86   : > { %638 = vmatpush1.bf16.msra.mxu0 %v1687_v31  ;;  %1575 = vmatpush1.bf16.msra.mxu1 %v1687_v31  ;;  %v401_v31 = vpack.c.bf16 %v363_v26, %v361_v25 }
  0x87   : > { %639 = vmatprep.subr.bf16.mxu0 %v1688_v32  ;;  %1560 = vmatprep.subr.bf16.mxu1 %v1688_v32  ;;  %v388_v32 = vpack.c.bf16 %v336_v27, %v334_v24 }
  0x8a   : > { %640 = vmatpush1.bf16.msra.mxu0 %v1690_v33  ;;  %1576 = vmatpush1.bf16.msra.mxu1 %v1690_v33  ;;  %v404_v33 = vpack.c.bf16 %v368_v29, %v366_v28 }
  0x8b   : > { %641 = vmatprep.subr.bf16.mxu0 %v1691_v34  ;;  %1561 = vmatprep.subr.bf16.mxu1 %v1691_v34  ;;  %v333_v34 = vld [vmem:[%s1969_s14 + $0xa0] sm:$0xff] }
  0x8e   : > { %642 = vmatpush1.bf16.msra.mxu0 %v1693_v35  ;;  %1577 = vmatpush1.bf16.msra.mxu1 %v1693_v35  ;;  %v335_v35 = vld [vmem:[%s1969_s14 + $0xb0] sm:$0xff] }
  0x8f   : > { %643 = vmatprep.subr.bf16.mxu0 %v1694_v36  ;;  %1562 = vmatprep.subr.bf16.mxu1 %v1694_v36  ;;  %v338_v36 = vld [vmem:[%s1969_s14 + $0xc8] sm:$0xff]  ;;  %v387_v42 = vpack.c.bf16 %v335_v35, %v333_v34 }
  0x90   : > { %v390_v44 = vpack.c.bf16 %v340_v39, %v338_v36 }
  0x92   : > { %644 = vmatpush1.bf16.msra.mxu0 %v1696_v37  ;;  %1578 = vmatpush1.bf16.msra.mxu1 %v1696_v37  ;;  %v365_v37 = vld [vmem:[%s1969_s14 + $0x1a0] sm:$0xff] }
  0x93   : > { %v403_v43 = vpack.c.bf16 %v367_v38, %v365_v37 }
  0x95   : > { %646 = vmatmul.mubr.bf16.vlgmr.msra.gmra.mrb[0].mxu0 %v377_v46  ;;  %726 = vmatmul.mubr.bf16.vlgmr.msra.gmra.mrb[0].mxu1 %v393_v47  ;;  %v337_v46 = vld [vmem:[%s1969_s14 + $0xc0] sm:$0xff]  ;;  %v339_v47 = vld [vmem:[%s1969_s14 + $0xd0] sm:$0xff] }
  0x96   : > { %655 = vmatprep.mubr.bf16.mxu0 %v380_v48  ;;  %735 = vmatprep.mubr.bf16.mxu1 %v396_v49  ;;  %v342_v48 = vld [vmem:[%s1969_s14 + $0xe8] sm:$0xff]  ;;  %v369_v49 = vld [vmem:[%s1969_s14 + $0x1c0] sm:$0xff]  ;;  %v389_v54 = vpack.c.bf16 %v339_v47, %v337_v46 }
  0x97   : > { %v405_v55 = vpack.c.bf16 %v371_v50, %v369_v49  ;;  %v392_v56 = vpack.c.bf16 %v344_v51, %v342_v48 }
  0x9d   : > { %656 = vmatmul.mubr.bf16.gmra.mrb[4].mxu0 %v379_v58  ;;  %736 = vmatmul.mubr.bf16.gmra.mrb[4].mxu1 %v395_v59  ;;  %v341_v58 = vld [vmem:[%s1969_s14 + $0xe0] sm:$0xff]  ;;  %v343_v59 = vld [vmem:[%s1969_s14 + $0xf0] sm:$0xff] }
  0x9e   : > { %665 = vmatprep.mubr.bf16.mxu0 %v382_v60  ;;  %745 = vmatprep.mubr.bf16.mxu1 %v398_v61  ;;  %v373_v60 = vld [vmem:[%s1969_s14 + $0x1e0] sm:$0xff]  ;;  %v375_v61 = vld [vmem:[%s1969_s14 + $0x1f0] sm:$0xff]  ;;  %v391_v62 = vpack.c.bf16 %v343_v59, %v341_v58 }
  0x9f   : > { %v407_v63 = vpack.c.bf16 %v375_v61, %v373_v60 }
  0xa5   : > { %666 = vmatmul.mubr.bf16.gmra.mrb[8].mxu0 %v381_v6  ;;  %746 = vmatmul.mubr.bf16.gmra.mrb[8].mxu1 %v397_v7  ;;  %v2049_v6 = vrot.slane %v441_v3, %v449_v4 }
  0xa6   : > { %675 = vmatprep.mubr.bf16.mxu0 %v384_v8  ;;  %755 = vmatprep.mubr.bf16.mxu1 %v400_v9 }
  0xad   : > { %676 = vmatmul.mubr.bf16.gmra.mrb[12].mxu0 %v383_v18  ;;  %756 = vmatmul.mubr.bf16.gmra.mrb[12].mxu1 %v399_v19 }
  0xae   : > { %685 = vmatprep.mubr.bf16.mxu0 %v386_v20  ;;  %765 = vmatprep.mubr.bf16.mxu1 %v402_v21 }
  0xb5   : > { %686 = vmatmul.mubr.bf16.gmra.mrb[16].mxu0 %v385_v30  ;;  %766 = vmatmul.mubr.bf16.gmra.mrb[16].mxu1 %v401_v31 }
  0xb6   : > { %695 = vmatprep.mubr.bf16.mxu0 %v388_v32  ;;  %775 = vmatprep.mubr.bf16.mxu1 %v404_v33 }
  0xbd   : > { %696 = vmatmul.mubr.bf16.gmra.mrb[20].mxu0 %v387_v42  ;;  %776 = vmatmul.mubr.bf16.gmra.mrb[20].mxu1 %v403_v43 }
  0xbe   : > { %705 = vmatprep.mubr.bf16.mxu0 %v390_v44  ;;  %785 = vmatprep.mubr.bf16.mxu1 %v406_v45 }
  0xc5   : > { %706 = vmatmul.mubr.bf16.gmra.mrb[24].mxu0 %v389_v54  ;;  %786 = vmatmul.mubr.bf16.gmra.mrb[24].mxu1 %v405_v55 }
  0xc6   : > { %715 = vmatprep.mubr.bf16.mxu0 %v392_v56  ;;  %795 = vmatprep.mubr.bf16.mxu1 %v408_v57 }
  0xcd   : > { %716 = vmatmul.mubr.bf16.gmra.mrb[28].mxu0 %v391_v62  ;;  %796 = vmatmul.mubr.bf16.gmra.mrb[28].mxu1 %v407_v63 }
 0x168   : > { %v647_v7 = vpop.f32.mrb[0].mxu0  ;;  %v727_v8 = vpop.f32.mrb[0].mxu1 }
 0x169   : > { %v648_v9 = vadd.f32 %v647_v7, %v2047_v5  ;;  %v649_v10 = vpop.f32.mrb[1].mxu0  ;;  %v2053_v11 = vadd.f32 %v727_v8, %v2047_v5  ;;  %v729_v12 = vpop.f32.mrb[1].mxu1 }
 0x16a   : > { %v650_v13 = vadd.f32 %v649_v10, %v2049_v6  ;;  %v651_v14 = vpop.f32.mrb[2].mxu0  ;;  %v2057_v15 = vadd.f32 %v729_v12, %v2049_v6  ;;  %v731_v16 = vpop.f32.mrb[2].mxu1 }
 0x16b   : > { %v652_v17 = vadd.f32 %v651_v14, %v2047_v5  ;;  %v653_v18 = vpop.f32.mrb[3].mxu0  ;;  %v733_v19 = vpop.f32.mrb[3].mxu1  ;;  %v880_v20 = vmul.f32 %v648_v9, %v648_v9  ;;  %v2067_v23 = vadd.f32 %v731_v16, %v2047_v5 }
 0x16c   : > { %v1515_v21 = vpack.c.bf16 %v650_v13, %v648_v9  ;;  %v654_v22 = vadd.f32 %v653_v18, %v2049_v6  ;;  %v881_v24 = vmul.f32 %v650_v13, %v650_v13  ;;  %v1531_v27 = vpack.c.bf16 %v2057_v15, %v2053_v11 }
 0x16d   : > { %v806_v25 = vadd.f32 %v652_v17, %v648_v9  ;;  %v882_v26 = vmul.f32 %v652_v17, %v652_v17  ;;  %v2073_v31 = vadd.f32 %v733_v19, %v2049_v6 }
 0x16e   : > { %1225 = vst [vmem:[%s2062_s10] sm:$0xff] %v1515_v21  ;;  %v843_v28 = vadd.f32 %v654_v22, %v650_v13  ;;  %v883_v29 = vmul.f32 %v654_v22, %v654_v22  ;;  %v1516_v30 = vpack.c.bf16 %v654_v22, %v652_v17  ;;  %1241 = vst [vmem:[%s2062_s10 + $0x80] sm:$0xff] %v1531_v27 }
 0x16f   : > { %v944_v32 = vadd.f32 %v882_v26, %v880_v20  ;;  %v1532_v35 = vpack.c.bf16 %v2073_v31, %v2067_v23 }
 0x170   : > { %v981_v33 = vadd.f32 %v883_v29, %v881_v24  ;;  %1226 = vst [vmem:[%s2062_s10 + $0x8] sm:$0xff] %v1516_v30  ;;  %v657_v34 = vpop.f32.mrb[4].mxu0  ;;  %v737_v36 = vpop.f32.mrb[4].mxu1 }
 0x171   : > { %v658_v37 = vadd.f32 %v657_v34, %v2047_v5  ;;  %v659_v38 = vpop.f32.mrb[5].mxu0  ;;  %v739_v39 = vpop.f32.mrb[5].mxu1  ;;  %1242 = vst [vmem:[%s2062_s10 + $0x88] sm:$0xff] %v1532_v35  ;;  %v2083_v42 = vadd.f32 %v737_v36, %v2047_v5 }
 0x172   : > { %v660_v40 = vadd.f32 %v659_v38, %v2049_v6  ;;  %v661_v41 = vpop.f32.mrb[6].mxu0  ;;  %v741_v43 = vpop.f32.mrb[6].mxu1  ;;  %v2087_v48 = vadd.f32 %v739_v39, %v2049_v6 }
 0x173   : > { %v807_v44 = vadd.f32 %v806_v25, %v658_v37  ;;  %v884_v45 = vmul.f32 %v658_v37, %v658_v37  ;;  %v662_v46 = vadd.f32 %v661_v41, %v2047_v5  ;;  %v663_v47 = vpop.f32.mrb[7].mxu0  ;;  %v743_v49 = vpop.f32.mrb[7].mxu1  ;;  %v2094_v63 = vadd.f32 %v741_v43, %v2047_v5 }
 0x174   : > { %v844_v50 = vadd.f32 %v843_v28, %v660_v40  ;;  %v885_v51 = vmul.f32 %v660_v40, %v660_v40  ;;  %v1517_v52 = vpack.c.bf16 %v660_v40, %v658_v37  ;;  %v664_v53 = vadd.f32 %v663_v47, %v2049_v6 }
 0x175   : > { %v945_v54 = vadd.f32 %v944_v32, %v884_v45  ;;  %v808_v55 = vadd.f32 %v807_v44, %v662_v46  ;;  %v886_v56 = vmul.f32 %v662_v46, %v662_v46  ;;  %v1533_v62 = vpack.c.bf16 %v2087_v48, %v2083_v42 }
 0x176   : > { %v982_v57 = vadd.f32 %v981_v33, %v885_v51  ;;  %1227 = vst [vmem:[%s2062_s10 + $0x10] sm:$0xff] %v1517_v52  ;;  %v845_v58 = vadd.f32 %v844_v50, %v664_v53  ;;  %v887_v59 = vmul.f32 %v664_v53, %v664_v53  ;;  %v1518_v60 = vpack.c.bf16 %v664_v53, %v662_v46 }
 0x177   : > { %v946_v61 = vadd.f32 %v945_v54, %v886_v56  ;;  %v2097_v0 = vadd.f32 %v743_v49, %v2049_v6  ;;  %1243 = vst [vmem:[%s2062_s10 + $0x90] sm:$0xff] %v1533_v62 }
 0x178   : > { %v983_v1 = vadd.f32 %v982_v57, %v887_v59  ;;  %1228 = vst [vmem:[%s2062_s10 + $0x18] sm:$0xff] %v1518_v60  ;;  %v667_v2 = vpop.f32.mrb[8].mxu0  ;;  %v747_v3 = vpop.f32.mrb[8].mxu1 }
 0x179   : > { %v668_v4 = vadd.f32 %v667_v2, %v2047_v5  ;;  %v669_v7 = vpop.f32.mrb[9].mxu0  ;;  %v1534_v8 = vpack.c.bf16 %v2097_v0, %v2094_v63  ;;  %v749_v9 = vpop.f32.mrb[9].mxu1  ;;  %v2106_v13 = vadd.f32 %v747_v3, %v2047_v5 }
 0x17a   : > { %v670_v10 = vadd.f32 %v669_v7, %v2049_v6  ;;  %v671_v12 = vpop.f32.mrb[10].mxu0  ;;  %v751_v14 = vpop.f32.mrb[10].mxu1  ;;  %v2111_v20 = vadd.f32 %v749_v9, %v2049_v6 }
 0x17b   : > { %v809_v16 = vadd.f32 %v808_v55, %v668_v4  ;;  %v888_v17 = vmul.f32 %v668_v4, %v668_v4  ;;  %v672_v18 = vadd.f32 %v671_v12, %v2047_v5  ;;  %v673_v19 = vpop.f32.mrb[11].mxu0  ;;  %1244 = vst [vmem:[%s2062_s10 + $0x98] sm:$0xff] %v1534_v8  ;;  %v753_v21 = vpop.f32.mrb[11].mxu1  ;;  %v2115_v30 = vadd.f32 %v751_v14, %v2047_v5 }
 0x17c   : > { %v846_v22 = vadd.f32 %v845_v58, %v670_v10  ;;  %v889_v24 = vmul.f32 %v670_v10, %v670_v10  ;;  %v1519_v25 = vpack.c.bf16 %v670_v10, %v668_v4  ;;  %v674_v26 = vadd.f32 %v673_v19, %v2049_v6 }
 0x17d   : > { %v947_v27 = vadd.f32 %v946_v61, %v888_v17  ;;  %v810_v28 = vadd.f32 %v809_v16, %v672_v18  ;;  %v890_v29 = vmul.f32 %v672_v18, %v672_v18  ;;  %v1535_v37 = vpack.c.bf16 %v2111_v20, %v2106_v13 }
 0x17e   : > { %v984_v32 = vadd.f32 %v983_v1, %v889_v24  ;;  %1229 = vst [vmem:[%s2062_s10 + $0x20] sm:$0xff] %v1519_v25  ;;  %v847_v33 = vadd.f32 %v846_v22, %v674_v26  ;;  %v891_v34 = vmul.f32 %v674_v26, %v674_v26  ;;  %v1520_v35 = vpack.c.bf16 %v674_v26, %v672_v18 }
 0x17f   : > { %v948_v36 = vadd.f32 %v947_v27, %v890_v29  ;;  %v2122_v40 = vadd.f32 %v753_v21, %v2049_v6  ;;  %1245 = vst [vmem:[%s2062_s10 + $0xa0] sm:$0xff] %v1535_v37 }
 0x180   : > { %v985_v38 = vadd.f32 %v984_v32, %v891_v34  ;;  %1230 = vst [vmem:[%s2062_s10 + $0x28] sm:$0xff] %v1520_v35  ;;  %v677_v39 = vpop.f32.mrb[12].mxu0  ;;  %v757_v41 = vpop.f32.mrb[12].mxu1 }
 0x181   : > { %v678_v43 = vadd.f32 %v677_v39, %v2047_v5  ;;  %v679_v44 = vpop.f32.mrb[13].mxu0  ;;  %v759_v45 = vpop.f32.mrb[13].mxu1  ;;  %v1536_v49 = vpack.c.bf16 %v2122_v40, %v2115_v30  ;;  %v2130_v50 = vadd.f32 %v757_v41, %v2047_v5 }
 0x182   : > { %v680_v46 = vadd.f32 %v679_v44, %v2049_v6  ;;  %v681_v47 = vpop.f32.mrb[14].mxu0  ;;  %v761_v51 = vpop.f32.mrb[14].mxu1  ;;  %v2134_v56 = vadd.f32 %v759_v45, %v2049_v6 }
 0x183   : > { %v811_v52 = vadd.f32 %v810_v28, %v678_v43  ;;  %v892_v53 = vmul.f32 %v678_v43, %v678_v43  ;;  %v682_v54 = vadd.f32 %v681_v47, %v2047_v5  ;;  %v683_v55 = vpop.f32.mrb[15].mxu0  ;;  %v763_v57 = vpop.f32.mrb[15].mxu1  ;;  %1246 = vst [vmem:[%s2062_s10 + $0xa8] sm:$0xff] %v1536_v49  ;;  %v2142_v12 = vadd.f32 %v761_v51, %v2047_v5 }
 0x184   : > { %v848_v58 = vadd.f32 %v847_v33, %v680_v46  ;;  %v893_v59 = vmul.f32 %v680_v46, %v680_v46  ;;  %v1521_v60 = vpack.c.bf16 %v680_v46, %v678_v43  ;;  %v684_v61 = vadd.f32 %v683_v55, %v2049_v6 }
 0x185   : > { %v949_v62 = vadd.f32 %v948_v36, %v892_v53  ;;  %v812_v1 = vadd.f32 %v811_v52, %v682_v54  ;;  %v894_v2 = vmul.f32 %v682_v54, %v682_v54  ;;  %v1537_v10 = vpack.c.bf16 %v2134_v56, %v2130_v50 }
 0x186   : > { %v986_v3 = vadd.f32 %v985_v38, %v893_v59  ;;  %1231 = vst [vmem:[%s2062_s10 + $0x30] sm:$0xff] %v1521_v60  ;;  %v849_v4 = vadd.f32 %v848_v58, %v684_v61  ;;  %v895_v7 = vmul.f32 %v684_v61, %v684_v61  ;;  %v1522_v8 = vpack.c.bf16 %v684_v61, %v682_v54 }
 0x187   : > { %v950_v9 = vadd.f32 %v949_v62, %v894_v2  ;;  %v2145_v14 = vadd.f32 %v763_v57, %v2049_v6  ;;  %1247 = vst [vmem:[%s2062_s10 + $0xb0] sm:$0xff] %v1537_v10 }
 0x188   : > { %v987_v16 = vadd.f32 %v986_v3, %v895_v7  ;;  %1232 = vst [vmem:[%s2062_s10 + $0x38] sm:$0xff] %v1522_v8  ;;  %v687_v17 = vpop.f32.mrb[16].mxu0  ;;  %v767_v18 = vpop.f32.mrb[16].mxu1 }
 0x189   : > { %v688_v19 = vadd.f32 %v687_v17, %v2047_v5  ;;  %v689_v21 = vpop.f32.mrb[17].mxu0  ;;  %v1538_v22 = vpack.c.bf16 %v2145_v14, %v2142_v12  ;;  %v769_v24 = vpop.f32.mrb[17].mxu1  ;;  %v2154_v27 = vadd.f32 %v767_v18, %v2047_v5 }
 0x18a   : > { %v690_v25 = vadd.f32 %v689_v21, %v2049_v6  ;;  %v691_v26 = vpop.f32.mrb[18].mxu0  ;;  %v771_v28 = vpop.f32.mrb[18].mxu1  ;;  %v2159_v35 = vadd.f32 %v769_v24, %v2049_v6 }
 0x18b   : > { %v813_v29 = vadd.f32 %v812_v1, %v688_v19  ;;  %v896_v32 = vmul.f32 %v688_v19, %v688_v19  ;;  %v692_v33 = vadd.f32 %v691_v26, %v2047_v5  ;;  %v693_v34 = vpop.f32.mrb[19].mxu0  ;;  %1248 = vst [vmem:[%s2062_s10 + $0xb8] sm:$0xff] %v1538_v22  ;;  %v773_v36 = vpop.f32.mrb[19].mxu1  ;;  %v2163_v46 = vadd.f32 %v771_v28, %v2047_v5 }
 0x18c   : > { %v850_v37 = vadd.f32 %v849_v4, %v690_v25  ;;  %v897_v38 = vmul.f32 %v690_v25, %v690_v25  ;;  %v1523_v39 = vpack.c.bf16 %v690_v25, %v688_v19  ;;  %v694_v41 = vadd.f32 %v693_v34, %v2049_v6 }
 0x18d   : > { %v951_v43 = vadd.f32 %v950_v9, %v896_v32  ;;  %v814_v44 = vadd.f32 %v813_v29, %v692_v33  ;;  %v898_v45 = vmul.f32 %v692_v33, %v692_v33  ;;  %v1539_v54 = vpack.c.bf16 %v2159_v35, %v2154_v27 }
 0x18e   : > { %v988_v47 = vadd.f32 %v987_v16, %v897_v38  ;;  %1233 = vst [vmem:[%s2062_s10 + $0x40] sm:$0xff] %v1523_v39  ;;  %v851_v49 = vadd.f32 %v850_v37, %v694_v41  ;;  %v899_v51 = vmul.f32 %v694_v41, %v694_v41  ;;  %v1524_v52 = vpack.c.bf16 %v694_v41, %v692_v33 }
 0x18f   : > { %v952_v53 = vadd.f32 %v951_v43, %v898_v45  ;;  %v2170_v58 = vadd.f32 %v773_v36, %v2049_v6  ;;  %1249 = vst [vmem:[%s2062_s10 + $0xc0] sm:$0xff] %v1539_v54 }
 0x190   : > { %v989_v55 = vadd.f32 %v988_v47, %v899_v51  ;;  %1234 = vst [vmem:[%s2062_s10 + $0x48] sm:$0xff] %v1524_v52  ;;  %v697_v57 = vpop.f32.mrb[20].mxu0  ;;  %v777_v59 = vpop.f32.mrb[20].mxu1 }
 0x191   : > { %v698_v60 = vadd.f32 %v697_v57, %v2047_v5  ;;  %v699_v61 = vpop.f32.mrb[21].mxu0  ;;  %v779_v62 = vpop.f32.mrb[21].mxu1  ;;  %v1540_v3 = vpack.c.bf16 %v2170_v58, %v2163_v46  ;;  %v2178_v4 = vadd.f32 %v777_v59, %v2047_v5 }
 0x192   : > { %v700_v1 = vadd.f32 %v699_v61, %v2049_v6  ;;  %v701_v2 = vpop.f32.mrb[22].mxu0  ;;  %v781_v7 = vpop.f32.mrb[22].mxu1  ;;  %v2182_v17 = vadd.f32 %v779_v62, %v2049_v6 }
 0x193   : > { %v815_v8 = vadd.f32 %v814_v44, %v698_v60  ;;  %v900_v9 = vmul.f32 %v698_v60, %v698_v60  ;;  %v702_v10 = vadd.f32 %v701_v2, %v2047_v5  ;;  %v703_v16 = vpop.f32.mrb[23].mxu0  ;;  %v783_v18 = vpop.f32.mrb[23].mxu1  ;;  %1250 = vst [vmem:[%s2062_s10 + $0xc8] sm:$0xff] %v1540_v3  ;;  %v2190_v38 = vadd.f32 %v781_v7, %v2047_v5 }
 0x194   : > { %v852_v19 = vadd.f32 %v851_v49, %v700_v1  ;;  %v901_v21 = vmul.f32 %v700_v1, %v700_v1  ;;  %v1525_v22 = vpack.c.bf16 %v700_v1, %v698_v60  ;;  %v704_v24 = vadd.f32 %v703_v16, %v2049_v6 }
 0x195   : > { %v953_v25 = vadd.f32 %v952_v53, %v900_v9  ;;  %v816_v26 = vadd.f32 %v815_v8, %v702_v10  ;;  %v902_v28 = vmul.f32 %v702_v10, %v702_v10  ;;  %v1541_v37 = vpack.c.bf16 %v2182_v17, %v2178_v4 }
 0x196   : > { %v990_v29 = vadd.f32 %v989_v55, %v901_v21  ;;  %1235 = vst [vmem:[%s2062_s10 + $0x50] sm:$0xff] %v1525_v22  ;;  %v853_v32 = vadd.f32 %v852_v19, %v704_v24  ;;  %v903_v33 = vmul.f32 %v704_v24, %v704_v24  ;;  %v1526_v34 = vpack.c.bf16 %v704_v24, %v702_v10 }
 0x197   : > { %v954_v36 = vadd.f32 %v953_v25, %v902_v28  ;;  %v2193_v39 = vadd.f32 %v783_v18, %v2049_v6  ;;  %1251 = vst [vmem:[%s2062_s10 + $0xd0] sm:$0xff] %v1541_v37 }
 0x198   : > { %v991_v41 = vadd.f32 %v990_v29, %v903_v33  ;;  %1236 = vst [vmem:[%s2062_s10 + $0x58] sm:$0xff] %v1526_v34  ;;  %v707_v43 = vpop.f32.mrb[24].mxu0  ;;  %v787_v44 = vpop.f32.mrb[24].mxu1 }
 0x199   : > { %v708_v45 = vadd.f32 %v707_v43, %v2047_v5  ;;  %v709_v47 = vpop.f32.mrb[25].mxu0  ;;  %v1542_v49 = vpack.c.bf16 %v2193_v39, %v2190_v38  ;;  %v789_v51 = vpop.f32.mrb[25].mxu1  ;;  %v2202_v54 = vadd.f32 %v787_v44, %v2047_v5 }
 0x19a   : > { %v710_v52 = vadd.f32 %v709_v47, %v2049_v6  ;;  %v711_v53 = vpop.f32.mrb[26].mxu0  ;;  %v791_v55 = vpop.f32.mrb[26].mxu1  ;;  %v2207_v62 = vadd.f32 %v789_v51, %v2049_v6 }
 0x19b   : > { %v817_v57 = vadd.f32 %v816_v26, %v708_v45  ;;  %v904_v59 = vmul.f32 %v708_v45, %v708_v45  ;;  %v712_v60 = vadd.f32 %v711_v53, %v2047_v5  ;;  %v713_v61 = vpop.f32.mrb[27].mxu0  ;;  %1252 = vst [vmem:[%s2062_s10 + $0xd8] sm:$0xff] %v1542_v49  ;;  %v793_v1 = vpop.f32.mrb[27].mxu1  ;;  %v2211_v18 = vadd.f32 %v791_v55, %v2047_v5 }
 0x19c   : > { %v854_v2 = vadd.f32 %v853_v32, %v710_v52  ;;  %v905_v3 = vmul.f32 %v710_v52, %v710_v52  ;;  %v1527_v7 = vpack.c.bf16 %v710_v52, %v708_v45  ;;  %v714_v8 = vadd.f32 %v713_v61, %v2049_v6 }
 0x19d   : > { %v955_v9 = vadd.f32 %v954_v36, %v904_v59  ;;  %v818_v10 = vadd.f32 %v817_v57, %v712_v60  ;;  %v906_v16 = vmul.f32 %v712_v60, %v712_v60  ;;  %v1543_v26 = vpack.c.bf16 %v2207_v62, %v2202_v54 }
 0x19e   : > { %v992_v19 = vadd.f32 %v991_v41, %v905_v3  ;;  %1237 = vst [vmem:[%s2062_s10 + $0x60] sm:$0xff] %v1527_v7  ;;  %v855_v21 = vadd.f32 %v854_v2, %v714_v8  ;;  %v907_v22 = vmul.f32 %v714_v8, %v714_v8  ;;  %v1528_v24 = vpack.c.bf16 %v714_v8, %v712_v60 }
 0x19f   : > { %v956_v25 = vadd.f32 %v955_v9, %v906_v16  ;;  %v2218_v32 = vadd.f32 %v793_v1, %v2049_v6  ;;  %1253 = vst [vmem:[%s2062_s10 + $0xe0] sm:$0xff] %v1543_v26  ;;  %v912_v2 = vmul.f32 %v2053_v11, %v2053_v11 }
 0x1a0   : > { %v993_v28 = vadd.f32 %v992_v19, %v907_v22  ;;  %1238 = vst [vmem:[%s2062_s10 + $0x68] sm:$0xff] %v1528_v24  ;;  %v717_v29 = vpop.f32.mrb[28].mxu0  ;;  %v797_v33 = vpop.f32.mrb[28].mxu1 }
 0x1a1   : > { %v718_v34 = vadd.f32 %v717_v29, %v2047_v5  ;;  %v719_v36 = vpop.f32.mrb[29].mxu0  ;;  %v799_v37 = vpop.f32.mrb[29].mxu1  ;;  %v1544_v44 = vpack.c.bf16 %v2218_v32, %v2211_v18  ;;  %v2226_v45 = vadd.f32 %v797_v33, %v2047_v5 }
 0x1a2   : > { %v720_v41 = vadd.f32 %v719_v36, %v2049_v6  ;;  %v721_v43 = vpop.f32.mrb[30].mxu0  ;;  %v801_v47 = vpop.f32.mrb[30].mxu1  ;;  %v2230_v55 = vadd.f32 %v799_v37, %v2049_v6 }
 0x1a3   : > { %v819_v49 = vadd.f32 %v818_v10, %v718_v34  ;;  %v908_v51 = vmul.f32 %v718_v34, %v718_v34  ;;  %v722_v52 = vadd.f32 %v721_v43, %v2047_v5  ;;  %v723_v53 = vpop.f32.mrb[31].mxu0  ;;  %v803_v57 = vpop.f32.mrb[31].mxu1  ;;  %1254 = vst [vmem:[%s2062_s10 + $0xe8] sm:$0xff] %v1544_v44  ;;  %v2241_v26 = vadd.f32 %v801_v47, %v2047_v5 }
 0x1a4   : > { %v856_v59 = vadd.f32 %v855_v21, %v720_v41  ;;  %v909_v60 = vmul.f32 %v720_v41, %v720_v41  ;;  %v1529_v61 = vpack.c.bf16 %v720_v41, %v718_v34  ;;  %v724_v1 = vadd.f32 %v723_v53, %v2049_v6 }
 0x1a5   : > { %v957_v3 = vadd.f32 %v956_v25, %v908_v51  ;;  %v820_v7 = vadd.f32 %v819_v49, %v722_v52  ;;  %v910_v8 = vmul.f32 %v722_v52, %v722_v52  ;;  %v1545_v24 = vpack.c.bf16 %v2230_v55, %v2226_v45 }
 0x1a6   : > { %v994_v9 = vadd.f32 %v993_v28, %v909_v60  ;;  %1239 = vst [vmem:[%s2062_s10 + $0x70] sm:$0xff] %v1529_v61  ;;  %v857_v10 = vadd.f32 %v856_v59, %v724_v1  ;;  %v911_v16 = vmul.f32 %v724_v1, %v724_v1  ;;  %v1530_v19 = vpack.c.bf16 %v724_v1, %v722_v52 }
 0x1a7   : > { %v821_v21 = vadd.f32 %v820_v7, %v2053_v11  ;;  %v958_v22 = vadd.f32 %v957_v3, %v910_v8  ;;  %v913_v25 = vmul.f32 %v2057_v15, %v2057_v15  ;;  %v2248_v33 = vadd.f32 %v803_v57, %v2049_v6  ;;  %1255 = vst [vmem:[%s2062_s10 + $0xf0] sm:$0xff] %v1545_v24 }
 0x1a8   : > { %v858_v29 = vadd.f32 %v857_v10, %v2057_v15  ;;  %v995_v28 = vadd.f32 %v994_v9, %v911_v16  ;;  %1240 = vst [vmem:[%s2062_s10 + $0x78] sm:$0xff] %v1530_v19  ;;  %v914_v11 = vmul.f32 %v2067_v23, %v2067_v23  ;;  %v915_v5 = vmul.f32 %v2073_v31, %v2073_v31 }
 0x1a9   : > { %v822_v34 = vadd.f32 %v821_v21, %v2067_v23  ;;  %v959_v36 = vadd.f32 %v958_v22, %v912_v2  ;;  %v1546_v15 = vpack.c.bf16 %v2248_v33, %v2241_v26  ;;  %v916_v6 = vmul.f32 %v2083_v42, %v2083_v42 }
 0x1aa   : > { %v859_v37 = vadd.f32 %v858_v29, %v2073_v31  ;;  %v996_v41 = vadd.f32 %v995_v28, %v913_v25  ;;  %v917_v23 = vmul.f32 %v2087_v48, %v2087_v48  ;;  %v918_v31 = vmul.f32 %v2094_v63, %v2094_v63 }
 0x1ab   : > { %v823_v43 = vadd.f32 %v822_v34, %v2083_v42  ;;  %v960_v44 = vadd.f32 %v959_v36, %v914_v11  ;;  %1256 = vst [vmem:[%s2062_s10 + $0xf8] sm:$0xff] %v1546_v15  ;;  %v919_v53 = vmul.f32 %v2097_v0, %v2097_v0  ;;  %v920_v59 = vmul.f32 %v2106_v13, %v2106_v13 }
 0x1ac   : > { %v860_v47 = vadd.f32 %v859_v37, %v2087_v48  ;;  %v997_v49 = vadd.f32 %v996_v41, %v915_v5  ;;  %v921_v61 = vmul.f32 %v2111_v20, %v2111_v20  ;;  %v928_v28 = vmul.f32 %v2154_v27, %v2154_v27 }
 0x1ad   : > { %v824_v51 = vadd.f32 %v823_v43, %v2094_v63  ;;  %v961_v52 = vadd.f32 %v960_v44, %v916_v6  ;;  %v922_v63 = vmul.f32 %v2115_v30, %v2115_v30  ;;  %v929_v34 = vmul.f32 %v2159_v35, %v2159_v35 }
 0x1ae   : > { %v861_v57 = vadd.f32 %v860_v47, %v2097_v0  ;;  %v998_v42 = vadd.f32 %v997_v49, %v917_v23  ;;  %v923_v0 = vmul.f32 %v2122_v40, %v2122_v40  ;;  %v930_v37 = vmul.f32 %v2163_v46, %v2163_v46 }
 0x1af   : > { %v962_v60 = vadd.f32 %v961_v52, %v918_v31  ;;  %v825_v48 = vadd.f32 %v824_v51, %v2106_v13  ;;  %v924_v13 = vmul.f32 %v2130_v50, %v2130_v50  ;;  %v931_v15 = vmul.f32 %v2170_v58, %v2170_v58 }
 0x1b0   : > { %v999_v1 = vadd.f32 %v998_v42, %v919_v53  ;;  %v862_v2 = vadd.f32 %v861_v57, %v2111_v20  ;;  %v925_v20 = vmul.f32 %v2134_v56, %v2134_v56  ;;  %v932_v43 = vmul.f32 %v2178_v4, %v2178_v4 }
 0x1b1   : > { %v826_v3 = vadd.f32 %v825_v48, %v2115_v30  ;;  %v963_v7 = vadd.f32 %v962_v60, %v920_v59  ;;  %v926_v30 = vmul.f32 %v2142_v12, %v2142_v12  ;;  %v933_v23 = vmul.f32 %v2182_v17, %v2182_v17 }
 0x1b2   : > { %v863_v8 = vadd.f32 %v862_v2, %v2122_v40  ;;  %v1000_v9 = vadd.f32 %v999_v1, %v921_v61  ;;  %v927_v40 = vmul.f32 %v2145_v14, %v2145_v14  ;;  %v934_v49 = vmul.f32 %v2190_v38, %v2190_v38 }
 0x1b3   : > { %v827_v10 = vadd.f32 %v826_v3, %v2130_v50  ;;  %v964_v16 = vadd.f32 %v963_v7, %v922_v63  ;;  %v935_v51 = vmul.f32 %v2193_v39, %v2193_v39  ;;  %v936_v53 = vmul.f32 %v2202_v54, %v2202_v54 }
 0x1b4   : > { %v864_v19 = vadd.f32 %v863_v8, %v2134_v56  ;;  %v1001_v21 = vadd.f32 %v1000_v9, %v923_v0  ;;  %v937_v42 = vmul.f32 %v2207_v62, %v2207_v62  ;;  %v938_v60 = vmul.f32 %v2211_v18, %v2211_v18 }
 0x1b5   : > { %v828_v22 = vadd.f32 %v827_v10, %v2142_v12  ;;  %v965_v24 = vadd.f32 %v964_v16, %v924_v13  ;;  %v941_v1 = vmul.f32 %v2230_v55, %v2230_v55  ;;  %v942_v0 = vmul.f32 %v2241_v26, %v2241_v26 }
 0x1b6   : > { %v865_v25 = vadd.f32 %v864_v19, %v2145_v14  ;;  %v1002_v29 = vadd.f32 %v1001_v21, %v925_v20 }
 0x1b7   : > { %v829_v50 = vadd.f32 %v828_v22, %v2154_v27  ;;  %v966_v11 = vadd.f32 %v965_v24, %v926_v30 }
 0x1b8   : > { %v866_v56 = vadd.f32 %v865_v25, %v2159_v35  ;;  %v1003_v36 = vadd.f32 %v1002_v29, %v927_v40 }
 0x1b9   : > { %v967_v12 = vadd.f32 %v966_v11, %v928_v28  ;;  %v830_v5 = vadd.f32 %v829_v50, %v2163_v46 }
 0x1ba   : > { %v1004_v14 = vadd.f32 %v1003_v36, %v929_v34  ;;  %v867_v41 = vadd.f32 %v866_v56, %v2170_v58 }
 0x1bb   : > { %v968_v27 = vadd.f32 %v967_v12, %v930_v37  ;;  %v831_v6 = vadd.f32 %v830_v5, %v2178_v4 }
 0x1bc   : > { %v1005_v35 = vadd.f32 %v1004_v14, %v931_v15  ;;  %v868_v44 = vadd.f32 %v867_v41, %v2182_v17 }
 0x1bd   : > { %v969_v47 = vadd.f32 %v968_v27, %v932_v43  ;;  %v832_v46 = vadd.f32 %v831_v6, %v2190_v38 }
 0x1be   : > { %v1006_v31 = vadd.f32 %v1005_v35, %v933_v23  ;;  %v869_v58 = vadd.f32 %v868_v44, %v2193_v39  ;;  %v940_v39 = vmul.f32 %v2226_v45, %v2226_v45 }
 0x1bf   : > { %v970_v52 = vadd.f32 %v969_v47, %v934_v49  ;;  %v833_v4 = vadd.f32 %v832_v46, %v2202_v54  ;;  %v939_v54 = vmul.f32 %v2218_v32, %v2218_v32 }
 0x1c0   : > { %v1007_v57 = vadd.f32 %v1006_v31, %v935_v51  ;;  %v870_v17 = vadd.f32 %v869_v58, %v2207_v62 }
 0x1c1   : > { %v971_v59 = vadd.f32 %v970_v52, %v936_v53  ;;  %v834_v38 = vadd.f32 %v833_v4, %v2211_v18 }
 0x1c2   : > { %v1008_v48 = vadd.f32 %v1007_v57, %v937_v42  ;;  %v871_v61 = vadd.f32 %v870_v17, %v2218_v32  ;;  %v943_v32 = vmul.f32 %v2248_v33, %v2248_v33 }
 0x1c3   : > { %v972_v2 = vadd.f32 %v971_v59, %v938_v60  ;;  %v835_v62 = vadd.f32 %v834_v38, %v2226_v45 }
 0x1c4   : > { %v1009_v63 = vadd.f32 %v1008_v48, %v939_v54  ;;  %v872_v3 = vadd.f32 %v871_v61, %v2230_v55 }
 0x1c5   : > { %v973_v7 = vadd.f32 %v972_v2, %v940_v39  ;;  %v836_v18 = vadd.f32 %v835_v62, %v2241_v26 }
 0x1c6   : > { %v1010_v8 = vadd.f32 %v1009_v63, %v941_v1  ;;  %v873_v9 = vadd.f32 %v872_v3, %v2248_v33 }
 0x1c7   : > { %v837_v13 = vrot.slane %v836_v18, 4  ;;  %v974_v10 = vadd.f32 %v973_v7, %v942_v0 }
 0x1c8   : > { %v874_v16 = vrot.slane %v873_v9, 4  ;;  %v1011_v45 = vadd.f32 %v1010_v8, %v943_v32 }
 0x1c9   : > { %v838_v20 = vadd.f32 %v837_v13, %v836_v18  ;;  %v975_v55 = vrot.slane %v974_v10, 4 }
 0x1ca   : > { %v875_v19 = vadd.f32 %v874_v16, %v873_v9  ;;  %v1012_v21 = vrot.slane %v1011_v45, 4 }
 0x1cb   : > { %v839_v30 = vrot.slane %v838_v20, 2  ;;  %v976_v22 = vadd.f32 %v975_v55, %v974_v10 }
 0x1cc   : > { %v876_v24 = vrot.slane %v875_v19, 2  ;;  %v1013_v26 = vadd.f32 %v1012_v21, %v1011_v45 }
 0x1cd   : > { %v840_v40 = vadd.f32 %v839_v30, %v838_v20  ;;  %v977_v25 = vrot.slane %v976_v22, 2 }
 0x1ce   : > { %v877_v29 = vadd.f32 %v876_v24, %v875_v19  ;;  %v1014_v50 = vrot.slane %v1013_v26, 2 }
 0x1cf   : > { %v841_v28 = vrot.slane %v840_v40, 1  ;;  %v978_v33 = vadd.f32 %v977_v25, %v976_v22 }
 0x1d0   : > { %v878_v11 = vrot.slane %v877_v29, 1  ;;  %v1015_v56 = vadd.f32 %v1014_v50, %v1013_v26 }
 0x1d1   : > { %v979_v34 = vrot.slane %v978_v33, 1  ;;  %v842_v12 = vadd.f32 %v841_v28, %v840_v40 }
 0x1d2   : > { %v1016_v36 = vrot.slane %v1015_v56, 1  ;;  %v879_v37 = vadd.f32 %v878_v11, %v877_v29 }
 0x1d3   : > { %v980_v5 = vadd.f32 %v979_v34, %v978_v33 }
 0x1d4   : > { %v1017_v14 = vadd.f32 %v1016_v36, %v1015_v56 }
 0x1d5   : > { %v1019_v41 = vsel %vm1018_vm0, %v842_v12, %v980_v5 }
 0x1d6   : > { %v1020_v15 = vsel %vm1018_vm0, %v879_v37, %v1017_v14 }
 0x1d7   : > { %v1023_v27 = vcombine.low %v1019_v41, %v1020_v15 }
 0x1d9   : > { %1476 = vst.sshfl [vmem:[%s311_s29] sm:$0x33 pattern:$0x76325410] %v1023_v27 }
 0x1da PF: > { %s19_s20 = sadd.s32 1, %s1809_s20   ;;  %s2384_s15 = smov %s1793_s16 }
 0x1db   : > { %p16_p4 = scmp.ge.s32.totalorder %s19_s20, 4   ;;  %s2385_s16 = smov %s1797_s17 }
 0x1dc   : > { %s2386_s17 = smov %s1925_s5  ;;  %s2387_s18 = smov %s1805_s19 }
 0x1dd   : > { %s2388_s19 = smov %s2390_s28  ;;  %18 = sbr.rel (!%p16_p4) target bundleno = 5 (0x5), region = 92 }
 0x1e4   :  { %1315 = vsyncpa [#allocation3], 1 }
 0x1e5   :  { %1317 = vsyncpa [#allocation3 + $0x1], 1 }
 0x1e6   :  { %1318 = vsyncpa [#allocation5], 1 }

// kernel: projection_head.5
= control target key start
LH: loop header
LB: loop body
LE: loop exit
PB: predicated region body
PF: predicated region fallthrough
CT: control target
= control target key end

     0   :  { %10 = vsyncpa [#allocation3], 0  ;;  %s1828_s0 = inlined_call_operand.vmem [shape: bf16[512,256], index: 0, kind: input, shape index: {}]   ;;  %s1829_s1 = inlined_call_operand.vmem [shape: f32[1,256], index: 1, kind: input, shape index: {}]   ;;  %s1830_s2 = inlined_call_operand.vmem [shape: f32[1,256], index: 2, kind: input, shape index: {}]   ;;  %s1831_s3 = inlined_call_operand.vmem [shape: bf16[256,128], index: 3, kind: input, shape index: {}]   ;;  %s1832_s4 = inlined_call_operand.vmem [shape: f32[1,128], index: 4, kind: input, shape index: {}]   ;;  %s1833_s5 = inlined_call_operand.hbm [shape: f32[512,128], index: 5, kind: output, shape index: {}]  }
   0x1   :  { %12 = vsyncpa [#allocation3 + $0x1], 0  ;;  %s1410_s18 = smov 0   ;;  %s1412_s19 = smov 0  }
   0x2   :  { %s1414_s20 = smov 0   ;;  %s1416_s21 = smov 0  }
   0x3   :  { %s1418_s22 = smov 0   ;;  %s1420_s23 = smov 0  }
   0x4 LB: > { %s1061_s24 = sadd.s32 4294967295, %s1375_s23   ;;  %s1062_s25 = sadd.s32 4294967294, %s1375_s23   ;;  %s1375_s23 = sphi %s1420_s23, %s18_s23   ;;  %s1371_s22 = sphi %s1418_s22, %s1840_s22   ;;  %s1367_s21 = sphi %s1416_s21, %s1839_s21   ;;  %s1363_s20 = sphi %s1414_s20, %s1838_s20   ;;  %s1359_s19 = sphi %s1412_s19, %s1837_s19   ;;  %s1355_s18 = sphi %s1410_s18, %s1836_s18  }
   0x5   : > { %s27_s26 = sadd.s32 1, %s1371_s22  ;;  %s159_s27 = sadd.s32 1, %s1363_s20 }
   0x6   : > { %p28_p0 = scmp.ge.s32.totalorder %s27_s26, 2  ;;  %p169_p1 = scmp.ne.s32.totalorder %s1363_s20, %s1359_s19 }
   0x7   : > { %p170_p2 = scmp.eq.s32.totalorder %s1061_s24, 1  ;;  %p175_p3 = scmp.ne.s32.totalorder %s1359_s19, %s1355_s18 }
   0x8   : > { %s1842_s26 = smov (%p28_p0, %s27_s26), 0  ;;  %p176_p5 = scmp.eq.s32.totalorder %s1062_s25, 1 }
   0x9   : > { %p1450_p4 = por %p170_p2, %p169_p1  ;;  %s154_s29 = ssub.s32 %s1371_s22, %s1842_s26 }
   0xa   : > { %p1067_p6 = scmp.ge.s32.totalorder %s1375_s23, 1  ;;  %p157_p7 = scmp.eq.s32.totalorder %s154_s29, 0 }
   0xb   : > { %p1457_p8 = por %p176_p5, %p175_p3  ;;  %p223_p9 = scmp.lt.s32.totalorder %s1375_s23, 3 }
   0xc   : > { %s1463_s6 = scalar_select %p157_p7, %s1363_s20, %s159_s27  }
   0xd   : > { %p224_p10 = pnand %p1067_p6, %p223_p9 }
   0xe   : > { %v1281_v0 = vld [vmem:[%s1831_s3 + $0x40] sm:$0xff] (!%p224_p10)   ;;  %s1069_s9 = sshll.u32 (!%p224_p10), %s1367_s21, 5  ;;  %v1283_v2 = vld [vmem:[%s1831_s3 + $0x48] sm:$0xff] (!%p224_p10)   ;;  %v1285_v4 = vld [vmem:[%s1831_s3 + $0x50] sm:$0xff] (!%p224_p10)   ;;  %v373_v5 = vlaneseq (!%p224_p10)  ;;  %s1095_s8 = sshll.u32 (!%p224_p10), %s1367_s21, 12 }
   0xf   : > { %227 = sbr.rel (%p224_p10) target bundleno = 337 (0x151), region = 40  ;;  %v1282_v1 = vld [vmem:[%s1831_s3] sm:$0xff] (!%p224_p10)   ;;  %1096 = vmatprep.subr.bf16.mxu0 (!%p224_p10), %v1281_v0  ;;  %1208 = vmatprep.subr.bf16.mxu1 (!%p224_p10), %v1281_v0  ;;  %p260_p11 = scmp.lt.s32.totalorder (!%p224_p10), %s1069_s9, 63  ;;  %v1284_v3 = vld [vmem:[%s1831_s3 + $0x8] sm:$0xff] (!%p224_p10)   ;;  %v1286_v6 = vld [vmem:[%s1831_s3 + $0x10] sm:$0xff] (!%p224_p10)  }
  0x10   : > { %1097 = vmatpush3.bf16.msra.mxu0 (!%p224_p10), %v1282_v1  ;;  %1216 = vmatpush3.bf16.msra.mxu1 (!%p224_p10), %v1282_v1  ;;  %v1287_v7 = vld [vmem:[%s1831_s3 + $0x58] sm:$0xff] (!%p224_p10)   ;;  %v374_v8 = vshrl.u32 (!%p224_p10), %v373_v5, 7  ;;  %v1289_v10 = vld [vmem:[%s1831_s3 + $0x60] sm:$0xff] (!%p224_p10)   ;;  %v1291_v14 = vld [vmem:[%s1831_s3 + $0x68] sm:$0xff] (!%p224_p10)   ;;  %s1772_s13 = scalar_lea.hbm (!%p224_p10), %s1833_s5, %s1095_s8 }
  0x11   : > { %1098 = vmatprep.subr.bf16.mxu0 (!%p224_p10), %v1283_v2  ;;  %1209 = vmatprep.subr.bf16.mxu1 (!%p224_p10), %v1283_v2  ;;  %v1288_v9 = vld [vmem:[%s1831_s3 + $0x18] sm:$0xff] (!%p224_p10)   ;;  %v1290_v12 = vld [vmem:[%s1831_s3 + $0x20] sm:$0xff] (!%p224_p10)   ;;  %v1292_v30 = vld [vmem:[%s1831_s3 + $0x28] sm:$0xff] (!%p224_p10)  }
  0x12   : > { %v375_v11 = vsub.s32 (!%p224_p10), 0, %v374_v8  ;;  %v379_v13 = vsub.s32 (!%p224_p10), 1, %v374_v8  ;;  %v371_v17 = vld [vmem:[%s1829_s1] sm:$0x3] (!%p224_p10)  ;;  %v1293_v35 = vld [vmem:[%s1831_s3 + $0x70] sm:$0xff] (!%p224_p10)   ;;  %v1295_v54 = vld [vmem:[%s1831_s3 + $0x78] sm:$0xff] (!%p224_p10)  }
  0x13   : > { %v447_v22 = vld [vmem:[%s1830_s2] sm:$0x3] (!%p224_p10)  ;;  %v1294_v49 = vld [vmem:[%s1831_s3 + $0x30] sm:$0xff] (!%p224_p10)   ;;  %v1296_v5 = vld [vmem:[%s1831_s3 + $0x38] sm:$0xff] (!%p224_p10)  }
  0x14   : > { %1099 = vmatpush3.bf16.msra.mxu0 (!%p224_p10), %v1284_v3  ;;  %1217 = vmatpush3.bf16.msra.mxu1 (!%p224_p10), %v1284_v3  ;;  %v1514_v25 = vrot.slane (!%p224_p10), %v371_v17, %v375_v11  ;;  %v1516_v26 = vrot.slane (!%p224_p10), %v371_v17, %v379_v13  ;;  %v1518_v27 = vrot.slane (!%p224_p10), %v447_v22, %v375_v11 }
  0x15   : > { %1100 = vmatprep.subr.bf16.mxu0 (!%p224_p10), %v1285_v4  ;;  %1210 = vmatprep.subr.bf16.mxu1 (!%p224_p10), %v1285_v4  ;;  %v1520_v28 = vrot.slane (!%p224_p10), %v447_v22, %v379_v13 }
  0x16   : > { %s1844_s9 = smov (!%p260_p11, %s1069_s9), 63 }
  0x17   : > { %s1094_s7 = sshll.u32 %s1844_s9, 3  ;;  %s1377_s9 = smov [#allocation2]  }
  0x18   : > { %1101 = vmatpush3.bf16.msra.mxu0 %v1286_v6  ;;  %1218 = vmatpush3.bf16.msra.mxu1 %v1286_v6  ;;  %s1496_s15 = scalar_lea.vmem %s1828_s0, %s1094_s7  ;;  %s1301_s16 = sshll.u32 %s1377_s9, 4  ;;  %s1302_s16 = int_to_ptr.vmem [resolvable:$false] %s1301_s16 }
  0x19   : > { %1102 = vmatprep.subr.bf16.mxu0 %v1287_v7  ;;  %1211 = vmatprep.subr.bf16.mxu1 %v1287_v7  ;;  %v275_v15 = vld [vmem:[%s1496_s15] sm:$0xff]  ;;  %v276_v16 = vld [vmem:[%s1496_s15 + $0x8] sm:$0xff]  ;;  %v1523_v29 = vld [vmem:[%s1496_s15 + $0x10] sm:$0xff]  ;;  %s1303_s17 = scalar_lea.vmem %s1302_s16, 8192 }
  0x1a   : > { %v307_v18 = vunpack.c.l.bf16 %v275_v15  ;;  %v308_v19 = vunpack.c.h.bf16 %v275_v15  ;;  %v309_v20 = vunpack.c.l.bf16 %v276_v16  ;;  %v310_v21 = vunpack.c.h.bf16 %v276_v16  ;;  %v291_v23 = vld [vmem:[%s1496_s15 + $0x80] sm:$0xff]  ;;  %v292_v24 = vld [vmem:[%s1496_s15 + $0x88] sm:$0xff]  ;;  %v278_v39 = vld [vmem:[%s1496_s15 + $0x18] sm:$0xff] }
  0x1b   : > { %v339_v31 = vunpack.c.l.bf16 %v291_v23  ;;  %v340_v32 = vunpack.c.h.bf16 %v291_v23  ;;  %v341_v33 = vunpack.c.l.bf16 %v292_v24  ;;  %v342_v34 = vunpack.c.h.bf16 %v292_v24  ;;  %v293_v59 = vld [vmem:[%s1496_s15 + $0x90] sm:$0xff]  ;;  %v294_v0 = vld [vmem:[%s1496_s15 + $0x98] sm:$0xff] }
  0x1c   : > { %1103 = vmatpush3.bf16.msra.mxu0 %v1288_v9  ;;  %1219 = vmatpush3.bf16.msra.mxu1 %v1288_v9  ;;  %v384_v36 = vmul.f32 %v1516_v26, %v308_v19  ;;  %v386_v37 = vmul.f32 %v1516_v26, %v310_v21  ;;  %v383_v38 = vmul.f32 %v1514_v25, %v307_v18  ;;  %v312_v40 = vunpack.c.h.bf16 %v1523_v29  ;;  %v279_v18 = vld [vmem:[%s1496_s15 + $0x20] sm:$0xff] }
  0x1d   : > { %1104 = vmatprep.subr.bf16.mxu0 %v1289_v10  ;;  %1212 = vmatprep.subr.bf16.mxu1 %v1289_v10  ;;  %v416_v41 = vmul.f32 %v1516_v26, %v340_v32  ;;  %v418_v42 = vmul.f32 %v1516_v26, %v342_v34  ;;  %v385_v43 = vmul.f32 %v1514_v25, %v309_v20  ;;  %v314_v53 = vunpack.c.h.bf16 %v278_v39 }
  0x1e   : > { %v415_v44 = vmul.f32 %v1514_v25, %v339_v31  ;;  %v460_v45 = vadd.f32 %v1520_v28, %v384_v36  ;;  %v462_v46 = vadd.f32 %v1520_v28, %v386_v37  ;;  %v459_v47 = vadd.f32 %v1518_v27, %v383_v38  ;;  %v280_v31 = vld [vmem:[%s1496_s15 + $0x28] sm:$0xff]  ;;  %v295_v36 = vld [vmem:[%s1496_s15 + $0xa0] sm:$0xff] }
  0x1f   : > { %v417_v48 = vmul.f32 %v1514_v25, %v341_v33  ;;  %v492_v50 = vadd.f32 %v1520_v28, %v416_v41  ;;  %v494_v51 = vadd.f32 %v1520_v28, %v418_v42  ;;  %v461_v52 = vadd.f32 %v1518_v27, %v385_v43  ;;  %v296_v41 = vld [vmem:[%s1496_s15 + $0xa8] sm:$0xff] }
  0x20   : > { %1105 = vmatpush3.bf16.msra.mxu0 %v1290_v12  ;;  %1220 = vmatpush3.bf16.msra.mxu1 %v1290_v12  ;;  %v524_v55 = vmax.f32 %v460_v45, 0.0  ;;  %v526_v56 = vmax.f32 %v462_v46, 0.0  ;;  %v523_v57 = vmax.f32 %v459_v47, 0.0  ;;  %v491_v58 = vadd.f32 %v1518_v27, %v415_v44 }
  0x21   : > { %1106 = vmatprep.subr.bf16.mxu0 %v1291_v14  ;;  %1213 = vmatprep.subr.bf16.mxu1 %v1291_v14  ;;  %v556_v60 = vmax.f32 %v492_v50, 0.0  ;;  %v558_v61 = vmax.f32 %v494_v51, 0.0  ;;  %v525_v62 = vmax.f32 %v461_v52, 0.0  ;;  %v493_v63 = vadd.f32 %v1518_v27, %v417_v48 }
  0x22   : > { %v588_v1 = vpack.c.bf16 %v526_v56, %v524_v55  ;;  %v555_v2 = vmax.f32 %v491_v58, 0.0  ;;  %v388_v3 = vmul.f32 %v1516_v26, %v312_v40  ;;  %v390_v4 = vmul.f32 %v1516_v26, %v314_v53 }
  0x23   : > { %v604_v6 = vpack.c.bf16 %v558_v61, %v556_v60  ;;  %v587_v7 = vpack.c.bf16 %v525_v62, %v523_v57  ;;  %v557_v8 = vmax.f32 %v493_v63, 0.0  ;;  %v344_v9 = vunpack.c.h.bf16 %v293_v59  ;;  %v281_v62 = vld [vmem:[%s1496_s15 + $0x30] sm:$0xff] }
  0x24   : > { %1107 = vmatpush3.bf16.msra.mxu0 %v1292_v30  ;;  %1221 = vmatpush3.bf16.msra.mxu1 %v1292_v30  ;;  %v464_v10 = vadd.f32 %v1520_v28, %v388_v3  ;;  %v466_v11 = vadd.f32 %v1520_v28, %v390_v4  ;;  %v346_v12 = vunpack.c.h.bf16 %v294_v0  ;;  %v311_v13 = vunpack.c.l.bf16 %v1523_v29 }
  0x25   : > { %1108 = vmatprep.subr.bf16.mxu0 %v1293_v35  ;;  %1214 = vmatprep.subr.bf16.mxu1 %v1293_v35  ;;  %v603_v14 = vpack.c.bf16 %v557_v8, %v555_v2  ;;  %v420_v15 = vmul.f32 %v1516_v26, %v344_v9  ;;  %v313_v16 = vunpack.c.l.bf16 %v278_v39  ;;  %v343_v17 = vunpack.c.l.bf16 %v293_v59 }
  0x26   : > { %786 = vmatprep.mubr.bf16.mxu0 %v588_v1  ;;  %850 = vmatprep.mubr.bf16.mxu1 %v604_v6  ;;  %v528_v19 = vmax.f32 %v464_v10, 0.0  ;;  %v530_v20 = vmax.f32 %v466_v11, 0.0  ;;  %v422_v21 = vmul.f32 %v1516_v26, %v346_v12  ;;  %v387_v22 = vmul.f32 %v1514_v25, %v311_v13  ;;  %v297_v12 = vld [vmem:[%s1496_s15 + $0xb0] sm:$0xff] }
  0x27   : > { %v496_v23 = vadd.f32 %v1520_v28, %v420_v15  ;;  %v389_v24 = vmul.f32 %v1514_v25, %v313_v16  ;;  %v345_v29 = vunpack.c.l.bf16 %v294_v0  ;;  %v419_v30 = vmul.f32 %v1514_v25, %v343_v17  ;;  %v298_v17 = vld [vmem:[%s1496_s15 + $0xb8] sm:$0xff] }
  0x28   : > { %1109 = vmatpush3.bf16.msra.mxu0 %v1294_v49  ;;  %1222 = vmatpush3.bf16.msra.mxu1 %v1294_v49  ;;  %v590_v32 = vpack.c.bf16 %v530_v20, %v528_v19  ;;  %v498_v33 = vadd.f32 %v1520_v28, %v422_v21  ;;  %v463_v34 = vadd.f32 %v1518_v27, %v387_v22  ;;  %v316_v35 = vunpack.c.h.bf16 %v279_v18 }
  0x29   : > { %1110 = vmatprep.subr.bf16.mxu0 %v1295_v54  ;;  %1215 = vmatprep.subr.bf16.mxu1 %v1295_v54  ;;  %v560_v37 = vmax.f32 %v496_v23, 0.0  ;;  %v465_v38 = vadd.f32 %v1518_v27, %v389_v24  ;;  %v421_v39 = vmul.f32 %v1514_v25, %v345_v29  ;;  %v495_v40 = vadd.f32 %v1518_v27, %v419_v30 }
  0x2a   : > { %v562_v42 = vmax.f32 %v498_v33, 0.0  ;;  %v527_v43 = vmax.f32 %v463_v34, 0.0  ;;  %v318_v44 = vunpack.c.h.bf16 %v280_v31  ;;  %v392_v45 = vmul.f32 %v1516_v26, %v316_v35 }
  0x2b   : > { %v529_v46 = vmax.f32 %v465_v38, 0.0  ;;  %v497_v47 = vadd.f32 %v1518_v27, %v421_v39  ;;  %v559_v48 = vmax.f32 %v495_v40, 0.0  ;;  %v348_v49 = vunpack.c.h.bf16 %v295_v36 }
  0x2c   : > { %1111 = vmatpush3.bf16.msra.mxu0 %v1296_v5  ;;  %1223 = vmatpush3.bf16.msra.mxu1 %v1296_v5  ;;  %v606_v50 = vpack.c.bf16 %v562_v42, %v560_v37  ;;  %v394_v51 = vmul.f32 %v1516_v26, %v318_v44  ;;  %v468_v52 = vadd.f32 %v1520_v28, %v392_v45  ;;  %v350_v53 = vunpack.c.h.bf16 %v296_v41  ;;  %v283_v42 = vld [vmem:[%s1496_s15 + $0x40] sm:$0xff] }
  0x2d   : > { %v589_v54 = vpack.c.bf16 %v529_v46, %v527_v43  ;;  %v561_v55 = vmax.f32 %v497_v47, 0.0  ;;  %v424_v56 = vmul.f32 %v1516_v26, %v348_v49  ;;  %v315_v57 = vunpack.c.l.bf16 %v279_v18 }
  0x2e   : > { %v470_v58 = vadd.f32 %v1520_v28, %v394_v51  ;;  %v532_v59 = vmax.f32 %v468_v52, 0.0  ;;  %v426_v60 = vmul.f32 %v1516_v26, %v350_v53  ;;  %v317_v61 = vunpack.c.l.bf16 %v280_v31  ;;  %v284_v51 = vld [vmem:[%s1496_s15 + $0x48] sm:$0xff] }
  0x2f   : > { %787 = vmatmul.mubr.bf16.vlgmr.msra.gmra.mrb[0].mxu0 %v587_v7  ;;  %851 = vmatmul.mubr.bf16.vlgmr.msra.gmra.mrb[0].mxu1 %v603_v14  ;;  %v605_v63 = vpack.c.bf16 %v561_v55, %v559_v48  ;;  %v500_v0 = vadd.f32 %v1520_v28, %v424_v56  ;;  %v391_v1 = vmul.f32 %v1514_v25, %v315_v57  ;;  %v347_v2 = vunpack.c.l.bf16 %v295_v36  ;;  %v282_v7 = vld [vmem:[%s1496_s15 + $0x38] sm:$0xff]  ;;  %v299_v56 = vld [vmem:[%s1496_s15 + $0xc0] sm:$0xff] }
  0x30   : > { %794 = vmatprep.mubr.bf16.mxu0 %v590_v32  ;;  %858 = vmatprep.mubr.bf16.mxu1 %v606_v50  ;;  %v534_v3 = vmax.f32 %v470_v58, 0.0  ;;  %v502_v4 = vadd.f32 %v1520_v28, %v426_v60  ;;  %v393_v5 = vmul.f32 %v1514_v25, %v317_v61  ;;  %v349_v6 = vunpack.c.l.bf16 %v296_v41  ;;  %v300_v61 = vld [vmem:[%s1496_s15 + $0xc8] sm:$0xff] }
  0x31   : > { %v564_v8 = vmax.f32 %v500_v0, 0.0  ;;  %v467_v9 = vadd.f32 %v1518_v27, %v391_v1  ;;  %v423_v10 = vmul.f32 %v1514_v25, %v347_v2  ;;  %v320_v11 = vunpack.c.h.bf16 %v281_v62 }
  0x32   : > { %v592_v13 = vpack.c.bf16 %v534_v3, %v532_v59  ;;  %v566_v14 = vmax.f32 %v502_v4, 0.0  ;;  %v469_v15 = vadd.f32 %v1518_v27, %v393_v5  ;;  %v425_v16 = vmul.f32 %v1514_v25, %v349_v6 }
  0x33   : > { %v531_v18 = vmax.f32 %v467_v9, 0.0  ;;  %v499_v19 = vadd.f32 %v1518_v27, %v423_v10  ;;  %v322_v20 = vunpack.c.h.bf16 %v282_v7  ;;  %v396_v21 = vmul.f32 %v1516_v26, %v320_v11 }
  0x34   : > { %v608_v22 = vpack.c.bf16 %v566_v14, %v564_v8  ;;  %v533_v23 = vmax.f32 %v469_v15, 0.0  ;;  %v501_v24 = vadd.f32 %v1518_v27, %v425_v16  ;;  %v352_v29 = vunpack.c.h.bf16 %v297_v12 }
  0x35   : > { %v563_v30 = vmax.f32 %v499_v19, 0.0  ;;  %v398_v31 = vmul.f32 %v1516_v26, %v322_v20  ;;  %v472_v32 = vadd.f32 %v1520_v28, %v396_v21  ;;  %v354_v33 = vunpack.c.h.bf16 %v298_v17 }
  0x36   : > { %v591_v34 = vpack.c.bf16 %v533_v23, %v531_v18  ;;  %v565_v35 = vmax.f32 %v501_v24, 0.0  ;;  %v428_v36 = vmul.f32 %v1516_v26, %v352_v29  ;;  %v319_v37 = vunpack.c.l.bf16 %v281_v62  ;;  %v285_v18 = vld [vmem:[%s1496_s15 + $0x50] sm:$0xff] }
  0x37   : > { %795 = vmatmul.mubr.bf16.gmra.mrb[4].mxu0 %v589_v54  ;;  %859 = vmatmul.mubr.bf16.gmra.mrb[4].mxu1 %v605_v63  ;;  %v474_v38 = vadd.f32 %v1520_v28, %v398_v31  ;;  %v536_v39 = vmax.f32 %v472_v32, 0.0  ;;  %v430_v40 = vmul.f32 %v1516_v26, %v354_v33  ;;  %v321_v41 = vunpack.c.l.bf16 %v282_v7  ;;  %v286_v31 = vld [vmem:[%s1496_s15 + $0x58] sm:$0xff] }
  0x38   : > { %802 = vmatprep.mubr.bf16.mxu0 %v592_v13  ;;  %866 = vmatprep.mubr.bf16.mxu1 %v608_v22  ;;  %v607_v43 = vpack.c.bf16 %v565_v35, %v563_v30  ;;  %v504_v44 = vadd.f32 %v1520_v28, %v428_v36  ;;  %v395_v45 = vmul.f32 %v1514_v25, %v319_v37  ;;  %v351_v46 = vunpack.c.l.bf16 %v297_v12  ;;  %v301_v36 = vld [vmem:[%s1496_s15 + $0xd0] sm:$0xff] }
  0x39   : > { %v538_v47 = vmax.f32 %v474_v38, 0.0  ;;  %v506_v48 = vadd.f32 %v1520_v28, %v430_v40  ;;  %v397_v49 = vmul.f32 %v1514_v25, %v321_v41  ;;  %v353_v50 = vunpack.c.l.bf16 %v298_v17  ;;  %v302_v41 = vld [vmem:[%s1496_s15 + $0xd8] sm:$0xff] }
  0x3a   : > { %v568_v52 = vmax.f32 %v504_v44, 0.0  ;;  %v471_v53 = vadd.f32 %v1518_v27, %v395_v45  ;;  %v427_v54 = vmul.f32 %v1514_v25, %v351_v46  ;;  %v324_v55 = vunpack.c.h.bf16 %v283_v42 }
  0x3b   : > { %v594_v57 = vpack.c.bf16 %v538_v47, %v536_v39  ;;  %v570_v58 = vmax.f32 %v506_v48, 0.0  ;;  %v473_v59 = vadd.f32 %v1518_v27, %v397_v49  ;;  %v429_v60 = vmul.f32 %v1514_v25, %v353_v50 }
  0x3c   : > { %v535_v62 = vmax.f32 %v471_v53, 0.0  ;;  %v503_v63 = vadd.f32 %v1518_v27, %v427_v54  ;;  %v326_v0 = vunpack.c.h.bf16 %v284_v51  ;;  %v400_v1 = vmul.f32 %v1516_v26, %v324_v55 }
  0x3d   : > { %v610_v2 = vpack.c.bf16 %v570_v58, %v568_v52  ;;  %v537_v3 = vmax.f32 %v473_v59, 0.0  ;;  %v505_v4 = vadd.f32 %v1518_v27, %v429_v60  ;;  %v356_v5 = vunpack.c.h.bf16 %v299_v56 }
  0x3e   : > { %v567_v6 = vmax.f32 %v503_v63, 0.0  ;;  %v402_v7 = vmul.f32 %v1516_v26, %v326_v0  ;;  %v476_v8 = vadd.f32 %v1520_v28, %v400_v1  ;;  %v358_v9 = vunpack.c.h.bf16 %v300_v61 }
  0x3f   : > { %803 = vmatmul.mubr.bf16.gmra.mrb[8].mxu0 %v591_v34  ;;  %867 = vmatmul.mubr.bf16.gmra.mrb[8].mxu1 %v607_v43  ;;  %v593_v10 = vpack.c.bf16 %v537_v3, %v535_v62  ;;  %v569_v11 = vmax.f32 %v505_v4, 0.0  ;;  %v432_v12 = vmul.f32 %v1516_v26, %v356_v5  ;;  %v323_v13 = vunpack.c.l.bf16 %v283_v42  ;;  %v287_v62 = vld [vmem:[%s1496_s15 + $0x60] sm:$0xff] }
  0x40   : > { %810 = vmatprep.mubr.bf16.mxu0 %v594_v57  ;;  %874 = vmatprep.mubr.bf16.mxu1 %v610_v2  ;;  %v478_v14 = vadd.f32 %v1520_v28, %v402_v7  ;;  %v540_v15 = vmax.f32 %v476_v8, 0.0  ;;  %v434_v16 = vmul.f32 %v1516_v26, %v358_v9  ;;  %v325_v17 = vunpack.c.l.bf16 %v284_v51  ;;  %v288_v7 = vld [vmem:[%s1496_s15 + $0x68] sm:$0xff] }
  0x41   : > { %v609_v19 = vpack.c.bf16 %v569_v11, %v567_v6  ;;  %v508_v20 = vadd.f32 %v1520_v28, %v432_v12  ;;  %v399_v21 = vmul.f32 %v1514_v25, %v323_v13  ;;  %v355_v22 = vunpack.c.l.bf16 %v299_v56  ;;  %v303_v12 = vld [vmem:[%s1496_s15 + $0xe0] sm:$0xff] }
  0x42   : > { %v542_v23 = vmax.f32 %v478_v14, 0.0  ;;  %v510_v24 = vadd.f32 %v1520_v28, %v434_v16  ;;  %v401_v29 = vmul.f32 %v1514_v25, %v325_v17  ;;  %v357_v30 = vunpack.c.l.bf16 %v300_v61  ;;  %v304_v17 = vld [vmem:[%s1496_s15 + $0xe8] sm:$0xff] }
  0x43   : > { %v572_v32 = vmax.f32 %v508_v20, 0.0  ;;  %v475_v33 = vadd.f32 %v1518_v27, %v399_v21  ;;  %v431_v34 = vmul.f32 %v1514_v25, %v355_v22  ;;  %v328_v35 = vunpack.c.h.bf16 %v285_v18 }
  0x44   : > { %v596_v37 = vpack.c.bf16 %v542_v23, %v540_v15  ;;  %v574_v38 = vmax.f32 %v510_v24, 0.0  ;;  %v477_v39 = vadd.f32 %v1518_v27, %v401_v29  ;;  %v433_v40 = vmul.f32 %v1514_v25, %v357_v30 }
  0x45   : > { %v539_v42 = vmax.f32 %v475_v33, 0.0  ;;  %v507_v43 = vadd.f32 %v1518_v27, %v431_v34  ;;  %v330_v44 = vunpack.c.h.bf16 %v286_v31  ;;  %v404_v45 = vmul.f32 %v1516_v26, %v328_v35 }
  0x46   : > { %v612_v46 = vpack.c.bf16 %v574_v38, %v572_v32  ;;  %v541_v47 = vmax.f32 %v477_v39, 0.0  ;;  %v509_v48 = vadd.f32 %v1518_v27, %v433_v40  ;;  %v360_v49 = vunpack.c.h.bf16 %v301_v36 }
  0x47   : > { %811 = vmatmul.mubr.bf16.gmra.mrb[12].mxu0 %v593_v10  ;;  %875 = vmatmul.mubr.bf16.gmra.mrb[12].mxu1 %v609_v19  ;;  %v571_v50 = vmax.f32 %v507_v43, 0.0  ;;  %v406_v51 = vmul.f32 %v1516_v26, %v330_v44  ;;  %v480_v52 = vadd.f32 %v1520_v28, %v404_v45  ;;  %v362_v53 = vunpack.c.h.bf16 %v302_v41 }
  0x48   : > { %818 = vmatprep.mubr.bf16.mxu0 %v596_v37  ;;  %882 = vmatprep.mubr.bf16.mxu1 %v612_v46  ;;  %v595_v54 = vpack.c.bf16 %v541_v47, %v539_v42  ;;  %v573_v55 = vmax.f32 %v509_v48, 0.0  ;;  %v436_v56 = vmul.f32 %v1516_v26, %v360_v49  ;;  %v327_v57 = vunpack.c.l.bf16 %v285_v18  ;;  %v289_v42 = vld [vmem:[%s1496_s15 + $0x70] sm:$0xff] }
  0x49   : > { %v482_v58 = vadd.f32 %v1520_v28, %v406_v51  ;;  %v544_v59 = vmax.f32 %v480_v52, 0.0  ;;  %v438_v60 = vmul.f32 %v1516_v26, %v362_v53  ;;  %v329_v61 = vunpack.c.l.bf16 %v286_v31  ;;  %v290_v51 = vld [vmem:[%s1496_s15 + $0x78] sm:$0xff] }
  0x4a   : > { %v611_v63 = vpack.c.bf16 %v573_v55, %v571_v50  ;;  %v512_v0 = vadd.f32 %v1520_v28, %v436_v56  ;;  %v403_v1 = vmul.f32 %v1514_v25, %v327_v57  ;;  %v359_v2 = vunpack.c.l.bf16 %v301_v36  ;;  %v305_v56 = vld [vmem:[%s1496_s15 + $0xf0] sm:$0xff] }
  0x4b   : > { %v546_v3 = vmax.f32 %v482_v58, 0.0  ;;  %v514_v4 = vadd.f32 %v1520_v28, %v438_v60  ;;  %v405_v5 = vmul.f32 %v1514_v25, %v329_v61  ;;  %v361_v6 = vunpack.c.l.bf16 %v302_v41  ;;  %v306_v61 = vld [vmem:[%s1496_s15 + $0xf8] sm:$0xff]  ;;  %s256_s15 = sand.u32 1, %s1359_s19  }
  0x4c   : > { %v576_v8 = vmax.f32 %v512_v0, 0.0  ;;  %v479_v9 = vadd.f32 %v1518_v27, %v403_v1  ;;  %v435_v10 = vmul.f32 %v1514_v25, %v359_v2  ;;  %v332_v11 = vunpack.c.h.bf16 %v287_v62  ;;  %s1068_s25 = sshll.u32 %s256_s15, 8  ;;  %s1782_s21 = scalar_lea.sflag [#allocation3], %s256_s15 }
  0x4d   : > { %v598_v13 = vpack.c.bf16 %v546_v3, %v544_v59  ;;  %v578_v14 = vmax.f32 %v514_v4, 0.0  ;;  %v481_v15 = vadd.f32 %v1518_v27, %v405_v5  ;;  %v437_v16 = vmul.f32 %v1514_v25, %v361_v6  ;;  %s1707_s7 = scalar_lea.vmem [#allocation2], %s1068_s25 }
  0x4e   : > { %v543_v18 = vmax.f32 %v479_v9, 0.0  ;;  %v511_v19 = vadd.f32 %v1518_v27, %v435_v10  ;;  %v334_v20 = vunpack.c.h.bf16 %v288_v7  ;;  %v408_v21 = vmul.f32 %v1516_v26, %v332_v11  ;;  %s962_s10 = sshll.u32 %s1707_s7, 4  ;;  %s1774_s10 = int_to_ptr.vmem [resolvable:$true] %s962_s10 }
  0x4f   : > { %819 = vmatmul.mubr.bf16.gmra.mrb[16].mxu0 %v595_v54  ;;  %883 = vmatmul.mubr.bf16.gmra.mrb[16].mxu1 %v611_v63  ;;  %v614_v22 = vpack.c.bf16 %v578_v14, %v576_v8  ;;  %v545_v23 = vmax.f32 %v481_v15, 0.0  ;;  %v513_v24 = vadd.f32 %v1518_v27, %v437_v16  ;;  %v364_v29 = vunpack.c.h.bf16 %v303_v12  ;;  %s1297_s14 = scalar_lea.vmem %s1774_s10, 4096  ;;  %p1304_p1 = scmp.lt.s32.totalorder %s1774_s10, %s1302_s16 }
  0x50   : > { %826 = vmatprep.mubr.bf16.mxu0 %v598_v13  ;;  %v575_v30 = vmax.f32 %v511_v19, 0.0  ;;  %v410_v31 = vmul.f32 %v1516_v26, %v334_v20  ;;  %v484_v32 = vadd.f32 %v1520_v28, %v408_v21  ;;  %v366_v33 = vunpack.c.h.bf16 %v304_v17  ;;  %p1298_p12 = scmp.ne.s32.totalorder %s1774_s10, %s1297_s14  ;;  %p1305_p2 = scmp.lt.s32.totalorder %s1303_s17, %s1297_s14 }
  0x51   : > { %890 = vmatprep.mubr.bf16.mxu1 %v614_v22  ;;  %v597_v34 = vpack.c.bf16 %v545_v23, %v543_v18  ;;  %v577_v35 = vmax.f32 %v513_v24, 0.0  ;;  %v440_v36 = vmul.f32 %v1516_v26, %v364_v29  ;;  %v331_v37 = vunpack.c.l.bf16 %v287_v62 }
  0x52   : > { %v486_v38 = vadd.f32 %v1520_v28, %v410_v31  ;;  %v548_v39 = vmax.f32 %v484_v32, 0.0  ;;  %v442_v40 = vmul.f32 %v1516_v26, %v366_v33  ;;  %v333_v41 = vunpack.c.l.bf16 %v288_v7  ;;  %p1299_p13 = pnand %p1298_p12, %p1450_p4  ;;  %p1306_p3 = por %p1305_p2, %p1304_p1 }
  0x53   : > { %v613_v43 = vpack.c.bf16 %v577_v35, %v575_v30  ;;  %v516_v44 = vadd.f32 %v1520_v28, %v440_v36  ;;  %v407_v45 = vmul.f32 %v1514_v25, %v331_v37  ;;  %v363_v46 = vunpack.c.l.bf16 %v303_v12 }
  0x54   : > { %v550_v47 = vmax.f32 %v486_v38, 0.0  ;;  %v518_v48 = vadd.f32 %v1520_v28, %v442_v40  ;;  %v409_v49 = vmul.f32 %v1514_v25, %v333_v41  ;;  %v365_v50 = vunpack.c.l.bf16 %v304_v17  ;;  %p1300_p0 = pneg %p1299_p13 }
  0x55   : > { %v580_v52 = vmax.f32 %v516_v44, 0.0  ;;  %v483_v53 = vadd.f32 %v1518_v27, %v407_v45  ;;  %v439_v54 = vmul.f32 %v1514_v25, %v363_v46  ;;  %v336_v55 = vunpack.c.h.bf16 %v289_v42 }
  0x56   : > { %v600_v57 = vpack.c.bf16 %v550_v47, %v548_v39  ;;  %v582_v58 = vmax.f32 %v518_v48, 0.0  ;;  %v485_v59 = vadd.f32 %v1518_v27, %v409_v49  ;;  %v441_v60 = vmul.f32 %v1514_v25, %v365_v50  ;;  %p1307_p5 = pnand %p1306_p3, %p1300_p0 }
  0x57   : > { %827 = vmatmul.mubr.bf16.gmra.mrb[20].mxu0 %v597_v34  ;;  %891 = vmatmul.mubr.bf16.gmra.mrb[20].mxu1 %v613_v43  ;;  %v547_v62 = vmax.f32 %v483_v53, 0.0  ;;  %v515_v63 = vadd.f32 %v1518_v27, %v439_v54  ;;  %v338_v0 = vunpack.c.h.bf16 %v290_v51  ;;  %v412_v1 = vmul.f32 %v1516_v26, %v336_v55 }
  0x58   : > { %834 = vmatprep.mubr.bf16.mxu0 %v600_v57  ;;  %v616_v2 = vpack.c.bf16 %v582_v58, %v580_v52  ;;  %v549_v3 = vmax.f32 %v485_v59, 0.0  ;;  %v517_v4 = vadd.f32 %v1518_v27, %v441_v60  ;;  %v368_v5 = vunpack.c.h.bf16 %v305_v56 }
  0x59   : > { %v579_v6 = vmax.f32 %v515_v63, 0.0  ;;  %v414_v7 = vmul.f32 %v1516_v26, %v338_v0  ;;  %v488_v8 = vadd.f32 %v1520_v28, %v412_v1  ;;  %v370_v9 = vunpack.c.h.bf16 %v306_v61 }
  0x5a   : > { %898 = vmatprep.mubr.bf16.mxu1 %v616_v2  ;;  %v599_v10 = vpack.c.bf16 %v549_v3, %v547_v62  ;;  %v581_v11 = vmax.f32 %v517_v4, 0.0  ;;  %v444_v12 = vmul.f32 %v1516_v26, %v368_v5  ;;  %v335_v13 = vunpack.c.l.bf16 %v289_v42 }
  0x5b   : > { %v490_v14 = vadd.f32 %v1520_v28, %v414_v7  ;;  %v552_v15 = vmax.f32 %v488_v8, 0.0  ;;  %v446_v16 = vmul.f32 %v1516_v26, %v370_v9  ;;  %v337_v17 = vunpack.c.l.bf16 %v290_v51 }
  0x5c   : > { %v615_v18 = vpack.c.bf16 %v581_v11, %v579_v6  ;;  %v520_v19 = vadd.f32 %v1520_v28, %v444_v12  ;;  %v411_v20 = vmul.f32 %v1514_v25, %v335_v13  ;;  %v367_v21 = vunpack.c.l.bf16 %v305_v56 }
  0x5d   : > { %v554_v22 = vmax.f32 %v490_v14, 0.0  ;;  %v522_v23 = vadd.f32 %v1520_v28, %v446_v16  ;;  %v413_v24 = vmul.f32 %v1514_v25, %v337_v17  ;;  %v369_v29 = vunpack.c.l.bf16 %v306_v61 }
  0x5e   : > { %v584_v30 = vmax.f32 %v520_v19, 0.0  ;;  %v487_v31 = vadd.f32 %v1518_v27, %v411_v20  ;;  %v443_v26 = vmul.f32 %v1514_v25, %v367_v21 }
  0x5f   : > { %835 = vmatmul.mubr.bf16.gmra.mrb[24].mxu0 %v599_v10  ;;  %899 = vmatmul.mubr.bf16.gmra.mrb[24].mxu1 %v615_v18  ;;  %v602_v32 = vpack.c.bf16 %v554_v22, %v552_v15  ;;  %v586_v33 = vmax.f32 %v522_v23, 0.0  ;;  %v489_v34 = vadd.f32 %v1518_v27, %v413_v24  ;;  %v445_v35 = vmul.f32 %v1514_v25, %v369_v29  ;;  %v1703_v25 = vld [vmem:[%s1832_s4] ss:$0 sm:$0xff] }
  0x60   : > { %v551_v36 = vmax.f32 %v487_v31, 0.0  ;;  %v519_v28 = vadd.f32 %v1518_v27, %v443_v26 }
  0x61   : > { %842 = vmatprep.mubr.bf16.mxu0 %v602_v32  ;;  %v618_v37 = vpack.c.bf16 %v586_v33, %v584_v30  ;;  %v553_v38 = vmax.f32 %v489_v34, 0.0  ;;  %v521_v39 = vadd.f32 %v1518_v27, %v445_v35 }
  0x62   : > { %v583_v40 = vmax.f32 %v519_v28, 0.0 }
  0x63   : > { %906 = vmatprep.mubr.bf16.mxu1 %v618_v37  ;;  %v601_v41 = vpack.c.bf16 %v553_v38, %v551_v36  ;;  %v585_v42 = vmax.f32 %v521_v39, 0.0 }
  0x65   : > { %v617_v43 = vpack.c.bf16 %v585_v42, %v583_v40 }
  0x67   : > { %843 = vmatmul.mubr.bf16.gmra.mrb[28].mxu0 %v601_v41  ;;  %907 = vmatmul.mubr.bf16.gmra.mrb[28].mxu1 %v617_v43 }
 0x102   : > { %v1112_v44 = vpop.f32.mrb[0].mxu0  ;;  %v1160_v45 = vpop.f32.mrb[0].mxu1 }
 0x103   : > { %v1113_v46 = vpop.f32.mrb[1].mxu0  ;;  %v1161_v47 = vpop.f32.mrb[1].mxu1 }
 0x104   : > { %v1114_v27 = vadd.f32 %v1113_v46, %v1112_v44  ;;  %v1162_v48 = vadd.f32 %v1161_v47, %v1160_v45  ;;  %v1115_v49 = vpop.f32.mrb[2].mxu0  ;;  %v1163_v50 = vpop.f32.mrb[2].mxu1 }
 0x105   : > { %v1116_v51 = vpop.f32.mrb[3].mxu0  ;;  %v1164_v52 = vpop.f32.mrb[3].mxu1 }
 0x106   : > { %v789_v53 = vadd.f32 %v1114_v27, %v1703_v25  ;;  %v853_v54 = vadd.f32 %v1162_v48, %v1703_v25  ;;  %v1117_v55 = vadd.f32 %v1116_v51, %v1115_v49  ;;  %v1165_v56 = vadd.f32 %v1164_v52, %v1163_v50 }
 0x108   : > { %915 = vst [vmem:[%s1707_s7] sm:$0xff] %v789_v53  ;;  %931 = vst [vmem:[%s1707_s7 + $0x80] sm:$0xff] %v853_v54  ;;  %v792_v57 = vadd.f32 %v1117_v55, %v1703_v25  ;;  %v856_v58 = vadd.f32 %v1165_v56, %v1703_v25 }
 0x10a   : > { %916 = vst [vmem:[%s1707_s7 + $0x8] sm:$0xff] %v792_v57  ;;  %932 = vst [vmem:[%s1707_s7 + $0x88] sm:$0xff] %v856_v58  ;;  %v1118_v59 = vpop.f32.mrb[4].mxu0  ;;  %v1166_v60 = vpop.f32.mrb[4].mxu1 }
 0x10b   : > { %v1119_v61 = vpop.f32.mrb[5].mxu0  ;;  %v1167_v62 = vpop.f32.mrb[5].mxu1 }
 0x10c   : > { %v1120_v63 = vadd.f32 %v1119_v61, %v1118_v59  ;;  %v1168_v0 = vadd.f32 %v1167_v62, %v1166_v60  ;;  %v1121_v1 = vpop.f32.mrb[6].mxu0  ;;  %v1169_v2 = vpop.f32.mrb[6].mxu1 }
 0x10d   : > { %v1122_v3 = vpop.f32.mrb[7].mxu0  ;;  %v1170_v4 = vpop.f32.mrb[7].mxu1 }
 0x10e   : > { %v797_v5 = vadd.f32 %v1120_v63, %v1703_v25  ;;  %v861_v6 = vadd.f32 %v1168_v0, %v1703_v25  ;;  %v1123_v7 = vadd.f32 %v1122_v3, %v1121_v1  ;;  %v1171_v8 = vadd.f32 %v1170_v4, %v1169_v2 }
 0x110   : > { %917 = vst [vmem:[%s1707_s7 + $0x10] sm:$0xff] %v797_v5  ;;  %933 = vst [vmem:[%s1707_s7 + $0x90] sm:$0xff] %v861_v6  ;;  %v800_v9 = vadd.f32 %v1123_v7, %v1703_v25  ;;  %v864_v10 = vadd.f32 %v1171_v8, %v1703_v25 }
 0x112   : > { %918 = vst [vmem:[%s1707_s7 + $0x18] sm:$0xff] %v800_v9  ;;  %934 = vst [vmem:[%s1707_s7 + $0x98] sm:$0xff] %v864_v10  ;;  %v1124_v11 = vpop.f32.mrb[8].mxu0  ;;  %v1172_v12 = vpop.f32.mrb[8].mxu1 }
 0x113   : > { %v1125_v13 = vpop.f32.mrb[9].mxu0  ;;  %v1173_v14 = vpop.f32.mrb[9].mxu1 }
 0x114   : > { %v1126_v15 = vadd.f32 %v1125_v13, %v1124_v11  ;;  %v1174_v16 = vadd.f32 %v1173_v14, %v1172_v12  ;;  %v1127_v17 = vpop.f32.mrb[10].mxu0  ;;  %v1175_v18 = vpop.f32.mrb[10].mxu1 }
 0x115   : > { %v1128_v19 = vpop.f32.mrb[11].mxu0  ;;  %v1176_v20 = vpop.f32.mrb[11].mxu1 }
 0x116   : > { %v805_v21 = vadd.f32 %v1126_v15, %v1703_v25  ;;  %v869_v22 = vadd.f32 %v1174_v16, %v1703_v25  ;;  %v1129_v23 = vadd.f32 %v1128_v19, %v1127_v17  ;;  %v1177_v24 = vadd.f32 %v1176_v20, %v1175_v18 }
 0x118   : > { %919 = vst [vmem:[%s1707_s7 + $0x20] sm:$0xff] %v805_v21  ;;  %935 = vst [vmem:[%s1707_s7 + $0xa0] sm:$0xff] %v869_v22  ;;  %v808_v29 = vadd.f32 %v1129_v23, %v1703_v25  ;;  %v872_v30 = vadd.f32 %v1177_v24, %v1703_v25 }
 0x11a   : > { %920 = vst [vmem:[%s1707_s7 + $0x28] sm:$0xff] %v808_v29  ;;  %936 = vst [vmem:[%s1707_s7 + $0xa8] sm:$0xff] %v872_v30  ;;  %v1130_v31 = vpop.f32.mrb[12].mxu0  ;;  %v1178_v26 = vpop.f32.mrb[12].mxu1 }
 0x11b   : > { %v1131_v32 = vpop.f32.mrb[13].mxu0  ;;  %v1179_v34 = vpop.f32.mrb[13].mxu1 }
 0x11c   : > { %v1132_v33 = vadd.f32 %v1131_v32, %v1130_v31  ;;  %v1133_v35 = vpop.f32.mrb[14].mxu0  ;;  %v1180_v36 = vadd.f32 %v1179_v34, %v1178_v26  ;;  %v1181_v28 = vpop.f32.mrb[14].mxu1 }
 0x11d   : > { %v1134_v37 = vpop.f32.mrb[15].mxu0  ;;  %v1182_v40 = vpop.f32.mrb[15].mxu1 }
 0x11e   : > { %v813_v38 = vadd.f32 %v1132_v33, %v1703_v25  ;;  %v1135_v39 = vadd.f32 %v1134_v37, %v1133_v35  ;;  %v877_v41 = vadd.f32 %v1180_v36, %v1703_v25  ;;  %v1183_v42 = vadd.f32 %v1182_v40, %v1181_v28 }
 0x120   : > { %921 = vst [vmem:[%s1707_s7 + $0x30] sm:$0xff] %v813_v38  ;;  %v816_v43 = vadd.f32 %v1135_v39, %v1703_v25  ;;  %937 = vst [vmem:[%s1707_s7 + $0xb0] sm:$0xff] %v877_v41  ;;  %v880_v44 = vadd.f32 %v1183_v42, %v1703_v25 }
 0x122   : > { %922 = vst [vmem:[%s1707_s7 + $0x38] sm:$0xff] %v816_v43  ;;  %v1136_v45 = vpop.f32.mrb[16].mxu0  ;;  %938 = vst [vmem:[%s1707_s7 + $0xb8] sm:$0xff] %v880_v44  ;;  %v1184_v47 = vpop.f32.mrb[16].mxu1 }
 0x123   : > { %v1137_v46 = vpop.f32.mrb[17].mxu0  ;;  %v1185_v49 = vpop.f32.mrb[17].mxu1 }
 0x124   : > { %v1138_v27 = vadd.f32 %v1137_v46, %v1136_v45  ;;  %v1139_v48 = vpop.f32.mrb[18].mxu0  ;;  %v1186_v52 = vadd.f32 %v1185_v49, %v1184_v47  ;;  %v1187_v53 = vpop.f32.mrb[18].mxu1 }
 0x125   : > { %v1140_v50 = vpop.f32.mrb[19].mxu0  ;;  %v1188_v55 = vpop.f32.mrb[19].mxu1 }
 0x126   : > { %v821_v51 = vadd.f32 %v1138_v27, %v1703_v25  ;;  %v1141_v54 = vadd.f32 %v1140_v50, %v1139_v48  ;;  %v885_v56 = vadd.f32 %v1186_v52, %v1703_v25  ;;  %v1189_v58 = vadd.f32 %v1188_v55, %v1187_v53 }
 0x128   : > { %923 = vst [vmem:[%s1707_s7 + $0x40] sm:$0xff] %v821_v51  ;;  %v824_v57 = vadd.f32 %v1141_v54, %v1703_v25  ;;  %939 = vst [vmem:[%s1707_s7 + $0xc0] sm:$0xff] %v885_v56  ;;  %v888_v59 = vadd.f32 %v1189_v58, %v1703_v25 }
 0x12a   : > { %924 = vst [vmem:[%s1707_s7 + $0x48] sm:$0xff] %v824_v57  ;;  %v1142_v60 = vpop.f32.mrb[20].mxu0  ;;  %940 = vst [vmem:[%s1707_s7 + $0xc8] sm:$0xff] %v888_v59  ;;  %v1190_v62 = vpop.f32.mrb[20].mxu1 }
 0x12b   : > { %v1143_v61 = vpop.f32.mrb[21].mxu0  ;;  %v1191_v1 = vpop.f32.mrb[21].mxu1 }
 0x12c   : > { %v1144_v63 = vadd.f32 %v1143_v61, %v1142_v60  ;;  %v1145_v0 = vpop.f32.mrb[22].mxu0  ;;  %v1192_v4 = vadd.f32 %v1191_v1, %v1190_v62  ;;  %v1193_v5 = vpop.f32.mrb[22].mxu1 }
 0x12d   : > { %v1146_v2 = vpop.f32.mrb[23].mxu0  ;;  %v1194_v7 = vpop.f32.mrb[23].mxu1 }
 0x12e   : > { %v829_v3 = vadd.f32 %v1144_v63, %v1703_v25  ;;  %v1147_v6 = vadd.f32 %v1146_v2, %v1145_v0  ;;  %v893_v8 = vadd.f32 %v1192_v4, %v1703_v25  ;;  %v1195_v10 = vadd.f32 %v1194_v7, %v1193_v5 }
 0x130   : > { %925 = vst [vmem:[%s1707_s7 + $0x50] sm:$0xff] %v829_v3  ;;  %v832_v9 = vadd.f32 %v1147_v6, %v1703_v25  ;;  %941 = vst [vmem:[%s1707_s7 + $0xd0] sm:$0xff] %v893_v8  ;;  %v896_v11 = vadd.f32 %v1195_v10, %v1703_v25 }
 0x132   : > { %926 = vst [vmem:[%s1707_s7 + $0x58] sm:$0xff] %v832_v9  ;;  %v1148_v12 = vpop.f32.mrb[24].mxu0  ;;  %942 = vst [vmem:[%s1707_s7 + $0xd8] sm:$0xff] %v896_v11  ;;  %v1196_v14 = vpop.f32.mrb[24].mxu1 }
 0x133   : > { %v1149_v13 = vpop.f32.mrb[25].mxu0  ;;  %v1197_v17 = vpop.f32.mrb[25].mxu1 }
 0x134   : > { %v1150_v15 = vadd.f32 %v1149_v13, %v1148_v12  ;;  %v1151_v16 = vpop.f32.mrb[26].mxu0  ;;  %v1198_v20 = vadd.f32 %v1197_v17, %v1196_v14  ;;  %v1199_v21 = vpop.f32.mrb[26].mxu1 }
 0x135   : > { %v1152_v18 = vpop.f32.mrb[27].mxu0  ;;  %v1200_v23 = vpop.f32.mrb[27].mxu1 }
 0x136   : > { %v837_v19 = vadd.f32 %v1150_v15, %v1703_v25  ;;  %v1153_v22 = vadd.f32 %v1152_v18, %v1151_v16  ;;  %v901_v24 = vadd.f32 %v1198_v20, %v1703_v25  ;;  %v1201_v30 = vadd.f32 %v1200_v23, %v1199_v21 }
 0x138   : > { %927 = vst [vmem:[%s1707_s7 + $0x60] sm:$0xff] %v837_v19  ;;  %v840_v29 = vadd.f32 %v1153_v22, %v1703_v25  ;;  %943 = vst [vmem:[%s1707_s7 + $0xe0] sm:$0xff] %v901_v24  ;;  %v904_v31 = vadd.f32 %v1201_v30, %v1703_v25 }
 0x13a   : > { %928 = vst [vmem:[%s1707_s7 + $0x68] sm:$0xff] %v840_v29  ;;  %v1154_v26 = vpop.f32.mrb[28].mxu0  ;;  %944 = vst [vmem:[%s1707_s7 + $0xe8] sm:$0xff] %v904_v31  ;;  %v1202_v33 = vpop.f32.mrb[28].mxu1 }
 0x13b   : > { %v1155_v32 = vpop.f32.mrb[29].mxu0  ;;  %v1203_v36 = vpop.f32.mrb[29].mxu1 }
 0x13c   : > { %v1156_v34 = vadd.f32 %v1155_v32, %v1154_v26  ;;  %v1157_v35 = vpop.f32.mrb[30].mxu0  ;;  %v1204_v38 = vadd.f32 %v1203_v36, %v1202_v33  ;;  %v1205_v39 = vpop.f32.mrb[30].mxu1 }
 0x13d   : > { %v1158_v28 = vpop.f32.mrb[31].mxu0  ;;  %v1206_v41 = vpop.f32.mrb[31].mxu1 }
 0x13e   : > { %v845_v37 = vadd.f32 %v1156_v34, %v1703_v25  ;;  %v1159_v40 = vadd.f32 %v1158_v28, %v1157_v35  ;;  %v909_v42 = vadd.f32 %v1204_v38, %v1703_v25  ;;  %v1207_v44 = vadd.f32 %v1206_v41, %v1205_v39 }
 0x140   : > { %929 = vst [vmem:[%s1707_s7 + $0x70] sm:$0xff] %v845_v37  ;;  %v848_v43 = vadd.f32 %v1159_v40, %v1703_v25  ;;  %945 = vst [vmem:[%s1707_s7 + $0xf0] sm:$0xff] %v909_v42  ;;  %v912_v45 = vadd.f32 %v1207_v44, %v1703_v25 }
 0x142   : > { %930 = vst [vmem:[%s1707_s7 + $0x78] sm:$0xff] %v848_v43  ;;  %946 = vst [vmem:[%s1707_s7 + $0xf8] sm:$0xff] %v912_v45 }
 0x143   : > { %1310 = shalt.err (!%p1307_p5)
}
 0x144   : > { %s1311_s24 = scalar_lea.hbm %s1772_s13, 4096  ;;  %s1315_s27 = scalar_lea.hbm %s1833_s5, 8192 }
 0x145   : > { %p1312_p6 = scmp.ne.s32.totalorder %s1772_s13, %s1311_s24  ;;  %p1316_p10 = scmp.lt.u32.totalorder %s1772_s13, %s1833_s5 }
 0x146   : > { %p1317_p11 = scmp.lt.u32.totalorder %s1315_s27, %s1311_s24  ;;  %p1319_p13 = scmp.lt.u32.totalorder %s1311_s24, %s1772_s13 }
 0x147   : > { %p1313_p7 = pnand %p1312_p6, %p1450_p4 }
 0x148   : > { %p1318_p12 = por %p1317_p11, %p1316_p10 }
 0x149   : > { %p1314_p9 = pneg %p1313_p7 }
 0x14a   : > { %p1320_p0 = por %p1319_p13, %p1318_p12 }
 0x14c   : > { %p1321_p1 = pnand %p1320_p0, %p1314_p9 }
 0x14e   : > { %1324 = shalt.err (!%p1321_p1)
}
 0x14f   : > { %s1378_s8 = smov 128   ;;  %s1379_s11 = smov 8  }
 0x150   : > { %1224 = dma.vmem_to_hbm [thread:$0]  (%p1450_p4), %s1774_s10, 4096, %s1772_s13, %s1782_s21, %s1378_s8, %s1378_s8, %s1379_s11  }
 0x151 PF: > { %p1230_p2 = scmp.ge.s32.totalorder %s1375_s23, 2  ;;  %s977_s12 = sand.u32 1, %s1355_s18  }
 0x152   : > { %s978_s14 = scalar_lea.sflag [#allocation3], %s977_s12 }
 0x153   : > { %p1227_p3 = pnand %p1230_p2, %p1457_p8 }
 0x155   : > { %1350 = dma.done.wait (!%p1227_p3), %s978_s14, 4096  }
 0x156   : > { %1352 = vsyncadd (!%p1227_p3), %s978_s14, 4294963200  ;;  %s18_s23 = sadd.s32 1, %s1375_s23   ;;  %s1836_s18 = smov %s1359_s19 }
 0x157   : > { %p15_p5 = scmp.ge.s32.totalorder %s18_s23, 4   ;;  %s1837_s19 = smov %s1363_s20 }
 0x158   : > { %s1838_s20 = smov %s1463_s6  ;;  %s1839_s21 = smov %s1371_s22 }
 0x159   : > { %s1840_s22 = smov %s1842_s26  ;;  %17 = sbr.rel (!%p15_p5) target bundleno = 4 (0x4), region = 81 }
 0x160   :  { %983 = vsyncpa [#allocation3], 1 }
 0x161   :  { %985 = vsyncpa [#allocation3 + $0x1], 1 }

// kernel: projection_head.4
= control target key start
LH: loop header
LB: loop body
LE: loop exit
PB: predicated region body
PF: predicated region fallthrough
CT: control target
= control target key end

     0   :  { %s1981_s21 = smov 0   ;;  %s1983_s22 = smov 0   ;;  %s2709_s0 = inlined_call_operand.vmem [shape: bf16[512,256], index: 0, kind: input, shape index: {}]   ;;  %s2710_s1 = inlined_call_operand.vmem [shape: f32[1,256], index: 1, kind: input, shape index: {}]   ;;  %s2711_s2 = inlined_call_operand.vmem [shape: f32[1,256], index: 2, kind: input, shape index: {}]   ;;  %s2712_s3 = inlined_call_operand.vmem [shape: bf16[256,256], index: 3, kind: input, shape index: {}]   ;;  %s2713_s4 = inlined_call_operand.vmem [shape: f32[1,256], index: 4, kind: input, shape index: {}]   ;;  %s2714_s5 = inlined_call_operand.vmem [shape: bf16[512,256], index: 5, kind: output, shape index: {0}]   ;;  %s2715_s6 = inlined_call_operand.vmem [shape: f32[2,2,256], index: 6, kind: output, shape index: {1}]  }
   0x1   :  { %s1985_s23 = smov 0  }
   0x2 LB: > { %s26_s24 = sadd.s32 1, %s1940_s22  ;;  %p1707_p0 = scmp.ge.s32.totalorder %s1944_s23, 1  ;;  %s1944_s23 = sphi %s1985_s23, %s17_s23   ;;  %s1940_s22 = sphi %s1983_s22, %s2717_s22   ;;  %s1936_s21 = sphi %s1981_s21, %s2716_s21  }
   0x3   : > { %p27_p1 = scmp.ge.s32.totalorder %s26_s24, 2  ;;  %p254_p2 = scmp.lt.s32.totalorder %s1944_s23, 3 }
   0x5   : > { %s2719_s24 = smov (%p27_p1, %s26_s24), 0  ;;  %p255_p3 = pnand %p1707_p0, %p254_p2 }
   0x6   : > { %v1874_v0 = vld [vmem:[%s2712_s3 + $0x4] ss:$8 sps:$4 sm:$0xff] (!%p255_p3)   ;;  %v1876_v1 = vld [vmem:[%s2712_s3] ss:$8 sps:$4 sm:$0xff] (!%p255_p3)   ;;  %v1877_v2 = vld [vmem:[%s2712_s3 + $0x14] ss:$8 sps:$4 sm:$0xff] (!%p255_p3)   ;;  %v446_v8 = vlaneseq (!%p255_p3) }
   0x7   : > { %258 = sbr.rel (%p255_p3) target bundleno = 396 (0x18c), region = 40  ;;  %896 = vmatprep.subr.bf16.mxu0 (!%p255_p3), %v1874_v0  ;;  %1818 = vmatprep.subr.bf16.mxu1 (!%p255_p3), %v1874_v0  ;;  %v1879_v3 = vld [vmem:[%s2712_s3 + $0x10] ss:$8 sps:$4 sm:$0xff] (!%p255_p3)   ;;  %v1880_v4 = vld [vmem:[%s2712_s3 + $0x24] ss:$8 sps:$4 sm:$0xff] (!%p255_p3)   ;;  %s1708_s11 = sshll.u32 (!%p255_p3), %s1936_s21, 5 }
   0x8   : > { %897 = vmatpush1.bf16.msra.mxu0 (!%p255_p3), %v1876_v1  ;;  %1834 = vmatpush1.bf16.msra.mxu1 (!%p255_p3), %v1876_v1  ;;  %v1882_v5 = vld [vmem:[%s2712_s3 + $0x20] ss:$8 sps:$4 sm:$0xff] (!%p255_p3)   ;;  %p309_p4 = scmp.lt.s32.totalorder (!%p255_p3), %s1708_s11, 63  ;;  %v1883_v6 = vld [vmem:[%s2712_s3 + $0x34] ss:$8 sps:$4 sm:$0xff] (!%p255_p3)   ;;  %v447_v11 = vshrl.u32 (!%p255_p3), %v446_v8, 7 }
   0x9   : > { %898 = vmatprep.subr.bf16.mxu0 (!%p255_p3), %v1877_v2  ;;  %1819 = vmatprep.subr.bf16.mxu1 (!%p255_p3), %v1877_v2  ;;  %v1885_v7 = vld [vmem:[%s2712_s3 + $0x30] ss:$8 sps:$4 sm:$0xff] (!%p255_p3)   ;;  %v1886_v9 = vld [vmem:[%s2712_s3 + $0x44] ss:$8 sps:$4 sm:$0xff] (!%p255_p3)   ;;  %v1888_v10 = vld [vmem:[%s2712_s3 + $0x40] ss:$8 sps:$4 sm:$0xff] (!%p255_p3)  }
   0xa   : > { %v1889_v12 = vld [vmem:[%s2712_s3 + $0x54] ss:$8 sps:$4 sm:$0xff] (!%p255_p3)   ;;  %v1891_v13 = vld [vmem:[%s2712_s3 + $0x50] ss:$8 sps:$4 sm:$0xff] (!%p255_p3)   ;;  %v2048_v14 = vsub.s32 (!%p255_p3), 1, %v447_v11  ;;  %v2083_v34 = vsub.s32 (!%p255_p3), 0, %v447_v11 }
   0xb   : > { %v1892_v15 = vld [vmem:[%s2712_s3 + $0x64] ss:$8 sps:$4 sm:$0xff] (!%p255_p3)   ;;  %v444_v20 = vld [vmem:[%s2710_s1] sm:$0x3] (!%p255_p3)  ;;  %v1895_v24 = vld [vmem:[%s2712_s3 + $0x74] ss:$8 sps:$4 sm:$0xff] (!%p255_p3)  }
   0xc   : > { %899 = vmatpush1.bf16.msra.mxu0 (!%p255_p3), %v1879_v3  ;;  %1835 = vmatpush1.bf16.msra.mxu1 (!%p255_p3), %v1879_v3  ;;  %v520_v21 = vld [vmem:[%s2711_s2] sm:$0x3] (!%p255_p3)  ;;  %v2065_v23 = vrot.slane (!%p255_p3), %v444_v20, %v2048_v14  ;;  %v1897_v28 = vld [vmem:[%s2712_s3 + $0x70] ss:$8 sps:$4 sm:$0xff] (!%p255_p3)   ;;  %v1898_v31 = vld [vmem:[%s2712_s3 + $0x84] ss:$8 sps:$4 sm:$0xff] (!%p255_p3)   ;;  %v2094_v41 = vrot.slane (!%p255_p3), %v444_v20, %v2083_v34 }
   0xd   : > { %900 = vmatprep.subr.bf16.mxu0 (!%p255_p3), %v1880_v4  ;;  %1820 = vmatprep.subr.bf16.mxu1 (!%p255_p3), %v1880_v4  ;;  %v1894_v22 = vld [vmem:[%s2712_s3 + $0x60] ss:$8 sps:$4 sm:$0xff] (!%p255_p3)   ;;  %v2071_v25 = vrot.slane (!%p255_p3), %v520_v21, %v2048_v14  ;;  %v1901_v37 = vld [vmem:[%s2712_s3 + $0x94] ss:$8 sps:$4 sm:$0xff] (!%p255_p3)   ;;  %v1903_v42 = vld [vmem:[%s2712_s3 + $0x90] ss:$8 sps:$4 sm:$0xff] (!%p255_p3)   ;;  %v2109_v51 = vrot.slane (!%p255_p3), %v520_v21, %v2083_v34 }
   0xe   : > { %s2721_s11 = smov (!%p309_p4, %s1708_s11), 63  ;;  %v1900_v35 = vld [vmem:[%s2712_s3 + $0x80] ss:$8 sps:$4 sm:$0xff]   ;;  %v1904_v45 = vld [vmem:[%s2712_s3 + $0xa4] ss:$8 sps:$4 sm:$0xff]   ;;  %p339_p5 = scmp.lt.s32.totalorder %s1936_s21, 1 }
   0xf   : > { %s1783_s26 = sshll.u32 %s2721_s11, 3  ;;  %v1906_v55 = vld [vmem:[%s2712_s3 + $0xa0] ss:$8 sps:$4 sm:$0xff]   ;;  %v1907_v59 = vld [vmem:[%s2712_s3 + $0xb4] ss:$8 sps:$4 sm:$0xff]   ;;  %vm1301_vm0 = vcmask 1040384  }
  0x10   : > { %901 = vmatpush1.bf16.msra.mxu0 %v1882_v5  ;;  %1836 = vmatpush1.bf16.msra.mxu1 %v1882_v5  ;;  %s2043_s7 = scalar_lea.vmem %s2709_s0, %s1783_s26  ;;  %v1909_v5 = vld [vmem:[%s2712_s3 + $0xb0] ss:$8 sps:$4 sm:$0xff]   ;;  %s2413_s29 = scalar_lea.vmem %s2714_s5, %s1783_s26 }
  0x11   : > { %902 = vmatprep.subr.bf16.mxu0 %v1883_v6  ;;  %1821 = vmatprep.subr.bf16.mxu1 %v1883_v6  ;;  %v348_v16 = vld [vmem:[%s2043_s7] sm:$0xff]  ;;  %v349_v17 = vld [vmem:[%s2043_s7 + $0x8] sm:$0xff]  ;;  %v350_v38 = vld [vmem:[%s2043_s7 + $0x10] sm:$0xff]  ;;  %s2723_s21 = smov (!%p339_p5, %s1936_s21), 1 }
  0x12   : > { %v381_v18 = vunpack.c.h.bf16 %v348_v16  ;;  %v383_v19 = vunpack.c.h.bf16 %v349_v17  ;;  %v351_v39 = vld [vmem:[%s2043_s7 + $0x18] sm:$0xff]  ;;  %v380_v40 = vunpack.c.l.bf16 %v348_v16  ;;  %v382_v43 = vunpack.c.l.bf16 %v349_v17  ;;  %v2103_v48 = vld [vmem:[%s2043_s7 + $0x80] sm:$0xff]  ;;  %v2106_v50 = vld [vmem:[%s2043_s7 + $0x88] sm:$0xff]  ;;  %s1785_s11 = sshll.u32 %s2723_s21, 2 }
  0x13   : > { %v385_v44 = vunpack.c.h.bf16 %v350_v38  ;;  %v387_v46 = vunpack.c.h.bf16 %v351_v39  ;;  %v384_v47 = vunpack.c.l.bf16 %v350_v38  ;;  %v386_v49 = vunpack.c.l.bf16 %v351_v39  ;;  %v2113_v53 = vld [vmem:[%s2043_s7 + $0x20] sm:$0xff]  ;;  %v2116_v54 = vld [vmem:[%s2043_s7 + $0x28] sm:$0xff]  ;;  %s346_s8 = scalar_lea.vmem %s2715_s6, %s1785_s11 }
  0x14   : > { %903 = vmatpush1.bf16.msra.mxu0 %v1885_v7  ;;  %1837 = vmatpush1.bf16.msra.mxu1 %v1885_v7  ;;  %v457_v26 = vmul.f32 %v2065_v23, %v381_v18  ;;  %v459_v27 = vmul.f32 %v2065_v23, %v383_v19  ;;  %v456_v52 = vmul.f32 %v2094_v41, %v380_v40  ;;  %v413_v58 = vunpack.c.h.bf16 %v2103_v48  ;;  %v354_v40 = vld [vmem:[%s2043_s7 + $0x30] sm:$0xff] }
  0x15   : > { %904 = vmatprep.subr.bf16.mxu0 %v1886_v9  ;;  %1822 = vmatprep.subr.bf16.mxu1 %v1886_v9  ;;  %v458_v56 = vmul.f32 %v2094_v41, %v382_v43  ;;  %v461_v57 = vmul.f32 %v2065_v23, %v385_v44  ;;  %v463_v60 = vmul.f32 %v2065_v23, %v387_v46  ;;  %v415_v62 = vunpack.c.h.bf16 %v2106_v50  ;;  %v1910_v9 = vld [vmem:[%s2712_s3 + $0xc4] ss:$8 sps:$4 sm:$0xff]  }
  0x16   : > { %v533_v29 = vadd.f32 %v2071_v25, %v457_v26  ;;  %v535_v30 = vadd.f32 %v2071_v25, %v459_v27  ;;  %v460_v61 = vmul.f32 %v2094_v41, %v384_v47  ;;  %v462_v63 = vmul.f32 %v2094_v41, %v386_v49 }
  0x17   : > { %v389_v0 = vunpack.c.h.bf16 %v2113_v53  ;;  %v391_v1 = vunpack.c.h.bf16 %v2116_v54  ;;  %v489_v2 = vmul.f32 %v2065_v23, %v413_v58  ;;  %v532_v3 = vadd.f32 %v2109_v51, %v456_v52 }
  0x18   : > { %905 = vmatpush1.bf16.msra.mxu0 %v1888_v10  ;;  %1838 = vmatpush1.bf16.msra.mxu1 %v1888_v10  ;;  %v597_v32 = vmax.f32 %v533_v29, 0.0  ;;  %v599_v33 = vmax.f32 %v535_v30, 0.0  ;;  %v491_v4 = vmul.f32 %v2065_v23, %v415_v62  ;;  %v534_v6 = vadd.f32 %v2109_v51, %v458_v56  ;;  %v1913_v30 = vld [vmem:[%s2712_s3 + $0xd4] ss:$8 sps:$4 sm:$0xff]  }
  0x19   : > { %906 = vmatprep.subr.bf16.mxu0 %v1889_v12  ;;  %1823 = vmatprep.subr.bf16.mxu1 %v1889_v12  ;;  %v537_v7 = vadd.f32 %v2071_v25, %v461_v57  ;;  %v565_v8 = vadd.f32 %v2071_v25, %v489_v2  ;;  %v539_v10 = vadd.f32 %v2071_v25, %v463_v60  ;;  %v412_v20 = vunpack.c.l.bf16 %v2103_v48  ;;  %v2194_v60 = vld [vmem:[%s2043_s7 + $0xa0] sm:$0xff] }
  0x1a   : > { %v661_v36 = vpack.c.bf16 %v599_v33, %v597_v32  ;;  %v536_v11 = vadd.f32 %v2109_v51, %v460_v61  ;;  %v567_v12 = vadd.f32 %v2071_v25, %v491_v4  ;;  %v538_v16 = vadd.f32 %v2109_v51, %v462_v63  ;;  %v1918_v2 = vld [vmem:[%s2712_s3 + $0xe0] ss:$8 sps:$4 sm:$0xff]  }
  0x1b   : > { %v465_v17 = vmul.f32 %v2065_v23, %v389_v0  ;;  %v467_v18 = vmul.f32 %v2065_v23, %v391_v1  ;;  %v629_v19 = vmax.f32 %v565_v8, 0.0  ;;  %v414_v21 = vunpack.c.l.bf16 %v2106_v50  ;;  %v1916_v50 = vld [vmem:[%s2712_s3 + $0xe4] ss:$8 sps:$4 sm:$0xff]  }
  0x1c   : > { %907 = vmatpush1.bf16.msra.mxu0 %v1891_v13  ;;  %1839 = vmatpush1.bf16.msra.mxu1 %v1891_v13  ;;  %v2149_v13 = vld [vmem:[%s2043_s7 + $0x90] sm:$0xff]  ;;  %v596_v26 = vmax.f32 %v532_v3, 0.0  ;;  %v598_v27 = vmax.f32 %v534_v6, 0.0  ;;  %v603_v32 = vmax.f32 %v539_v10, 0.0  ;;  %v388_v33 = vunpack.c.l.bf16 %v2113_v53  ;;  %v369_v1 = vld [vmem:[%s2043_s7 + $0xa8] sm:$0xff] }
  0x1d   : > { %908 = vmatprep.subr.bf16.mxu0 %v1892_v15  ;;  %1824 = vmatprep.subr.bf16.mxu1 %v1892_v15  ;;  %v2152_v15 = vld [vmem:[%s2043_s7 + $0x98] sm:$0xff]  ;;  %v541_v38 = vadd.f32 %v2071_v25, %v465_v17  ;;  %v543_v39 = vadd.f32 %v2071_v25, %v467_v18  ;;  %v488_v43 = vmul.f32 %v2094_v41, %v412_v20  ;;  %v390_v47 = vunpack.c.l.bf16 %v2116_v54 }
  0x1e   : > { %928 = vmatprep.mubr.bf16.mxu0 %v661_v36  ;;  %v419_v29 = vunpack.c.h.bf16 %v2152_v15  ;;  %v600_v36 = vmax.f32 %v536_v11, 0.0  ;;  %v490_v44 = vmul.f32 %v2094_v41, %v414_v21  ;;  %v2179_v46 = vpack.c.bf16 %v598_v27, %v596_v26  ;;  %v1919_v6 = vld [vmem:[%s2712_s3 + $0xf4] ss:$8 sps:$4 sm:$0xff]   ;;  %v1921_v21 = vld [vmem:[%s2712_s3 + $0xf0] ss:$8 sps:$4 sm:$0xff]  }
  0x1f   : > { %v464_v53 = vmul.f32 %v2094_v41, %v388_v33  ;;  %v605_v54 = vmax.f32 %v541_v38, 0.0  ;;  %v607_v58 = vmax.f32 %v543_v39, 0.0  ;;  %v564_v61 = vadd.f32 %v2109_v51, %v488_v43  ;;  %v370_v43 = vld [vmem:[%s2043_s7 + $0xb0] sm:$0xff] }
  0x20   : > { %909 = vmatpush1.bf16.msra.mxu0 %v1894_v22  ;;  %1840 = vmatpush1.bf16.msra.mxu1 %v1894_v22  ;;  %v631_v22 = vmax.f32 %v567_v12, 0.0  ;;  %v495_v49 = vmul.f32 %v2065_v23, %v419_v29  ;;  %v566_v62 = vadd.f32 %v2109_v51, %v490_v44  ;;  %v416_v63 = vunpack.c.l.bf16 %v2149_v13 }
  0x21   : > { %910 = vmatprep.subr.bf16.mxu0 %v1895_v24  ;;  %1825 = vmatprep.subr.bf16.mxu1 %v1895_v24  ;;  %v1912_v24 = vld [vmem:[%s2712_s3 + $0xc0] ss:$8 sps:$4 sm:$0xff]   ;;  %v418_v0 = vunpack.c.l.bf16 %v2152_v15  ;;  %v466_v3 = vmul.f32 %v2094_v41, %v390_v47  ;;  %v421_v10 = vunpack.c.h.bf16 %v2194_v60  ;;  %v2216_v11 = vpack.c.bf16 %v607_v58, %v605_v54 }
  0x22   : > { %v2221_v15 = vld [vmem:[%s2043_s7 + $0x40] sm:$0xff]  ;;  %v628_v17 = vmax.f32 %v564_v61, 0.0  ;;  %v630_v18 = vmax.f32 %v566_v62, 0.0 }
  0x23   : > { %v494_v20 = vmul.f32 %v2094_v41, %v418_v0  ;;  %v497_v27 = vmul.f32 %v2065_v23, %v421_v10  ;;  %v542_v29 = vadd.f32 %v2109_v51, %v466_v3  ;;  %v396_v54 = vunpack.c.l.bf16 %v2221_v15 }
  0x24   : > { %911 = vmatpush1.bf16.msra.mxu0 %v1897_v28  ;;  %1841 = vmatpush1.bf16.msra.mxu1 %v1897_v28  ;;  %v417_v28 = vunpack.c.h.bf16 %v2149_v13  ;;  %v676_v38 = vpack.c.bf16 %v630_v18, %v628_v17 }
  0x25   : > { %912 = vmatprep.subr.bf16.mxu0 %v1898_v31  ;;  %1826 = vmatprep.subr.bf16.mxu1 %v1898_v31  ;;  %v601_v31 = vmax.f32 %v537_v7, 0.0  ;;  %v2211_v7 = vadd.f32 %v2109_v51, %v464_v53  ;;  %v573_v47 = vadd.f32 %v2071_v25, %v497_v27 }
  0x26   : > { %v493_v48 = vmul.f32 %v2065_v23, %v417_v28 }
  0x27   : > { %v2187_v52 = vpack.c.bf16 %v603_v32, %v601_v31  ;;  %v397_v32 = vunpack.c.h.bf16 %v2221_v15  ;;  %v604_v44 = vmax.f32 %v2211_v7, 0.0 }
  0x28   : > { %913 = vmatpush1.bf16.msra.mxu0 %v1900_v35  ;;  %1842 = vmatpush1.bf16.msra.mxu1 %v1900_v35  ;;  %v677_v35 = vpack.c.bf16 %v631_v22, %v629_v19  ;;  %v569_v4 = vadd.f32 %v2071_v25, %v493_v48  ;;  %v492_v19 = vmul.f32 %v2094_v41, %v416_v63  ;;  %v2229_v22 = vld [vmem:[%s2043_s7 + $0x48] sm:$0xff] }
  0x29   : > { %914 = vmatprep.subr.bf16.mxu0 %v1901_v37  ;;  %1827 = vmatprep.subr.bf16.mxu1 %v1901_v37  ;;  %v602_v37 = vmax.f32 %v538_v16, 0.0  ;;  %v423_v16 = vunpack.c.h.bf16 %v369_v1  ;;  %v399_v39 = vunpack.c.h.bf16 %v2229_v22 }
  0x2a   : > { %1008 = vmatprep.mubr.bf16.mxu1 %v677_v35 }
  0x2b   : > { %v2191_v57 = vpack.c.bf16 %v602_v37, %v600_v36  ;;  %v499_v28 = vmul.f32 %v2065_v23, %v423_v16  ;;  %v420_v36 = vunpack.c.l.bf16 %v2194_v60  ;;  %v422_v37 = vunpack.c.l.bf16 %v369_v1 }
  0x2c   : > { %915 = vmatpush1.bf16.msra.mxu0 %v1903_v42  ;;  %1843 = vmatpush1.bf16.msra.mxu1 %v1903_v42  ;;  %v2172_v42 = vld [vmem:[%s2043_s7 + $0x38] sm:$0xff]  ;;  %v425_v60 = vunpack.c.h.bf16 %v370_v43  ;;  %v475_v61 = vmul.f32 %v2065_v23, %v399_v39  ;;  %v472_v16 = vmul.f32 %v2094_v41, %v396_v54 }
  0x2d   : > { %916 = vmatprep.subr.bf16.mxu0 %v1904_v45  ;;  %1828 = vmatprep.subr.bf16.mxu1 %v1904_v45  ;;  %v1915_v45 = vld [vmem:[%s2712_s3 + $0xd0] ss:$8 sps:$4 sm:$0xff]   ;;  %v395_v56 = vunpack.c.h.bf16 %v2172_v42  ;;  %v394_v12 = vunpack.c.l.bf16 %v2172_v42  ;;  %v570_v42 = vadd.f32 %v2109_v51, %v494_v20  ;;  %v575_v48 = vadd.f32 %v2071_v25, %v499_v28 }
  0x2e   : > { %v496_v58 = vmul.f32 %v2094_v41, %v420_v36  ;;  %v551_v15 = vadd.f32 %v2071_v25, %v475_v61 }
  0x2f   : > { %v470_v33 = vmul.f32 %v2094_v41, %v394_v12  ;;  %v634_v63 = vmax.f32 %v570_v42, 0.0  ;;  %v639_v3 = vmax.f32 %v575_v48, 0.0 }
  0x30   : > { %917 = vmatpush1.bf16.msra.mxu0 %v1906_v55  ;;  %1844 = vmatpush1.bf16.msra.mxu1 %v1906_v55  ;;  %v393_v55 = vunpack.c.h.bf16 %v354_v40  ;;  %v572_v10 = vadd.f32 %v2109_v51, %v496_v58 }
  0x31   : > { %918 = vmatprep.subr.bf16.mxu0 %v1907_v59  ;;  %1829 = vmatprep.subr.bf16.mxu1 %v1907_v59  ;;  %v392_v59 = vunpack.c.l.bf16 %v354_v40  ;;  %v568_v40 = vadd.f32 %v2109_v51, %v492_v19  ;;  %v2258_v1 = vadd.f32 %v2109_v51, %v470_v33  ;;  %v372_v19 = vld [vmem:[%s2043_s7 + $0xc0] sm:$0xff] }
  0x32   : > { %v469_v8 = vmul.f32 %v2065_v23, %v393_v55  ;;  %v428_v58 = vunpack.c.l.bf16 %v372_v19 }
  0x33   : > { %v468_v13 = vmul.f32 %v2094_v41, %v392_v59  ;;  %v498_v59 = vmul.f32 %v2094_v41, %v422_v37  ;;  %v632_v62 = vmax.f32 %v568_v40, 0.0  ;;  %v615_v37 = vmax.f32 %v551_v15, 0.0 }
  0x34   : > { %919 = vmatpush1.bf16.msra.mxu0 %v1909_v5  ;;  %1845 = vmatpush1.bf16.msra.mxu1 %v1909_v5  ;;  %v571_v5 = vadd.f32 %v2071_v25, %v495_v49  ;;  %v371_v49 = vld [vmem:[%s2043_s7 + $0xb8] sm:$0xff] }
  0x35   : > { %920 = vmatprep.subr.bf16.mxu0 %v1910_v9  ;;  %1830 = vmatprep.subr.bf16.mxu1 %v1910_v9  ;;  %v471_v9 = vmul.f32 %v2065_v23, %v395_v56  ;;  %v2239_v35 = vadd.f32 %v2109_v51, %v468_v13  ;;  %v473_v56 = vmul.f32 %v2065_v23, %v397_v32  ;;  %v427_v0 = vunpack.c.h.bf16 %v371_v49 }
  0x36   : > { %v635_v26 = vmax.f32 %v571_v5, 0.0  ;;  %v574_v12 = vadd.f32 %v2109_v51, %v498_v59  ;;  %v424_v13 = vunpack.c.l.bf16 %v370_v43  ;;  %v678_v17 = vpack.c.bf16 %v634_v63, %v632_v62 }
  0x37   : > { %v547_v31 = vadd.f32 %v2071_v25, %v471_v9  ;;  %v608_v5 = vmax.f32 %v2239_v35, 0.0  ;;  %v503_v7 = vmul.f32 %v2065_v23, %v427_v0  ;;  %v359_v9 = vld [vmem:[%s2043_s7 + $0x58] sm:$0xff]  ;;  %v426_v18 = vunpack.c.l.bf16 %v371_v49 }
  0x38   : > { %921 = vmatpush1.bf16.msra.mxu0 %v1912_v24  ;;  %1846 = vmatpush1.bf16.msra.mxu1 %v1912_v24  ;;  %v633_v24 = vmax.f32 %v569_v4, 0.0  ;;  %v501_v4 = vmul.f32 %v2065_v23, %v425_v60  ;;  %v638_v32 = vmax.f32 %v574_v12, 0.0  ;;  %v500_v33 = vmul.f32 %v2094_v41, %v424_v13 }
  0x39   : > { %922 = vmatprep.subr.bf16.mxu0 %v1913_v30  ;;  %1831 = vmatprep.subr.bf16.mxu1 %v1913_v30  ;;  %v545_v30 = vadd.f32 %v2071_v25, %v469_v8  ;;  %v611_v55 = vmax.f32 %v547_v31, 0.0  ;;  %v549_v8 = vadd.f32 %v2071_v25, %v473_v56  ;;  %v636_v31 = vmax.f32 %v572_v10, 0.0 }
  0x3a   : > { %v429_v35 = vunpack.c.h.bf16 %v372_v19  ;;  %v502_v39 = vmul.f32 %v2094_v41, %v426_v18  ;;  %v504_v12 = vmul.f32 %v2094_v41, %v428_v58 }
  0x3b   : > { %v609_v53 = vmax.f32 %v545_v30, 0.0  ;;  %v373_v30 = vld [vmem:[%s2043_s7 + $0xc8] sm:$0xff]  ;;  %v613_v36 = vmax.f32 %v549_v8, 0.0 }
  0x3c   : > { %923 = vmatpush1.bf16.msra.mxu0 %v1915_v45  ;;  %1847 = vmatpush1.bf16.msra.mxu1 %v1915_v45  ;;  %v679_v45 = vpack.c.bf16 %v635_v26, %v633_v24  ;;  %v579_v24 = vadd.f32 %v2071_v25, %v503_v7  ;;  %v610_v26 = vmax.f32 %v2258_v1, 0.0  ;;  %v431_v43 = vunpack.c.h.bf16 %v373_v30 }
  0x3d   : > { %924 = vmatprep.subr.bf16.mxu0 %v1916_v50  ;;  %1832 = vmatprep.subr.bf16.mxu1 %v1916_v50  ;;  %v606_v50 = vmax.f32 %v542_v29, 0.0  ;;  %v667_v20 = vpack.c.bf16 %v611_v55, %v609_v53  ;;  %v403_v29 = vunpack.c.h.bf16 %v359_v9  ;;  %v402_v53 = vunpack.c.l.bf16 %v359_v9  ;;  %v2309_v9 = vld [vmem:[%s2043_s7 + $0x68] sm:$0xff] }
  0x3e   : > { %v643_v42 = vmax.f32 %v579_v24, 0.0  ;;  %v680_v55 = vpack.c.bf16 %v638_v32, %v636_v31  ;;  %v507_v56 = vmul.f32 %v2065_v23, %v431_v43  ;;  %v578_v54 = vadd.f32 %v2109_v51, %v502_v39 }
  0x3f   : > { %v479_v48 = vmul.f32 %v2065_v23, %v403_v29  ;;  %v430_v59 = vunpack.c.l.bf16 %v373_v30  ;;  %v666_v1 = vpack.c.bf16 %v610_v26, %v608_v5  ;;  %v478_v8 = vmul.f32 %v2094_v41, %v402_v53  ;;  %v2319_v26 = vld [vmem:[%s2043_s7 + $0xe0] sm:$0xff] }
  0x40   : > { %925 = vmatpush1.bf16.msra.mxu0 %v1918_v2  ;;  %1848 = vmatpush1.bf16.msra.mxu1 %v1918_v2  ;;  %v637_v2 = vmax.f32 %v573_v47, 0.0  ;;  %v583_v63 = vadd.f32 %v2071_v25, %v507_v56  ;;  %v642_v5 = vmax.f32 %v578_v54, 0.0  ;;  %v407_v24 = vunpack.c.h.bf16 %v2309_v9 }
  0x41   : > { %926 = vmatprep.subr.bf16.mxu0 %v1919_v6  ;;  %1833 = vmatprep.subr.bf16.mxu1 %v1919_v6  ;;  %v398_v6 = vunpack.c.l.bf16 %v2229_v22  ;;  %v577_v22 = vadd.f32 %v2071_v25, %v501_v4  ;;  %v555_v4 = vadd.f32 %v2071_v25, %v479_v48  ;;  %v506_v13 = vmul.f32 %v2094_v41, %v430_v59  ;;  %v378_v59 = vld [vmem:[%s2043_s7 + $0xf0] sm:$0xff] }
  0x42   : > { %v647_v18 = vmax.f32 %v583_v63, 0.0  ;;  %v580_v32 = vadd.f32 %v2109_v51, %v504_v12  ;;  %v406_v63 = vunpack.c.l.bf16 %v2309_v9 }
  0x43   : > { %v474_v27 = vmul.f32 %v2094_v41, %v398_v6  ;;  %v641_v40 = vmax.f32 %v577_v22, 0.0  ;;  %v669_v6 = vpack.c.bf16 %v615_v37, %v613_v36  ;;  %v619_v22 = vmax.f32 %v555_v4, 0.0 }
  0x44   : > { %927 = vmatpush1.bf16.msra.mxu0 %v1921_v21  ;;  %1849 = vmatpush1.bf16.msra.mxu1 %v1921_v21  ;;  %v681_v21 = vpack.c.bf16 %v639_v3, %v637_v2  ;;  %v644_v53 = vmax.f32 %v580_v32, 0.0 }
  0x45   : > { %v683_v61 = vpack.c.bf16 %v643_v42, %v641_v40  ;;  %v483_v42 = vmul.f32 %v2065_v23, %v407_v24 }
  0x47   : > { %929 = vmatmul.mubr.bf16.vlgmr.msra.gmra.mrb[0].mxu0 %v2179_v46  ;;  %1009 = vmatmul.mubr.bf16.vlgmr.msra.gmra.mrb[0].mxu1 %v676_v38  ;;  %v2261_v46 = vpack.c.bf16 %v606_v50, %v604_v44  ;;  %v2282_v38 = vadd.f32 %v2109_v51, %v472_v16  ;;  %v505_v44 = vmul.f32 %v2065_v23, %v429_v35  ;;  %v375_v50 = vld [vmem:[%s2043_s7 + $0xd8] sm:$0xff] }
  0x48   : > { %938 = vmatprep.mubr.bf16.mxu0 %v2187_v52  ;;  %1018 = vmatprep.mubr.bf16.mxu1 %v679_v45  ;;  %v358_v52 = vld [vmem:[%s2043_s7 + $0x50] sm:$0xff]  ;;  %v435_v0 = vunpack.c.h.bf16 %v375_v50  ;;  %v434_v30 = vunpack.c.l.bf16 %v375_v50  ;;  %v2347_v50 = vld [vmem:[%s2043_s7 + $0x78] sm:$0xff] }
  0x49   : > { %v401_v28 = vunpack.c.h.bf16 %v358_v52  ;;  %v2288_v45 = vld [vmem:[%s2043_s7 + $0xd0] sm:$0xff]  ;;  %v400_v49 = vunpack.c.l.bf16 %v358_v52  ;;  %v581_v62 = vadd.f32 %v2071_v25, %v505_v44  ;;  %v612_v2 = vmax.f32 %v2282_v38, 0.0  ;;  %v2306_v52 = vld [vmem:[%s2043_s7 + $0x60] sm:$0xff] }
  0x4a   : > { %v433_v60 = vunpack.c.h.bf16 %v2288_v45  ;;  %v511_v19 = vmul.f32 %v2065_v23, %v435_v0  ;;  %v432_v29 = vunpack.c.l.bf16 %v2288_v45  ;;  %v437_v38 = vunpack.c.h.bf16 %v2319_v26  ;;  %v379_v0 = vld [vmem:[%s2043_s7 + $0xf8] sm:$0xff] }
  0x4b   : > { %v477_v47 = vmul.f32 %v2065_v23, %v401_v28  ;;  %v476_v7 = vmul.f32 %v2094_v41, %v400_v49  ;;  %v2344_v49 = vld [vmem:[%s2043_s7 + $0x70] sm:$0xff]  ;;  %v443_v12 = vunpack.c.h.bf16 %v379_v0 }
  0x4c   : > { %v509_v15 = vmul.f32 %v2065_v23, %v433_v60  ;;  %v587_v37 = vadd.f32 %v2071_v25, %v511_v19  ;;  %v508_v45 = vmul.f32 %v2094_v41, %v432_v29  ;;  %v513_v54 = vmul.f32 %v2065_v23, %v437_v38 }
  0x4d   : > { %v553_v3 = vadd.f32 %v2071_v25, %v477_v47  ;;  %v2325_v28 = vadd.f32 %v2109_v51, %v476_v7  ;;  %v436_v7 = vunpack.c.l.bf16 %v2319_v26 }
  0x4e   : > { %v585_v35 = vadd.f32 %v2071_v25, %v509_v15  ;;  %v651_v56 = vmax.f32 %v587_v37, 0.0 }
  0x4f   : > { %939 = vmatmul.mubr.bf16.gmra.mrb[4].mxu0 %v2191_v57  ;;  %1019 = vmatmul.mubr.bf16.gmra.mrb[4].mxu1 %v678_v17  ;;  %v550_v57 = vadd.f32 %v2109_v51, %v474_v27  ;;  %v645_v17 = vmax.f32 %v581_v62, 0.0  ;;  %v2322_v27 = vld [vmem:[%s2043_s7 + $0xe8] sm:$0xff]  ;;  %v616_v47 = vmax.f32 %v2325_v28, 0.0  ;;  %v404_v62 = vunpack.c.l.bf16 %v2306_v52 }
  0x50   : > { %948 = vmatprep.mubr.bf16.mxu0 %v2216_v11  ;;  %1028 = vmatprep.mubr.bf16.mxu1 %v681_v21  ;;  %v576_v11 = vadd.f32 %v2109_v51, %v500_v33  ;;  %v617_v21 = vmax.f32 %v553_v3, 0.0  ;;  %v582_v33 = vadd.f32 %v2109_v51, %v506_v13  ;;  %v439_v39 = vunpack.c.h.bf16 %v2322_v27 }
  0x51   : > { %v614_v16 = vmax.f32 %v550_v57, 0.0  ;;  %v685_v36 = vpack.c.bf16 %v647_v18, %v645_v17  ;;  %v510_v57 = vmul.f32 %v2094_v41, %v434_v30  ;;  %v584_v3 = vadd.f32 %v2109_v51, %v508_v45 }
  0x52   : > { %v640_v10 = vmax.f32 %v576_v11, 0.0  ;;  %v671_v44 = vpack.c.bf16 %v619_v22, %v617_v21  ;;  %v649_v11 = vmax.f32 %v585_v35, 0.0  ;;  %v515_v58 = vmul.f32 %v2065_v23, %v439_v39 }
  0x53   : > { %v668_v43 = vpack.c.bf16 %v614_v16, %v612_v2  ;;  %v411_v2 = vunpack.c.h.bf16 %v2347_v50  ;;  %v586_v4 = vadd.f32 %v2109_v51, %v510_v57  ;;  %v480_v16 = vmul.f32 %v2094_v41, %v404_v62 }
  0x54   : > { %v682_v31 = vpack.c.bf16 %v642_v5, %v640_v10  ;;  %v441_v10 = vunpack.c.h.bf16 %v378_v59  ;;  %v687_v5 = vpack.c.bf16 %v651_v56, %v649_v11  ;;  %v591_v9 = vadd.f32 %v2071_v25, %v515_v58 }
  0x55   : > { %v482_v17 = vmul.f32 %v2094_v41, %v406_v63  ;;  %v648_v19 = vmax.f32 %v584_v3, 0.0  ;;  %v650_v21 = vmax.f32 %v586_v4, 0.0  ;;  %v487_v22 = vmul.f32 %v2065_v23, %v411_v2 }
  0x56   : > { %v517_v28 = vmul.f32 %v2065_v23, %v441_v10  ;;  %v408_v35 = vunpack.c.l.bf16 %v2344_v49  ;;  %v724_v10 = vld [vmem:[%s2713_s4] sm:$0x3] }
  0x57   : > { %949 = vmatmul.mubr.bf16.gmra.mrb[8].mxu0 %v2261_v46  ;;  %1029 = vmatmul.mubr.bf16.gmra.mrb[8].mxu1 %v680_v55  ;;  %v405_v46 = vunpack.c.h.bf16 %v2306_v52  ;;  %v646_v55 = vmax.f32 %v582_v33, 0.0  ;;  %v589_v52 = vadd.f32 %v2071_v25, %v513_v54  ;;  %v558_v32 = vadd.f32 %v2109_v51, %v482_v17 }
  0x58   : > { %958 = vmatprep.mubr.bf16.mxu0 %v667_v20  ;;  %1038 = vmatprep.mubr.bf16.mxu1 %v683_v61  ;;  %v2328_v20 = vadd.f32 %v2109_v51, %v478_v8  ;;  %v559_v61 = vadd.f32 %v2071_v25, %v483_v42  ;;  %v438_v8 = vunpack.c.l.bf16 %v2322_v27  ;;  %v655_v27 = vmax.f32 %v591_v9, 0.0 }
  0x59   : > { %v481_v40 = vmul.f32 %v2065_v23, %v405_v46  ;;  %v512_v46 = vmul.f32 %v2094_v41, %v436_v7  ;;  %v653_v26 = vmax.f32 %v589_v52, 0.0  ;;  %v686_v37 = vpack.c.bf16 %v650_v21, %v648_v19 }
  0x5a   : > { %v618_v48 = vmax.f32 %v2328_v20, 0.0  ;;  %v623_v15 = vmax.f32 %v559_v61, 0.0  ;;  %v514_v24 = vmul.f32 %v2094_v41, %v438_v8  ;;  %v519_v20 = vmul.f32 %v2065_v23, %v443_v12 }
  0x5b   : > { %v557_v60 = vadd.f32 %v2071_v25, %v481_v40  ;;  %v588_v38 = vadd.f32 %v2109_v51, %v512_v46  ;;  %v440_v40 = vunpack.c.l.bf16 %v378_v59  ;;  %v442_v42 = vunpack.c.l.bf16 %v379_v0 }
  0x5c   : > { %v670_v29 = vpack.c.bf16 %v618_v48, %v616_v47  ;;  %v590_v39 = vadd.f32 %v2109_v51, %v514_v24  ;;  %v595_v45 = vadd.f32 %v2071_v25, %v519_v20  ;;  %v622_v47 = vmax.f32 %v558_v32, 0.0 }
  0x5d   : > { %v621_v13 = vmax.f32 %v557_v60, 0.0  ;;  %v484_v48 = vmul.f32 %v2094_v41, %v408_v35  ;;  %v518_v11 = vmul.f32 %v2094_v41, %v442_v42 }
  0x5f   : > { %959 = vmatmul.mubr.bf16.gmra.mrb[12].mxu0 %v666_v1  ;;  %1039 = vmatmul.mubr.bf16.gmra.mrb[12].mxu1 %v682_v31  ;;  %v409_v1 = vunpack.c.h.bf16 %v2344_v49  ;;  %v673_v30 = vpack.c.bf16 %v623_v15, %v621_v13  ;;  %v556_v31 = vadd.f32 %v2109_v51, %v480_v16  ;;  %v560_v60 = vadd.f32 %v2109_v51, %v484_v48 }
  0x60   : > { %968 = vmatprep.mubr.bf16.mxu0 %v669_v6  ;;  %1048 = vmatprep.mubr.bf16.mxu1 %v685_v36  ;;  %v684_v6 = vpack.c.bf16 %v646_v55, %v644_v53  ;;  %v410_v36 = vunpack.c.l.bf16 %v2347_v50  ;;  %v652_v50 = vmax.f32 %v588_v38, 0.0  ;;  %v654_v53 = vmax.f32 %v590_v39, 0.0 }
  0x61   : > { %v485_v18 = vmul.f32 %v2065_v23, %v409_v1  ;;  %v563_v23 = vadd.f32 %v2071_v25, %v487_v22  ;;  %v620_v57 = vmax.f32 %v556_v31, 0.0  ;;  %v516_v55 = vmul.f32 %v2094_v41, %v440_v40 }
  0x62   : > { %v486_v49 = vmul.f32 %v2094_v41, %v410_v36  ;;  %v688_v62 = vpack.c.bf16 %v654_v53, %v652_v50  ;;  %v594_v0 = vadd.f32 %v2109_v51, %v518_v11  ;;  %v624_v41 = vmax.f32 %v560_v60, 0.0 }
  0x63   : > { %v561_v33 = vadd.f32 %v2071_v25, %v485_v18  ;;  %v627_v54 = vmax.f32 %v563_v23, 0.0  ;;  %v672_v59 = vpack.c.bf16 %v622_v47, %v620_v57  ;;  %v592_v63 = vadd.f32 %v2109_v51, %v516_v55 }
  0x64   : > { %v562_v61 = vadd.f32 %v2109_v51, %v486_v49  ;;  %v2395_v51 = vrot.slane %v724_v10, %v2083_v34 }
  0x65   : > { %v625_v56 = vmax.f32 %v561_v33, 0.0  ;;  %v656_v4 = vmax.f32 %v592_v63, 0.0 }
  0x66   : > { %v626_v3 = vmax.f32 %v562_v61, 0.0 }
  0x67   : > { %969 = vmatmul.mubr.bf16.gmra.mrb[16].mxu0 %v668_v43  ;;  %1049 = vmatmul.mubr.bf16.gmra.mrb[16].mxu1 %v684_v6  ;;  %v689_v43 = vpack.c.bf16 %v655_v27, %v653_v26  ;;  %v675_v1 = vpack.c.bf16 %v627_v54, %v625_v56  ;;  %v658_v6 = vmax.f32 %v594_v0, 0.0 }
  0x68   : > { %978 = vmatprep.mubr.bf16.mxu0 %v671_v44  ;;  %1058 = vmatprep.mubr.bf16.mxu1 %v687_v5  ;;  %v593_v44 = vadd.f32 %v2071_v25, %v517_v28  ;;  %v659_v25 = vmax.f32 %v595_v45, 0.0  ;;  %v674_v7 = vpack.c.bf16 %v626_v3, %v624_v41  ;;  %v2398_v5 = vrot.slane %v724_v10, %v2048_v14 }
  0x69   : > { %v690_v8 = vpack.c.bf16 %v658_v6, %v656_v4 }
  0x6a   : > { %v657_v58 = vmax.f32 %v593_v44, 0.0 }
  0x6c   : > { %v691_v2 = vpack.c.bf16 %v659_v25, %v657_v58 }
  0x6f   : > { %979 = vmatmul.mubr.bf16.gmra.mrb[20].mxu0 %v670_v29  ;;  %1059 = vmatmul.mubr.bf16.gmra.mrb[20].mxu1 %v686_v37 }
  0x70   : > { %988 = vmatprep.mubr.bf16.mxu0 %v673_v30  ;;  %1068 = vmatprep.mubr.bf16.mxu1 %v689_v43 }
  0x77   : > { %989 = vmatmul.mubr.bf16.gmra.mrb[24].mxu0 %v672_v59  ;;  %1069 = vmatmul.mubr.bf16.gmra.mrb[24].mxu1 %v688_v62 }
  0x78   : > { %998 = vmatprep.mubr.bf16.mxu0 %v675_v1  ;;  %1078 = vmatprep.mubr.bf16.mxu1 %v691_v2 }
  0x7f   : > { %999 = vmatmul.mubr.bf16.gmra.mrb[28].mxu0 %v674_v7  ;;  %1079 = vmatmul.mubr.bf16.gmra.mrb[28].mxu1 %v690_v8 }
 0x11a   : > { %v930_v52 = vpop.f32.mrb[0].mxu0  ;;  %v1010_v9 = vpop.f32.mrb[0].mxu1 }
 0x11b   : > { %v931_v12 = vadd.f32 %v930_v52, %v2395_v51  ;;  %v932_v13 = vpop.f32.mrb[1].mxu0  ;;  %v2402_v15 = vadd.f32 %v1010_v9, %v2395_v51  ;;  %v1012_v16 = vpop.f32.mrb[1].mxu1 }
 0x11c   : > { %v933_v17 = vadd.f32 %v932_v13, %v2398_v5  ;;  %v934_v18 = vpop.f32.mrb[2].mxu0  ;;  %v2406_v19 = vadd.f32 %v1012_v16, %v2398_v5  ;;  %v1014_v34 = vpop.f32.mrb[2].mxu1 }
 0x11d   : > { %v935_v14 = vadd.f32 %v934_v18, %v2395_v51  ;;  %v936_v21 = vpop.f32.mrb[3].mxu0  ;;  %v1016_v22 = vpop.f32.mrb[3].mxu1  ;;  %v1163_v46 = vmul.f32 %v931_v12, %v931_v12  ;;  %v2418_v27 = vadd.f32 %v1014_v34, %v2395_v51 }
 0x11e   : > { %v1786_v24 = vpack.c.bf16 %v933_v17, %v931_v12  ;;  %v937_v26 = vadd.f32 %v936_v21, %v2398_v5  ;;  %v1164_v28 = vmul.f32 %v933_v17, %v933_v17  ;;  %v1802_v30 = vpack.c.bf16 %v2406_v19, %v2402_v15 }
 0x11f   : > { %v1089_v20 = vadd.f32 %v935_v14, %v931_v12  ;;  %v1165_v29 = vmul.f32 %v935_v14, %v935_v14  ;;  %v2424_v35 = vadd.f32 %v1016_v22, %v2398_v5 }
 0x120   : > { %1508 = vst [vmem:[%s2413_s29] sm:$0xff] %v1786_v24  ;;  %v1126_v31 = vadd.f32 %v937_v26, %v933_v17  ;;  %v1166_v32 = vmul.f32 %v937_v26, %v937_v26  ;;  %v1787_v33 = vpack.c.bf16 %v937_v26, %v935_v14  ;;  %1524 = vst [vmem:[%s2413_s29 + $0x80] sm:$0xff] %v1802_v30 }
 0x121   : > { %v1227_v36 = vadd.f32 %v1165_v29, %v1163_v46  ;;  %v1803_v39 = vpack.c.bf16 %v2424_v35, %v2418_v27 }
 0x122   : > { %v1264_v37 = vadd.f32 %v1166_v32, %v1164_v28  ;;  %1509 = vst [vmem:[%s2413_s29 + $0x8] sm:$0xff] %v1787_v33  ;;  %v940_v38 = vpop.f32.mrb[4].mxu0  ;;  %v1020_v40 = vpop.f32.mrb[4].mxu1 }
 0x123   : > { %v941_v42 = vadd.f32 %v940_v38, %v2395_v51  ;;  %v942_v23 = vpop.f32.mrb[5].mxu0  ;;  %v1022_v43 = vpop.f32.mrb[5].mxu1  ;;  %1525 = vst [vmem:[%s2413_s29 + $0x88] sm:$0xff] %v1803_v39  ;;  %v2434_v57 = vadd.f32 %v1020_v40, %v2395_v51 }
 0x124   : > { %v943_v44 = vadd.f32 %v942_v23, %v2398_v5  ;;  %v944_v45 = vpop.f32.mrb[6].mxu0  ;;  %v1024_v47 = vpop.f32.mrb[6].mxu1  ;;  %v2438_v55 = vadd.f32 %v1022_v43, %v2398_v5 }
 0x125   : > { %v1090_v48 = vadd.f32 %v1089_v20, %v941_v42  ;;  %v1167_v49 = vmul.f32 %v941_v42, %v941_v42  ;;  %v945_v50 = vadd.f32 %v944_v45, %v2395_v51  ;;  %v946_v53 = vpop.f32.mrb[7].mxu0  ;;  %v1026_v11 = vpop.f32.mrb[7].mxu1  ;;  %v2445_v3 = vadd.f32 %v1024_v47, %v2395_v51 }
 0x126   : > { %v1127_v56 = vadd.f32 %v1126_v31, %v943_v44  ;;  %v1168_v54 = vmul.f32 %v943_v44, %v943_v44  ;;  %v1788_v58 = vpack.c.bf16 %v943_v44, %v941_v42  ;;  %v947_v25 = vadd.f32 %v946_v53, %v2398_v5 }
 0x127   : > { %v1228_v59 = vadd.f32 %v1227_v36, %v1167_v49  ;;  %v1091_v60 = vadd.f32 %v1090_v48, %v945_v50  ;;  %v1169_v61 = vmul.f32 %v945_v50, %v945_v50  ;;  %v1804_v41 = vpack.c.bf16 %v2438_v55, %v2434_v57 }
 0x128   : > { %v1265_v62 = vadd.f32 %v1264_v37, %v1168_v54  ;;  %1510 = vst [vmem:[%s2413_s29 + $0x10] sm:$0xff] %v1788_v58  ;;  %v1128_v63 = vadd.f32 %v1127_v56, %v947_v25  ;;  %v1170_v0 = vmul.f32 %v947_v25, %v947_v25  ;;  %v1789_v1 = vpack.c.bf16 %v947_v25, %v945_v50 }
 0x129   : > { %v1229_v2 = vadd.f32 %v1228_v59, %v1169_v61  ;;  %v2448_v4 = vadd.f32 %v1026_v11, %v2398_v5  ;;  %1526 = vst [vmem:[%s2413_s29 + $0x90] sm:$0xff] %v1804_v41 }
 0x12a   : > { %v1266_v6 = vadd.f32 %v1265_v62, %v1170_v0  ;;  %1511 = vst [vmem:[%s2413_s29 + $0x18] sm:$0xff] %v1789_v1  ;;  %v950_v7 = vpop.f32.mrb[8].mxu0  ;;  %v1030_v8 = vpop.f32.mrb[8].mxu1 }
 0x12b   : > { %v951_v10 = vadd.f32 %v950_v7, %v2395_v51  ;;  %v952_v52 = vpop.f32.mrb[9].mxu0  ;;  %v1805_v9 = vpack.c.bf16 %v2448_v4, %v2445_v3  ;;  %v1032_v12 = vpop.f32.mrb[9].mxu1  ;;  %v2457_v17 = vadd.f32 %v1030_v8, %v2395_v51 }
 0x12c   : > { %v953_v13 = vadd.f32 %v952_v52, %v2398_v5  ;;  %v954_v16 = vpop.f32.mrb[10].mxu0  ;;  %v1034_v18 = vpop.f32.mrb[10].mxu1  ;;  %v2462_v46 = vadd.f32 %v1032_v12, %v2398_v5 }
 0x12d   : > { %v1092_v34 = vadd.f32 %v1091_v60, %v951_v10  ;;  %v1171_v14 = vmul.f32 %v951_v10, %v951_v10  ;;  %v955_v21 = vadd.f32 %v954_v16, %v2395_v51  ;;  %v956_v22 = vpop.f32.mrb[11].mxu0  ;;  %1527 = vst [vmem:[%s2413_s29 + $0x98] sm:$0xff] %v1805_v9  ;;  %v1036_v24 = vpop.f32.mrb[11].mxu1  ;;  %v2466_v33 = vadd.f32 %v1034_v18, %v2395_v51 }
 0x12e   : > { %v1129_v26 = vadd.f32 %v1128_v63, %v953_v13  ;;  %v1172_v28 = vmul.f32 %v953_v13, %v953_v13  ;;  %v1790_v20 = vpack.c.bf16 %v953_v13, %v951_v10  ;;  %v957_v29 = vadd.f32 %v956_v22, %v2398_v5 }
 0x12f   : > { %v1230_v30 = vadd.f32 %v1229_v2, %v1171_v14  ;;  %v1093_v31 = vadd.f32 %v1092_v34, %v955_v21  ;;  %v1173_v32 = vmul.f32 %v955_v21, %v955_v21  ;;  %v1806_v42 = vpack.c.bf16 %v2462_v46, %v2457_v17 }
 0x130   : > { %v1267_v36 = vadd.f32 %v1266_v6, %v1172_v28  ;;  %1512 = vst [vmem:[%s2413_s29 + $0x20] sm:$0xff] %v1790_v20  ;;  %v1130_v37 = vadd.f32 %v1129_v26, %v957_v29  ;;  %v1174_v38 = vmul.f32 %v957_v29, %v957_v29  ;;  %v1791_v39 = vpack.c.bf16 %v957_v29, %v955_v21 }
 0x131   : > { %v1231_v40 = vadd.f32 %v1230_v30, %v1173_v32  ;;  %v2473_v44 = vadd.f32 %v1036_v24, %v2398_v5  ;;  %1528 = vst [vmem:[%s2413_s29 + $0xa0] sm:$0xff] %v1806_v42 }
 0x132   : > { %v1268_v23 = vadd.f32 %v1267_v36, %v1174_v38  ;;  %1513 = vst [vmem:[%s2413_s29 + $0x28] sm:$0xff] %v1791_v39  ;;  %v960_v43 = vpop.f32.mrb[12].mxu0  ;;  %v1040_v45 = vpop.f32.mrb[12].mxu1 }
 0x133   : > { %v961_v47 = vadd.f32 %v960_v43, %v2395_v51  ;;  %v962_v48 = vpop.f32.mrb[13].mxu0  ;;  %v1042_v49 = vpop.f32.mrb[13].mxu1  ;;  %v1807_v11 = vpack.c.bf16 %v2473_v44, %v2466_v33  ;;  %v2481_v56 = vadd.f32 %v1040_v45, %v2395_v51 }
 0x134   : > { %v963_v50 = vadd.f32 %v962_v48, %v2398_v5  ;;  %v964_v53 = vpop.f32.mrb[14].mxu0  ;;  %v1044_v54 = vpop.f32.mrb[14].mxu1  ;;  %v2485_v61 = vadd.f32 %v1042_v49, %v2398_v5 }
 0x135   : > { %v1094_v58 = vadd.f32 %v1093_v31, %v961_v47  ;;  %v1175_v25 = vmul.f32 %v961_v47, %v961_v47  ;;  %v965_v59 = vadd.f32 %v964_v53, %v2395_v51  ;;  %v966_v60 = vpop.f32.mrb[15].mxu0  ;;  %v1046_v62 = vpop.f32.mrb[15].mxu1  ;;  %1529 = vst [vmem:[%s2413_s29 + $0xa8] sm:$0xff] %v1807_v11  ;;  %v2493_v16 = vadd.f32 %v1044_v54, %v2395_v51 }
 0x136   : > { %v1131_v63 = vadd.f32 %v1130_v37, %v963_v50  ;;  %v1176_v0 = vmul.f32 %v963_v50, %v963_v50  ;;  %v1792_v1 = vpack.c.bf16 %v963_v50, %v961_v47  ;;  %v967_v2 = vadd.f32 %v966_v60, %v2398_v5 }
 0x137   : > { %v1232_v41 = vadd.f32 %v1231_v40, %v1175_v25  ;;  %v1095_v6 = vadd.f32 %v1094_v58, %v965_v59  ;;  %v1177_v7 = vmul.f32 %v965_v59, %v965_v59  ;;  %v1808_v13 = vpack.c.bf16 %v2485_v61, %v2481_v56 }
 0x138   : > { %v1269_v8 = vadd.f32 %v1268_v23, %v1176_v0  ;;  %1514 = vst [vmem:[%s2413_s29 + $0x30] sm:$0xff] %v1792_v1  ;;  %v1132_v10 = vadd.f32 %v1131_v63, %v967_v2  ;;  %v1178_v52 = vmul.f32 %v967_v2, %v967_v2  ;;  %v1793_v9 = vpack.c.bf16 %v967_v2, %v965_v59 }
 0x139   : > { %v1233_v12 = vadd.f32 %v1232_v41, %v1177_v7  ;;  %v2496_v18 = vadd.f32 %v1046_v62, %v2398_v5  ;;  %1530 = vst [vmem:[%s2413_s29 + $0xb0] sm:$0xff] %v1808_v13 }
 0x13a   : > { %v1270_v34 = vadd.f32 %v1269_v8, %v1178_v52  ;;  %1515 = vst [vmem:[%s2413_s29 + $0x38] sm:$0xff] %v1793_v9  ;;  %v970_v14 = vpop.f32.mrb[16].mxu0  ;;  %v1050_v21 = vpop.f32.mrb[16].mxu1 }
 0x13b   : > { %v971_v22 = vadd.f32 %v970_v14, %v2395_v51  ;;  %v972_v24 = vpop.f32.mrb[17].mxu0  ;;  %v1809_v26 = vpack.c.bf16 %v2496_v18, %v2493_v16  ;;  %v1052_v28 = vpop.f32.mrb[17].mxu1  ;;  %v2505_v30 = vadd.f32 %v1050_v21, %v2395_v51 }
 0x13c   : > { %v973_v20 = vadd.f32 %v972_v24, %v2398_v5  ;;  %v974_v29 = vpop.f32.mrb[18].mxu0  ;;  %v1054_v31 = vpop.f32.mrb[18].mxu1  ;;  %v2510_v39 = vadd.f32 %v1052_v28, %v2398_v5 }
 0x13d   : > { %v1096_v32 = vadd.f32 %v1095_v6, %v971_v22  ;;  %v1179_v36 = vmul.f32 %v971_v22, %v971_v22  ;;  %v975_v37 = vadd.f32 %v974_v29, %v2395_v51  ;;  %v976_v38 = vpop.f32.mrb[19].mxu0  ;;  %1531 = vst [vmem:[%s2413_s29 + $0xb8] sm:$0xff] %v1809_v26  ;;  %v1056_v40 = vpop.f32.mrb[19].mxu1  ;;  %v2514_v50 = vadd.f32 %v1054_v31, %v2395_v51 }
 0x13e   : > { %v1133_v42 = vadd.f32 %v1132_v10, %v973_v20  ;;  %v1180_v23 = vmul.f32 %v973_v20, %v973_v20  ;;  %v1794_v43 = vpack.c.bf16 %v973_v20, %v971_v22  ;;  %v977_v45 = vadd.f32 %v976_v38, %v2398_v5 }
 0x13f   : > { %v1234_v47 = vadd.f32 %v1233_v12, %v1179_v36  ;;  %v1097_v48 = vadd.f32 %v1096_v32, %v975_v37  ;;  %v1181_v49 = vmul.f32 %v975_v37, %v975_v37  ;;  %v1810_v59 = vpack.c.bf16 %v2510_v39, %v2505_v30 }
 0x140   : > { %v1271_v53 = vadd.f32 %v1270_v34, %v1180_v23  ;;  %1516 = vst [vmem:[%s2413_s29 + $0x40] sm:$0xff] %v1794_v43  ;;  %v1134_v11 = vadd.f32 %v1133_v42, %v977_v45  ;;  %v1182_v54 = vmul.f32 %v977_v45, %v977_v45  ;;  %v1795_v58 = vpack.c.bf16 %v977_v45, %v975_v37 }
 0x141   : > { %v1235_v25 = vadd.f32 %v1234_v47, %v1181_v49  ;;  %v2521_v63 = vadd.f32 %v1056_v40, %v2398_v5  ;;  %1532 = vst [vmem:[%s2413_s29 + $0xc0] sm:$0xff] %v1810_v59 }
 0x142   : > { %v1272_v60 = vadd.f32 %v1271_v53, %v1182_v54  ;;  %1517 = vst [vmem:[%s2413_s29 + $0x48] sm:$0xff] %v1795_v58  ;;  %v980_v62 = vpop.f32.mrb[20].mxu0  ;;  %v1060_v0 = vpop.f32.mrb[20].mxu1 }
 0x143   : > { %v981_v1 = vadd.f32 %v980_v62, %v2395_v51  ;;  %v982_v2 = vpop.f32.mrb[21].mxu0  ;;  %v1062_v41 = vpop.f32.mrb[21].mxu1  ;;  %v1811_v8 = vpack.c.bf16 %v2521_v63, %v2514_v50  ;;  %v2529_v10 = vadd.f32 %v1060_v0, %v2395_v51 }
 0x144   : > { %v983_v6 = vadd.f32 %v982_v2, %v2398_v5  ;;  %v984_v7 = vpop.f32.mrb[22].mxu0  ;;  %v1064_v52 = vpop.f32.mrb[22].mxu1  ;;  %v2533_v14 = vadd.f32 %v1062_v41, %v2398_v5 }
 0x145   : > { %v1098_v9 = vadd.f32 %v1097_v48, %v981_v1  ;;  %v1183_v12 = vmul.f32 %v981_v1, %v981_v1  ;;  %v985_v13 = vadd.f32 %v984_v7, %v2395_v51  ;;  %v986_v34 = vpop.f32.mrb[23].mxu0  ;;  %v1066_v21 = vpop.f32.mrb[23].mxu1  ;;  %1533 = vst [vmem:[%s2413_s29 + $0xc8] sm:$0xff] %v1811_v8  ;;  %v2541_v23 = vadd.f32 %v1064_v52, %v2395_v51 }
 0x146   : > { %v1135_v22 = vadd.f32 %v1134_v11, %v983_v6  ;;  %v1184_v24 = vmul.f32 %v983_v6, %v983_v6  ;;  %v1796_v26 = vpack.c.bf16 %v983_v6, %v981_v1  ;;  %v987_v28 = vadd.f32 %v986_v34, %v2398_v5 }
 0x147   : > { %v1236_v20 = vadd.f32 %v1235_v25, %v1183_v12  ;;  %v1099_v29 = vadd.f32 %v1098_v9, %v985_v13  ;;  %v1185_v31 = vmul.f32 %v985_v13, %v985_v13  ;;  %v1812_v42 = vpack.c.bf16 %v2533_v14, %v2529_v10 }
 0x148   : > { %v1273_v32 = vadd.f32 %v1272_v60, %v1184_v24  ;;  %1518 = vst [vmem:[%s2413_s29 + $0x50] sm:$0xff] %v1796_v26  ;;  %v1136_v36 = vadd.f32 %v1135_v22, %v987_v28  ;;  %v1186_v37 = vmul.f32 %v987_v28, %v987_v28  ;;  %v1797_v38 = vpack.c.bf16 %v987_v28, %v985_v13 }
 0x149   : > { %v1237_v40 = vadd.f32 %v1236_v20, %v1185_v31  ;;  %v2544_v43 = vadd.f32 %v1066_v21, %v2398_v5  ;;  %1534 = vst [vmem:[%s2413_s29 + $0xd0] sm:$0xff] %v1812_v42 }
 0x14a   : > { %v1274_v45 = vadd.f32 %v1273_v32, %v1186_v37  ;;  %1519 = vst [vmem:[%s2413_s29 + $0x58] sm:$0xff] %v1797_v38  ;;  %v990_v47 = vpop.f32.mrb[24].mxu0  ;;  %v1070_v48 = vpop.f32.mrb[24].mxu1 }
 0x14b   : > { %v991_v49 = vadd.f32 %v990_v47, %v2395_v51  ;;  %v992_v53 = vpop.f32.mrb[25].mxu0  ;;  %v1813_v11 = vpack.c.bf16 %v2544_v43, %v2541_v23  ;;  %v1072_v54 = vpop.f32.mrb[25].mxu1  ;;  %v2553_v59 = vadd.f32 %v1070_v48, %v2395_v51 }
 0x14c   : > { %v993_v58 = vadd.f32 %v992_v53, %v2398_v5  ;;  %v994_v25 = vpop.f32.mrb[26].mxu0  ;;  %v1074_v60 = vpop.f32.mrb[26].mxu1  ;;  %v2558_v41 = vadd.f32 %v1072_v54, %v2398_v5 }
 0x14d   : > { %v1100_v62 = vadd.f32 %v1099_v29, %v991_v49  ;;  %v1187_v0 = vmul.f32 %v991_v49, %v991_v49  ;;  %v995_v1 = vadd.f32 %v994_v25, %v2395_v51  ;;  %v996_v2 = vpop.f32.mrb[27].mxu0  ;;  %1535 = vst [vmem:[%s2413_s29 + $0xd8] sm:$0xff] %v1813_v11  ;;  %v1076_v6 = vpop.f32.mrb[27].mxu1  ;;  %v2562_v21 = vadd.f32 %v1074_v60, %v2395_v51 }
 0x14e   : > { %v1137_v7 = vadd.f32 %v1136_v36, %v993_v58  ;;  %v1188_v8 = vmul.f32 %v993_v58, %v993_v58  ;;  %v1798_v52 = vpack.c.bf16 %v993_v58, %v991_v49  ;;  %v997_v9 = vadd.f32 %v996_v2, %v2398_v5 }
 0x14f   : > { %v1238_v12 = vadd.f32 %v1237_v40, %v1187_v0  ;;  %v1101_v13 = vadd.f32 %v1100_v62, %v995_v1  ;;  %v1189_v34 = vmul.f32 %v995_v1, %v995_v1  ;;  %v1814_v29 = vpack.c.bf16 %v2558_v41, %v2553_v59 }
 0x150   : > { %v1275_v22 = vadd.f32 %v1274_v45, %v1188_v8  ;;  %1520 = vst [vmem:[%s2413_s29 + $0x60] sm:$0xff] %v1798_v52  ;;  %v1138_v24 = vadd.f32 %v1137_v7, %v997_v9  ;;  %v1190_v26 = vmul.f32 %v997_v9, %v997_v9  ;;  %v1799_v28 = vpack.c.bf16 %v997_v9, %v995_v1 }
 0x151   : > { %v1239_v20 = vadd.f32 %v1238_v12, %v1189_v34  ;;  %v2569_v36 = vadd.f32 %v1076_v6, %v2398_v5  ;;  %1536 = vst [vmem:[%s2413_s29 + $0xe0] sm:$0xff] %v1814_v29  ;;  %v1195_v7 = vmul.f32 %v2402_v15, %v2402_v15 }
 0x152   : > { %v1276_v31 = vadd.f32 %v1275_v22, %v1190_v26  ;;  %1521 = vst [vmem:[%s2413_s29 + $0x68] sm:$0xff] %v1799_v28  ;;  %v1000_v32 = vpop.f32.mrb[28].mxu0  ;;  %v1080_v37 = vpop.f32.mrb[28].mxu1 }
 0x153   : > { %v1001_v38 = vadd.f32 %v1000_v32, %v2395_v51  ;;  %v1002_v40 = vpop.f32.mrb[29].mxu0  ;;  %v1082_v42 = vpop.f32.mrb[29].mxu1  ;;  %v1815_v48 = vpack.c.bf16 %v2569_v36, %v2562_v21  ;;  %v2577_v49 = vadd.f32 %v1080_v37, %v2395_v51 }
 0x154   : > { %v1003_v45 = vadd.f32 %v1002_v40, %v2398_v5  ;;  %v1004_v47 = vpop.f32.mrb[30].mxu0  ;;  %v1084_v53 = vpop.f32.mrb[30].mxu1  ;;  %v2581_v60 = vadd.f32 %v1082_v42, %v2398_v5 }
 0x155   : > { %v1102_v11 = vadd.f32 %v1101_v13, %v1001_v38  ;;  %v1191_v54 = vmul.f32 %v1001_v38, %v1001_v38  ;;  %v1005_v58 = vadd.f32 %v1004_v47, %v2395_v51  ;;  %v1006_v25 = vpop.f32.mrb[31].mxu0  ;;  %v1086_v62 = vpop.f32.mrb[31].mxu1  ;;  %1537 = vst [vmem:[%s2413_s29 + $0xe8] sm:$0xff] %v1815_v48  ;;  %v2592_v29 = vadd.f32 %v1084_v53, %v2395_v51 }
 0x156   : > { %v1139_v0 = vadd.f32 %v1138_v24, %v1003_v45  ;;  %v1192_v1 = vmul.f32 %v1003_v45, %v1003_v45  ;;  %v1800_v2 = vpack.c.bf16 %v1003_v45, %v1001_v38  ;;  %v1007_v6 = vadd.f32 %v1006_v25, %v2398_v5 }
 0x157   : > { %v1240_v8 = vadd.f32 %v1239_v20, %v1191_v54  ;;  %v1103_v52 = vadd.f32 %v1102_v11, %v1005_v58  ;;  %v1193_v9 = vmul.f32 %v1005_v58, %v1005_v58  ;;  %v1816_v28 = vpack.c.bf16 %v2581_v60, %v2577_v49 }
 0x158   : > { %v1277_v12 = vadd.f32 %v1276_v31, %v1192_v1  ;;  %1522 = vst [vmem:[%s2413_s29 + $0x70] sm:$0xff] %v1800_v2  ;;  %v1140_v13 = vadd.f32 %v1139_v0, %v1007_v6  ;;  %v1194_v34 = vmul.f32 %v1007_v6, %v1007_v6  ;;  %v1801_v22 = vpack.c.bf16 %v1007_v6, %v1005_v58 }
 0x159   : > { %v1104_v24 = vadd.f32 %v1103_v52, %v2402_v15  ;;  %v1241_v26 = vadd.f32 %v1240_v8, %v1193_v9  ;;  %v1196_v20 = vmul.f32 %v2406_v19, %v2406_v19  ;;  %v2599_v37 = vadd.f32 %v1086_v62, %v2398_v5  ;;  %1538 = vst [vmem:[%s2413_s29 + $0xf0] sm:$0xff] %v1816_v28 }
 0x15a   : > { %v1141_v32 = vadd.f32 %v1140_v13, %v2406_v19  ;;  %v1278_v31 = vadd.f32 %v1277_v12, %v1194_v34  ;;  %1523 = vst [vmem:[%s2413_s29 + $0x78] sm:$0xff] %v1801_v22  ;;  %v1197_v15 = vmul.f32 %v2418_v27, %v2418_v27  ;;  %v1198_v51 = vmul.f32 %v2424_v35, %v2424_v35 }
 0x15b   : > { %v1105_v38 = vadd.f32 %v1104_v24, %v2418_v27  ;;  %v1242_v40 = vadd.f32 %v1241_v26, %v1195_v7  ;;  %v1817_v19 = vpack.c.bf16 %v2599_v37, %v2592_v29  ;;  %v1199_v5 = vmul.f32 %v2434_v57, %v2434_v57 }
 0x15c   : > { %v1142_v42 = vadd.f32 %v1141_v32, %v2424_v35  ;;  %v1279_v45 = vadd.f32 %v1278_v31, %v1196_v20  ;;  %v1200_v27 = vmul.f32 %v2438_v55, %v2438_v55  ;;  %v1201_v35 = vmul.f32 %v2445_v3, %v2445_v3 }
 0x15d   : > { %v1106_v47 = vadd.f32 %v1105_v38, %v2434_v57  ;;  %v1243_v48 = vadd.f32 %v1242_v40, %v1197_v15  ;;  %1539 = vst [vmem:[%s2413_s29 + $0xf8] sm:$0xff] %v1817_v19  ;;  %v1202_v25 = vmul.f32 %v2448_v4, %v2448_v4  ;;  %v1203_v0 = vmul.f32 %v2457_v17, %v2457_v17 }
 0x15e   : > { %v1143_v53 = vadd.f32 %v1142_v42, %v2438_v55  ;;  %v1280_v11 = vadd.f32 %v1279_v45, %v1198_v51  ;;  %v1204_v2 = vmul.f32 %v2462_v46, %v2462_v46  ;;  %v1211_v31 = vmul.f32 %v2505_v30, %v2505_v30 }
 0x15f   : > { %v1107_v54 = vadd.f32 %v1106_v47, %v2445_v3  ;;  %v1244_v58 = vadd.f32 %v1243_v48, %v1199_v5  ;;  %v1205_v3 = vmul.f32 %v2466_v33, %v2466_v33  ;;  %v1212_v38 = vmul.f32 %v2510_v39, %v2510_v39 }
 0x160   : > { %v1144_v62 = vadd.f32 %v1143_v53, %v2448_v4  ;;  %v1281_v57 = vadd.f32 %v1280_v11, %v1200_v27  ;;  %v1206_v4 = vmul.f32 %v2473_v44, %v2473_v44  ;;  %v1213_v42 = vmul.f32 %v2514_v50, %v2514_v50 }
 0x161   : > { %v1245_v1 = vadd.f32 %v1244_v58, %v1201_v35  ;;  %v1108_v55 = vadd.f32 %v1107_v54, %v2457_v17  ;;  %v1207_v17 = vmul.f32 %v2481_v56, %v2481_v56  ;;  %v1214_v19 = vmul.f32 %v2521_v63, %v2521_v63 }
 0x162   : > { %v1282_v6 = vadd.f32 %v1281_v57, %v1202_v25  ;;  %v1145_v7 = vadd.f32 %v1144_v62, %v2462_v46  ;;  %v1208_v46 = vmul.f32 %v2485_v61, %v2485_v61  ;;  %v1215_v47 = vmul.f32 %v2529_v10, %v2529_v10 }
 0x163   : > { %v1109_v8 = vadd.f32 %v1108_v55, %v2466_v33  ;;  %v1246_v52 = vadd.f32 %v1245_v1, %v1203_v0  ;;  %v1209_v33 = vmul.f32 %v2493_v16, %v2493_v16  ;;  %v1216_v27 = vmul.f32 %v2533_v14, %v2533_v14 }
 0x164   : > { %v1146_v9 = vadd.f32 %v1145_v7, %v2473_v44  ;;  %v1283_v12 = vadd.f32 %v1282_v6, %v1204_v2  ;;  %v1210_v44 = vmul.f32 %v2496_v18, %v2496_v18  ;;  %v1217_v11 = vmul.f32 %v2541_v23, %v2541_v23 }
 0x165   : > { %v1110_v13 = vadd.f32 %v1109_v8, %v2481_v56  ;;  %v1247_v34 = vadd.f32 %v1246_v52, %v1205_v3  ;;  %v1218_v54 = vmul.f32 %v2544_v43, %v2544_v43  ;;  %v1219_v25 = vmul.f32 %v2553_v59, %v2553_v59 }
 0x166   : > { %v1147_v22 = vadd.f32 %v1146_v9, %v2485_v61  ;;  %v1284_v24 = vadd.f32 %v1283_v12, %v1206_v4  ;;  %v1220_v57 = vmul.f32 %v2558_v41, %v2558_v41  ;;  %v1221_v1 = vmul.f32 %v2562_v21, %v2562_v21 }
 0x167   : > { %v1111_v26 = vadd.f32 %v1110_v13, %v2493_v16  ;;  %v1248_v28 = vadd.f32 %v1247_v34, %v1207_v17  ;;  %v1224_v6 = vmul.f32 %v2581_v60, %v2581_v60  ;;  %v1225_v4 = vmul.f32 %v2592_v29, %v2592_v29 }
 0x168   : > { %v1148_v20 = vadd.f32 %v1147_v22, %v2496_v18  ;;  %v1285_v32 = vadd.f32 %v1284_v24, %v1208_v46 }
 0x169   : > { %v1112_v56 = vadd.f32 %v1111_v26, %v2505_v30  ;;  %v1249_v15 = vadd.f32 %v1248_v28, %v1209_v33 }
 0x16a   : > { %v1149_v61 = vadd.f32 %v1148_v20, %v2510_v39  ;;  %v1286_v40 = vadd.f32 %v1285_v32, %v1210_v44 }
 0x16b   : > { %v1250_v16 = vadd.f32 %v1249_v15, %v1211_v31  ;;  %v1113_v51 = vadd.f32 %v1112_v56, %v2514_v50 }
 0x16c   : > { %v1287_v18 = vadd.f32 %v1286_v40, %v1212_v38  ;;  %v1150_v45 = vadd.f32 %v1149_v61, %v2521_v63 }
 0x16d   : > { %v1251_v30 = vadd.f32 %v1250_v16, %v1213_v42  ;;  %v1114_v5 = vadd.f32 %v1113_v51, %v2529_v10 }
 0x16e   : > { %v1288_v39 = vadd.f32 %v1287_v18, %v1214_v19  ;;  %v1151_v48 = vadd.f32 %v1150_v45, %v2533_v14 }
 0x16f   : > { %v1252_v53 = vadd.f32 %v1251_v30, %v1215_v47  ;;  %v1115_v50 = vadd.f32 %v1114_v5, %v2541_v23 }
 0x170   : > { %v1289_v35 = vadd.f32 %v1288_v39, %v1216_v27  ;;  %v1152_v63 = vadd.f32 %v1151_v48, %v2544_v43  ;;  %v1223_v43 = vmul.f32 %v2577_v49, %v2577_v49 }
 0x171   : > { %v1253_v58 = vadd.f32 %v1252_v53, %v1217_v11  ;;  %v1116_v10 = vadd.f32 %v1115_v50, %v2553_v59  ;;  %v1222_v59 = vmul.f32 %v2569_v36, %v2569_v36 }
 0x172   : > { %v1290_v62 = vadd.f32 %v1289_v35, %v1218_v54  ;;  %v1153_v14 = vadd.f32 %v1152_v63, %v2558_v41 }
 0x173   : > { %v1254_v0 = vadd.f32 %v1253_v58, %v1219_v25  ;;  %v1117_v23 = vadd.f32 %v1116_v10, %v2562_v21 }
 0x174   : > { %v1291_v55 = vadd.f32 %v1290_v62, %v1220_v57  ;;  %v1154_v2 = vadd.f32 %v1153_v14, %v2569_v36  ;;  %v1226_v36 = vmul.f32 %v2599_v37, %v2599_v37 }
 0x175   : > { %v1255_v7 = vadd.f32 %v1254_v0, %v1221_v1  ;;  %v1118_v41 = vadd.f32 %v1117_v23, %v2577_v49 }
 0x176   : > { %v1292_v3 = vadd.f32 %v1291_v55, %v1222_v59  ;;  %v1155_v8 = vadd.f32 %v1154_v2, %v2581_v60 }
 0x177   : > { %v1256_v52 = vadd.f32 %v1255_v7, %v1223_v43  ;;  %v1119_v21 = vadd.f32 %v1118_v41, %v2592_v29 }
 0x178   : > { %v1293_v9 = vadd.f32 %v1292_v3, %v1224_v6  ;;  %v1156_v12 = vadd.f32 %v1155_v8, %v2599_v37 }
 0x179   : > { %v1120_v17 = vrot.slane %v1119_v21, 4  ;;  %v1257_v13 = vadd.f32 %v1256_v52, %v1225_v4 }
 0x17a   : > { %v1157_v34 = vrot.slane %v1156_v12, 4  ;;  %v1294_v49 = vadd.f32 %v1293_v9, %v1226_v36 }
 0x17b   : > { %v1121_v46 = vadd.f32 %v1120_v17, %v1119_v21  ;;  %v1258_v60 = vrot.slane %v1257_v13, 4 }
 0x17c   : > { %v1158_v22 = vadd.f32 %v1157_v34, %v1156_v12  ;;  %v1295_v24 = vrot.slane %v1294_v49, 4 }
 0x17d   : > { %v1122_v33 = vrot.slane %v1121_v46, 2  ;;  %v1259_v26 = vadd.f32 %v1258_v60, %v1257_v13 }
 0x17e   : > { %v1159_v28 = vrot.slane %v1158_v22, 2  ;;  %v1296_v29 = vadd.f32 %v1295_v24, %v1294_v49 }
 0x17f   : > { %v1123_v44 = vadd.f32 %v1122_v33, %v1121_v46  ;;  %v1260_v20 = vrot.slane %v1259_v26, 2 }
 0x180   : > { %v1160_v32 = vadd.f32 %v1159_v28, %v1158_v22  ;;  %v1297_v56 = vrot.slane %v1296_v29, 2 }
 0x181   : > { %v1124_v31 = vrot.slane %v1123_v44, 1  ;;  %v1261_v37 = vadd.f32 %v1260_v20, %v1259_v26 }
 0x182   : > { %v1161_v15 = vrot.slane %v1160_v32, 1  ;;  %v1298_v61 = vadd.f32 %v1297_v56, %v1296_v29 }
 0x183   : > { %v1262_v38 = vrot.slane %v1261_v37, 1  ;;  %v1125_v16 = vadd.f32 %v1124_v31, %v1123_v44 }
 0x184   : > { %v1299_v40 = vrot.slane %v1298_v61, 1  ;;  %v1162_v42 = vadd.f32 %v1161_v15, %v1160_v32 }
 0x185   : > { %v1263_v51 = vadd.f32 %v1262_v38, %v1261_v37 }
 0x186   : > { %v1300_v18 = vadd.f32 %v1299_v40, %v1298_v61 }
 0x187   : > { %v1302_v45 = vsel %vm1301_vm0, %v1125_v16, %v1263_v51 }
 0x188   : > { %v1303_v19 = vsel %vm1301_vm0, %v1162_v42, %v1300_v18 }
 0x189   : > { %v1306_v30 = vcombine.low %v1302_v45, %v1303_v19 }
 0x18b   : > { %1748 = vst.sshfl [vmem:[%s346_s8] sm:$0x33 pattern:$0x76325410] %v1306_v30 }
 0x18c PF: > { %s17_s23 = sadd.s32 1, %s1944_s23   ;;  %s2716_s21 = smov %s1940_s22 }
 0x18d   : > { %p14_p6 = scmp.ge.s32.totalorder %s17_s23, 4   ;;  %s2717_s22 = smov %s2719_s24 }
 0x18f   :  { %16 = sbr.rel (!%p14_p6) target bundleno = 2 (0x2), region = 88 }

// kernel: projection_head.3
= control target key start
LH: loop header
LB: loop body
LE: loop exit
PB: predicated region body
PF: predicated region fallthrough
CT: control target
= control target key end

     0   :  { %10 = vsyncpa [#allocation3], 0  ;;  %s2367_s0 = inlined_call_operand.hbm [shape: f32[512,256], index: 0, kind: input, shape index: {}]   ;;  %s2368_s1 = inlined_call_operand.hbm [shape: bf16[256,256], index: 1, kind: input, shape index: {}]   ;;  %s2369_s2 = inlined_call_operand.vmem [shape: f32[1,256], index: 2, kind: input, shape index: {}]   ;;  %s2370_s3 = inlined_call_operand.vmem [shape: bf16[512,256], index: 3, kind: output, shape index: {0}]   ;;  %s2371_s4 = inlined_call_operand.vmem [shape: f32[2,2,256], index: 4, kind: output, shape index: {1}]  }
   0x1   :  { %12 = vsyncpa [#allocation3 + $0x1], 0 }
   0x2   :  { %13 = vsyncpa [#allocation5], 0  ;;  %s1842_s15 = smov 0   ;;  %s1844_s16 = smov 0  }
   0x3   :  { %s1846_s17 = smov 0   ;;  %s1848_s18 = smov 0  }
   0x4   :  { %s1850_s19 = smov 0   ;;  %s1852_s20 = smov 0  }
   0x5 LB: > { %s1426_s21 = sadd.s32 4294967295, %s1809_s20   ;;  %p51_p0 = scmp.ne.s32.totalorder %s1793_s16, %s1789_s15  ;;  %s1809_s20 = sphi %s1852_s20, %s19_s20   ;;  %s1805_s19 = sphi %s1850_s19, %s2388_s19   ;;  %s1801_s18 = sphi %s1848_s18, %s2387_s18   ;;  %s1797_s17 = sphi %s1846_s17, %s2386_s17   ;;  %s1793_s16 = sphi %s1844_s16, %s2385_s16   ;;  %s1789_s15 = sphi %s1842_s15, %s2384_s15  }
   0x6   : > { %p1872_p1 = scmp.eq.s32.totalorder %s1426_s21, 0  ;;  %p1428_p2 = scmp.ge.s32.totalorder %s1809_s20, 1 }
   0x7   : > { %p170_p3 = scmp.lt.s32.totalorder %s1809_s20, 3  ;;  %s1811_s25 = smov [#allocation4]  }
   0x8   : > { %s2376_s22 = scalar_select %p1872_p1, 1, 0 }
   0x9   : > { %p1880_p4 = por %p1872_p1, %p51_p0  ;;  %p1884_p5 = pnand %p1428_p2, %p170_p3 }
   0xa   : > { %s185_s26 = sshll.u32 %s1811_s25, 4  ;;  %s28_s28 = sadd.s32 1, %s1805_s19  ;;  %s186_s26 = int_to_ptr.vmem [resolvable:$true] %s185_s26 }
   0xb   : > { %s2377_s23 = scalar_select %p1880_p4, 1, 0 }
   0xc   : > { %s2378_s24 = scalar_select %p1884_p5, 1, 0 }
   0xd   : > { %p1585_p6 = pneg %p1884_p5  ;;  %s1697_s5 = scalar_lea.hbm %s2368_s1, 4096 }
   0xe   : > { %p1698_p8 = scmp.ne.s32.totalorder %s2368_s1, %s1697_s5  ;;  %p1704_p12 = scmp.lt.u32.totalorder %s1697_s5, %s2368_s1 }
   0xf   : > { %p1892_p7 = pnand %p1585_p6, %p1872_p1 }
  0x11   : > { %p1699_p9 = pneg %p1892_p7 }
  0x13   : > { %p1700_p10 = pnand %p1699_p9, %p1698_p8 }
  0x15   : > { %p1701_p11 = pneg %p1700_p10 }
  0x17   : > { %p1706_p13 = pnand %p1704_p12, %p1701_p11 }
  0x19   : > { %1709 = shalt.err (!%p1706_p13)
}
  0x1a   : > { %s1710_s10 = scalar_lea.vmem %s186_s26, 4096  ;;  %p1718_p6 = scmp.lt.s32.totalorder %s186_s26, %s186_s26 }
  0x1b   : > { %p1711_p0 = scmp.ne.s32.totalorder %s186_s26, %s1710_s10  ;;  %p1719_p1 = scmp.lt.s32.totalorder %s1710_s10, %s1710_s10 }
  0x1d   : > { %p1713_p2 = pnand %p1711_p0, %p1699_p9  ;;  %p1720_p4 = por %p1719_p1, %p1718_p6 }
  0x1f   : > { %p1714_p3 = pneg %p1713_p2 }
  0x21   : > { %p1721_p5 = pnand %p1720_p4, %p1714_p3 }
  0x23   : > { %1724 = shalt.err (!%p1721_p5)
}
  0x24   : > { %s1812_s11 = smov 128   ;;  %s1813_s12 = smov 8  }
  0x25   : > { %1588 = dma.hbm_to_vmem [thread:$0]  (!%p1892_p7), %s2368_s1, 4096, %s186_s26, [#allocation5], %s1812_s11, %s1812_s11, %s1813_s12  }
  0x26   : > { %p29_p1 = scmp.ge.s32.totalorder %s28_s28, 2  ;;  %s38_s15 = sadd.s32 1, %s1797_s17 }
  0x27   : > { %p45_p4 = scmp.ne.s32.totalorder %s1797_s17, %s1793_s16  ;;  %p46_p5 = scmp.eq.s32.totalorder %s1809_s20, 0 }
  0x28   : > { %s2390_s28 = smov (%p29_p1, %s28_s28), 0  ;;  %p1594_p9 = scmp.lt.s32.totalorder %s1809_s20, 2 }
  0x29   : > { %p47_p8 = por %p46_p5, %p45_p4  ;;  %s35_s21 = ssub.s32 %s1805_s19, %s2390_s28 }
  0x2a   : > { %s207_s25 = sand.u32 1, %s1797_s17   ;;  %p36_p10 = scmp.eq.s32.totalorder %s35_s21, 0 }
  0x2b   : > { %s1432_s29 = sshll.u32 %s207_s25, 9  ;;  %s1512_s30 = sshll.u32 %s1805_s19, 13 }
  0x2c   : > { %s1925_s5 = scalar_select %p36_p10, %s1797_s17, %s38_s15  }
  0x2d   : > { %s1930_s26 = scalar_lea.hbm %s2367_s0, %s1512_s30  ;;  %s211_s7 = scalar_lea.vmem [#allocation2], %s1432_s29 }
  0x2e   : > { %s219_s8 = sshll.u32 %s211_s7, 4  ;;  %p1932_p7 = pnand %p1594_p9, %p47_p8  ;;  %s1936_s8 = int_to_ptr.vmem [resolvable:$true] %s219_s8 }
  0x2f   : > { %s1938_s10 = scalar_lea.sflag [#allocation3], %s207_s25  ;;  %s1725_s11 = scalar_lea.hbm %s1930_s26, 8192 }
  0x30   : > { %p1726_p11 = scmp.ne.s32.totalorder %s1930_s26, %s1725_s11  ;;  %p1727_p12 = pneg %p1932_p7 }
  0x31   : > { %s1730_s14 = scalar_lea.hbm %s2367_s0, 16384  ;;  %p1731_p2 = scmp.lt.u32.totalorder %s1930_s26, %s2367_s0 }
  0x32   : > { %p1728_p13 = pnand %p1727_p12, %p1726_p11  ;;  %p1732_p3 = scmp.lt.u32.totalorder %s1730_s14, %s1725_s11 }
  0x33   : > { %p1734_p1 = scmp.lt.u32.totalorder %s1725_s11, %s1930_s26 }
  0x34   : > { %p1729_p0 = pneg %p1728_p13  ;;  %p1733_p6 = por %p1732_p3, %p1731_p2 }
  0x36   : > { %p1735_p4 = por %p1734_p1, %p1733_p6 }
  0x38   : > { %p1736_p5 = pnand %p1735_p4, %p1729_p0 }
  0x3a   : > { %1739 = shalt.err (!%p1736_p5)
}
  0x3b   : > { %s1740_s25 = scalar_lea.vmem %s1936_s8, 8192  ;;  %s1814_s29 = smov [#allocation2]  }
  0x3c   : > { %p1741_p8 = scmp.ne.s32.totalorder %s1936_s8, %s1740_s25  ;;  %s1745_s30 = sshll.u32 %s1814_s29, 4  ;;  %s1746_s30 = int_to_ptr.vmem [resolvable:$false] %s1745_s30 }
  0x3d   : > { %s1747_s27 = scalar_lea.vmem %s1746_s30, 16384  ;;  %p1748_p11 = scmp.lt.s32.totalorder %s1936_s8, %s1746_s30 }
  0x3e   : > { %p1743_p9 = pnand %p1741_p8, %p1727_p12  ;;  %p1749_p13 = scmp.lt.s32.totalorder %s1747_s27, %s1740_s25 }
  0x40   : > { %p1744_p10 = pneg %p1743_p9  ;;  %p1750_p2 = por %p1749_p13, %p1748_p11 }
  0x42   : > { %p1751_p3 = pnand %p1750_p2, %p1744_p10 }
  0x44   : > { %1754 = shalt.err (!%p1751_p3)
}
  0x45   : > { %s1815_s6 = smov 256   ;;  %s1816_s7 = smov 16  }
  0x46   : > { %1592 = dma.hbm_to_vmem [thread:$0]  (!%p1932_p7), %s1930_s26, 8192, %s1936_s8, %s1938_s10, %s1815_s6, %s1815_s6, %s1816_s7  }
  0x47   : > { %p2381_p12 = scmp.ne.s32.totalorder %s2378_s24, 0 }
  0x48   : > { %s233_s11 = sand.u32 (!%p2381_p12), 1, %s1793_s16   ;;  %p2382_p0 = scmp.ne.s32.totalorder (!%p2381_p12), %s2377_s23, 0 }
  0x49   : > { %231 = sbr.rel (%p2381_p12) target bundleno = 474 (0x1da), region = 32  ;;  %s1437_s12 = sshll.u32 (!%p2381_p12), %s233_s11, 9 }
  0x4a   : > { %s234_s13 = scalar_lea.sflag (!%p2381_p12), [#allocation3], %s233_s11  ;;  %s1969_s14 = scalar_lea.vmem (!%p2381_p12), [#allocation2], %s1437_s12 }
  0x50   : > { %1780 = dma.done.wait (%p2382_p0), %s234_s13, 8192  }
  0x51   : > { %1782 = vsyncadd (%p2382_p0), %s234_s13, 4294959104  ;;  %p2383_p6 = scmp.ne.s32.totalorder %s2376_s22, 0 }
  0x53   : > { %1784 = dma.done.wait (%p2383_p6), [#allocation5], 4096  }
  0x54   : > { %1786 = vsyncadd (%p2383_p6), [#allocation5], 4294963200  ;;  %v1649_v0 = vld [vmem:[#allocation4 + $0x4] ss:$8 sps:$4 sm:$0xff]   ;;  %v1651_v1 = vld [vmem:[#allocation4] ss:$8 sps:$4 sm:$0xff]  }
  0x55   : > { %613 = vmatprep.subr.bf16.mxu0 %v1649_v0  ;;  %v1652_v2 = vld [vmem:[#allocation4 + $0x14] ss:$8 sps:$4 sm:$0xff]   ;;  %1547 = vmatprep.subr.bf16.mxu1 %v1649_v0  ;;  %v1654_v3 = vld [vmem:[#allocation4 + $0x10] ss:$8 sps:$4 sm:$0xff]   ;;  %v1655_v4 = vld [vmem:[#allocation4 + $0x24] ss:$8 sps:$4 sm:$0xff]  }
  0x56   : > { %614 = vmatpush1.bf16.msra.mxu0 %v1651_v1  ;;  %1563 = vmatpush1.bf16.msra.mxu1 %v1651_v1  ;;  %v1657_v5 = vld [vmem:[#allocation4 + $0x20] ss:$8 sps:$4 sm:$0xff]   ;;  %v1658_v6 = vld [vmem:[#allocation4 + $0x34] ss:$8 sps:$4 sm:$0xff]   ;;  %v1660_v7 = vld [vmem:[#allocation4 + $0x30] ss:$8 sps:$4 sm:$0xff]  }
  0x57   : > { %615 = vmatprep.subr.bf16.mxu0 %v1652_v2  ;;  %1548 = vmatprep.subr.bf16.mxu1 %v1652_v2  ;;  %v1661_v8 = vld [vmem:[#allocation4 + $0x44] ss:$8 sps:$4 sm:$0xff]   ;;  %v1663_v9 = vld [vmem:[#allocation4 + $0x40] ss:$8 sps:$4 sm:$0xff]   ;;  %v1664_v10 = vld [vmem:[#allocation4 + $0x54] ss:$8 sps:$4 sm:$0xff]  }
  0x58   : > { %v1666_v11 = vld [vmem:[#allocation4 + $0x50] ss:$8 sps:$4 sm:$0xff]   ;;  %v1667_v12 = vld [vmem:[#allocation4 + $0x64] ss:$8 sps:$4 sm:$0xff]   ;;  %v1669_v16 = vld [vmem:[#allocation4 + $0x60] ss:$8 sps:$4 sm:$0xff]  }
  0x59   : > { %v314_v13 = vld [vmem:[%s1969_s14 + $0x8] sm:$0xff]  ;;  %v316_v14 = vld [vmem:[%s1969_s14 + $0x18] sm:$0xff]  ;;  %v313_v38 = vld [vmem:[%s1969_s14] sm:$0xff]  ;;  %s1439_s22 = sshll.u32 %s1801_s18, 5  ;;  %p304_p1 = scmp.lt.s32.totalorder %s1801_s18, 1  ;;  %vm1018_vm0 = vcmask 1040384  }
  0x5a   : > { %616 = vmatpush1.bf16.msra.mxu0 %v1654_v3  ;;  %1564 = vmatpush1.bf16.msra.mxu1 %v1654_v3  ;;  %v378_v15 = vpack.c.bf16 %v316_v14, %v314_v13  ;;  %v1670_v17 = vld [vmem:[#allocation4 + $0x74] ss:$8 sps:$4 sm:$0xff]   ;;  %v346_v18 = vld [vmem:[%s1969_s14 + $0x108] sm:$0xff]  ;;  %v1672_v19 = vld [vmem:[#allocation4 + $0x70] ss:$8 sps:$4 sm:$0xff]   ;;  %p293_p7 = scmp.lt.s32.totalorder %s1439_s22, 63 }
  0x5b   : > { %617 = vmatprep.subr.bf16.mxu0 %v1655_v4  ;;  %1549 = vmatprep.subr.bf16.mxu1 %v1655_v4  ;;  %v348_v20 = vld [vmem:[%s1969_s14 + $0x118] sm:$0xff]  ;;  %v1673_v21 = vld [vmem:[#allocation4 + $0x84] ss:$8 sps:$4 sm:$0xff]   ;;  %v1675_v23 = vld [vmem:[#allocation4 + $0x80] ss:$8 sps:$4 sm:$0xff]   ;;  %s2394_s18 = smov (!%p304_p1, %s1801_s18), 1 }
  0x5c   : > { %645 = vmatprep.mubr.bf16.mxu0 %v378_v15  ;;  %v394_v22 = vpack.c.bf16 %v348_v20, %v346_v18  ;;  %v1676_v24 = vld [vmem:[#allocation4 + $0x94] ss:$8 sps:$4 sm:$0xff]   ;;  %v1678_v25 = vld [vmem:[#allocation4 + $0x90] ss:$8 sps:$4 sm:$0xff]   ;;  %v1679_v26 = vld [vmem:[#allocation4 + $0xa4] ss:$8 sps:$4 sm:$0xff]  }
  0x5d   : > { %v1681_v27 = vld [vmem:[#allocation4 + $0xa0] ss:$8 sps:$4 sm:$0xff]   ;;  %v1682_v28 = vld [vmem:[#allocation4 + $0xb4] ss:$8 sps:$4 sm:$0xff]   ;;  %v1684_v29 = vld [vmem:[#allocation4 + $0xb0] ss:$8 sps:$4 sm:$0xff]  }
  0x5e   : > { %618 = vmatpush1.bf16.msra.mxu0 %v1657_v5  ;;  %1565 = vmatpush1.bf16.msra.mxu1 %v1657_v5  ;;  %v1685_v30 = vld [vmem:[#allocation4 + $0xc4] ss:$8 sps:$4 sm:$0xff]   ;;  %v1687_v31 = vld [vmem:[#allocation4 + $0xc0] ss:$8 sps:$4 sm:$0xff]   ;;  %v1688_v32 = vld [vmem:[#allocation4 + $0xd4] ss:$8 sps:$4 sm:$0xff]  }
  0x5f   : > { %619 = vmatprep.subr.bf16.mxu0 %v1658_v6  ;;  %1550 = vmatprep.subr.bf16.mxu1 %v1658_v6  ;;  %v1690_v33 = vld [vmem:[#allocation4 + $0xd0] ss:$8 sps:$4 sm:$0xff]   ;;  %v1691_v34 = vld [vmem:[#allocation4 + $0xe4] ss:$8 sps:$4 sm:$0xff]   ;;  %v1693_v35 = vld [vmem:[#allocation4 + $0xe0] ss:$8 sps:$4 sm:$0xff]  }
  0x60   : > { %725 = vmatprep.mubr.bf16.mxu1 %v394_v22  ;;  %v1694_v36 = vld [vmem:[#allocation4 + $0xf4] ss:$8 sps:$4 sm:$0xff]   ;;  %v1696_v37 = vld [vmem:[#allocation4 + $0xf0] ss:$8 sps:$4 sm:$0xff]   ;;  %v318_v40 = vld [vmem:[%s1969_s14 + $0x28] sm:$0xff]  ;;  %s2392_s22 = smov (!%p293_p7, %s1439_s22), 63 }
  0x61   : > { %v315_v39 = vld [vmem:[%s1969_s14 + $0x10] sm:$0xff]  ;;  %v345_v41 = vld [vmem:[%s1969_s14 + $0x100] sm:$0xff]  ;;  %v320_v43 = vld [vmem:[%s1969_s14 + $0x38] sm:$0xff]  ;;  %s1513_s26 = sshll.u32 %s2392_s22, 3  ;;  %s1514_s15 = sshll.u32 %s2394_s18, 2 }
  0x62   : > { %620 = vmatpush1.bf16.msra.mxu0 %v1660_v7  ;;  %1566 = vmatpush1.bf16.msra.mxu1 %v1660_v7  ;;  %v347_v42 = vld [vmem:[%s1969_s14 + $0x110] sm:$0xff]  ;;  %v350_v44 = vld [vmem:[%s1969_s14 + $0x128] sm:$0xff]  ;;  %v352_v45 = vld [vmem:[%s1969_s14 + $0x138] sm:$0xff]  ;;  %v377_v46 = vpack.c.bf16 %v315_v39, %v313_v38  ;;  %v380_v48 = vpack.c.bf16 %v320_v43, %v318_v40  ;;  %s2062_s10 = scalar_lea.vmem %s2370_s3, %s1513_s26  ;;  %s311_s29 = scalar_lea.vmem %s2371_s4, %s1514_s15 }
  0x63   : > { %621 = vmatprep.subr.bf16.mxu0 %v1661_v8  ;;  %1551 = vmatprep.subr.bf16.mxu1 %v1661_v8  ;;  %v393_v47 = vpack.c.bf16 %v347_v42, %v345_v41  ;;  %v396_v49 = vpack.c.bf16 %v352_v45, %v350_v44  ;;  %v317_v50 = vld [vmem:[%s1969_s14 + $0x20] sm:$0xff]  ;;  %v319_v51 = vld [vmem:[%s1969_s14 + $0x30] sm:$0xff]  ;;  %v322_v52 = vld [vmem:[%s1969_s14 + $0x48] sm:$0xff] }
  0x64   : > { %v349_v53 = vld [vmem:[%s1969_s14 + $0x120] sm:$0xff]  ;;  %v351_v54 = vld [vmem:[%s1969_s14 + $0x130] sm:$0xff]  ;;  %v324_v55 = vld [vmem:[%s1969_s14 + $0x58] sm:$0xff]  ;;  %v379_v58 = vpack.c.bf16 %v319_v51, %v317_v50 }
  0x65   : > { %v354_v56 = vld [vmem:[%s1969_s14 + $0x148] sm:$0xff]  ;;  %v356_v57 = vld [vmem:[%s1969_s14 + $0x158] sm:$0xff]  ;;  %v395_v59 = vpack.c.bf16 %v351_v54, %v349_v53  ;;  %v382_v60 = vpack.c.bf16 %v324_v55, %v322_v52  ;;  %v321_v62 = vld [vmem:[%s1969_s14 + $0x40] sm:$0xff] }
  0x66   : > { %622 = vmatpush1.bf16.msra.mxu0 %v1663_v9  ;;  %1567 = vmatpush1.bf16.msra.mxu1 %v1663_v9  ;;  %v398_v61 = vpack.c.bf16 %v356_v57, %v354_v56  ;;  %v323_v63 = vld [vmem:[%s1969_s14 + $0x50] sm:$0xff]  ;;  %v326_v0 = vld [vmem:[%s1969_s14 + $0x68] sm:$0xff]  ;;  %v353_v1 = vld [vmem:[%s1969_s14 + $0x140] sm:$0xff] }
  0x67   : > { %623 = vmatprep.subr.bf16.mxu0 %v1664_v10  ;;  %1552 = vmatprep.subr.bf16.mxu1 %v1664_v10  ;;  %v355_v2 = vld [vmem:[%s1969_s14 + $0x150] sm:$0xff]  ;;  %v328_v3 = vld [vmem:[%s1969_s14 + $0x78] sm:$0xff]  ;;  %v358_v4 = vld [vmem:[%s1969_s14 + $0x168] sm:$0xff]  ;;  %v381_v6 = vpack.c.bf16 %v323_v63, %v321_v62 }
  0x68   : > { %v360_v5 = vld [vmem:[%s1969_s14 + $0x178] sm:$0xff]  ;;  %v397_v7 = vpack.c.bf16 %v355_v2, %v353_v1  ;;  %v384_v8 = vpack.c.bf16 %v328_v3, %v326_v0  ;;  %v325_v10 = vld [vmem:[%s1969_s14 + $0x60] sm:$0xff]  ;;  %v359_v14 = vld [vmem:[%s1969_s14 + $0x170] sm:$0xff]  ;;  %v443_v0 = vlaneseq }
  0x69   : > { %v400_v9 = vpack.c.bf16 %v360_v5, %v358_v4  ;;  %v357_v13 = vld [vmem:[%s1969_s14 + $0x160] sm:$0xff]  ;;  %v332_v15 = vld [vmem:[%s1969_s14 + $0x98] sm:$0xff]  ;;  %v367_v38 = vld [vmem:[%s1969_s14 + $0x1b0] sm:$0xff] }
  0x6a   : > { %624 = vmatpush1.bf16.msra.mxu0 %v1666_v11  ;;  %1568 = vmatpush1.bf16.msra.mxu1 %v1666_v11  ;;  %v327_v11 = vld [vmem:[%s1969_s14 + $0x70] sm:$0xff]  ;;  %v329_v22 = vld [vmem:[%s1969_s14 + $0x80] sm:$0xff]  ;;  %v340_v39 = vld [vmem:[%s1969_s14 + $0xd8] sm:$0xff]  ;;  %v444_v1 = vshrl.u32 %v443_v0, 7 }
  0x6b   : > { %625 = vmatprep.subr.bf16.mxu0 %v1667_v12  ;;  %1553 = vmatprep.subr.bf16.mxu1 %v1667_v12  ;;  %v330_v12 = vld [vmem:[%s1969_s14 + $0x88] sm:$0xff]  ;;  %v383_v18 = vpack.c.bf16 %v327_v11, %v325_v10  ;;  %v372_v41 = vld [vmem:[%s1969_s14 + $0x1d8] sm:$0xff]  ;;  %v371_v50 = vld [vmem:[%s1969_s14 + $0x1d0] sm:$0xff] }
  0x6c   : > { %v386_v20 = vpack.c.bf16 %v332_v15, %v330_v12  ;;  %v370_v40 = vld [vmem:[%s1969_s14 + $0x1c8] sm:$0xff]  ;;  %v344_v51 = vld [vmem:[%s1969_s14 + $0xf8] sm:$0xff]  ;;  %v445_v2 = vsub.s32 0, %v444_v1  ;;  %v441_v3 = vld [vmem:[%s2369_s2] sm:$0x3]  ;;  %v449_v4 = vsub.s32 1, %v444_v1 }
  0x6d   : > { %v406_v45 = vpack.c.bf16 %v372_v41, %v370_v40  ;;  %v374_v52 = vld [vmem:[%s1969_s14 + $0x1e8] sm:$0xff]  ;;  %v376_v53 = vld [vmem:[%s1969_s14 + $0x1f8] sm:$0xff] }
  0x6e   : > { %626 = vmatpush1.bf16.msra.mxu0 %v1669_v16  ;;  %1569 = vmatpush1.bf16.msra.mxu1 %v1669_v16  ;;  %v362_v16 = vld [vmem:[%s1969_s14 + $0x188] sm:$0xff]  ;;  %v408_v57 = vpack.c.bf16 %v376_v53, %v374_v52  ;;  %v2047_v5 = vrot.slane %v441_v3, %v445_v2 }
  0x6f   : > { %627 = vmatprep.subr.bf16.mxu0 %v1670_v17  ;;  %1554 = vmatprep.subr.bf16.mxu1 %v1670_v17  ;;  %v364_v17 = vld [vmem:[%s1969_s14 + $0x198] sm:$0xff] }
  0x72   : > { %628 = vmatpush1.bf16.msra.mxu0 %v1672_v19  ;;  %1570 = vmatpush1.bf16.msra.mxu1 %v1672_v19  ;;  %v399_v19 = vpack.c.bf16 %v359_v14, %v357_v13 }
  0x73   : > { %629 = vmatprep.subr.bf16.mxu0 %v1673_v21  ;;  %1555 = vmatprep.subr.bf16.mxu1 %v1673_v21  ;;  %v402_v21 = vpack.c.bf16 %v364_v17, %v362_v16 }
  0x76   : > { %630 = vmatpush1.bf16.msra.mxu0 %v1675_v23  ;;  %1571 = vmatpush1.bf16.msra.mxu1 %v1675_v23  ;;  %v331_v23 = vld [vmem:[%s1969_s14 + $0x90] sm:$0xff] }
  0x77   : > { %631 = vmatprep.subr.bf16.mxu0 %v1676_v24  ;;  %1556 = vmatprep.subr.bf16.mxu1 %v1676_v24  ;;  %v334_v24 = vld [vmem:[%s1969_s14 + $0xa8] sm:$0xff] }
  0x7a   : > { %632 = vmatpush1.bf16.msra.mxu0 %v1678_v25  ;;  %1572 = vmatpush1.bf16.msra.mxu1 %v1678_v25  ;;  %v361_v25 = vld [vmem:[%s1969_s14 + $0x180] sm:$0xff] }
  0x7b   : > { %633 = vmatprep.subr.bf16.mxu0 %v1679_v26  ;;  %1557 = vmatprep.subr.bf16.mxu1 %v1679_v26  ;;  %v363_v26 = vld [vmem:[%s1969_s14 + $0x190] sm:$0xff] }
  0x7e   : > { %634 = vmatpush1.bf16.msra.mxu0 %v1681_v27  ;;  %1573 = vmatpush1.bf16.msra.mxu1 %v1681_v27  ;;  %v336_v27 = vld [vmem:[%s1969_s14 + $0xb8] sm:$0xff] }
  0x7f   : > { %635 = vmatprep.subr.bf16.mxu0 %v1682_v28  ;;  %1558 = vmatprep.subr.bf16.mxu1 %v1682_v28  ;;  %v366_v28 = vld [vmem:[%s1969_s14 + $0x1a8] sm:$0xff] }
  0x82   : > { %636 = vmatpush1.bf16.msra.mxu0 %v1684_v29  ;;  %1574 = vmatpush1.bf16.msra.mxu1 %v1684_v29  ;;  %v368_v29 = vld [vmem:[%s1969_s14 + $0x1b8] sm:$0xff] }
  0x83   : > { %637 = vmatprep.subr.bf16.mxu0 %v1685_v30  ;;  %1559 = vmatprep.subr.bf16.mxu1 %v1685_v30  ;;  %v385_v30 = vpack.c.bf16 %v331_v23, %v329_v22 }
  0x86   : > { %638 = vmatpush1.bf16.msra.mxu0 %v1687_v31  ;;  %1575 = vmatpush1.bf16.msra.mxu1 %v1687_v31  ;;  %v401_v31 = vpack.c.bf16 %v363_v26, %v361_v25 }
  0x87   : > { %639 = vmatprep.subr.bf16.mxu0 %v1688_v32  ;;  %1560 = vmatprep.subr.bf16.mxu1 %v1688_v32  ;;  %v388_v32 = vpack.c.bf16 %v336_v27, %v334_v24 }
  0x8a   : > { %640 = vmatpush1.bf16.msra.mxu0 %v1690_v33  ;;  %1576 = vmatpush1.bf16.msra.mxu1 %v1690_v33  ;;  %v404_v33 = vpack.c.bf16 %v368_v29, %v366_v28 }
  0x8b   : > { %641 = vmatprep.subr.bf16.mxu0 %v1691_v34  ;;  %1561 = vmatprep.subr.bf16.mxu1 %v1691_v34  ;;  %v333_v34 = vld [vmem:[%s1969_s14 + $0xa0] sm:$0xff] }
  0x8e   : > { %642 = vmatpush1.bf16.msra.mxu0 %v1693_v35  ;;  %1577 = vmatpush1.bf16.msra.mxu1 %v1693_v35  ;;  %v335_v35 = vld [vmem:[%s1969_s14 + $0xb0] sm:$0xff] }
  0x8f   : > { %643 = vmatprep.subr.bf16.mxu0 %v1694_v36  ;;  %1562 = vmatprep.subr.bf16.mxu1 %v1694_v36  ;;  %v338_v36 = vld [vmem:[%s1969_s14 + $0xc8] sm:$0xff]  ;;  %v387_v42 = vpack.c.bf16 %v335_v35, %v333_v34 }
  0x90   : > { %v390_v44 = vpack.c.bf16 %v340_v39, %v338_v36 }
  0x92   : > { %644 = vmatpush1.bf16.msra.mxu0 %v1696_v37  ;;  %1578 = vmatpush1.bf16.msra.mxu1 %v1696_v37  ;;  %v365_v37 = vld [vmem:[%s1969_s14 + $0x1a0] sm:$0xff] }
  0x93   : > { %v403_v43 = vpack.c.bf16 %v367_v38, %v365_v37 }
  0x95   : > { %646 = vmatmul.mubr.bf16.vlgmr.msra.gmra.mrb[0].mxu0 %v377_v46  ;;  %726 = vmatmul.mubr.bf16.vlgmr.msra.gmra.mrb[0].mxu1 %v393_v47  ;;  %v337_v46 = vld [vmem:[%s1969_s14 + $0xc0] sm:$0xff]  ;;  %v339_v47 = vld [vmem:[%s1969_s14 + $0xd0] sm:$0xff] }
  0x96   : > { %655 = vmatprep.mubr.bf16.mxu0 %v380_v48  ;;  %735 = vmatprep.mubr.bf16.mxu1 %v396_v49  ;;  %v342_v48 = vld [vmem:[%s1969_s14 + $0xe8] sm:$0xff]  ;;  %v369_v49 = vld [vmem:[%s1969_s14 + $0x1c0] sm:$0xff]  ;;  %v389_v54 = vpack.c.bf16 %v339_v47, %v337_v46 }
  0x97   : > { %v405_v55 = vpack.c.bf16 %v371_v50, %v369_v49  ;;  %v392_v56 = vpack.c.bf16 %v344_v51, %v342_v48 }
  0x9d   : > { %656 = vmatmul.mubr.bf16.gmra.mrb[4].mxu0 %v379_v58  ;;  %736 = vmatmul.mubr.bf16.gmra.mrb[4].mxu1 %v395_v59  ;;  %v341_v58 = vld [vmem:[%s1969_s14 + $0xe0] sm:$0xff]  ;;  %v343_v59 = vld [vmem:[%s1969_s14 + $0xf0] sm:$0xff] }
  0x9e   : > { %665 = vmatprep.mubr.bf16.mxu0 %v382_v60  ;;  %745 = vmatprep.mubr.bf16.mxu1 %v398_v61  ;;  %v373_v60 = vld [vmem:[%s1969_s14 + $0x1e0] sm:$0xff]  ;;  %v375_v61 = vld [vmem:[%s1969_s14 + $0x1f0] sm:$0xff]  ;;  %v391_v62 = vpack.c.bf16 %v343_v59, %v341_v58 }
  0x9f   : > { %v407_v63 = vpack.c.bf16 %v375_v61, %v373_v60 }
  0xa5   : > { %666 = vmatmul.mubr.bf16.gmra.mrb[8].mxu0 %v381_v6  ;;  %746 = vmatmul.mubr.bf16.gmra.mrb[8].mxu1 %v397_v7  ;;  %v2049_v6 = vrot.slane %v441_v3, %v449_v4 }
  0xa6   : > { %675 = vmatprep.mubr.bf16.mxu0 %v384_v8  ;;  %755 = vmatprep.mubr.bf16.mxu1 %v400_v9 }
  0xad   : > { %676 = vmatmul.mubr.bf16.gmra.mrb[12].mxu0 %v383_v18  ;;  %756 = vmatmul.mubr.bf16.gmra.mrb[12].mxu1 %v399_v19 }
  0xae   : > { %685 = vmatprep.mubr.bf16.mxu0 %v386_v20  ;;  %765 = vmatprep.mubr.bf16.mxu1 %v402_v21 }
  0xb5   : > { %686 = vmatmul.mubr.bf16.gmra.mrb[16].mxu0 %v385_v30  ;;  %766 = vmatmul.mubr.bf16.gmra.mrb[16].mxu1 %v401_v31 }
  0xb6   : > { %695 = vmatprep.mubr.bf16.mxu0 %v388_v32  ;;  %775 = vmatprep.mubr.bf16.mxu1 %v404_v33 }
  0xbd   : > { %696 = vmatmul.mubr.bf16.gmra.mrb[20].mxu0 %v387_v42  ;;  %776 = vmatmul.mubr.bf16.gmra.mrb[20].mxu1 %v403_v43 }
  0xbe   : > { %705 = vmatprep.mubr.bf16.mxu0 %v390_v44  ;;  %785 = vmatprep.mubr.bf16.mxu1 %v406_v45 }
  0xc5   : > { %706 = vmatmul.mubr.bf16.gmra.mrb[24].mxu0 %v389_v54  ;;  %786 = vmatmul.mubr.bf16.gmra.mrb[24].mxu1 %v405_v55 }
  0xc6   : > { %715 = vmatprep.mubr.bf16.mxu0 %v392_v56  ;;  %795 = vmatprep.mubr.bf16.mxu1 %v408_v57 }
  0xcd   : > { %716 = vmatmul.mubr.bf16.gmra.mrb[28].mxu0 %v391_v62  ;;  %796 = vmatmul.mubr.bf16.gmra.mrb[28].mxu1 %v407_v63 }
 0x168   : > { %v647_v7 = vpop.f32.mrb[0].mxu0  ;;  %v727_v8 = vpop.f32.mrb[0].mxu1 }
 0x169   : > { %v648_v9 = vadd.f32 %v647_v7, %v2047_v5  ;;  %v649_v10 = vpop.f32.mrb[1].mxu0  ;;  %v2053_v11 = vadd.f32 %v727_v8, %v2047_v5  ;;  %v729_v12 = vpop.f32.mrb[1].mxu1 }
 0x16a   : > { %v650_v13 = vadd.f32 %v649_v10, %v2049_v6  ;;  %v651_v14 = vpop.f32.mrb[2].mxu0  ;;  %v2057_v15 = vadd.f32 %v729_v12, %v2049_v6  ;;  %v731_v16 = vpop.f32.mrb[2].mxu1 }
 0x16b   : > { %v652_v17 = vadd.f32 %v651_v14, %v2047_v5  ;;  %v653_v18 = vpop.f32.mrb[3].mxu0  ;;  %v733_v19 = vpop.f32.mrb[3].mxu1  ;;  %v880_v20 = vmul.f32 %v648_v9, %v648_v9  ;;  %v2067_v23 = vadd.f32 %v731_v16, %v2047_v5 }
 0x16c   : > { %v1515_v21 = vpack.c.bf16 %v650_v13, %v648_v9  ;;  %v654_v22 = vadd.f32 %v653_v18, %v2049_v6  ;;  %v881_v24 = vmul.f32 %v650_v13, %v650_v13  ;;  %v1531_v27 = vpack.c.bf16 %v2057_v15, %v2053_v11 }
 0x16d   : > { %v806_v25 = vadd.f32 %v652_v17, %v648_v9  ;;  %v882_v26 = vmul.f32 %v652_v17, %v652_v17  ;;  %v2073_v31 = vadd.f32 %v733_v19, %v2049_v6 }
 0x16e   : > { %1225 = vst [vmem:[%s2062_s10] sm:$0xff] %v1515_v21  ;;  %v843_v28 = vadd.f32 %v654_v22, %v650_v13  ;;  %v883_v29 = vmul.f32 %v654_v22, %v654_v22  ;;  %v1516_v30 = vpack.c.bf16 %v654_v22, %v652_v17  ;;  %1241 = vst [vmem:[%s2062_s10 + $0x80] sm:$0xff] %v1531_v27 }
 0x16f   : > { %v944_v32 = vadd.f32 %v882_v26, %v880_v20  ;;  %v1532_v35 = vpack.c.bf16 %v2073_v31, %v2067_v23 }
 0x170   : > { %v981_v33 = vadd.f32 %v883_v29, %v881_v24  ;;  %1226 = vst [vmem:[%s2062_s10 + $0x8] sm:$0xff] %v1516_v30  ;;  %v657_v34 = vpop.f32.mrb[4].mxu0  ;;  %v737_v36 = vpop.f32.mrb[4].mxu1 }
 0x171   : > { %v658_v37 = vadd.f32 %v657_v34, %v2047_v5  ;;  %v659_v38 = vpop.f32.mrb[5].mxu0  ;;  %v739_v39 = vpop.f32.mrb[5].mxu1  ;;  %1242 = vst [vmem:[%s2062_s10 + $0x88] sm:$0xff] %v1532_v35  ;;  %v2083_v42 = vadd.f32 %v737_v36, %v2047_v5 }
 0x172   : > { %v660_v40 = vadd.f32 %v659_v38, %v2049_v6  ;;  %v661_v41 = vpop.f32.mrb[6].mxu0  ;;  %v741_v43 = vpop.f32.mrb[6].mxu1  ;;  %v2087_v48 = vadd.f32 %v739_v39, %v2049_v6 }
 0x173   : > { %v807_v44 = vadd.f32 %v806_v25, %v658_v37  ;;  %v884_v45 = vmul.f32 %v658_v37, %v658_v37  ;;  %v662_v46 = vadd.f32 %v661_v41, %v2047_v5  ;;  %v663_v47 = vpop.f32.mrb[7].mxu0  ;;  %v743_v49 = vpop.f32.mrb[7].mxu1  ;;  %v2094_v63 = vadd.f32 %v741_v43, %v2047_v5 }
 0x174   : > { %v844_v50 = vadd.f32 %v843_v28, %v660_v40  ;;  %v885_v51 = vmul.f32 %v660_v40, %v660_v40  ;;  %v1517_v52 = vpack.c.bf16 %v660_v40, %v658_v37  ;;  %v664_v53 = vadd.f32 %v663_v47, %v2049_v6 }
 0x175   : > { %v945_v54 = vadd.f32 %v944_v32, %v884_v45  ;;  %v808_v55 = vadd.f32 %v807_v44, %v662_v46  ;;  %v886_v56 = vmul.f32 %v662_v46, %v662_v46  ;;  %v1533_v62 = vpack.c.bf16 %v2087_v48, %v2083_v42 }
 0x176   : > { %v982_v57 = vadd.f32 %v981_v33, %v885_v51  ;;  %1227 = vst [vmem:[%s2062_s10 + $0x10] sm:$0xff] %v1517_v52  ;;  %v845_v58 = vadd.f32 %v844_v50, %v664_v53  ;;  %v887_v59 = vmul.f32 %v664_v53, %v664_v53  ;;  %v1518_v60 = vpack.c.bf16 %v664_v53, %v662_v46 }
 0x177   : > { %v946_v61 = vadd.f32 %v945_v54, %v886_v56  ;;  %v2097_v0 = vadd.f32 %v743_v49, %v2049_v6  ;;  %1243 = vst [vmem:[%s2062_s10 + $0x90] sm:$0xff] %v1533_v62 }
 0x178   : > { %v983_v1 = vadd.f32 %v982_v57, %v887_v59  ;;  %1228 = vst [vmem:[%s2062_s10 + $0x18] sm:$0xff] %v1518_v60  ;;  %v667_v2 = vpop.f32.mrb[8].mxu0  ;;  %v747_v3 = vpop.f32.mrb[8].mxu1 }
 0x179   : > { %v668_v4 = vadd.f32 %v667_v2, %v2047_v5  ;;  %v669_v7 = vpop.f32.mrb[9].mxu0  ;;  %v1534_v8 = vpack.c.bf16 %v2097_v0, %v2094_v63  ;;  %v749_v9 = vpop.f32.mrb[9].mxu1  ;;  %v2106_v13 = vadd.f32 %v747_v3, %v2047_v5 }
 0x17a   : > { %v670_v10 = vadd.f32 %v669_v7, %v2049_v6  ;;  %v671_v12 = vpop.f32.mrb[10].mxu0  ;;  %v751_v14 = vpop.f32.mrb[10].mxu1  ;;  %v2111_v20 = vadd.f32 %v749_v9, %v2049_v6 }
 0x17b   : > { %v809_v16 = vadd.f32 %v808_v55, %v668_v4  ;;  %v888_v17 = vmul.f32 %v668_v4, %v668_v4  ;;  %v672_v18 = vadd.f32 %v671_v12, %v2047_v5  ;;  %v673_v19 = vpop.f32.mrb[11].mxu0  ;;  %1244 = vst [vmem:[%s2062_s10 + $0x98] sm:$0xff] %v1534_v8  ;;  %v753_v21 = vpop.f32.mrb[11].mxu1  ;;  %v2115_v30 = vadd.f32 %v751_v14, %v2047_v5 }
 0x17c   : > { %v846_v22 = vadd.f32 %v845_v58, %v670_v10  ;;  %v889_v24 = vmul.f32 %v670_v10, %v670_v10  ;;  %v1519_v25 = vpack.c.bf16 %v670_v10, %v668_v4  ;;  %v674_v26 = vadd.f32 %v673_v19, %v2049_v6 }
 0x17d   : > { %v947_v27 = vadd.f32 %v946_v61, %v888_v17  ;;  %v810_v28 = vadd.f32 %v809_v16, %v672_v18  ;;  %v890_v29 = vmul.f32 %v672_v18, %v672_v18  ;;  %v1535_v37 = vpack.c.bf16 %v2111_v20, %v2106_v13 }
 0x17e   : > { %v984_v32 = vadd.f32 %v983_v1, %v889_v24  ;;  %1229 = vst [vmem:[%s2062_s10 + $0x20] sm:$0xff] %v1519_v25  ;;  %v847_v33 = vadd.f32 %v846_v22, %v674_v26  ;;  %v891_v34 = vmul.f32 %v674_v26, %v674_v26  ;;  %v1520_v35 = vpack.c.bf16 %v674_v26, %v672_v18 }
 0x17f   : > { %v948_v36 = vadd.f32 %v947_v27, %v890_v29  ;;  %v2122_v40 = vadd.f32 %v753_v21, %v2049_v6  ;;  %1245 = vst [vmem:[%s2062_s10 + $0xa0] sm:$0xff] %v1535_v37 }
 0x180   : > { %v985_v38 = vadd.f32 %v984_v32, %v891_v34  ;;  %1230 = vst [vmem:[%s2062_s10 + $0x28] sm:$0xff] %v1520_v35  ;;  %v677_v39 = vpop.f32.mrb[12].mxu0  ;;  %v757_v41 = vpop.f32.mrb[12].mxu1 }
 0x181   : > { %v678_v43 = vadd.f32 %v677_v39, %v2047_v5  ;;  %v679_v44 = vpop.f32.mrb[13].mxu0  ;;  %v759_v45 = vpop.f32.mrb[13].mxu1  ;;  %v1536_v49 = vpack.c.bf16 %v2122_v40, %v2115_v30  ;;  %v2130_v50 = vadd.f32 %v757_v41, %v2047_v5 }
 0x182   : > { %v680_v46 = vadd.f32 %v679_v44, %v2049_v6  ;;  %v681_v47 = vpop.f32.mrb[14].mxu0  ;;  %v761_v51 = vpop.f32.mrb[14].mxu1  ;;  %v2134_v56 = vadd.f32 %v759_v45, %v2049_v6 }
 0x183   : > { %v811_v52 = vadd.f32 %v810_v28, %v678_v43  ;;  %v892_v53 = vmul.f32 %v678_v43, %v678_v43  ;;  %v682_v54 = vadd.f32 %v681_v47, %v2047_v5  ;;  %v683_v55 = vpop.f32.mrb[15].mxu0  ;;  %v763_v57 = vpop.f32.mrb[15].mxu1  ;;  %1246 = vst [vmem:[%s2062_s10 + $0xa8] sm:$0xff] %v1536_v49  ;;  %v2142_v12 = vadd.f32 %v761_v51, %v2047_v5 }
 0x184   : > { %v848_v58 = vadd.f32 %v847_v33, %v680_v46  ;;  %v893_v59 = vmul.f32 %v680_v46, %v680_v46  ;;  %v1521_v60 = vpack.c.bf16 %v680_v46, %v678_v43  ;;  %v684_v61 = vadd.f32 %v683_v55, %v2049_v6 }
 0x185   : > { %v949_v62 = vadd.f32 %v948_v36, %v892_v53  ;;  %v812_v1 = vadd.f32 %v811_v52, %v682_v54  ;;  %v894_v2 = vmul.f32 %v682_v54, %v682_v54  ;;  %v1537_v10 = vpack.c.bf16 %v2134_v56, %v2130_v50 }
 0x186   : > { %v986_v3 = vadd.f32 %v985_v38, %v893_v59  ;;  %1231 = vst [vmem:[%s2062_s10 + $0x30] sm:$0xff] %v1521_v60  ;;  %v849_v4 = vadd.f32 %v848_v58, %v684_v61  ;;  %v895_v7 = vmul.f32 %v684_v61, %v684_v61  ;;  %v1522_v8 = vpack.c.bf16 %v684_v61, %v682_v54 }
 0x187   : > { %v950_v9 = vadd.f32 %v949_v62, %v894_v2  ;;  %v2145_v14 = vadd.f32 %v763_v57, %v2049_v6  ;;  %1247 = vst [vmem:[%s2062_s10 + $0xb0] sm:$0xff] %v1537_v10 }
 0x188   : > { %v987_v16 = vadd.f32 %v986_v3, %v895_v7  ;;  %1232 = vst [vmem:[%s2062_s10 + $0x38] sm:$0xff] %v1522_v8  ;;  %v687_v17 = vpop.f32.mrb[16].mxu0  ;;  %v767_v18 = vpop.f32.mrb[16].mxu1 }
 0x189   : > { %v688_v19 = vadd.f32 %v687_v17, %v2047_v5  ;;  %v689_v21 = vpop.f32.mrb[17].mxu0  ;;  %v1538_v22 = vpack.c.bf16 %v2145_v14, %v2142_v12  ;;  %v769_v24 = vpop.f32.mrb[17].mxu1  ;;  %v2154_v27 = vadd.f32 %v767_v18, %v2047_v5 }
 0x18a   : > { %v690_v25 = vadd.f32 %v689_v21, %v2049_v6  ;;  %v691_v26 = vpop.f32.mrb[18].mxu0  ;;  %v771_v28 = vpop.f32.mrb[18].mxu1  ;;  %v2159_v35 = vadd.f32 %v769_v24, %v2049_v6 }
 0x18b   : > { %v813_v29 = vadd.f32 %v812_v1, %v688_v19  ;;  %v896_v32 = vmul.f32 %v688_v19, %v688_v19  ;;  %v692_v33 = vadd.f32 %v691_v26, %v2047_v5  ;;  %v693_v34 = vpop.f32.mrb[19].mxu0  ;;  %1248 = vst [vmem:[%s2062_s10 + $0xb8] sm:$0xff] %v1538_v22  ;;  %v773_v36 = vpop.f32.mrb[19].mxu1  ;;  %v2163_v46 = vadd.f32 %v771_v28, %v2047_v5 }
 0x18c   : > { %v850_v37 = vadd.f32 %v849_v4, %v690_v25  ;;  %v897_v38 = vmul.f32 %v690_v25, %v690_v25  ;;  %v1523_v39 = vpack.c.bf16 %v690_v25, %v688_v19  ;;  %v694_v41 = vadd.f32 %v693_v34, %v2049_v6 }
 0x18d   : > { %v951_v43 = vadd.f32 %v950_v9, %v896_v32  ;;  %v814_v44 = vadd.f32 %v813_v29, %v692_v33  ;;  %v898_v45 = vmul.f32 %v692_v33, %v692_v33  ;;  %v1539_v54 = vpack.c.bf16 %v2159_v35, %v2154_v27 }
 0x18e   : > { %v988_v47 = vadd.f32 %v987_v16, %v897_v38  ;;  %1233 = vst [vmem:[%s2062_s10 + $0x40] sm:$0xff] %v1523_v39  ;;  %v851_v49 = vadd.f32 %v850_v37, %v694_v41  ;;  %v899_v51 = vmul.f32 %v694_v41, %v694_v41  ;;  %v1524_v52 = vpack.c.bf16 %v694_v41, %v692_v33 }
 0x18f   : > { %v952_v53 = vadd.f32 %v951_v43, %v898_v45  ;;  %v2170_v58 = vadd.f32 %v773_v36, %v2049_v6  ;;  %1249 = vst [vmem:[%s2062_s10 + $0xc0] sm:$0xff] %v1539_v54 }
 0x190   : > { %v989_v55 = vadd.f32 %v988_v47, %v899_v51  ;;  %1234 = vst [vmem:[%s2062_s10 + $0x48] sm:$0xff] %v1524_v52  ;;  %v697_v57 = vpop.f32.mrb[20].mxu0  ;;  %v777_v59 = vpop.f32.mrb[20].mxu1 }
 0x191   : > { %v698_v60 = vadd.f32 %v697_v57, %v2047_v5  ;;  %v699_v61 = vpop.f32.mrb[21].mxu0  ;;  %v779_v62 = vpop.f32.mrb[21].mxu1  ;;  %v1540_v3 = vpack.c.bf16 %v2170_v58, %v2163_v46  ;;  %v2178_v4 = vadd.f32 %v777_v59, %v2047_v5 }
 0x192   : > { %v700_v1 = vadd.f32 %v699_v61, %v2049_v6  ;;  %v701_v2 = vpop.f32.mrb[22].mxu0  ;;  %v781_v7 = vpop.f32.mrb[22].mxu1  ;;  %v2182_v17 = vadd.f32 %v779_v62, %v2049_v6 }
 0x193   : > { %v815_v8 = vadd.f32 %v814_v44, %v698_v60  ;;  %v900_v9 = vmul.f32 %v698_v60, %v698_v60  ;;  %v702_v10 = vadd.f32 %v701_v2, %v2047_v5  ;;  %v703_v16 = vpop.f32.mrb[23].mxu0  ;;  %v783_v18 = vpop.f32.mrb[23].mxu1  ;;  %1250 = vst [vmem:[%s2062_s10 + $0xc8] sm:$0xff] %v1540_v3  ;;  %v2190_v38 = vadd.f32 %v781_v7, %v2047_v5 }
 0x194   : > { %v852_v19 = vadd.f32 %v851_v49, %v700_v1  ;;  %v901_v21 = vmul.f32 %v700_v1, %v700_v1  ;;  %v1525_v22 = vpack.c.bf16 %v700_v1, %v698_v60  ;;  %v704_v24 = vadd.f32 %v703_v16, %v2049_v6 }
 0x195   : > { %v953_v25 = vadd.f32 %v952_v53, %v900_v9  ;;  %v816_v26 = vadd.f32 %v815_v8, %v702_v10  ;;  %v902_v28 = vmul.f32 %v702_v10, %v702_v10  ;;  %v1541_v37 = vpack.c.bf16 %v2182_v17, %v2178_v4 }
 0x196   : > { %v990_v29 = vadd.f32 %v989_v55, %v901_v21  ;;  %1235 = vst [vmem:[%s2062_s10 + $0x50] sm:$0xff] %v1525_v22  ;;  %v853_v32 = vadd.f32 %v852_v19, %v704_v24  ;;  %v903_v33 = vmul.f32 %v704_v24, %v704_v24  ;;  %v1526_v34 = vpack.c.bf16 %v704_v24, %v702_v10 }
 0x197   : > { %v954_v36 = vadd.f32 %v953_v25, %v902_v28  ;;  %v2193_v39 = vadd.f32 %v783_v18, %v2049_v6  ;;  %1251 = vst [vmem:[%s2062_s10 + $0xd0] sm:$0xff] %v1541_v37 }
 0x198   : > { %v991_v41 = vadd.f32 %v990_v29, %v903_v33  ;;  %1236 = vst [vmem:[%s2062_s10 + $0x58] sm:$0xff] %v1526_v34  ;;  %v707_v43 = vpop.f32.mrb[24].mxu0  ;;  %v787_v44 = vpop.f32.mrb[24].mxu1 }
 0x199   : > { %v708_v45 = vadd.f32 %v707_v43, %v2047_v5  ;;  %v709_v47 = vpop.f32.mrb[25].mxu0  ;;  %v1542_v49 = vpack.c.bf16 %v2193_v39, %v2190_v38  ;;  %v789_v51 = vpop.f32.mrb[25].mxu1  ;;  %v2202_v54 = vadd.f32 %v787_v44, %v2047_v5 }
 0x19a   : > { %v710_v52 = vadd.f32 %v709_v47, %v2049_v6  ;;  %v711_v53 = vpop.f32.mrb[26].mxu0  ;;  %v791_v55 = vpop.f32.mrb[26].mxu1  ;;  %v2207_v62 = vadd.f32 %v789_v51, %v2049_v6 }
 0x19b   : > { %v817_v57 = vadd.f32 %v816_v26, %v708_v45  ;;  %v904_v59 = vmul.f32 %v708_v45, %v708_v45  ;;  %v712_v60 = vadd.f32 %v711_v53, %v2047_v5  ;;  %v713_v61 = vpop.f32.mrb[27].mxu0  ;;  %1252 = vst [vmem:[%s2062_s10 + $0xd8] sm:$0xff] %v1542_v49  ;;  %v793_v1 = vpop.f32.mrb[27].mxu1  ;;  %v2211_v18 = vadd.f32 %v791_v55, %v2047_v5 }
 0x19c   : > { %v854_v2 = vadd.f32 %v853_v32, %v710_v52  ;;  %v905_v3 = vmul.f32 %v710_v52, %v710_v52  ;;  %v1527_v7 = vpack.c.bf16 %v710_v52, %v708_v45  ;;  %v714_v8 = vadd.f32 %v713_v61, %v2049_v6 }
 0x19d   : > { %v955_v9 = vadd.f32 %v954_v36, %v904_v59  ;;  %v818_v10 = vadd.f32 %v817_v57, %v712_v60  ;;  %v906_v16 = vmul.f32 %v712_v60, %v712_v60  ;;  %v1543_v26 = vpack.c.bf16 %v2207_v62, %v2202_v54 }
 0x19e   : > { %v992_v19 = vadd.f32 %v991_v41, %v905_v3  ;;  %1237 = vst [vmem:[%s2062_s10 + $0x60] sm:$0xff] %v1527_v7  ;;  %v855_v21 = vadd.f32 %v854_v2, %v714_v8  ;;  %v907_v22 = vmul.f32 %v714_v8, %v714_v8  ;;  %v1528_v24 = vpack.c.bf16 %v714_v8, %v712_v60 }
 0x19f   : > { %v956_v25 = vadd.f32 %v955_v9, %v906_v16  ;;  %v2218_v32 = vadd.f32 %v793_v1, %v2049_v6  ;;  %1253 = vst [vmem:[%s2062_s10 + $0xe0] sm:$0xff] %v1543_v26  ;;  %v912_v2 = vmul.f32 %v2053_v11, %v2053_v11 }
 0x1a0   : > { %v993_v28 = vadd.f32 %v992_v19, %v907_v22  ;;  %1238 = vst [vmem:[%s2062_s10 + $0x68] sm:$0xff] %v1528_v24  ;;  %v717_v29 = vpop.f32.mrb[28].mxu0  ;;  %v797_v33 = vpop.f32.mrb[28].mxu1 }
 0x1a1   : > { %v718_v34 = vadd.f32 %v717_v29, %v2047_v5  ;;  %v719_v36 = vpop.f32.mrb[29].mxu0  ;;  %v799_v37 = vpop.f32.mrb[29].mxu1  ;;  %v1544_v44 = vpack.c.bf16 %v2218_v32, %v2211_v18  ;;  %v2226_v45 = vadd.f32 %v797_v33, %v2047_v5 }
 0x1a2   : > { %v720_v41 = vadd.f32 %v719_v36, %v2049_v6  ;;  %v721_v43 = vpop.f32.mrb[30].mxu0  ;;  %v801_v47 = vpop.f32.mrb[30].mxu1  ;;  %v2230_v55 = vadd.f32 %v799_v37, %v2049_v6 }
 0x1a3   : > { %v819_v49 = vadd.f32 %v818_v10, %v718_v34  ;;  %v908_v51 = vmul.f32 %v718_v34, %v718_v34  ;;  %v722_v52 = vadd.f32 %v721_v43, %v2047_v5  ;;  %v723_v53 = vpop.f32.mrb[31].mxu0  ;;  %v803_v57 = vpop.f32.mrb[31].mxu1  ;;  %1254 = vst [vmem:[%s2062_s10 + $0xe8] sm:$0xff] %v1544_v44  ;;  %v2241_v26 = vadd.f32 %v801_v47, %v2047_v5 }
 0x1a4   : > { %v856_v59 = vadd.f32 %v855_v21, %v720_v41  ;;  %v909_v60 = vmul.f32 %v720_v41, %v720_v41  ;;  %v1529_v61 = vpack.c.bf16 %v720_v41, %v718_v34  ;;  %v724_v1 = vadd.f32 %v723_v53, %v2049_v6 }
 0x1a5   : > { %v957_v3 = vadd.f32 %v956_v25, %v908_v51  ;;  %v820_v7 = vadd.f32 %v819_v49, %v722_v52  ;;  %v910_v8 = vmul.f32 %v722_v52, %v722_v52  ;;  %v1545_v24 = vpack.c.bf16 %v2230_v55, %v2226_v45 }
 0x1a6   : > { %v994_v9 = vadd.f32 %v993_v28, %v909_v60  ;;  %1239 = vst [vmem:[%s2062_s10 + $0x70] sm:$0xff] %v1529_v61  ;;  %v857_v10 = vadd.f32 %v856_v59, %v724_v1  ;;  %v911_v16 = vmul.f32 %v724_v1, %v724_v1  ;;  %v1530_v19 = vpack.c.bf16 %v724_v1, %v722_v52 }
 0x1a7   : > { %v821_v21 = vadd.f32 %v820_v7, %v2053_v11  ;;  %v958_v22 = vadd.f32 %v957_v3, %v910_v8  ;;  %v913_v25 = vmul.f32 %v2057_v15, %v2057_v15  ;;  %v2248_v33 = vadd.f32 %v803_v57, %v2049_v6  ;;  %1255 = vst [vmem:[%s2062_s10 + $0xf0] sm:$0xff] %v1545_v24 }
 0x1a8   : > { %v858_v29 = vadd.f32 %v857_v10, %v2057_v15  ;;  %v995_v28 = vadd.f32 %v994_v9, %v911_v16  ;;  %1240 = vst [vmem:[%s2062_s10 + $0x78] sm:$0xff] %v1530_v19  ;;  %v914_v11 = vmul.f32 %v2067_v23, %v2067_v23  ;;  %v915_v5 = vmul.f32 %v2073_v31, %v2073_v31 }
 0x1a9   : > { %v822_v34 = vadd.f32 %v821_v21, %v2067_v23  ;;  %v959_v36 = vadd.f32 %v958_v22, %v912_v2  ;;  %v1546_v15 = vpack.c.bf16 %v2248_v33, %v2241_v26  ;;  %v916_v6 = vmul.f32 %v2083_v42, %v2083_v42 }
 0x1aa   : > { %v859_v37 = vadd.f32 %v858_v29, %v2073_v31  ;;  %v996_v41 = vadd.f32 %v995_v28, %v913_v25  ;;  %v917_v23 = vmul.f32 %v2087_v48, %v2087_v48  ;;  %v918_v31 = vmul.f32 %v2094_v63, %v2094_v63 }
 0x1ab   : > { %v823_v43 = vadd.f32 %v822_v34, %v2083_v42  ;;  %v960_v44 = vadd.f32 %v959_v36, %v914_v11  ;;  %1256 = vst [vmem:[%s2062_s10 + $0xf8] sm:$0xff] %v1546_v15  ;;  %v919_v53 = vmul.f32 %v2097_v0, %v2097_v0  ;;  %v920_v59 = vmul.f32 %v2106_v13, %v2106_v13 }
 0x1ac   : > { %v860_v47 = vadd.f32 %v859_v37, %v2087_v48  ;;  %v997_v49 = vadd.f32 %v996_v41, %v915_v5  ;;  %v921_v61 = vmul.f32 %v2111_v20, %v2111_v20  ;;  %v928_v28 = vmul.f32 %v2154_v27, %v2154_v27 }
 0x1ad   : > { %v824_v51 = vadd.f32 %v823_v43, %v2094_v63  ;;  %v961_v52 = vadd.f32 %v960_v44, %v916_v6  ;;  %v922_v63 = vmul.f32 %v2115_v30, %v2115_v30  ;;  %v929_v34 = vmul.f32 %v2159_v35, %v2159_v35 }
 0x1ae   : > { %v861_v57 = vadd.f32 %v860_v47, %v2097_v0  ;;  %v998_v42 = vadd.f32 %v997_v49, %v917_v23  ;;  %v923_v0 = vmul.f32 %v2122_v40, %v2122_v40  ;;  %v930_v37 = vmul.f32 %v2163_v46, %v2163_v46 }
 0x1af   : > { %v962_v60 = vadd.f32 %v961_v52, %v918_v31  ;;  %v825_v48 = vadd.f32 %v824_v51, %v2106_v13  ;;  %v924_v13 = vmul.f32 %v2130_v50, %v2130_v50  ;;  %v931_v15 = vmul.f32 %v2170_v58, %v2170_v58 }
 0x1b0   : > { %v999_v1 = vadd.f32 %v998_v42, %v919_v53  ;;  %v862_v2 = vadd.f32 %v861_v57, %v2111_v20  ;;  %v925_v20 = vmul.f32 %v2134_v56, %v2134_v56  ;;  %v932_v43 = vmul.f32 %v2178_v4, %v2178_v4 }
 0x1b1   : > { %v826_v3 = vadd.f32 %v825_v48, %v2115_v30  ;;  %v963_v7 = vadd.f32 %v962_v60, %v920_v59  ;;  %v926_v30 = vmul.f32 %v2142_v12, %v2142_v12  ;;  %v933_v23 = vmul.f32 %v2182_v17, %v2182_v17 }
 0x1b2   : > { %v863_v8 = vadd.f32 %v862_v2, %v2122_v40  ;;  %v1000_v9 = vadd.f32 %v999_v1, %v921_v61  ;;  %v927_v40 = vmul.f32 %v2145_v14, %v2145_v14  ;;  %v934_v49 = vmul.f32 %v2190_v38, %v2190_v38 }
 0x1b3   : > { %v827_v10 = vadd.f32 %v826_v3, %v2130_v50  ;;  %v964_v16 = vadd.f32 %v963_v7, %v922_v63  ;;  %v935_v51 = vmul.f32 %v2193_v39, %v2193_v39  ;;  %v936_v53 = vmul.f32 %v2202_v54, %v2202_v54 }
 0x1b4   : > { %v864_v19 = vadd.f32 %v863_v8, %v2134_v56  ;;  %v1001_v21 = vadd.f32 %v1000_v9, %v923_v0  ;;  %v937_v42 = vmul.f32 %v2207_v62, %v2207_v62  ;;  %v938_v60 = vmul.f32 %v2211_v18, %v2211_v18 }
 0x1b5   : > { %v828_v22 = vadd.f32 %v827_v10, %v2142_v12  ;;  %v965_v24 = vadd.f32 %v964_v16, %v924_v13  ;;  %v941_v1 = vmul.f32 %v2230_v55, %v2230_v55  ;;  %v942_v0 = vmul.f32 %v2241_v26, %v2241_v26 }
 0x1b6   : > { %v865_v25 = vadd.f32 %v864_v19, %v2145_v14  ;;  %v1002_v29 = vadd.f32 %v1001_v21, %v925_v20 }
 0x1b7   : > { %v829_v50 = vadd.f32 %v828_v22, %v2154_v27  ;;  %v966_v11 = vadd.f32 %v965_v24, %v926_v30 }
 0x1b8   : > { %v866_v56 = vadd.f32 %v865_v25, %v2159_v35  ;;  %v1003_v36 = vadd.f32 %v1002_v29, %v927_v40 }
 0x1b9   : > { %v967_v12 = vadd.f32 %v966_v11, %v928_v28  ;;  %v830_v5 = vadd.f32 %v829_v50, %v2163_v46 }
 0x1ba   : > { %v1004_v14 = vadd.f32 %v1003_v36, %v929_v34  ;;  %v867_v41 = vadd.f32 %v866_v56, %v2170_v58 }
 0x1bb   : > { %v968_v27 = vadd.f32 %v967_v12, %v930_v37  ;;  %v831_v6 = vadd.f32 %v830_v5, %v2178_v4 }
 0x1bc   : > { %v1005_v35 = vadd.f32 %v1004_v14, %v931_v15  ;;  %v868_v44 = vadd.f32 %v867_v41, %v2182_v17 }
 0x1bd   : > { %v969_v47 = vadd.f32 %v968_v27, %v932_v43  ;;  %v832_v46 = vadd.f32 %v831_v6, %v2190_v38 }
 0x1be   : > { %v1006_v31 = vadd.f32 %v1005_v35, %v933_v23  ;;  %v869_v58 = vadd.f32 %v868_v44, %v2193_v39  ;;  %v940_v39 = vmul.f32 %v2226_v45, %v2226_v45 }
 0x1bf   : > { %v970_v52 = vadd.f32 %v969_v47, %v934_v49  ;;  %v833_v4 = vadd.f32 %v832_v46, %v2202_v54  ;;  %v939_v54 = vmul.f32 %v2218_v32, %v2218_v32 }
 0x1c0   : > { %v1007_v57 = vadd.f32 %v1006_v31, %v935_v51  ;;  %v870_v17 = vadd.f32 %v869_v58, %v2207_v62 }
 0x1c1   : > { %v971_v59 = vadd.f32 %v970_v52, %v936_v53  ;;  %v834_v38 = vadd.f32 %v833_v4, %v2211_v18 }
 0x1c2   : > { %v1008_v48 = vadd.f32 %v1007_v57, %v937_v42  ;;  %v871_v61 = vadd.f32 %v870_v17, %v2218_v32  ;;  %v943_v32 = vmul.f32 %v2248_v33, %v2248_v33 }
 0x1c3   : > { %v972_v2 = vadd.f32 %v971_v59, %v938_v60  ;;  %v835_v62 = vadd.f32 %v834_v38, %v2226_v45 }
 0x1c4   : > { %v1009_v63 = vadd.f32 %v1008_v48, %v939_v54  ;;  %v872_v3 = vadd.f32 %v871_v61, %v2230_v55 }
 0x1c5   : > { %v973_v7 = vadd.f32 %v972_v2, %v940_v39  ;;  %v836_v18 = vadd.f32 %v835_v62, %v2241_v26 }
 0x1c6   : > { %v1010_v8 = vadd.f32 %v1009_v63, %v941_v1  ;;  %v873_v9 = vadd.f32 %v872_v3, %v2248_v33 }
 0x1c7   : > { %v837_v13 = vrot.slane %v836_v18, 4  ;;  %v974_v10 = vadd.f32 %v973_v7, %v942_v0 }
 0x1c8   : > { %v874_v16 = vrot.slane %v873_v9, 4  ;;  %v1011_v45 = vadd.f32 %v1010_v8, %v943_v32 }
 0x1c9   : > { %v838_v20 = vadd.f32 %v837_v13, %v836_v18  ;;  %v975_v55 = vrot.slane %v974_v10, 4 }
 0x1ca   : > { %v875_v19 = vadd.f32 %v874_v16, %v873_v9  ;;  %v1012_v21 = vrot.slane %v1011_v45, 4 }
 0x1cb   : > { %v839_v30 = vrot.slane %v838_v20, 2  ;;  %v976_v22 = vadd.f32 %v975_v55, %v974_v10 }
 0x1cc   : > { %v876_v24 = vrot.slane %v875_v19, 2  ;;  %v1013_v26 = vadd.f32 %v1012_v21, %v1011_v45 }
 0x1cd   : > { %v840_v40 = vadd.f32 %v839_v30, %v838_v20  ;;  %v977_v25 = vrot.slane %v976_v22, 2 }
 0x1ce   : > { %v877_v29 = vadd.f32 %v876_v24, %v875_v19  ;;  %v1014_v50 = vrot.slane %v1013_v26, 2 }
 0x1cf   : > { %v841_v28 = vrot.slane %v840_v40, 1  ;;  %v978_v33 = vadd.f32 %v977_v25, %v976_v22 }
 0x1d0   : > { %v878_v11 = vrot.slane %v877_v29, 1  ;;  %v1015_v56 = vadd.f32 %v1014_v50, %v1013_v26 }
 0x1d1   : > { %v979_v34 = vrot.slane %v978_v33, 1  ;;  %v842_v12 = vadd.f32 %v841_v28, %v840_v40 }
 0x1d2   : > { %v1016_v36 = vrot.slane %v1015_v56, 1  ;;  %v879_v37 = vadd.f32 %v878_v11, %v877_v29 }
 0x1d3   : > { %v980_v5 = vadd.f32 %v979_v34, %v978_v33 }
 0x1d4   : > { %v1017_v14 = vadd.f32 %v1016_v36, %v1015_v56 }
 0x1d5   : > { %v1019_v41 = vsel %vm1018_vm0, %v842_v12, %v980_v5 }
 0x1d6   : > { %v1020_v15 = vsel %vm1018_vm0, %v879_v37, %v1017_v14 }
 0x1d7   : > { %v1023_v27 = vcombine.low %v1019_v41, %v1020_v15 }
 0x1d9   : > { %1476 = vst.sshfl [vmem:[%s311_s29] sm:$0x33 pattern:$0x76325410] %v1023_v27 }
 0x1da PF: > { %s19_s20 = sadd.s32 1, %s1809_s20   ;;  %s2384_s15 = smov %s1793_s16 }
 0x1db   : > { %p16_p4 = scmp.ge.s32.totalorder %s19_s20, 4   ;;  %s2385_s16 = smov %s1797_s17 }
 0x1dc   : > { %s2386_s17 = smov %s1925_s5  ;;  %s2387_s18 = smov %s1805_s19 }
 0x1dd   : > { %s2388_s19 = smov %s2390_s28  ;;  %18 = sbr.rel (!%p16_p4) target bundleno = 5 (0x5), region = 92 }
 0x1e4   :  { %1315 = vsyncpa [#allocation3], 1 }
 0x1e5   :  { %1317 = vsyncpa [#allocation3 + $0x1], 1 }
 0x1e6   :  { %1318 = vsyncpa [#allocation5], 1 }

// kernel: projection_head.4
= control target key start
LH: loop header
LB: loop body
LE: loop exit
PB: predicated region body
PF: predicated region fallthrough
CT: control target
= control target key end

     0   :  { %s1981_s21 = smov 0   ;;  %s1983_s22 = smov 0   ;;  %s2709_s0 = inlined_call_operand.vmem [shape: bf16[512,256], index: 0, kind: input, shape index: {}]   ;;  %s2710_s1 = inlined_call_operand.vmem [shape: f32[1,256], index: 1, kind: input, shape index: {}]   ;;  %s2711_s2 = inlined_call_operand.vmem [shape: f32[1,256], index: 2, kind: input, shape index: {}]   ;;  %s2712_s3 = inlined_call_operand.vmem [shape: bf16[256,256], index: 3, kind: input, shape index: {}]   ;;  %s2713_s4 = inlined_call_operand.vmem [shape: f32[1,256], index: 4, kind: input, shape index: {}]   ;;  %s2714_s5 = inlined_call_operand.vmem [shape: bf16[512,256], index: 5, kind: output, shape index: {0}]   ;;  %s2715_s6 = inlined_call_operand.vmem [shape: f32[2,2,256], index: 6, kind: output, shape index: {1}]  }
   0x1   :  { %s1985_s23 = smov 0  }
   0x2 LB: > { %s26_s24 = sadd.s32 1, %s1940_s22  ;;  %p1707_p0 = scmp.ge.s32.totalorder %s1944_s23, 1  ;;  %s1944_s23 = sphi %s1985_s23, %s17_s23   ;;  %s1940_s22 = sphi %s1983_s22, %s2717_s22   ;;  %s1936_s21 = sphi %s1981_s21, %s2716_s21  }
   0x3   : > { %p27_p1 = scmp.ge.s32.totalorder %s26_s24, 2  ;;  %p254_p2 = scmp.lt.s32.totalorder %s1944_s23, 3 }
   0x5   : > { %s2719_s24 = smov (%p27_p1, %s26_s24), 0  ;;  %p255_p3 = pnand %p1707_p0, %p254_p2 }
   0x6   : > { %v1874_v0 = vld [vmem:[%s2712_s3 + $0x4] ss:$8 sps:$4 sm:$0xff] (!%p255_p3)   ;;  %v1876_v1 = vld [vmem:[%s2712_s3] ss:$8 sps:$4 sm:$0xff] (!%p255_p3)   ;;  %v1877_v2 = vld [vmem:[%s2712_s3 + $0x14] ss:$8 sps:$4 sm:$0xff] (!%p255_p3)   ;;  %v446_v8 = vlaneseq (!%p255_p3) }
   0x7   : > { %258 = sbr.rel (%p255_p3) target bundleno = 396 (0x18c), region = 40  ;;  %896 = vmatprep.subr.bf16.mxu0 (!%p255_p3), %v1874_v0  ;;  %1818 = vmatprep.subr.bf16.mxu1 (!%p255_p3), %v1874_v0  ;;  %v1879_v3 = vld [vmem:[%s2712_s3 + $0x10] ss:$8 sps:$4 sm:$0xff] (!%p255_p3)   ;;  %v1880_v4 = vld [vmem:[%s2712_s3 + $0x24] ss:$8 sps:$4 sm:$0xff] (!%p255_p3)   ;;  %s1708_s11 = sshll.u32 (!%p255_p3), %s1936_s21, 5 }
   0x8   : > { %897 = vmatpush1.bf16.msra.mxu0 (!%p255_p3), %v1876_v1  ;;  %1834 = vmatpush1.bf16.msra.mxu1 (!%p255_p3), %v1876_v1  ;;  %v1882_v5 = vld [vmem:[%s2712_s3 + $0x20] ss:$8 sps:$4 sm:$0xff] (!%p255_p3)   ;;  %p309_p4 = scmp.lt.s32.totalorder (!%p255_p3), %s1708_s11, 63  ;;  %v1883_v6 = vld [vmem:[%s2712_s3 + $0x34] ss:$8 sps:$4 sm:$0xff] (!%p255_p3)   ;;  %v447_v11 = vshrl.u32 (!%p255_p3), %v446_v8, 7 }
   0x9   : > { %898 = vmatprep.subr.bf16.mxu0 (!%p255_p3), %v1877_v2  ;;  %1819 = vmatprep.subr.bf16.mxu1 (!%p255_p3), %v1877_v2  ;;  %v1885_v7 = vld [vmem:[%s2712_s3 + $0x30] ss:$8 sps:$4 sm:$0xff] (!%p255_p3)   ;;  %v1886_v9 = vld [vmem:[%s2712_s3 + $0x44] ss:$8 sps:$4 sm:$0xff] (!%p255_p3)   ;;  %v1888_v10 = vld [vmem:[%s2712_s3 + $0x40] ss:$8 sps:$4 sm:$0xff] (!%p255_p3)  }
   0xa   : > { %v1889_v12 = vld [vmem:[%s2712_s3 + $0x54] ss:$8 sps:$4 sm:$0xff] (!%p255_p3)   ;;  %v1891_v13 = vld [vmem:[%s2712_s3 + $0x50] ss:$8 sps:$4 sm:$0xff] (!%p255_p3)   ;;  %v2048_v14 = vsub.s32 (!%p255_p3), 1, %v447_v11  ;;  %v2083_v34 = vsub.s32 (!%p255_p3), 0, %v447_v11 }
   0xb   : > { %v1892_v15 = vld [vmem:[%s2712_s3 + $0x64] ss:$8 sps:$4 sm:$0xff] (!%p255_p3)   ;;  %v444_v20 = vld [vmem:[%s2710_s1] sm:$0x3] (!%p255_p3)  ;;  %v1895_v24 = vld [vmem:[%s2712_s3 + $0x74] ss:$8 sps:$4 sm:$0xff] (!%p255_p3)  }
   0xc   : > { %899 = vmatpush1.bf16.msra.mxu0 (!%p255_p3), %v1879_v3  ;;  %1835 = vmatpush1.bf16.msra.mxu1 (!%p255_p3), %v1879_v3  ;;  %v520_v21 = vld [vmem:[%s2711_s2] sm:$0x3] (!%p255_p3)  ;;  %v2065_v23 = vrot.slane (!%p255_p3), %v444_v20, %v2048_v14  ;;  %v1897_v28 = vld [vmem:[%s2712_s3 + $0x70] ss:$8 sps:$4 sm:$0xff] (!%p255_p3)   ;;  %v1898_v31 = vld [vmem:[%s2712_s3 + $0x84] ss:$8 sps:$4 sm:$0xff] (!%p255_p3)   ;;  %v2094_v41 = vrot.slane (!%p255_p3), %v444_v20, %v2083_v34 }
   0xd   : > { %900 = vmatprep.subr.bf16.mxu0 (!%p255_p3), %v1880_v4  ;;  %1820 = vmatprep.subr.bf16.mxu1 (!%p255_p3), %v1880_v4  ;;  %v1894_v22 = vld [vmem:[%s2712_s3 + $0x60] ss:$8 sps:$4 sm:$0xff] (!%p255_p3)   ;;  %v2071_v25 = vrot.slane (!%p255_p3), %v520_v21, %v2048_v14  ;;  %v1901_v37 = vld [vmem:[%s2712_s3 + $0x94] ss:$8 sps:$4 sm:$0xff] (!%p255_p3)   ;;  %v1903_v42 = vld [vmem:[%s2712_s3 + $0x90] ss:$8 sps:$4 sm:$0xff] (!%p255_p3)   ;;  %v2109_v51 = vrot.slane (!%p255_p3), %v520_v21, %v2083_v34 }
   0xe   : > { %s2721_s11 = smov (!%p309_p4, %s1708_s11), 63  ;;  %v1900_v35 = vld [vmem:[%s2712_s3 + $0x80] ss:$8 sps:$4 sm:$0xff]   ;;  %v1904_v45 = vld [vmem:[%s2712_s3 + $0xa4] ss:$8 sps:$4 sm:$0xff]   ;;  %p339_p5 = scmp.lt.s32.totalorder %s1936_s21, 1 }
   0xf   : > { %s1783_s26 = sshll.u32 %s2721_s11, 3  ;;  %v1906_v55 = vld [vmem:[%s2712_s3 + $0xa0] ss:$8 sps:$4 sm:$0xff]   ;;  %v1907_v59 = vld [vmem:[%s2712_s3 + $0xb4] ss:$8 sps:$4 sm:$0xff]   ;;  %vm1301_vm0 = vcmask 1040384  }
  0x10   : > { %901 = vmatpush1.bf16.msra.mxu0 %v1882_v5  ;;  %1836 = vmatpush1.bf16.msra.mxu1 %v1882_v5  ;;  %s2043_s7 = scalar_lea.vmem %s2709_s0, %s1783_s26  ;;  %v1909_v5 = vld [vmem:[%s2712_s3 + $0xb0] ss:$8 sps:$4 sm:$0xff]   ;;  %s2413_s29 = scalar_lea.vmem %s2714_s5, %s1783_s26 }
  0x11   : > { %902 = vmatprep.subr.bf16.mxu0 %v1883_v6  ;;  %1821 = vmatprep.subr.bf16.mxu1 %v1883_v6  ;;  %v348_v16 = vld [vmem:[%s2043_s7] sm:$0xff]  ;;  %v349_v17 = vld [vmem:[%s2043_s7 + $0x8] sm:$0xff]  ;;  %v350_v38 = vld [vmem:[%s2043_s7 + $0x10] sm:$0xff]  ;;  %s2723_s21 = smov (!%p339_p5, %s1936_s21), 1 }
  0x12   : > { %v381_v18 = vunpack.c.h.bf16 %v348_v16  ;;  %v383_v19 = vunpack.c.h.bf16 %v349_v17  ;;  %v351_v39 = vld [vmem:[%s2043_s7 + $0x18] sm:$0xff]  ;;  %v380_v40 = vunpack.c.l.bf16 %v348_v16  ;;  %v382_v43 = vunpack.c.l.bf16 %v349_v17  ;;  %v2103_v48 = vld [vmem:[%s2043_s7 + $0x80] sm:$0xff]  ;;  %v2106_v50 = vld [vmem:[%s2043_s7 + $0x88] sm:$0xff]  ;;  %s1785_s11 = sshll.u32 %s2723_s21, 2 }
  0x13   : > { %v385_v44 = vunpack.c.h.bf16 %v350_v38  ;;  %v387_v46 = vunpack.c.h.bf16 %v351_v39  ;;  %v384_v47 = vunpack.c.l.bf16 %v350_v38  ;;  %v386_v49 = vunpack.c.l.bf16 %v351_v39  ;;  %v2113_v53 = vld [vmem:[%s2043_s7 + $0x20] sm:$0xff]  ;;  %v2116_v54 = vld [vmem:[%s2043_s7 + $0x28] sm:$0xff]  ;;  %s346_s8 = scalar_lea.vmem %s2715_s6, %s1785_s11 }
  0x14   : > { %903 = vmatpush1.bf16.msra.mxu0 %v1885_v7  ;;  %1837 = vmatpush1.bf16.msra.mxu1 %v1885_v7  ;;  %v457_v26 = vmul.f32 %v2065_v23, %v381_v18  ;;  %v459_v27 = vmul.f32 %v2065_v23, %v383_v19  ;;  %v456_v52 = vmul.f32 %v2094_v41, %v380_v40  ;;  %v413_v58 = vunpack.c.h.bf16 %v2103_v48  ;;  %v354_v40 = vld [vmem:[%s2043_s7 + $0x30] sm:$0xff] }
  0x15   : > { %904 = vmatprep.subr.bf16.mxu0 %v1886_v9  ;;  %1822 = vmatprep.subr.bf16.mxu1 %v1886_v9  ;;  %v458_v56 = vmul.f32 %v2094_v41, %v382_v43  ;;  %v461_v57 = vmul.f32 %v2065_v23, %v385_v44  ;;  %v463_v60 = vmul.f32 %v2065_v23, %v387_v46  ;;  %v415_v62 = vunpack.c.h.bf16 %v2106_v50  ;;  %v1910_v9 = vld [vmem:[%s2712_s3 + $0xc4] ss:$8 sps:$4 sm:$0xff]  }
  0x16   : > { %v533_v29 = vadd.f32 %v2071_v25, %v457_v26  ;;  %v535_v30 = vadd.f32 %v2071_v25, %v459_v27  ;;  %v460_v61 = vmul.f32 %v2094_v41, %v384_v47  ;;  %v462_v63 = vmul.f32 %v2094_v41, %v386_v49 }
  0x17   : > { %v389_v0 = vunpack.c.h.bf16 %v2113_v53  ;;  %v391_v1 = vunpack.c.h.bf16 %v2116_v54  ;;  %v489_v2 = vmul.f32 %v2065_v23, %v413_v58  ;;  %v532_v3 = vadd.f32 %v2109_v51, %v456_v52 }
  0x18   : > { %905 = vmatpush1.bf16.msra.mxu0 %v1888_v10  ;;  %1838 = vmatpush1.bf16.msra.mxu1 %v1888_v10  ;;  %v597_v32 = vmax.f32 %v533_v29, 0.0  ;;  %v599_v33 = vmax.f32 %v535_v30, 0.0  ;;  %v491_v4 = vmul.f32 %v2065_v23, %v415_v62  ;;  %v534_v6 = vadd.f32 %v2109_v51, %v458_v56  ;;  %v1913_v30 = vld [vmem:[%s2712_s3 + $0xd4] ss:$8 sps:$4 sm:$0xff]  }
  0x19   : > { %906 = vmatprep.subr.bf16.mxu0 %v1889_v12  ;;  %1823 = vmatprep.subr.bf16.mxu1 %v1889_v12  ;;  %v537_v7 = vadd.f32 %v2071_v25, %v461_v57  ;;  %v565_v8 = vadd.f32 %v2071_v25, %v489_v2  ;;  %v539_v10 = vadd.f32 %v2071_v25, %v463_v60  ;;  %v412_v20 = vunpack.c.l.bf16 %v2103_v48  ;;  %v2194_v60 = vld [vmem:[%s2043_s7 + $0xa0] sm:$0xff] }
  0x1a   : > { %v661_v36 = vpack.c.bf16 %v599_v33, %v597_v32  ;;  %v536_v11 = vadd.f32 %v2109_v51, %v460_v61  ;;  %v567_v12 = vadd.f32 %v2071_v25, %v491_v4  ;;  %v538_v16 = vadd.f32 %v2109_v51, %v462_v63  ;;  %v1918_v2 = vld [vmem:[%s2712_s3 + $0xe0] ss:$8 sps:$4 sm:$0xff]  }
  0x1b   : > { %v465_v17 = vmul.f32 %v2065_v23, %v389_v0  ;;  %v467_v18 = vmul.f32 %v2065_v23, %v391_v1  ;;  %v629_v19 = vmax.f32 %v565_v8, 0.0  ;;  %v414_v21 = vunpack.c.l.bf16 %v2106_v50  ;;  %v1916_v50 = vld [vmem:[%s2712_s3 + $0xe4] ss:$8 sps:$4 sm:$0xff]  }
  0x1c   : > { %907 = vmatpush1.bf16.msra.mxu0 %v1891_v13  ;;  %1839 = vmatpush1.bf16.msra.mxu1 %v1891_v13  ;;  %v2149_v13 = vld [vmem:[%s2043_s7 + $0x90] sm:$0xff]  ;;  %v596_v26 = vmax.f32 %v532_v3, 0.0  ;;  %v598_v27 = vmax.f32 %v534_v6, 0.0  ;;  %v603_v32 = vmax.f32 %v539_v10, 0.0  ;;  %v388_v33 = vunpack.c.l.bf16 %v2113_v53  ;;  %v369_v1 = vld [vmem:[%s2043_s7 + $0xa8] sm:$0xff] }
  0x1d   : > { %908 = vmatprep.subr.bf16.mxu0 %v1892_v15  ;;  %1824 = vmatprep.subr.bf16.mxu1 %v1892_v15  ;;  %v2152_v15 = vld [vmem:[%s2043_s7 + $0x98] sm:$0xff]  ;;  %v541_v38 = vadd.f32 %v2071_v25, %v465_v17  ;;  %v543_v39 = vadd.f32 %v2071_v25, %v467_v18  ;;  %v488_v43 = vmul.f32 %v2094_v41, %v412_v20  ;;  %v390_v47 = vunpack.c.l.bf16 %v2116_v54 }
  0x1e   : > { %928 = vmatprep.mubr.bf16.mxu0 %v661_v36  ;;  %v419_v29 = vunpack.c.h.bf16 %v2152_v15  ;;  %v600_v36 = vmax.f32 %v536_v11, 0.0  ;;  %v490_v44 = vmul.f32 %v2094_v41, %v414_v21  ;;  %v2179_v46 = vpack.c.bf16 %v598_v27, %v596_v26  ;;  %v1919_v6 = vld [vmem:[%s2712_s3 + $0xf4] ss:$8 sps:$4 sm:$0xff]   ;;  %v1921_v21 = vld [vmem:[%s2712_s3 + $0xf0] ss:$8 sps:$4 sm:$0xff]  }
  0x1f   : > { %v464_v53 = vmul.f32 %v2094_v41, %v388_v33  ;;  %v605_v54 = vmax.f32 %v541_v38, 0.0  ;;  %v607_v58 = vmax.f32 %v543_v39, 0.0  ;;  %v564_v61 = vadd.f32 %v2109_v51, %v488_v43  ;;  %v370_v43 = vld [vmem:[%s2043_s7 + $0xb0] sm:$0xff] }
  0x20   : > { %909 = vmatpush1.bf16.msra.mxu0 %v1894_v22  ;;  %1840 = vmatpush1.bf16.msra.mxu1 %v1894_v22  ;;  %v631_v22 = vmax.f32 %v567_v12, 0.0  ;;  %v495_v49 = vmul.f32 %v2065_v23, %v419_v29  ;;  %v566_v62 = vadd.f32 %v2109_v51, %v490_v44  ;;  %v416_v63 = vunpack.c.l.bf16 %v2149_v13 }
  0x21   : > { %910 = vmatprep.subr.bf16.mxu0 %v1895_v24  ;;  %1825 = vmatprep.subr.bf16.mxu1 %v1895_v24  ;;  %v1912_v24 = vld [vmem:[%s2712_s3 + $0xc0] ss:$8 sps:$4 sm:$0xff]   ;;  %v418_v0 = vunpack.c.l.bf16 %v2152_v15  ;;  %v466_v3 = vmul.f32 %v2094_v41, %v390_v47  ;;  %v421_v10 = vunpack.c.h.bf16 %v2194_v60  ;;  %v2216_v11 = vpack.c.bf16 %v607_v58, %v605_v54 }
  0x22   : > { %v2221_v15 = vld [vmem:[%s2043_s7 + $0x40] sm:$0xff]  ;;  %v628_v17 = vmax.f32 %v564_v61, 0.0  ;;  %v630_v18 = vmax.f32 %v566_v62, 0.0 }
  0x23   : > { %v494_v20 = vmul.f32 %v2094_v41, %v418_v0  ;;  %v497_v27 = vmul.f32 %v2065_v23, %v421_v10  ;;  %v542_v29 = vadd.f32 %v2109_v51, %v466_v3  ;;  %v396_v54 = vunpack.c.l.bf16 %v2221_v15 }
  0x24   : > { %911 = vmatpush1.bf16.msra.mxu0 %v1897_v28  ;;  %1841 = vmatpush1.bf16.msra.mxu1 %v1897_v28  ;;  %v417_v28 = vunpack.c.h.bf16 %v2149_v13  ;;  %v676_v38 = vpack.c.bf16 %v630_v18, %v628_v17 }
  0x25   : > { %912 = vmatprep.subr.bf16.mxu0 %v1898_v31  ;;  %1826 = vmatprep.subr.bf16.mxu1 %v1898_v31  ;;  %v601_v31 = vmax.f32 %v537_v7, 0.0  ;;  %v2211_v7 = vadd.f32 %v2109_v51, %v464_v53  ;;  %v573_v47 = vadd.f32 %v2071_v25, %v497_v27 }
  0x26   : > { %v493_v48 = vmul.f32 %v2065_v23, %v417_v28 }
  0x27   : > { %v2187_v52 = vpack.c.bf16 %v603_v32, %v601_v31  ;;  %v397_v32 = vunpack.c.h.bf16 %v2221_v15  ;;  %v604_v44 = vmax.f32 %v2211_v7, 0.0 }
  0x28   : > { %913 = vmatpush1.bf16.msra.mxu0 %v1900_v35  ;;  %1842 = vmatpush1.bf16.msra.mxu1 %v1900_v35  ;;  %v677_v35 = vpack.c.bf16 %v631_v22, %v629_v19  ;;  %v569_v4 = vadd.f32 %v2071_v25, %v493_v48  ;;  %v492_v19 = vmul.f32 %v2094_v41, %v416_v63  ;;  %v2229_v22 = vld [vmem:[%s2043_s7 + $0x48] sm:$0xff] }
  0x29   : > { %914 = vmatprep.subr.bf16.mxu0 %v1901_v37  ;;  %1827 = vmatprep.subr.bf16.mxu1 %v1901_v37  ;;  %v602_v37 = vmax.f32 %v538_v16, 0.0  ;;  %v423_v16 = vunpack.c.h.bf16 %v369_v1  ;;  %v399_v39 = vunpack.c.h.bf16 %v2229_v22 }
  0x2a   : > { %1008 = vmatprep.mubr.bf16.mxu1 %v677_v35 }
  0x2b   : > { %v2191_v57 = vpack.c.bf16 %v602_v37, %v600_v36  ;;  %v499_v28 = vmul.f32 %v2065_v23, %v423_v16  ;;  %v420_v36 = vunpack.c.l.bf16 %v2194_v60  ;;  %v422_v37 = vunpack.c.l.bf16 %v369_v1 }
  0x2c   : > { %915 = vmatpush1.bf16.msra.mxu0 %v1903_v42  ;;  %1843 = vmatpush1.bf16.msra.mxu1 %v1903_v42  ;;  %v2172_v42 = vld [vmem:[%s2043_s7 + $0x38] sm:$0xff]  ;;  %v425_v60 = vunpack.c.h.bf16 %v370_v43  ;;  %v475_v61 = vmul.f32 %v2065_v23, %v399_v39  ;;  %v472_v16 = vmul.f32 %v2094_v41, %v396_v54 }
  0x2d   : > { %916 = vmatprep.subr.bf16.mxu0 %v1904_v45  ;;  %1828 = vmatprep.subr.bf16.mxu1 %v1904_v45  ;;  %v1915_v45 = vld [vmem:[%s2712_s3 + $0xd0] ss:$8 sps:$4 sm:$0xff]   ;;  %v395_v56 = vunpack.c.h.bf16 %v2172_v42  ;;  %v394_v12 = vunpack.c.l.bf16 %v2172_v42  ;;  %v570_v42 = vadd.f32 %v2109_v51, %v494_v20  ;;  %v575_v48 = vadd.f32 %v2071_v25, %v499_v28 }
  0x2e   : > { %v496_v58 = vmul.f32 %v2094_v41, %v420_v36  ;;  %v551_v15 = vadd.f32 %v2071_v25, %v475_v61 }
  0x2f   : > { %v470_v33 = vmul.f32 %v2094_v41, %v394_v12  ;;  %v634_v63 = vmax.f32 %v570_v42, 0.0  ;;  %v639_v3 = vmax.f32 %v575_v48, 0.0 }
  0x30   : > { %917 = vmatpush1.bf16.msra.mxu0 %v1906_v55  ;;  %1844 = vmatpush1.bf16.msra.mxu1 %v1906_v55  ;;  %v393_v55 = vunpack.c.h.bf16 %v354_v40  ;;  %v572_v10 = vadd.f32 %v2109_v51, %v496_v58 }
  0x31   : > { %918 = vmatprep.subr.bf16.mxu0 %v1907_v59  ;;  %1829 = vmatprep.subr.bf16.mxu1 %v1907_v59  ;;  %v392_v59 = vunpack.c.l.bf16 %v354_v40  ;;  %v568_v40 = vadd.f32 %v2109_v51, %v492_v19  ;;  %v2258_v1 = vadd.f32 %v2109_v51, %v470_v33  ;;  %v372_v19 = vld [vmem:[%s2043_s7 + $0xc0] sm:$0xff] }
  0x32   : > { %v469_v8 = vmul.f32 %v2065_v23, %v393_v55  ;;  %v428_v58 = vunpack.c.l.bf16 %v372_v19 }
  0x33   : > { %v468_v13 = vmul.f32 %v2094_v41, %v392_v59  ;;  %v498_v59 = vmul.f32 %v2094_v41, %v422_v37  ;;  %v632_v62 = vmax.f32 %v568_v40, 0.0  ;;  %v615_v37 = vmax.f32 %v551_v15, 0.0 }
  0x34   : > { %919 = vmatpush1.bf16.msra.mxu0 %v1909_v5  ;;  %1845 = vmatpush1.bf16.msra.mxu1 %v1909_v5  ;;  %v571_v5 = vadd.f32 %v2071_v25, %v495_v49  ;;  %v371_v49 = vld [vmem:[%s2043_s7 + $0xb8] sm:$0xff] }
  0x35   : > { %920 = vmatprep.subr.bf16.mxu0 %v1910_v9  ;;  %1830 = vmatprep.subr.bf16.mxu1 %v1910_v9  ;;  %v471_v9 = vmul.f32 %v2065_v23, %v395_v56  ;;  %v2239_v35 = vadd.f32 %v2109_v51, %v468_v13  ;;  %v473_v56 = vmul.f32 %v2065_v23, %v397_v32  ;;  %v427_v0 = vunpack.c.h.bf16 %v371_v49 }
  0x36   : > { %v635_v26 = vmax.f32 %v571_v5, 0.0  ;;  %v574_v12 = vadd.f32 %v2109_v51, %v498_v59  ;;  %v424_v13 = vunpack.c.l.bf16 %v370_v43  ;;  %v678_v17 = vpack.c.bf16 %v634_v63, %v632_v62 }
  0x37   : > { %v547_v31 = vadd.f32 %v2071_v25, %v471_v9  ;;  %v608_v5 = vmax.f32 %v2239_v35, 0.0  ;;  %v503_v7 = vmul.f32 %v2065_v23, %v427_v0  ;;  %v359_v9 = vld [vmem:[%s2043_s7 + $0x58] sm:$0xff]  ;;  %v426_v18 = vunpack.c.l.bf16 %v371_v49 }
  0x38   : > { %921 = vmatpush1.bf16.msra.mxu0 %v1912_v24  ;;  %1846 = vmatpush1.bf16.msra.mxu1 %v1912_v24  ;;  %v633_v24 = vmax.f32 %v569_v4, 0.0  ;;  %v501_v4 = vmul.f32 %v2065_v23, %v425_v60  ;;  %v638_v32 = vmax.f32 %v574_v12, 0.0  ;;  %v500_v33 = vmul.f32 %v2094_v41, %v424_v13 }
  0x39   : > { %922 = vmatprep.subr.bf16.mxu0 %v1913_v30  ;;  %1831 = vmatprep.subr.bf16.mxu1 %v1913_v30  ;;  %v545_v30 = vadd.f32 %v2071_v25, %v469_v8  ;;  %v611_v55 = vmax.f32 %v547_v31, 0.0  ;;  %v549_v8 = vadd.f32 %v2071_v25, %v473_v56  ;;  %v636_v31 = vmax.f32 %v572_v10, 0.0 }
  0x3a   : > { %v429_v35 = vunpack.c.h.bf16 %v372_v19  ;;  %v502_v39 = vmul.f32 %v2094_v41, %v426_v18  ;;  %v504_v12 = vmul.f32 %v2094_v41, %v428_v58 }
  0x3b   : > { %v609_v53 = vmax.f32 %v545_v30, 0.0  ;;  %v373_v30 = vld [vmem:[%s2043_s7 + $0xc8] sm:$0xff]  ;;  %v613_v36 = vmax.f32 %v549_v8, 0.0 }
  0x3c   : > { %923 = vmatpush1.bf16.msra.mxu0 %v1915_v45  ;;  %1847 = vmatpush1.bf16.msra.mxu1 %v1915_v45  ;;  %v679_v45 = vpack.c.bf16 %v635_v26, %v633_v24  ;;  %v579_v24 = vadd.f32 %v2071_v25, %v503_v7  ;;  %v610_v26 = vmax.f32 %v2258_v1, 0.0  ;;  %v431_v43 = vunpack.c.h.bf16 %v373_v30 }
  0x3d   : > { %924 = vmatprep.subr.bf16.mxu0 %v1916_v50  ;;  %1832 = vmatprep.subr.bf16.mxu1 %v1916_v50  ;;  %v606_v50 = vmax.f32 %v542_v29, 0.0  ;;  %v667_v20 = vpack.c.bf16 %v611_v55, %v609_v53  ;;  %v403_v29 = vunpack.c.h.bf16 %v359_v9  ;;  %v402_v53 = vunpack.c.l.bf16 %v359_v9  ;;  %v2309_v9 = vld [vmem:[%s2043_s7 + $0x68] sm:$0xff] }
  0x3e   : > { %v643_v42 = vmax.f32 %v579_v24, 0.0  ;;  %v680_v55 = vpack.c.bf16 %v638_v32, %v636_v31  ;;  %v507_v56 = vmul.f32 %v2065_v23, %v431_v43  ;;  %v578_v54 = vadd.f32 %v2109_v51, %v502_v39 }
  0x3f   : > { %v479_v48 = vmul.f32 %v2065_v23, %v403_v29  ;;  %v430_v59 = vunpack.c.l.bf16 %v373_v30  ;;  %v666_v1 = vpack.c.bf16 %v610_v26, %v608_v5  ;;  %v478_v8 = vmul.f32 %v2094_v41, %v402_v53  ;;  %v2319_v26 = vld [vmem:[%s2043_s7 + $0xe0] sm:$0xff] }
  0x40   : > { %925 = vmatpush1.bf16.msra.mxu0 %v1918_v2  ;;  %1848 = vmatpush1.bf16.msra.mxu1 %v1918_v2  ;;  %v637_v2 = vmax.f32 %v573_v47, 0.0  ;;  %v583_v63 = vadd.f32 %v2071_v25, %v507_v56  ;;  %v642_v5 = vmax.f32 %v578_v54, 0.0  ;;  %v407_v24 = vunpack.c.h.bf16 %v2309_v9 }
  0x41   : > { %926 = vmatprep.subr.bf16.mxu0 %v1919_v6  ;;  %1833 = vmatprep.subr.bf16.mxu1 %v1919_v6  ;;  %v398_v6 = vunpack.c.l.bf16 %v2229_v22  ;;  %v577_v22 = vadd.f32 %v2071_v25, %v501_v4  ;;  %v555_v4 = vadd.f32 %v2071_v25, %v479_v48  ;;  %v506_v13 = vmul.f32 %v2094_v41, %v430_v59  ;;  %v378_v59 = vld [vmem:[%s2043_s7 + $0xf0] sm:$0xff] }
  0x42   : > { %v647_v18 = vmax.f32 %v583_v63, 0.0  ;;  %v580_v32 = vadd.f32 %v2109_v51, %v504_v12  ;;  %v406_v63 = vunpack.c.l.bf16 %v2309_v9 }
  0x43   : > { %v474_v27 = vmul.f32 %v2094_v41, %v398_v6  ;;  %v641_v40 = vmax.f32 %v577_v22, 0.0  ;;  %v669_v6 = vpack.c.bf16 %v615_v37, %v613_v36  ;;  %v619_v22 = vmax.f32 %v555_v4, 0.0 }
  0x44   : > { %927 = vmatpush1.bf16.msra.mxu0 %v1921_v21  ;;  %1849 = vmatpush1.bf16.msra.mxu1 %v1921_v21  ;;  %v681_v21 = vpack.c.bf16 %v639_v3, %v637_v2  ;;  %v644_v53 = vmax.f32 %v580_v32, 0.0 }
  0x45   : > { %v683_v61 = vpack.c.bf16 %v643_v42, %v641_v40  ;;  %v483_v42 = vmul.f32 %v2065_v23, %v407_v24 }
  0x47   : > { %929 = vmatmul.mubr.bf16.vlgmr.msra.gmra.mrb[0].mxu0 %v2179_v46  ;;  %1009 = vmatmul.mubr.bf16.vlgmr.msra.gmra.mrb[0].mxu1 %v676_v38  ;;  %v2261_v46 = vpack.c.bf16 %v606_v50, %v604_v44  ;;  %v2282_v38 = vadd.f32 %v2109_v51, %v472_v16  ;;  %v505_v44 = vmul.f32 %v2065_v23, %v429_v35  ;;  %v375_v50 = vld [vmem:[%s2043_s7 + $0xd8] sm:$0xff] }
  0x48   : > { %938 = vmatprep.mubr.bf16.mxu0 %v2187_v52  ;;  %1018 = vmatprep.mubr.bf16.mxu1 %v679_v45  ;;  %v358_v52 = vld [vmem:[%s2043_s7 + $0x50] sm:$0xff]  ;;  %v435_v0 = vunpack.c.h.bf16 %v375_v50  ;;  %v434_v30 = vunpack.c.l.bf16 %v375_v50  ;;  %v2347_v50 = vld [vmem:[%s2043_s7 + $0x78] sm:$0xff] }
  0x49   : > { %v401_v28 = vunpack.c.h.bf16 %v358_v52  ;;  %v2288_v45 = vld [vmem:[%s2043_s7 + $0xd0] sm:$0xff]  ;;  %v400_v49 = vunpack.c.l.bf16 %v358_v52  ;;  %v581_v62 = vadd.f32 %v2071_v25, %v505_v44  ;;  %v612_v2 = vmax.f32 %v2282_v38, 0.0  ;;  %v2306_v52 = vld [vmem:[%s2043_s7 + $0x60] sm:$0xff] }
  0x4a   : > { %v433_v60 = vunpack.c.h.bf16 %v2288_v45  ;;  %v511_v19 = vmul.f32 %v2065_v23, %v435_v0  ;;  %v432_v29 = vunpack.c.l.bf16 %v2288_v45  ;;  %v437_v38 = vunpack.c.h.bf16 %v2319_v26  ;;  %v379_v0 = vld [vmem:[%s2043_s7 + $0xf8] sm:$0xff] }
  0x4b   : > { %v477_v47 = vmul.f32 %v2065_v23, %v401_v28  ;;  %v476_v7 = vmul.f32 %v2094_v41, %v400_v49  ;;  %v2344_v49 = vld [vmem:[%s2043_s7 + $0x70] sm:$0xff]  ;;  %v443_v12 = vunpack.c.h.bf16 %v379_v0 }
  0x4c   : > { %v509_v15 = vmul.f32 %v2065_v23, %v433_v60  ;;  %v587_v37 = vadd.f32 %v2071_v25, %v511_v19  ;;  %v508_v45 = vmul.f32 %v2094_v41, %v432_v29  ;;  %v513_v54 = vmul.f32 %v2065_v23, %v437_v38 }
  0x4d   : > { %v553_v3 = vadd.f32 %v2071_v25, %v477_v47  ;;  %v2325_v28 = vadd.f32 %v2109_v51, %v476_v7  ;;  %v436_v7 = vunpack.c.l.bf16 %v2319_v26 }
  0x4e   : > { %v585_v35 = vadd.f32 %v2071_v25, %v509_v15  ;;  %v651_v56 = vmax.f32 %v587_v37, 0.0 }
  0x4f   : > { %939 = vmatmul.mubr.bf16.gmra.mrb[4].mxu0 %v2191_v57  ;;  %1019 = vmatmul.mubr.bf16.gmra.mrb[4].mxu1 %v678_v17  ;;  %v550_v57 = vadd.f32 %v2109_v51, %v474_v27  ;;  %v645_v17 = vmax.f32 %v581_v62, 0.0  ;;  %v2322_v27 = vld [vmem:[%s2043_s7 + $0xe8] sm:$0xff]  ;;  %v616_v47 = vmax.f32 %v2325_v28, 0.0  ;;  %v404_v62 = vunpack.c.l.bf16 %v2306_v52 }
  0x50   : > { %948 = vmatprep.mubr.bf16.mxu0 %v2216_v11  ;;  %1028 = vmatprep.mubr.bf16.mxu1 %v681_v21  ;;  %v576_v11 = vadd.f32 %v2109_v51, %v500_v33  ;;  %v617_v21 = vmax.f32 %v553_v3, 0.0  ;;  %v582_v33 = vadd.f32 %v2109_v51, %v506_v13  ;;  %v439_v39 = vunpack.c.h.bf16 %v2322_v27 }
  0x51   : > { %v614_v16 = vmax.f32 %v550_v57, 0.0  ;;  %v685_v36 = vpack.c.bf16 %v647_v18, %v645_v17  ;;  %v510_v57 = vmul.f32 %v2094_v41, %v434_v30  ;;  %v584_v3 = vadd.f32 %v2109_v51, %v508_v45 }
  0x52   : > { %v640_v10 = vmax.f32 %v576_v11, 0.0  ;;  %v671_v44 = vpack.c.bf16 %v619_v22, %v617_v21  ;;  %v649_v11 = vmax.f32 %v585_v35, 0.0  ;;  %v515_v58 = vmul.f32 %v2065_v23, %v439_v39 }
  0x53   : > { %v668_v43 = vpack.c.bf16 %v614_v16, %v612_v2  ;;  %v411_v2 = vunpack.c.h.bf16 %v2347_v50  ;;  %v586_v4 = vadd.f32 %v2109_v51, %v510_v57  ;;  %v480_v16 = vmul.f32 %v2094_v41, %v404_v62 }
  0x54   : > { %v682_v31 = vpack.c.bf16 %v642_v5, %v640_v10  ;;  %v441_v10 = vunpack.c.h.bf16 %v378_v59  ;;  %v687_v5 = vpack.c.bf16 %v651_v56, %v649_v11  ;;  %v591_v9 = vadd.f32 %v2071_v25, %v515_v58 }
  0x55   : > { %v482_v17 = vmul.f32 %v2094_v41, %v406_v63  ;;  %v648_v19 = vmax.f32 %v584_v3, 0.0  ;;  %v650_v21 = vmax.f32 %v586_v4, 0.0  ;;  %v487_v22 = vmul.f32 %v2065_v23, %v411_v2 }
  0x56   : > { %v517_v28 = vmul.f32 %v2065_v23, %v441_v10  ;;  %v408_v35 = vunpack.c.l.bf16 %v2344_v49  ;;  %v724_v10 = vld [vmem:[%s2713_s4] sm:$0x3] }
  0x57   : > { %949 = vmatmul.mubr.bf16.gmra.mrb[8].mxu0 %v2261_v46  ;;  %1029 = vmatmul.mubr.bf16.gmra.mrb[8].mxu1 %v680_v55  ;;  %v405_v46 = vunpack.c.h.bf16 %v2306_v52  ;;  %v646_v55 = vmax.f32 %v582_v33, 0.0  ;;  %v589_v52 = vadd.f32 %v2071_v25, %v513_v54  ;;  %v558_v32 = vadd.f32 %v2109_v51, %v482_v17 }
  0x58   : > { %958 = vmatprep.mubr.bf16.mxu0 %v667_v20  ;;  %1038 = vmatprep.mubr.bf16.mxu1 %v683_v61  ;;  %v2328_v20 = vadd.f32 %v2109_v51, %v478_v8  ;;  %v559_v61 = vadd.f32 %v2071_v25, %v483_v42  ;;  %v438_v8 = vunpack.c.l.bf16 %v2322_v27  ;;  %v655_v27 = vmax.f32 %v591_v9, 0.0 }
  0x59   : > { %v481_v40 = vmul.f32 %v2065_v23, %v405_v46  ;;  %v512_v46 = vmul.f32 %v2094_v41, %v436_v7  ;;  %v653_v26 = vmax.f32 %v589_v52, 0.0  ;;  %v686_v37 = vpack.c.bf16 %v650_v21, %v648_v19 }
  0x5a   : > { %v618_v48 = vmax.f32 %v2328_v20, 0.0  ;;  %v623_v15 = vmax.f32 %v559_v61, 0.0  ;;  %v514_v24 = vmul.f32 %v2094_v41, %v438_v8  ;;  %v519_v20 = vmul.f32 %v2065_v23, %v443_v12 }
  0x5b   : > { %v557_v60 = vadd.f32 %v2071_v25, %v481_v40  ;;  %v588_v38 = vadd.f32 %v2109_v51, %v512_v46  ;;  %v440_v40 = vunpack.c.l.bf16 %v378_v59  ;;  %v442_v42 = vunpack.c.l.bf16 %v379_v0 }
  0x5c   : > { %v670_v29 = vpack.c.bf16 %v618_v48, %v616_v47  ;;  %v590_v39 = vadd.f32 %v2109_v51, %v514_v24  ;;  %v595_v45 = vadd.f32 %v2071_v25, %v519_v20  ;;  %v622_v47 = vmax.f32 %v558_v32, 0.0 }
  0x5d   : > { %v621_v13 = vmax.f32 %v557_v60, 0.0  ;;  %v484_v48 = vmul.f32 %v2094_v41, %v408_v35  ;;  %v518_v11 = vmul.f32 %v2094_v41, %v442_v42 }
  0x5f   : > { %959 = vmatmul.mubr.bf16.gmra.mrb[12].mxu0 %v666_v1  ;;  %1039 = vmatmul.mubr.bf16.gmra.mrb[12].mxu1 %v682_v31  ;;  %v409_v1 = vunpack.c.h.bf16 %v2344_v49  ;;  %v673_v30 = vpack.c.bf16 %v623_v15, %v621_v13  ;;  %v556_v31 = vadd.f32 %v2109_v51, %v480_v16  ;;  %v560_v60 = vadd.f32 %v2109_v51, %v484_v48 }
  0x60   : > { %968 = vmatprep.mubr.bf16.mxu0 %v669_v6  ;;  %1048 = vmatprep.mubr.bf16.mxu1 %v685_v36  ;;  %v684_v6 = vpack.c.bf16 %v646_v55, %v644_v53  ;;  %v410_v36 = vunpack.c.l.bf16 %v2347_v50  ;;  %v652_v50 = vmax.f32 %v588_v38, 0.0  ;;  %v654_v53 = vmax.f32 %v590_v39, 0.0 }
  0x61   : > { %v485_v18 = vmul.f32 %v2065_v23, %v409_v1  ;;  %v563_v23 = vadd.f32 %v2071_v25, %v487_v22  ;;  %v620_v57 = vmax.f32 %v556_v31, 0.0  ;;  %v516_v55 = vmul.f32 %v2094_v41, %v440_v40 }
  0x62   : > { %v486_v49 = vmul.f32 %v2094_v41, %v410_v36  ;;  %v688_v62 = vpack.c.bf16 %v654_v53, %v652_v50  ;;  %v594_v0 = vadd.f32 %v2109_v51, %v518_v11  ;;  %v624_v41 = vmax.f32 %v560_v60, 0.0 }
  0x63   : > { %v561_v33 = vadd.f32 %v2071_v25, %v485_v18  ;;  %v627_v54 = vmax.f32 %v563_v23, 0.0  ;;  %v672_v59 = vpack.c.bf16 %v622_v47, %v620_v57  ;;  %v592_v63 = vadd.f32 %v2109_v51, %v516_v55 }
  0x64   : > { %v562_v61 = vadd.f32 %v2109_v51, %v486_v49  ;;  %v2395_v51 = vrot.slane %v724_v10, %v2083_v34 }
  0x65   : > { %v625_v56 = vmax.f32 %v561_v33, 0.0  ;;  %v656_v4 = vmax.f32 %v592_v63, 0.0 }
  0x66   : > { %v626_v3 = vmax.f32 %v562_v61, 0.0 }
  0x67   : > { %969 = vmatmul.mubr.bf16.gmra.mrb[16].mxu0 %v668_v43  ;;  %1049 = vmatmul.mubr.bf16.gmra.mrb[16].mxu1 %v684_v6  ;;  %v689_v43 = vpack.c.bf16 %v655_v27, %v653_v26  ;;  %v675_v1 = vpack.c.bf16 %v627_v54, %v625_v56  ;;  %v658_v6 = vmax.f32 %v594_v0, 0.0 }
  0x68   : > { %978 = vmatprep.mubr.bf16.mxu0 %v671_v44  ;;  %1058 = vmatprep.mubr.bf16.mxu1 %v687_v5  ;;  %v593_v44 = vadd.f32 %v2071_v25, %v517_v28  ;;  %v659_v25 = vmax.f32 %v595_v45, 0.0  ;;  %v674_v7 = vpack.c.bf16 %v626_v3, %v624_v41  ;;  %v2398_v5 = vrot.slane %v724_v10, %v2048_v14 }
  0x69   : > { %v690_v8 = vpack.c.bf16 %v658_v6, %v656_v4 }
  0x6a   : > { %v657_v58 = vmax.f32 %v593_v44, 0.0 }
  0x6c   : > { %v691_v2 = vpack.c.bf16 %v659_v25, %v657_v58 }
  0x6f   : > { %979 = vmatmul.mubr.bf16.gmra.mrb[20].mxu0 %v670_v29  ;;  %1059 = vmatmul.mubr.bf16.gmra.mrb[20].mxu1 %v686_v37 }
  0x70   : > { %988 = vmatprep.mubr.bf16.mxu0 %v673_v30  ;;  %1068 = vmatprep.mubr.bf16.mxu1 %v689_v43 }
  0x77   : > { %989 = vmatmul.mubr.bf16.gmra.mrb[24].mxu0 %v672_v59  ;;  %1069 = vmatmul.mubr.bf16.gmra.mrb[24].mxu1 %v688_v62 }
  0x78   : > { %998 = vmatprep.mubr.bf16.mxu0 %v675_v1  ;;  %1078 = vmatprep.mubr.bf16.mxu1 %v691_v2 }
  0x7f   : > { %999 = vmatmul.mubr.bf16.gmra.mrb[28].mxu0 %v674_v7  ;;  %1079 = vmatmul.mubr.bf16.gmra.mrb[28].mxu1 %v690_v8 }
 0x11a   : > { %v930_v52 = vpop.f32.mrb[0].mxu0  ;;  %v1010_v9 = vpop.f32.mrb[0].mxu1 }
 0x11b   : > { %v931_v12 = vadd.f32 %v930_v52, %v2395_v51  ;;  %v932_v13 = vpop.f32.mrb[1].mxu0  ;;  %v2402_v15 = vadd.f32 %v1010_v9, %v2395_v51  ;;  %v1012_v16 = vpop.f32.mrb[1].mxu1 }
 0x11c   : > { %v933_v17 = vadd.f32 %v932_v13, %v2398_v5  ;;  %v934_v18 = vpop.f32.mrb[2].mxu0  ;;  %v2406_v19 = vadd.f32 %v1012_v16, %v2398_v5  ;;  %v1014_v34 = vpop.f32.mrb[2].mxu1 }
 0x11d   : > { %v935_v14 = vadd.f32 %v934_v18, %v2395_v51  ;;  %v936_v21 = vpop.f32.mrb[3].mxu0  ;;  %v1016_v22 = vpop.f32.mrb[3].mxu1  ;;  %v1163_v46 = vmul.f32 %v931_v12, %v931_v12  ;;  %v2418_v27 = vadd.f32 %v1014_v34, %v2395_v51 }
 0x11e   : > { %v1786_v24 = vpack.c.bf16 %v933_v17, %v931_v12  ;;  %v937_v26 = vadd.f32 %v936_v21, %v2398_v5  ;;  %v1164_v28 = vmul.f32 %v933_v17, %v933_v17  ;;  %v1802_v30 = vpack.c.bf16 %v2406_v19, %v2402_v15 }
 0x11f   : > { %v1089_v20 = vadd.f32 %v935_v14, %v931_v12  ;;  %v1165_v29 = vmul.f32 %v935_v14, %v935_v14  ;;  %v2424_v35 = vadd.f32 %v1016_v22, %v2398_v5 }
 0x120   : > { %1508 = vst [vmem:[%s2413_s29] sm:$0xff] %v1786_v24  ;;  %v1126_v31 = vadd.f32 %v937_v26, %v933_v17  ;;  %v1166_v32 = vmul.f32 %v937_v26, %v937_v26  ;;  %v1787_v33 = vpack.c.bf16 %v937_v26, %v935_v14  ;;  %1524 = vst [vmem:[%s2413_s29 + $0x80] sm:$0xff] %v1802_v30 }
 0x121   : > { %v1227_v36 = vadd.f32 %v1165_v29, %v1163_v46  ;;  %v1803_v39 = vpack.c.bf16 %v2424_v35, %v2418_v27 }
 0x122   : > { %v1264_v37 = vadd.f32 %v1166_v32, %v1164_v28  ;;  %1509 = vst [vmem:[%s2413_s29 + $0x8] sm:$0xff] %v1787_v33  ;;  %v940_v38 = vpop.f32.mrb[4].mxu0  ;;  %v1020_v40 = vpop.f32.mrb[4].mxu1 }
 0x123   : > { %v941_v42 = vadd.f32 %v940_v38, %v2395_v51  ;;  %v942_v23 = vpop.f32.mrb[5].mxu0  ;;  %v1022_v43 = vpop.f32.mrb[5].mxu1  ;;  %1525 = vst [vmem:[%s2413_s29 + $0x88] sm:$0xff] %v1803_v39  ;;  %v2434_v57 = vadd.f32 %v1020_v40, %v2395_v51 }
 0x124   : > { %v943_v44 = vadd.f32 %v942_v23, %v2398_v5  ;;  %v944_v45 = vpop.f32.mrb[6].mxu0  ;;  %v1024_v47 = vpop.f32.mrb[6].mxu1  ;;  %v2438_v55 = vadd.f32 %v1022_v43, %v2398_v5 }
 0x125   : > { %v1090_v48 = vadd.f32 %v1089_v20, %v941_v42  ;;  %v1167_v49 = vmul.f32 %v941_v42, %v941_v42  ;;  %v945_v50 = vadd.f32 %v944_v45, %v2395_v51  ;;  %v946_v53 = vpop.f32.mrb[7].mxu0  ;;  %v1026_v11 = vpop.f32.mrb[7].mxu1  ;;  %v2445_v3 = vadd.f32 %v1024_v47, %v2395_v51 }
 0x126   : > { %v1127_v56 = vadd.f32 %v1126_v31, %v943_v44  ;;  %v1168_v54 = vmul.f32 %v943_v44, %v943_v44  ;;  %v1788_v58 = vpack.c.bf16 %v943_v44, %v941_v42  ;;  %v947_v25 = vadd.f32 %v946_v53, %v2398_v5 }
 0x127   : > { %v1228_v59 = vadd.f32 %v1227_v36, %v1167_v49  ;;  %v1091_v60 = vadd.f32 %v1090_v48, %v945_v50  ;;  %v1169_v61 = vmul.f32 %v945_v50, %v945_v50  ;;  %v1804_v41 = vpack.c.bf16 %v2438_v55, %v2434_v57 }
 0x128   : > { %v1265_v62 = vadd.f32 %v1264_v37, %v1168_v54  ;;  %1510 = vst [vmem:[%s2413_s29 + $0x10] sm:$0xff] %v1788_v58  ;;  %v1128_v63 = vadd.f32 %v1127_v56, %v947_v25  ;;  %v1170_v0 = vmul.f32 %v947_v25, %v947_v25  ;;  %v1789_v1 = vpack.c.bf16 %v947_v25, %v945_v50 }
 0x129   : > { %v1229_v2 = vadd.f32 %v1228_v59, %v1169_v61  ;;  %v2448_v4 = vadd.f32 %v1026_v11, %v2398_v5  ;;  %1526 = vst [vmem:[%s2413_s29 + $0x90] sm:$0xff] %v1804_v41 }
 0x12a   : > { %v1266_v6 = vadd.f32 %v1265_v62, %v1170_v0  ;;  %1511 = vst [vmem:[%s2413_s29 + $0x18] sm:$0xff] %v1789_v1  ;;  %v950_v7 = vpop.f32.mrb[8].mxu0  ;;  %v1030_v8 = vpop.f32.mrb[8].mxu1 }
 0x12b   : > { %v951_v10 = vadd.f32 %v950_v7, %v2395_v51  ;;  %v952_v52 = vpop.f32.mrb[9].mxu0  ;;  %v1805_v9 = vpack.c.bf16 %v2448_v4, %v2445_v3  ;;  %v1032_v12 = vpop.f32.mrb[9].mxu1  ;;  %v2457_v17 = vadd.f32 %v1030_v8, %v2395_v51 }
 0x12c   : > { %v953_v13 = vadd.f32 %v952_v52, %v2398_v5  ;;  %v954_v16 = vpop.f32.mrb[10].mxu0  ;;  %v1034_v18 = vpop.f32.mrb[10].mxu1  ;;  %v2462_v46 = vadd.f32 %v1032_v12, %v2398_v5 }
 0x12d   : > { %v1092_v34 = vadd.f32 %v1091_v60, %v951_v10  ;;  %v1171_v14 = vmul.f32 %v951_v10, %v951_v10  ;;  %v955_v21 = vadd.f32 %v954_v16, %v2395_v51  ;;  %v956_v22 = vpop.f32.mrb[11].mxu0  ;;  %1527 = vst [vmem:[%s2413_s29 + $0x98] sm:$0xff] %v1805_v9  ;;  %v1036_v24 = vpop.f32.mrb[11].mxu1  ;;  %v2466_v33 = vadd.f32 %v1034_v18, %v2395_v51 }
 0x12e   : > { %v1129_v26 = vadd.f32 %v1128_v63, %v953_v13  ;;  %v1172_v28 = vmul.f32 %v953_v13, %v953_v13  ;;  %v1790_v20 = vpack.c.bf16 %v953_v13, %v951_v10  ;;  %v957_v29 = vadd.f32 %v956_v22, %v2398_v5 }
 0x12f   : > { %v1230_v30 = vadd.f32 %v1229_v2, %v1171_v14  ;;  %v1093_v31 = vadd.f32 %v1092_v34, %v955_v21  ;;  %v1173_v32 = vmul.f32 %v955_v21, %v955_v21  ;;  %v1806_v42 = vpack.c.bf16 %v2462_v46, %v2457_v17 }
 0x130   : > { %v1267_v36 = vadd.f32 %v1266_v6, %v1172_v28  ;;  %1512 = vst [vmem:[%s2413_s29 + $0x20] sm:$0xff] %v1790_v20  ;;  %v1130_v37 = vadd.f32 %v1129_v26, %v957_v29  ;;  %v1174_v38 = vmul.f32 %v957_v29, %v957_v29  ;;  %v1791_v39 = vpack.c.bf16 %v957_v29, %v955_v21 }
 0x131   : > { %v1231_v40 = vadd.f32 %v1230_v30, %v1173_v32  ;;  %v2473_v44 = vadd.f32 %v1036_v24, %v2398_v5  ;;  %1528 = vst [vmem:[%s2413_s29 + $0xa0] sm:$0xff] %v1806_v42 }
 0x132   : > { %v1268_v23 = vadd.f32 %v1267_v36, %v1174_v38  ;;  %1513 = vst [vmem:[%s2413_s29 + $0x28] sm:$0xff] %v1791_v39  ;;  %v960_v43 = vpop.f32.mrb[12].mxu0  ;;  %v1040_v45 = vpop.f32.mrb[12].mxu1 }
 0x133   : > { %v961_v47 = vadd.f32 %v960_v43, %v2395_v51  ;;  %v962_v48 = vpop.f32.mrb[13].mxu0  ;;  %v1042_v49 = vpop.f32.mrb[13].mxu1  ;;  %v1807_v11 = vpack.c.bf16 %v2473_v44, %v2466_v33  ;;  %v2481_v56 = vadd.f32 %v1040_v45, %v2395_v51 }
 0x134   : > { %v963_v50 = vadd.f32 %v962_v48, %v2398_v5  ;;  %v964_v53 = vpop.f32.mrb[14].mxu0  ;;  %v1044_v54 = vpop.f32.mrb[14].mxu1  ;;  %v2485_v61 = vadd.f32 %v1042_v49, %v2398_v5 }
 0x135   : > { %v1094_v58 = vadd.f32 %v1093_v31, %v961_v47  ;;  %v1175_v25 = vmul.f32 %v961_v47, %v961_v47  ;;  %v965_v59 = vadd.f32 %v964_v53, %v2395_v51  ;;  %v966_v60 = vpop.f32.mrb[15].mxu0  ;;  %v1046_v62 = vpop.f32.mrb[15].mxu1  ;;  %1529 = vst [vmem:[%s2413_s29 + $0xa8] sm:$0xff] %v1807_v11  ;;  %v2493_v16 = vadd.f32 %v1044_v54, %v2395_v51 }
 0x136   : > { %v1131_v63 = vadd.f32 %v1130_v37, %v963_v50  ;;  %v1176_v0 = vmul.f32 %v963_v50, %v963_v50  ;;  %v1792_v1 = vpack.c.bf16 %v963_v50, %v961_v47  ;;  %v967_v2 = vadd.f32 %v966_v60, %v2398_v5 }
 0x137   : > { %v1232_v41 = vadd.f32 %v1231_v40, %v1175_v25  ;;  %v1095_v6 = vadd.f32 %v1094_v58, %v965_v59  ;;  %v1177_v7 = vmul.f32 %v965_v59, %v965_v59  ;;  %v1808_v13 = vpack.c.bf16 %v2485_v61, %v2481_v56 }
 0x138   : > { %v1269_v8 = vadd.f32 %v1268_v23, %v1176_v0  ;;  %1514 = vst [vmem:[%s2413_s29 + $0x30] sm:$0xff] %v1792_v1  ;;  %v1132_v10 = vadd.f32 %v1131_v63, %v967_v2  ;;  %v1178_v52 = vmul.f32 %v967_v2, %v967_v2  ;;  %v1793_v9 = vpack.c.bf16 %v967_v2, %v965_v59 }
 0x139   : > { %v1233_v12 = vadd.f32 %v1232_v41, %v1177_v7  ;;  %v2496_v18 = vadd.f32 %v1046_v62, %v2398_v5  ;;  %1530 = vst [vmem:[%s2413_s29 + $0xb0] sm:$0xff] %v1808_v13 }
 0x13a   : > { %v1270_v34 = vadd.f32 %v1269_v8, %v1178_v52  ;;  %1515 = vst [vmem:[%s2413_s29 + $0x38] sm:$0xff] %v1793_v9  ;;  %v970_v14 = vpop.f32.mrb[16].mxu0  ;;  %v1050_v21 = vpop.f32.mrb[16].mxu1 }
 0x13b   : > { %v971_v22 = vadd.f32 %v970_v14, %v2395_v51  ;;  %v972_v24 = vpop.f32.mrb[17].mxu0  ;;  %v1809_v26 = vpack.c.bf16 %v2496_v18, %v2493_v16  ;;  %v1052_v28 = vpop.f32.mrb[17].mxu1  ;;  %v2505_v30 = vadd.f32 %v1050_v21, %v2395_v51 }
 0x13c   : > { %v973_v20 = vadd.f32 %v972_v24, %v2398_v5  ;;  %v974_v29 = vpop.f32.mrb[18].mxu0  ;;  %v1054_v31 = vpop.f32.mrb[18].mxu1  ;;  %v2510_v39 = vadd.f32 %v1052_v28, %v2398_v5 }
 0x13d   : > { %v1096_v32 = vadd.f32 %v1095_v6, %v971_v22  ;;  %v1179_v36 = vmul.f32 %v971_v22, %v971_v22  ;;  %v975_v37 = vadd.f32 %v974_v29, %v2395_v51  ;;  %v976_v38 = vpop.f32.mrb[19].mxu0  ;;  %1531 = vst [vmem:[%s2413_s29 + $0xb8] sm:$0xff] %v1809_v26  ;;  %v1056_v40 = vpop.f32.mrb[19].mxu1  ;;  %v2514_v50 = vadd.f32 %v1054_v31, %v2395_v51 }
 0x13e   : > { %v1133_v42 = vadd.f32 %v1132_v10, %v973_v20  ;;  %v1180_v23 = vmul.f32 %v973_v20, %v973_v20  ;;  %v1794_v43 = vpack.c.bf16 %v973_v20, %v971_v22  ;;  %v977_v45 = vadd.f32 %v976_v38, %v2398_v5 }
 0x13f   : > { %v1234_v47 = vadd.f32 %v1233_v12, %v1179_v36  ;;  %v1097_v48 = vadd.f32 %v1096_v32, %v975_v37  ;;  %v1181_v49 = vmul.f32 %v975_v37, %v975_v37  ;;  %v1810_v59 = vpack.c.bf16 %v2510_v39, %v2505_v30 }
 0x140   : > { %v1271_v53 = vadd.f32 %v1270_v34, %v1180_v23  ;;  %1516 = vst [vmem:[%s2413_s29 + $0x40] sm:$0xff] %v1794_v43  ;;  %v1134_v11 = vadd.f32 %v1133_v42, %v977_v45  ;;  %v1182_v54 = vmul.f32 %v977_v45, %v977_v45  ;;  %v1795_v58 = vpack.c.bf16 %v977_v45, %v975_v37 }
 0x141   : > { %v1235_v25 = vadd.f32 %v1234_v47, %v1181_v49  ;;  %v2521_v63 = vadd.f32 %v1056_v40, %v2398_v5  ;;  %1532 = vst [vmem:[%s2413_s29 + $0xc0] sm:$0xff] %v1810_v59 }
 0x142   : > { %v1272_v60 = vadd.f32 %v1271_v53, %v1182_v54  ;;  %1517 = vst [vmem:[%s2413_s29 + $0x48] sm:$0xff] %v1795_v58  ;;  %v980_v62 = vpop.f32.mrb[20].mxu0  ;;  %v1060_v0 = vpop.f32.mrb[20].mxu1 }
 0x143   : > { %v981_v1 = vadd.f32 %v980_v62, %v2395_v51  ;;  %v982_v2 = vpop.f32.mrb[21].mxu0  ;;  %v1062_v41 = vpop.f32.mrb[21].mxu1  ;;  %v1811_v8 = vpack.c.bf16 %v2521_v63, %v2514_v50  ;;  %v2529_v10 = vadd.f32 %v1060_v0, %v2395_v51 }
 0x144   : > { %v983_v6 = vadd.f32 %v982_v2, %v2398_v5  ;;  %v984_v7 = vpop.f32.mrb[22].mxu0  ;;  %v1064_v52 = vpop.f32.mrb[22].mxu1  ;;  %v2533_v14 = vadd.f32 %v1062_v41, %v2398_v5 }
 0x145   : > { %v1098_v9 = vadd.f32 %v1097_v48, %v981_v1  ;;  %v1183_v12 = vmul.f32 %v981_v1, %v981_v1  ;;  %v985_v13 = vadd.f32 %v984_v7, %v2395_v51  ;;  %v986_v34 = vpop.f32.mrb[23].mxu0  ;;  %v1066_v21 = vpop.f32.mrb[23].mxu1  ;;  %1533 = vst [vmem:[%s2413_s29 + $0xc8] sm:$0xff] %v1811_v8  ;;  %v2541_v23 = vadd.f32 %v1064_v52, %v2395_v51 }
 0x146   : > { %v1135_v22 = vadd.f32 %v1134_v11, %v983_v6  ;;  %v1184_v24 = vmul.f32 %v983_v6, %v983_v6  ;;  %v1796_v26 = vpack.c.bf16 %v983_v6, %v981_v1  ;;  %v987_v28 = vadd.f32 %v986_v34, %v2398_v5 }
 0x147   : > { %v1236_v20 = vadd.f32 %v1235_v25, %v1183_v12  ;;  %v1099_v29 = vadd.f32 %v1098_v9, %v985_v13  ;;  %v1185_v31 = vmul.f32 %v985_v13, %v985_v13  ;;  %v1812_v42 = vpack.c.bf16 %v2533_v14, %v2529_v10 }
 0x148   : > { %v1273_v32 = vadd.f32 %v1272_v60, %v1184_v24  ;;  %1518 = vst [vmem:[%s2413_s29 + $0x50] sm:$0xff] %v1796_v26  ;;  %v1136_v36 = vadd.f32 %v1135_v22, %v987_v28  ;;  %v1186_v37 = vmul.f32 %v987_v28, %v987_v28  ;;  %v1797_v38 = vpack.c.bf16 %v987_v28, %v985_v13 }
 0x149   : > { %v1237_v40 = vadd.f32 %v1236_v20, %v1185_v31  ;;  %v2544_v43 = vadd.f32 %v1066_v21, %v2398_v5  ;;  %1534 = vst [vmem:[%s2413_s29 + $0xd0] sm:$0xff] %v1812_v42 }
 0x14a   : > { %v1274_v45 = vadd.f32 %v1273_v32, %v1186_v37  ;;  %1519 = vst [vmem:[%s2413_s29 + $0x58] sm:$0xff] %v1797_v38  ;;  %v990_v47 = vpop.f32.mrb[24].mxu0  ;;  %v1070_v48 = vpop.f32.mrb[24].mxu1 }
 0x14b   : > { %v991_v49 = vadd.f32 %v990_v47, %v2395_v51  ;;  %v992_v53 = vpop.f32.mrb[25].mxu0  ;;  %v1813_v11 = vpack.c.bf16 %v2544_v43, %v2541_v23  ;;  %v1072_v54 = vpop.f32.mrb[25].mxu1  ;;  %v2553_v59 = vadd.f32 %v1070_v48, %v2395_v51 }
 0x14c   : > { %v993_v58 = vadd.f32 %v992_v53, %v2398_v5  ;;  %v994_v25 = vpop.f32.mrb[26].mxu0  ;;  %v1074_v60 = vpop.f32.mrb[26].mxu1  ;;  %v2558_v41 = vadd.f32 %v1072_v54, %v2398_v5 }
 0x14d   : > { %v1100_v62 = vadd.f32 %v1099_v29, %v991_v49  ;;  %v1187_v0 = vmul.f32 %v991_v49, %v991_v49  ;;  %v995_v1 = vadd.f32 %v994_v25, %v2395_v51  ;;  %v996_v2 = vpop.f32.mrb[27].mxu0  ;;  %1535 = vst [vmem:[%s2413_s29 + $0xd8] sm:$0xff] %v1813_v11  ;;  %v1076_v6 = vpop.f32.mrb[27].mxu1  ;;  %v2562_v21 = vadd.f32 %v1074_v60, %v2395_v51 }
 0x14e   : > { %v1137_v7 = vadd.f32 %v1136_v36, %v993_v58  ;;  %v1188_v8 = vmul.f32 %v993_v58, %v993_v58  ;;  %v1798_v52 = vpack.c.bf16 %v993_v58, %v991_v49  ;;  %v997_v9 = vadd.f32 %v996_v2, %v2398_v5 }
 0x14f   : > { %v1238_v12 = vadd.f32 %v1237_v40, %v1187_v0  ;;  %v1101_v13 = vadd.f32 %v1100_v62, %v995_v1  ;;  %v1189_v34 = vmul.f32 %v995_v1, %v995_v1  ;;  %v1814_v29 = vpack.c.bf16 %v2558_v41, %v2553_v59 }
 0x150   : > { %v1275_v22 = vadd.f32 %v1274_v45, %v1188_v8  ;;  %1520 = vst [vmem:[%s2413_s29 + $0x60] sm:$0xff] %v1798_v52  ;;  %v1138_v24 = vadd.f32 %v1137_v7, %v997_v9  ;;  %v1190_v26 = vmul.f32 %v997_v9, %v997_v9  ;;  %v1799_v28 = vpack.c.bf16 %v997_v9, %v995_v1 }
 0x151   : > { %v1239_v20 = vadd.f32 %v1238_v12, %v1189_v34  ;;  %v2569_v36 = vadd.f32 %v1076_v6, %v2398_v5  ;;  %1536 = vst [vmem:[%s2413_s29 + $0xe0] sm:$0xff] %v1814_v29  ;;  %v1195_v7 = vmul.f32 %v2402_v15, %v2402_v15 }
 0x152   : > { %v1276_v31 = vadd.f32 %v1275_v22, %v1190_v26  ;;  %1521 = vst [vmem:[%s2413_s29 + $0x68] sm:$0xff] %v1799_v28  ;;  %v1000_v32 = vpop.f32.mrb[28].mxu0  ;;  %v1080_v37 = vpop.f32.mrb[28].mxu1 }
 0x153   : > { %v1001_v38 = vadd.f32 %v1000_v32, %v2395_v51  ;;  %v1002_v40 = vpop.f32.mrb[29].mxu0  ;;  %v1082_v42 = vpop.f32.mrb[29].mxu1  ;;  %v1815_v48 = vpack.c.bf16 %v2569_v36, %v2562_v21  ;;  %v2577_v49 = vadd.f32 %v1080_v37, %v2395_v51 }
 0x154   : > { %v1003_v45 = vadd.f32 %v1002_v40, %v2398_v5  ;;  %v1004_v47 = vpop.f32.mrb[30].mxu0  ;;  %v1084_v53 = vpop.f32.mrb[30].mxu1  ;;  %v2581_v60 = vadd.f32 %v1082_v42, %v2398_v5 }
 0x155   : > { %v1102_v11 = vadd.f32 %v1101_v13, %v1001_v38  ;;  %v1191_v54 = vmul.f32 %v1001_v38, %v1001_v38  ;;  %v1005_v58 = vadd.f32 %v1004_v47, %v2395_v51  ;;  %v1006_v25 = vpop.f32.mrb[31].mxu0  ;;  %v1086_v62 = vpop.f32.mrb[31].mxu1  ;;  %1537 = vst [vmem:[%s2413_s29 + $0xe8] sm:$0xff] %v1815_v48  ;;  %v2592_v29 = vadd.f32 %v1084_v53, %v2395_v51 }
 0x156   : > { %v1139_v0 = vadd.f32 %v1138_v24, %v1003_v45  ;;  %v1192_v1 = vmul.f32 %v1003_v45, %v1003_v45  ;;  %v1800_v2 = vpack.c.bf16 %v1003_v45, %v1001_v38  ;;  %v1007_v6 = vadd.f32 %v1006_v25, %v2398_v5 }
 0x157   : > { %v1240_v8 = vadd.f32 %v1239_v20, %v1191_v54  ;;  %v1103_v52 = vadd.f32 %v1102_v11, %v1005_v58  ;;  %v1193_v9 = vmul.f32 %v1005_v58, %v1005_v58  ;;  %v1816_v28 = vpack.c.bf16 %v2581_v60, %v2577_v49 }
 0x158   : > { %v1277_v12 = vadd.f32 %v1276_v31, %v1192_v1  ;;  %1522 = vst [vmem:[%s2413_s29 + $0x70] sm:$0xff] %v1800_v2  ;;  %v1140_v13 = vadd.f32 %v1139_v0, %v1007_v6  ;;  %v1194_v34 = vmul.f32 %v1007_v6, %v1007_v6  ;;  %v1801_v22 = vpack.c.bf16 %v1007_v6, %v1005_v58 }
 0x159   : > { %v1104_v24 = vadd.f32 %v1103_v52, %v2402_v15  ;;  %v1241_v26 = vadd.f32 %v1240_v8, %v1193_v9  ;;  %v1196_v20 = vmul.f32 %v2406_v19, %v2406_v19  ;;  %v2599_v37 = vadd.f32 %v1086_v62, %v2398_v5  ;;  %1538 = vst [vmem:[%s2413_s29 + $0xf0] sm:$0xff] %v1816_v28 }
 0x15a   : > { %v1141_v32 = vadd.f32 %v1140_v13, %v2406_v19  ;;  %v1278_v31 = vadd.f32 %v1277_v12, %v1194_v34  ;;  %1523 = vst [vmem:[%s2413_s29 + $0x78] sm:$0xff] %v1801_v22  ;;  %v1197_v15 = vmul.f32 %v2418_v27, %v2418_v27  ;;  %v1198_v51 = vmul.f32 %v2424_v35, %v2424_v35 }
 0x15b   : > { %v1105_v38 = vadd.f32 %v1104_v24, %v2418_v27  ;;  %v1242_v40 = vadd.f32 %v1241_v26, %v1195_v7  ;;  %v1817_v19 = vpack.c.bf16 %v2599_v37, %v2592_v29  ;;  %v1199_v5 = vmul.f32 %v2434_v57, %v2434_v57 }
 0x15c   : > { %v1142_v42 = vadd.f32 %v1141_v32, %v2424_v35  ;;  %v1279_v45 = vadd.f32 %v1278_v31, %v1196_v20  ;;  %v1200_v27 = vmul.f32 %v2438_v55, %v2438_v55  ;;  %v1201_v35 = vmul.f32 %v2445_v3, %v2445_v3 }
 0x15d   : > { %v1106_v47 = vadd.f32 %v1105_v38, %v2434_v57  ;;  %v1243_v48 = vadd.f32 %v1242_v40, %v1197_v15  ;;  %1539 = vst [vmem:[%s2413_s29 + $0xf8] sm:$0xff] %v1817_v19  ;;  %v1202_v25 = vmul.f32 %v2448_v4, %v2448_v4  ;;  %v1203_v0 = vmul.f32 %v2457_v17, %v2457_v17 }
 0x15e   : > { %v1143_v53 = vadd.f32 %v1142_v42, %v2438_v55  ;;  %v1280_v11 = vadd.f32 %v1279_v45, %v1198_v51  ;;  %v1204_v2 = vmul.f32 %v2462_v46, %v2462_v46  ;;  %v1211_v31 = vmul.f32 %v2505_v30, %v2505_v30 }
 0x15f   : > { %v1107_v54 = vadd.f32 %v1106_v47, %v2445_v3  ;;  %v1244_v58 = vadd.f32 %v1243_v48, %v1199_v5  ;;  %v1205_v3 = vmul.f32 %v2466_v33, %v2466_v33  ;;  %v1212_v38 = vmul.f32 %v2510_v39, %v2510_v39 }
 0x160   : > { %v1144_v62 = vadd.f32 %v1143_v53, %v2448_v4  ;;  %v1281_v57 = vadd.f32 %v1280_v11, %v1200_v27  ;;  %v1206_v4 = vmul.f32 %v2473_v44, %v2473_v44  ;;  %v1213_v42 = vmul.f32 %v2514_v50, %v2514_v50 }
 0x161   : > { %v1245_v1 = vadd.f32 %v1244_v58, %v1201_v35  ;;  %v1108_v55 = vadd.f32 %v1107_v54, %v2457_v17  ;;  %v1207_v17 = vmul.f32 %v2481_v56, %v2481_v56  ;;  %v1214_v19 = vmul.f32 %v2521_v63, %v2521_v63 }
 0x162   : > { %v1282_v6 = vadd.f32 %v1281_v57, %v1202_v25  ;;  %v1145_v7 = vadd.f32 %v1144_v62, %v2462_v46  ;;  %v1208_v46 = vmul.f32 %v2485_v61, %v2485_v61  ;;  %v1215_v47 = vmul.f32 %v2529_v10, %v2529_v10 }
 0x163   : > { %v1109_v8 = vadd.f32 %v1108_v55, %v2466_v33  ;;  %v1246_v52 = vadd.f32 %v1245_v1, %v1203_v0  ;;  %v1209_v33 = vmul.f32 %v2493_v16, %v2493_v16  ;;  %v1216_v27 = vmul.f32 %v2533_v14, %v2533_v14 }
 0x164   : > { %v1146_v9 = vadd.f32 %v1145_v7, %v2473_v44  ;;  %v1283_v12 = vadd.f32 %v1282_v6, %v1204_v2  ;;  %v1210_v44 = vmul.f32 %v2496_v18, %v2496_v18  ;;  %v1217_v11 = vmul.f32 %v2541_v23, %v2541_v23 }
 0x165   : > { %v1110_v13 = vadd.f32 %v1109_v8, %v2481_v56  ;;  %v1247_v34 = vadd.f32 %v1246_v52, %v1205_v3  ;;  %v1218_v54 = vmul.f32 %v2544_v43, %v2544_v43  ;;  %v1219_v25 = vmul.f32 %v2553_v59, %v2553_v59 }
 0x166   : > { %v1147_v22 = vadd.f32 %v1146_v9, %v2485_v61  ;;  %v1284_v24 = vadd.f32 %v1283_v12, %v1206_v4  ;;  %v1220_v57 = vmul.f32 %v2558_v41, %v2558_v41  ;;  %v1221_v1 = vmul.f32 %v2562_v21, %v2562_v21 }
 0x167   : > { %v1111_v26 = vadd.f32 %v1110_v13, %v2493_v16  ;;  %v1248_v28 = vadd.f32 %v1247_v34, %v1207_v17  ;;  %v1224_v6 = vmul.f32 %v2581_v60, %v2581_v60  ;;  %v1225_v4 = vmul.f32 %v2592_v29, %v2592_v29 }
 0x168   : > { %v1148_v20 = vadd.f32 %v1147_v22, %v2496_v18  ;;  %v1285_v32 = vadd.f32 %v1284_v24, %v1208_v46 }
 0x169   : > { %v1112_v56 = vadd.f32 %v1111_v26, %v2505_v30  ;;  %v1249_v15 = vadd.f32 %v1248_v28, %v1209_v33 }
 0x16a   : > { %v1149_v61 = vadd.f32 %v1148_v20, %v2510_v39  ;;  %v1286_v40 = vadd.f32 %v1285_v32, %v1210_v44 }
 0x16b   : > { %v1250_v16 = vadd.f32 %v1249_v15, %v1211_v31  ;;  %v1113_v51 = vadd.f32 %v1112_v56, %v2514_v50 }
 0x16c   : > { %v1287_v18 = vadd.f32 %v1286_v40, %v1212_v38  ;;  %v1150_v45 = vadd.f32 %v1149_v61, %v2521_v63 }
 0x16d   : > { %v1251_v30 = vadd.f32 %v1250_v16, %v1213_v42  ;;  %v1114_v5 = vadd.f32 %v1113_v51, %v2529_v10 }
 0x16e   : > { %v1288_v39 = vadd.f32 %v1287_v18, %v1214_v19  ;;  %v1151_v48 = vadd.f32 %v1150_v45, %v2533_v14 }
 0x16f   : > { %v1252_v53 = vadd.f32 %v1251_v30, %v1215_v47  ;;  %v1115_v50 = vadd.f32 %v1114_v5, %v2541_v23 }
 0x170   : > { %v1289_v35 = vadd.f32 %v1288_v39, %v1216_v27  ;;  %v1152_v63 = vadd.f32 %v1151_v48, %v2544_v43  ;;  %v1223_v43 = vmul.f32 %v2577_v49, %v2577_v49 }
 0x171   : > { %v1253_v58 = vadd.f32 %v1252_v53, %v1217_v11  ;;  %v1116_v10 = vadd.f32 %v1115_v50, %v2553_v59  ;;  %v1222_v59 = vmul.f32 %v2569_v36, %v2569_v36 }
 0x172   : > { %v1290_v62 = vadd.f32 %v1289_v35, %v1218_v54  ;;  %v1153_v14 = vadd.f32 %v1152_v63, %v2558_v41 }
 0x173   : > { %v1254_v0 = vadd.f32 %v1253_v58, %v1219_v25  ;;  %v1117_v23 = vadd.f32 %v1116_v10, %v2562_v21 }
 0x174   : > { %v1291_v55 = vadd.f32 %v1290_v62, %v1220_v57  ;;  %v1154_v2 = vadd.f32 %v1153_v14, %v2569_v36  ;;  %v1226_v36 = vmul.f32 %v2599_v37, %v2599_v37 }
 0x175   : > { %v1255_v7 = vadd.f32 %v1254_v0, %v1221_v1  ;;  %v1118_v41 = vadd.f32 %v1117_v23, %v2577_v49 }
 0x176   : > { %v1292_v3 = vadd.f32 %v1291_v55, %v1222_v59  ;;  %v1155_v8 = vadd.f32 %v1154_v2, %v2581_v60 }
 0x177   : > { %v1256_v52 = vadd.f32 %v1255_v7, %v1223_v43  ;;  %v1119_v21 = vadd.f32 %v1118_v41, %v2592_v29 }
 0x178   : > { %v1293_v9 = vadd.f32 %v1292_v3, %v1224_v6  ;;  %v1156_v12 = vadd.f32 %v1155_v8, %v2599_v37 }
 0x179   : > { %v1120_v17 = vrot.slane %v1119_v21, 4  ;;  %v1257_v13 = vadd.f32 %v1256_v52, %v1225_v4 }
 0x17a   : > { %v1157_v34 = vrot.slane %v1156_v12, 4  ;;  %v1294_v49 = vadd.f32 %v1293_v9, %v1226_v36 }
 0x17b   : > { %v1121_v46 = vadd.f32 %v1120_v17, %v1119_v21  ;;  %v1258_v60 = vrot.slane %v1257_v13, 4 }
 0x17c   : > { %v1158_v22 = vadd.f32 %v1157_v34, %v1156_v12  ;;  %v1295_v24 = vrot.slane %v1294_v49, 4 }
 0x17d   : > { %v1122_v33 = vrot.slane %v1121_v46, 2  ;;  %v1259_v26 = vadd.f32 %v1258_v60, %v1257_v13 }
 0x17e   : > { %v1159_v28 = vrot.slane %v1158_v22, 2  ;;  %v1296_v29 = vadd.f32 %v1295_v24, %v1294_v49 }
 0x17f   : > { %v1123_v44 = vadd.f32 %v1122_v33, %v1121_v46  ;;  %v1260_v20 = vrot.slane %v1259_v26, 2 }
 0x180   : > { %v1160_v32 = vadd.f32 %v1159_v28, %v1158_v22  ;;  %v1297_v56 = vrot.slane %v1296_v29, 2 }
 0x181   : > { %v1124_v31 = vrot.slane %v1123_v44, 1  ;;  %v1261_v37 = vadd.f32 %v1260_v20, %v1259_v26 }
 0x182   : > { %v1161_v15 = vrot.slane %v1160_v32, 1  ;;  %v1298_v61 = vadd.f32 %v1297_v56, %v1296_v29 }
 0x183   : > { %v1262_v38 = vrot.slane %v1261_v37, 1  ;;  %v1125_v16 = vadd.f32 %v1124_v31, %v1123_v44 }
 0x184   : > { %v1299_v40 = vrot.slane %v1298_v61, 1  ;;  %v1162_v42 = vadd.f32 %v1161_v15, %v1160_v32 }
 0x185   : > { %v1263_v51 = vadd.f32 %v1262_v38, %v1261_v37 }
 0x186   : > { %v1300_v18 = vadd.f32 %v1299_v40, %v1298_v61 }
 0x187   : > { %v1302_v45 = vsel %vm1301_vm0, %v1125_v16, %v1263_v51 }
 0x188   : > { %v1303_v19 = vsel %vm1301_vm0, %v1162_v42, %v1300_v18 }
 0x189   : > { %v1306_v30 = vcombine.low %v1302_v45, %v1303_v19 }
 0x18b   : > { %1748 = vst.sshfl [vmem:[%s346_s8] sm:$0x33 pattern:$0x76325410] %v1306_v30 }
 0x18c PF: > { %s17_s23 = sadd.s32 1, %s1944_s23   ;;  %s2716_s21 = smov %s1940_s22 }
 0x18d   : > { %p14_p6 = scmp.ge.s32.totalorder %s17_s23, 4   ;;  %s2717_s22 = smov %s2719_s24 }
 0x18f   :  { %16 = sbr.rel (!%p14_p6) target bundleno = 2 (0x2), region = 88 }

// kernel: projection_head.5
= control target key start
LH: loop header
LB: loop body
LE: loop exit
PB: predicated region body
PF: predicated region fallthrough
CT: control target
= control target key end

     0   :  { %10 = vsyncpa [#allocation3], 0  ;;  %s1828_s0 = inlined_call_operand.vmem [shape: bf16[512,256], index: 0, kind: input, shape index: {}]   ;;  %s1829_s1 = inlined_call_operand.vmem [shape: f32[1,256], index: 1, kind: input, shape index: {}]   ;;  %s1830_s2 = inlined_call_operand.vmem [shape: f32[1,256], index: 2, kind: input, shape index: {}]   ;;  %s1831_s3 = inlined_call_operand.vmem [shape: bf16[256,128], index: 3, kind: input, shape index: {}]   ;;  %s1832_s4 = inlined_call_operand.vmem [shape: f32[1,128], index: 4, kind: input, shape index: {}]   ;;  %s1833_s5 = inlined_call_operand.hbm [shape: f32[512,128], index: 5, kind: output, shape index: {}]  }
   0x1   :  { %12 = vsyncpa [#allocation3 + $0x1], 0  ;;  %s1410_s18 = smov 0   ;;  %s1412_s19 = smov 0  }
   0x2   :  { %s1414_s20 = smov 0   ;;  %s1416_s21 = smov 0  }
   0x3   :  { %s1418_s22 = smov 0   ;;  %s1420_s23 = smov 0  }
   0x4 LB: > { %s1061_s24 = sadd.s32 4294967295, %s1375_s23   ;;  %s1062_s25 = sadd.s32 4294967294, %s1375_s23   ;;  %s1375_s23 = sphi %s1420_s23, %s18_s23   ;;  %s1371_s22 = sphi %s1418_s22, %s1840_s22   ;;  %s1367_s21 = sphi %s1416_s21, %s1839_s21   ;;  %s1363_s20 = sphi %s1414_s20, %s1838_s20   ;;  %s1359_s19 = sphi %s1412_s19, %s1837_s19   ;;  %s1355_s18 = sphi %s1410_s18, %s1836_s18  }
   0x5   : > { %s27_s26 = sadd.s32 1, %s1371_s22  ;;  %s159_s27 = sadd.s32 1, %s1363_s20 }
   0x6   : > { %p28_p0 = scmp.ge.s32.totalorder %s27_s26, 2  ;;  %p169_p1 = scmp.ne.s32.totalorder %s1363_s20, %s1359_s19 }
   0x7   : > { %p170_p2 = scmp.eq.s32.totalorder %s1061_s24, 1  ;;  %p175_p3 = scmp.ne.s32.totalorder %s1359_s19, %s1355_s18 }
   0x8   : > { %s1842_s26 = smov (%p28_p0, %s27_s26), 0  ;;  %p176_p5 = scmp.eq.s32.totalorder %s1062_s25, 1 }
   0x9   : > { %p1450_p4 = por %p170_p2, %p169_p1  ;;  %s154_s29 = ssub.s32 %s1371_s22, %s1842_s26 }
   0xa   : > { %p1067_p6 = scmp.ge.s32.totalorder %s1375_s23, 1  ;;  %p157_p7 = scmp.eq.s32.totalorder %s154_s29, 0 }
   0xb   : > { %p1457_p8 = por %p176_p5, %p175_p3  ;;  %p223_p9 = scmp.lt.s32.totalorder %s1375_s23, 3 }
   0xc   : > { %s1463_s6 = scalar_select %p157_p7, %s1363_s20, %s159_s27  }
   0xd   : > { %p224_p10 = pnand %p1067_p6, %p223_p9 }
   0xe   : > { %v1281_v0 = vld [vmem:[%s1831_s3 + $0x40] sm:$0xff] (!%p224_p10)   ;;  %s1069_s9 = sshll.u32 (!%p224_p10), %s1367_s21, 5  ;;  %v1283_v2 = vld [vmem:[%s1831_s3 + $0x48] sm:$0xff] (!%p224_p10)   ;;  %v1285_v4 = vld [vmem:[%s1831_s3 + $0x50] sm:$0xff] (!%p224_p10)   ;;  %v373_v5 = vlaneseq (!%p224_p10)  ;;  %s1095_s8 = sshll.u32 (!%p224_p10), %s1367_s21, 12 }
   0xf   : > { %227 = sbr.rel (%p224_p10) target bundleno = 337 (0x151), region = 40  ;;  %v1282_v1 = vld [vmem:[%s1831_s3] sm:$0xff] (!%p224_p10)   ;;  %1096 = vmatprep.subr.bf16.mxu0 (!%p224_p10), %v1281_v0  ;;  %1208 = vmatprep.subr.bf16.mxu1 (!%p224_p10), %v1281_v0  ;;  %p260_p11 = scmp.lt.s32.totalorder (!%p224_p10), %s1069_s9, 63  ;;  %v1284_v3 = vld [vmem:[%s1831_s3 + $0x8] sm:$0xff] (!%p224_p10)   ;;  %v1286_v6 = vld [vmem:[%s1831_s3 + $0x10] sm:$0xff] (!%p224_p10)  }
  0x10   : > { %1097 = vmatpush3.bf16.msra.mxu0 (!%p224_p10), %v1282_v1  ;;  %1216 = vmatpush3.bf16.msra.mxu1 (!%p224_p10), %v1282_v1  ;;  %v1287_v7 = vld [vmem:[%s1831_s3 + $0x58] sm:$0xff] (!%p224_p10)   ;;  %v374_v8 = vshrl.u32 (!%p224_p10), %v373_v5, 7  ;;  %v1289_v10 = vld [vmem:[%s1831_s3 + $0x60] sm:$0xff] (!%p224_p10)   ;;  %v1291_v14 = vld [vmem:[%s1831_s3 + $0x68] sm:$0xff] (!%p224_p10)   ;;  %s1772_s13 = scalar_lea.hbm (!%p224_p10), %s1833_s5, %s1095_s8 }
  0x11   : > { %1098 = vmatprep.subr.bf16.mxu0 (!%p224_p10), %v1283_v2  ;;  %1209 = vmatprep.subr.bf16.mxu1 (!%p224_p10), %v1283_v2  ;;  %v1288_v9 = vld [vmem:[%s1831_s3 + $0x18] sm:$0xff] (!%p224_p10)   ;;  %v1290_v12 = vld [vmem:[%s1831_s3 + $0x20] sm:$0xff] (!%p224_p10)   ;;  %v1292_v30 = vld [vmem:[%s1831_s3 + $0x28] sm:$0xff] (!%p224_p10)  }
  0x12   : > { %v375_v11 = vsub.s32 (!%p224_p10), 0, %v374_v8  ;;  %v379_v13 = vsub.s32 (!%p224_p10), 1, %v374_v8  ;;  %v371_v17 = vld [vmem:[%s1829_s1] sm:$0x3] (!%p224_p10)  ;;  %v1293_v35 = vld [vmem:[%s1831_s3 + $0x70] sm:$0xff] (!%p224_p10)   ;;  %v1295_v54 = vld [vmem:[%s1831_s3 + $0x78] sm:$0xff] (!%p224_p10)  }
  0x13   : > { %v447_v22 = vld [vmem:[%s1830_s2] sm:$0x3] (!%p224_p10)  ;;  %v1294_v49 = vld [vmem:[%s1831_s3 + $0x30] sm:$0xff] (!%p224_p10)   ;;  %v1296_v5 = vld [vmem:[%s1831_s3 + $0x38] sm:$0xff] (!%p224_p10)  }
  0x14   : > { %1099 = vmatpush3.bf16.msra.mxu0 (!%p224_p10), %v1284_v3  ;;  %1217 = vmatpush3.bf16.msra.mxu1 (!%p224_p10), %v1284_v3  ;;  %v1514_v25 = vrot.slane (!%p224_p10), %v371_v17, %v375_v11  ;;  %v1516_v26 = vrot.slane (!%p224_p10), %v371_v17, %v379_v13  ;;  %v1518_v27 = vrot.slane (!%p224_p10), %v447_v22, %v375_v11 }
  0x15   : > { %1100 = vmatprep.subr.bf16.mxu0 (!%p224_p10), %v1285_v4  ;;  %1210 = vmatprep.subr.bf16.mxu1 (!%p224_p10), %v1285_v4  ;;  %v1520_v28 = vrot.slane (!%p224_p10), %v447_v22, %v379_v13 }
  0x16   : > { %s1844_s9 = smov (!%p260_p11, %s1069_s9), 63 }
  0x17   : > { %s1094_s7 = sshll.u32 %s1844_s9, 3  ;;  %s1377_s9 = smov [#allocation2]  }
  0x18   : > { %1101 = vmatpush3.bf16.msra.mxu0 %v1286_v6  ;;  %1218 = vmatpush3.bf16.msra.mxu1 %v1286_v6  ;;  %s1496_s15 = scalar_lea.vmem %s1828_s0, %s1094_s7  ;;  %s1301_s16 = sshll.u32 %s1377_s9, 4  ;;  %s1302_s16 = int_to_ptr.vmem [resolvable:$false] %s1301_s16 }
  0x19   : > { %1102 = vmatprep.subr.bf16.mxu0 %v1287_v7  ;;  %1211 = vmatprep.subr.bf16.mxu1 %v1287_v7  ;;  %v275_v15 = vld [vmem:[%s1496_s15] sm:$0xff]  ;;  %v276_v16 = vld [vmem:[%s1496_s15 + $0x8] sm:$0xff]  ;;  %v1523_v29 = vld [vmem:[%s1496_s15 + $0x10] sm:$0xff]  ;;  %s1303_s17 = scalar_lea.vmem %s1302_s16, 8192 }
  0x1a   : > { %v307_v18 = vunpack.c.l.bf16 %v275_v15  ;;  %v308_v19 = vunpack.c.h.bf16 %v275_v15  ;;  %v309_v20 = vunpack.c.l.bf16 %v276_v16  ;;  %v310_v21 = vunpack.c.h.bf16 %v276_v16  ;;  %v291_v23 = vld [vmem:[%s1496_s15 + $0x80] sm:$0xff]  ;;  %v292_v24 = vld [vmem:[%s1496_s15 + $0x88] sm:$0xff]  ;;  %v278_v39 = vld [vmem:[%s1496_s15 + $0x18] sm:$0xff] }
  0x1b   : > { %v339_v31 = vunpack.c.l.bf16 %v291_v23  ;;  %v340_v32 = vunpack.c.h.bf16 %v291_v23  ;;  %v341_v33 = vunpack.c.l.bf16 %v292_v24  ;;  %v342_v34 = vunpack.c.h.bf16 %v292_v24  ;;  %v293_v59 = vld [vmem:[%s1496_s15 + $0x90] sm:$0xff]  ;;  %v294_v0 = vld [vmem:[%s1496_s15 + $0x98] sm:$0xff] }
  0x1c   : > { %1103 = vmatpush3.bf16.msra.mxu0 %v1288_v9  ;;  %1219 = vmatpush3.bf16.msra.mxu1 %v1288_v9  ;;  %v384_v36 = vmul.f32 %v1516_v26, %v308_v19  ;;  %v386_v37 = vmul.f32 %v1516_v26, %v310_v21  ;;  %v383_v38 = vmul.f32 %v1514_v25, %v307_v18  ;;  %v312_v40 = vunpack.c.h.bf16 %v1523_v29  ;;  %v279_v18 = vld [vmem:[%s1496_s15 + $0x20] sm:$0xff] }
  0x1d   : > { %1104 = vmatprep.subr.bf16.mxu0 %v1289_v10  ;;  %1212 = vmatprep.subr.bf16.mxu1 %v1289_v10  ;;  %v416_v41 = vmul.f32 %v1516_v26, %v340_v32  ;;  %v418_v42 = vmul.f32 %v1516_v26, %v342_v34  ;;  %v385_v43 = vmul.f32 %v1514_v25, %v309_v20  ;;  %v314_v53 = vunpack.c.h.bf16 %v278_v39 }
  0x1e   : > { %v415_v44 = vmul.f32 %v1514_v25, %v339_v31  ;;  %v460_v45 = vadd.f32 %v1520_v28, %v384_v36  ;;  %v462_v46 = vadd.f32 %v1520_v28, %v386_v37  ;;  %v459_v47 = vadd.f32 %v1518_v27, %v383_v38  ;;  %v280_v31 = vld [vmem:[%s1496_s15 + $0x28] sm:$0xff]  ;;  %v295_v36 = vld [vmem:[%s1496_s15 + $0xa0] sm:$0xff] }
  0x1f   : > { %v417_v48 = vmul.f32 %v1514_v25, %v341_v33  ;;  %v492_v50 = vadd.f32 %v1520_v28, %v416_v41  ;;  %v494_v51 = vadd.f32 %v1520_v28, %v418_v42  ;;  %v461_v52 = vadd.f32 %v1518_v27, %v385_v43  ;;  %v296_v41 = vld [vmem:[%s1496_s15 + $0xa8] sm:$0xff] }
  0x20   : > { %1105 = vmatpush3.bf16.msra.mxu0 %v1290_v12  ;;  %1220 = vmatpush3.bf16.msra.mxu1 %v1290_v12  ;;  %v524_v55 = vmax.f32 %v460_v45, 0.0  ;;  %v526_v56 = vmax.f32 %v462_v46, 0.0  ;;  %v523_v57 = vmax.f32 %v459_v47, 0.0  ;;  %v491_v58 = vadd.f32 %v1518_v27, %v415_v44 }
  0x21   : > { %1106 = vmatprep.subr.bf16.mxu0 %v1291_v14  ;;  %1213 = vmatprep.subr.bf16.mxu1 %v1291_v14  ;;  %v556_v60 = vmax.f32 %v492_v50, 0.0  ;;  %v558_v61 = vmax.f32 %v494_v51, 0.0  ;;  %v525_v62 = vmax.f32 %v461_v52, 0.0  ;;  %v493_v63 = vadd.f32 %v1518_v27, %v417_v48 }
  0x22   : > { %v588_v1 = vpack.c.bf16 %v526_v56, %v524_v55  ;;  %v555_v2 = vmax.f32 %v491_v58, 0.0  ;;  %v388_v3 = vmul.f32 %v1516_v26, %v312_v40  ;;  %v390_v4 = vmul.f32 %v1516_v26, %v314_v53 }
  0x23   : > { %v604_v6 = vpack.c.bf16 %v558_v61, %v556_v60  ;;  %v587_v7 = vpack.c.bf16 %v525_v62, %v523_v57  ;;  %v557_v8 = vmax.f32 %v493_v63, 0.0  ;;  %v344_v9 = vunpack.c.h.bf16 %v293_v59  ;;  %v281_v62 = vld [vmem:[%s1496_s15 + $0x30] sm:$0xff] }
  0x24   : > { %1107 = vmatpush3.bf16.msra.mxu0 %v1292_v30  ;;  %1221 = vmatpush3.bf16.msra.mxu1 %v1292_v30  ;;  %v464_v10 = vadd.f32 %v1520_v28, %v388_v3  ;;  %v466_v11 = vadd.f32 %v1520_v28, %v390_v4  ;;  %v346_v12 = vunpack.c.h.bf16 %v294_v0  ;;  %v311_v13 = vunpack.c.l.bf16 %v1523_v29 }
  0x25   : > { %1108 = vmatprep.subr.bf16.mxu0 %v1293_v35  ;;  %1214 = vmatprep.subr.bf16.mxu1 %v1293_v35  ;;  %v603_v14 = vpack.c.bf16 %v557_v8, %v555_v2  ;;  %v420_v15 = vmul.f32 %v1516_v26, %v344_v9  ;;  %v313_v16 = vunpack.c.l.bf16 %v278_v39  ;;  %v343_v17 = vunpack.c.l.bf16 %v293_v59 }
  0x26   : > { %786 = vmatprep.mubr.bf16.mxu0 %v588_v1  ;;  %850 = vmatprep.mubr.bf16.mxu1 %v604_v6  ;;  %v528_v19 = vmax.f32 %v464_v10, 0.0  ;;  %v530_v20 = vmax.f32 %v466_v11, 0.0  ;;  %v422_v21 = vmul.f32 %v1516_v26, %v346_v12  ;;  %v387_v22 = vmul.f32 %v1514_v25, %v311_v13  ;;  %v297_v12 = vld [vmem:[%s1496_s15 + $0xb0] sm:$0xff] }
  0x27   : > { %v496_v23 = vadd.f32 %v1520_v28, %v420_v15  ;;  %v389_v24 = vmul.f32 %v1514_v25, %v313_v16  ;;  %v345_v29 = vunpack.c.l.bf16 %v294_v0  ;;  %v419_v30 = vmul.f32 %v1514_v25, %v343_v17  ;;  %v298_v17 = vld [vmem:[%s1496_s15 + $0xb8] sm:$0xff] }
  0x28   : > { %1109 = vmatpush3.bf16.msra.mxu0 %v1294_v49  ;;  %1222 = vmatpush3.bf16.msra.mxu1 %v1294_v49  ;;  %v590_v32 = vpack.c.bf16 %v530_v20, %v528_v19  ;;  %v498_v33 = vadd.f32 %v1520_v28, %v422_v21  ;;  %v463_v34 = vadd.f32 %v1518_v27, %v387_v22  ;;  %v316_v35 = vunpack.c.h.bf16 %v279_v18 }
  0x29   : > { %1110 = vmatprep.subr.bf16.mxu0 %v1295_v54  ;;  %1215 = vmatprep.subr.bf16.mxu1 %v1295_v54  ;;  %v560_v37 = vmax.f32 %v496_v23, 0.0  ;;  %v465_v38 = vadd.f32 %v1518_v27, %v389_v24  ;;  %v421_v39 = vmul.f32 %v1514_v25, %v345_v29  ;;  %v495_v40 = vadd.f32 %v1518_v27, %v419_v30 }
  0x2a   : > { %v562_v42 = vmax.f32 %v498_v33, 0.0  ;;  %v527_v43 = vmax.f32 %v463_v34, 0.0  ;;  %v318_v44 = vunpack.c.h.bf16 %v280_v31  ;;  %v392_v45 = vmul.f32 %v1516_v26, %v316_v35 }
  0x2b   : > { %v529_v46 = vmax.f32 %v465_v38, 0.0  ;;  %v497_v47 = vadd.f32 %v1518_v27, %v421_v39  ;;  %v559_v48 = vmax.f32 %v495_v40, 0.0  ;;  %v348_v49 = vunpack.c.h.bf16 %v295_v36 }
  0x2c   : > { %1111 = vmatpush3.bf16.msra.mxu0 %v1296_v5  ;;  %1223 = vmatpush3.bf16.msra.mxu1 %v1296_v5  ;;  %v606_v50 = vpack.c.bf16 %v562_v42, %v560_v37  ;;  %v394_v51 = vmul.f32 %v1516_v26, %v318_v44  ;;  %v468_v52 = vadd.f32 %v1520_v28, %v392_v45  ;;  %v350_v53 = vunpack.c.h.bf16 %v296_v41  ;;  %v283_v42 = vld [vmem:[%s1496_s15 + $0x40] sm:$0xff] }
  0x2d   : > { %v589_v54 = vpack.c.bf16 %v529_v46, %v527_v43  ;;  %v561_v55 = vmax.f32 %v497_v47, 0.0  ;;  %v424_v56 = vmul.f32 %v1516_v26, %v348_v49  ;;  %v315_v57 = vunpack.c.l.bf16 %v279_v18 }
  0x2e   : > { %v470_v58 = vadd.f32 %v1520_v28, %v394_v51  ;;  %v532_v59 = vmax.f32 %v468_v52, 0.0  ;;  %v426_v60 = vmul.f32 %v1516_v26, %v350_v53  ;;  %v317_v61 = vunpack.c.l.bf16 %v280_v31  ;;  %v284_v51 = vld [vmem:[%s1496_s15 + $0x48] sm:$0xff] }
  0x2f   : > { %787 = vmatmul.mubr.bf16.vlgmr.msra.gmra.mrb[0].mxu0 %v587_v7  ;;  %851 = vmatmul.mubr.bf16.vlgmr.msra.gmra.mrb[0].mxu1 %v603_v14  ;;  %v605_v63 = vpack.c.bf16 %v561_v55, %v559_v48  ;;  %v500_v0 = vadd.f32 %v1520_v28, %v424_v56  ;;  %v391_v1 = vmul.f32 %v1514_v25, %v315_v57  ;;  %v347_v2 = vunpack.c.l.bf16 %v295_v36  ;;  %v282_v7 = vld [vmem:[%s1496_s15 + $0x38] sm:$0xff]  ;;  %v299_v56 = vld [vmem:[%s1496_s15 + $0xc0] sm:$0xff] }
  0x30   : > { %794 = vmatprep.mubr.bf16.mxu0 %v590_v32  ;;  %858 = vmatprep.mubr.bf16.mxu1 %v606_v50  ;;  %v534_v3 = vmax.f32 %v470_v58, 0.0  ;;  %v502_v4 = vadd.f32 %v1520_v28, %v426_v60  ;;  %v393_v5 = vmul.f32 %v1514_v25, %v317_v61  ;;  %v349_v6 = vunpack.c.l.bf16 %v296_v41  ;;  %v300_v61 = vld [vmem:[%s1496_s15 + $0xc8] sm:$0xff] }
  0x31   : > { %v564_v8 = vmax.f32 %v500_v0, 0.0  ;;  %v467_v9 = vadd.f32 %v1518_v27, %v391_v1  ;;  %v423_v10 = vmul.f32 %v1514_v25, %v347_v2  ;;  %v320_v11 = vunpack.c.h.bf16 %v281_v62 }
  0x32   : > { %v592_v13 = vpack.c.bf16 %v534_v3, %v532_v59  ;;  %v566_v14 = vmax.f32 %v502_v4, 0.0  ;;  %v469_v15 = vadd.f32 %v1518_v27, %v393_v5  ;;  %v425_v16 = vmul.f32 %v1514_v25, %v349_v6 }
  0x33   : > { %v531_v18 = vmax.f32 %v467_v9, 0.0  ;;  %v499_v19 = vadd.f32 %v1518_v27, %v423_v10  ;;  %v322_v20 = vunpack.c.h.bf16 %v282_v7  ;;  %v396_v21 = vmul.f32 %v1516_v26, %v320_v11 }
  0x34   : > { %v608_v22 = vpack.c.bf16 %v566_v14, %v564_v8  ;;  %v533_v23 = vmax.f32 %v469_v15, 0.0  ;;  %v501_v24 = vadd.f32 %v1518_v27, %v425_v16  ;;  %v352_v29 = vunpack.c.h.bf16 %v297_v12 }
  0x35   : > { %v563_v30 = vmax.f32 %v499_v19, 0.0  ;;  %v398_v31 = vmul.f32 %v1516_v26, %v322_v20  ;;  %v472_v32 = vadd.f32 %v1520_v28, %v396_v21  ;;  %v354_v33 = vunpack.c.h.bf16 %v298_v17 }
  0x36   : > { %v591_v34 = vpack.c.bf16 %v533_v23, %v531_v18  ;;  %v565_v35 = vmax.f32 %v501_v24, 0.0  ;;  %v428_v36 = vmul.f32 %v1516_v26, %v352_v29  ;;  %v319_v37 = vunpack.c.l.bf16 %v281_v62  ;;  %v285_v18 = vld [vmem:[%s1496_s15 + $0x50] sm:$0xff] }
  0x37   : > { %795 = vmatmul.mubr.bf16.gmra.mrb[4].mxu0 %v589_v54  ;;  %859 = vmatmul.mubr.bf16.gmra.mrb[4].mxu1 %v605_v63  ;;  %v474_v38 = vadd.f32 %v1520_v28, %v398_v31  ;;  %v536_v39 = vmax.f32 %v472_v32, 0.0  ;;  %v430_v40 = vmul.f32 %v1516_v26, %v354_v33  ;;  %v321_v41 = vunpack.c.l.bf16 %v282_v7  ;;  %v286_v31 = vld [vmem:[%s1496_s15 + $0x58] sm:$0xff] }
  0x38   : > { %802 = vmatprep.mubr.bf16.mxu0 %v592_v13  ;;  %866 = vmatprep.mubr.bf16.mxu1 %v608_v22  ;;  %v607_v43 = vpack.c.bf16 %v565_v35, %v563_v30  ;;  %v504_v44 = vadd.f32 %v1520_v28, %v428_v36  ;;  %v395_v45 = vmul.f32 %v1514_v25, %v319_v37  ;;  %v351_v46 = vunpack.c.l.bf16 %v297_v12  ;;  %v301_v36 = vld [vmem:[%s1496_s15 + $0xd0] sm:$0xff] }
  0x39   : > { %v538_v47 = vmax.f32 %v474_v38, 0.0  ;;  %v506_v48 = vadd.f32 %v1520_v28, %v430_v40  ;;  %v397_v49 = vmul.f32 %v1514_v25, %v321_v41  ;;  %v353_v50 = vunpack.c.l.bf16 %v298_v17  ;;  %v302_v41 = vld [vmem:[%s1496_s15 + $0xd8] sm:$0xff] }
  0x3a   : > { %v568_v52 = vmax.f32 %v504_v44, 0.0  ;;  %v471_v53 = vadd.f32 %v1518_v27, %v395_v45  ;;  %v427_v54 = vmul.f32 %v1514_v25, %v351_v46  ;;  %v324_v55 = vunpack.c.h.bf16 %v283_v42 }
  0x3b   : > { %v594_v57 = vpack.c.bf16 %v538_v47, %v536_v39  ;;  %v570_v58 = vmax.f32 %v506_v48, 0.0  ;;  %v473_v59 = vadd.f32 %v1518_v27, %v397_v49  ;;  %v429_v60 = vmul.f32 %v1514_v25, %v353_v50 }
  0x3c   : > { %v535_v62 = vmax.f32 %v471_v53, 0.0  ;;  %v503_v63 = vadd.f32 %v1518_v27, %v427_v54  ;;  %v326_v0 = vunpack.c.h.bf16 %v284_v51  ;;  %v400_v1 = vmul.f32 %v1516_v26, %v324_v55 }
  0x3d   : > { %v610_v2 = vpack.c.bf16 %v570_v58, %v568_v52  ;;  %v537_v3 = vmax.f32 %v473_v59, 0.0  ;;  %v505_v4 = vadd.f32 %v1518_v27, %v429_v60  ;;  %v356_v5 = vunpack.c.h.bf16 %v299_v56 }
  0x3e   : > { %v567_v6 = vmax.f32 %v503_v63, 0.0  ;;  %v402_v7 = vmul.f32 %v1516_v26, %v326_v0  ;;  %v476_v8 = vadd.f32 %v1520_v28, %v400_v1  ;;  %v358_v9 = vunpack.c.h.bf16 %v300_v61 }
  0x3f   : > { %803 = vmatmul.mubr.bf16.gmra.mrb[8].mxu0 %v591_v34  ;;  %867 = vmatmul.mubr.bf16.gmra.mrb[8].mxu1 %v607_v43  ;;  %v593_v10 = vpack.c.bf16 %v537_v3, %v535_v62  ;;  %v569_v11 = vmax.f32 %v505_v4, 0.0  ;;  %v432_v12 = vmul.f32 %v1516_v26, %v356_v5  ;;  %v323_v13 = vunpack.c.l.bf16 %v283_v42  ;;  %v287_v62 = vld [vmem:[%s1496_s15 + $0x60] sm:$0xff] }
  0x40   : > { %810 = vmatprep.mubr.bf16.mxu0 %v594_v57  ;;  %874 = vmatprep.mubr.bf16.mxu1 %v610_v2  ;;  %v478_v14 = vadd.f32 %v1520_v28, %v402_v7  ;;  %v540_v15 = vmax.f32 %v476_v8, 0.0  ;;  %v434_v16 = vmul.f32 %v1516_v26, %v358_v9  ;;  %v325_v17 = vunpack.c.l.bf16 %v284_v51  ;;  %v288_v7 = vld [vmem:[%s1496_s15 + $0x68] sm:$0xff] }
  0x41   : > { %v609_v19 = vpack.c.bf16 %v569_v11, %v567_v6  ;;  %v508_v20 = vadd.f32 %v1520_v28, %v432_v12  ;;  %v399_v21 = vmul.f32 %v1514_v25, %v323_v13  ;;  %v355_v22 = vunpack.c.l.bf16 %v299_v56  ;;  %v303_v12 = vld [vmem:[%s1496_s15 + $0xe0] sm:$0xff] }
  0x42   : > { %v542_v23 = vmax.f32 %v478_v14, 0.0  ;;  %v510_v24 = vadd.f32 %v1520_v28, %v434_v16  ;;  %v401_v29 = vmul.f32 %v1514_v25, %v325_v17  ;;  %v357_v30 = vunpack.c.l.bf16 %v300_v61  ;;  %v304_v17 = vld [vmem:[%s1496_s15 + $0xe8] sm:$0xff] }
  0x43   : > { %v572_v32 = vmax.f32 %v508_v20, 0.0  ;;  %v475_v33 = vadd.f32 %v1518_v27, %v399_v21  ;;  %v431_v34 = vmul.f32 %v1514_v25, %v355_v22  ;;  %v328_v35 = vunpack.c.h.bf16 %v285_v18 }
  0x44   : > { %v596_v37 = vpack.c.bf16 %v542_v23, %v540_v15  ;;  %v574_v38 = vmax.f32 %v510_v24, 0.0  ;;  %v477_v39 = vadd.f32 %v1518_v27, %v401_v29  ;;  %v433_v40 = vmul.f32 %v1514_v25, %v357_v30 }
  0x45   : > { %v539_v42 = vmax.f32 %v475_v33, 0.0  ;;  %v507_v43 = vadd.f32 %v1518_v27, %v431_v34  ;;  %v330_v44 = vunpack.c.h.bf16 %v286_v31  ;;  %v404_v45 = vmul.f32 %v1516_v26, %v328_v35 }
  0x46   : > { %v612_v46 = vpack.c.bf16 %v574_v38, %v572_v32  ;;  %v541_v47 = vmax.f32 %v477_v39, 0.0  ;;  %v509_v48 = vadd.f32 %v1518_v27, %v433_v40  ;;  %v360_v49 = vunpack.c.h.bf16 %v301_v36 }
  0x47   : > { %811 = vmatmul.mubr.bf16.gmra.mrb[12].mxu0 %v593_v10  ;;  %875 = vmatmul.mubr.bf16.gmra.mrb[12].mxu1 %v609_v19  ;;  %v571_v50 = vmax.f32 %v507_v43, 0.0  ;;  %v406_v51 = vmul.f32 %v1516_v26, %v330_v44  ;;  %v480_v52 = vadd.f32 %v1520_v28, %v404_v45  ;;  %v362_v53 = vunpack.c.h.bf16 %v302_v41 }
  0x48   : > { %818 = vmatprep.mubr.bf16.mxu0 %v596_v37  ;;  %882 = vmatprep.mubr.bf16.mxu1 %v612_v46  ;;  %v595_v54 = vpack.c.bf16 %v541_v47, %v539_v42  ;;  %v573_v55 = vmax.f32 %v509_v48, 0.0  ;;  %v436_v56 = vmul.f32 %v1516_v26, %v360_v49  ;;  %v327_v57 = vunpack.c.l.bf16 %v285_v18  ;;  %v289_v42 = vld [vmem:[%s1496_s15 + $0x70] sm:$0xff] }
  0x49   : > { %v482_v58 = vadd.f32 %v1520_v28, %v406_v51  ;;  %v544_v59 = vmax.f32 %v480_v52, 0.0  ;;  %v438_v60 = vmul.f32 %v1516_v26, %v362_v53  ;;  %v329_v61 = vunpack.c.l.bf16 %v286_v31  ;;  %v290_v51 = vld [vmem:[%s1496_s15 + $0x78] sm:$0xff] }
  0x4a   : > { %v611_v63 = vpack.c.bf16 %v573_v55, %v571_v50  ;;  %v512_v0 = vadd.f32 %v1520_v28, %v436_v56  ;;  %v403_v1 = vmul.f32 %v1514_v25, %v327_v57  ;;  %v359_v2 = vunpack.c.l.bf16 %v301_v36  ;;  %v305_v56 = vld [vmem:[%s1496_s15 + $0xf0] sm:$0xff] }
  0x4b   : > { %v546_v3 = vmax.f32 %v482_v58, 0.0  ;;  %v514_v4 = vadd.f32 %v1520_v28, %v438_v60  ;;  %v405_v5 = vmul.f32 %v1514_v25, %v329_v61  ;;  %v361_v6 = vunpack.c.l.bf16 %v302_v41  ;;  %v306_v61 = vld [vmem:[%s1496_s15 + $0xf8] sm:$0xff]  ;;  %s256_s15 = sand.u32 1, %s1359_s19  }
  0x4c   : > { %v576_v8 = vmax.f32 %v512_v0, 0.0  ;;  %v479_v9 = vadd.f32 %v1518_v27, %v403_v1  ;;  %v435_v10 = vmul.f32 %v1514_v25, %v359_v2  ;;  %v332_v11 = vunpack.c.h.bf16 %v287_v62  ;;  %s1068_s25 = sshll.u32 %s256_s15, 8  ;;  %s1782_s21 = scalar_lea.sflag [#allocation3], %s256_s15 }
  0x4d   : > { %v598_v13 = vpack.c.bf16 %v546_v3, %v544_v59  ;;  %v578_v14 = vmax.f32 %v514_v4, 0.0  ;;  %v481_v15 = vadd.f32 %v1518_v27, %v405_v5  ;;  %v437_v16 = vmul.f32 %v1514_v25, %v361_v6  ;;  %s1707_s7 = scalar_lea.vmem [#allocation2], %s1068_s25 }
  0x4e   : > { %v543_v18 = vmax.f32 %v479_v9, 0.0  ;;  %v511_v19 = vadd.f32 %v1518_v27, %v435_v10  ;;  %v334_v20 = vunpack.c.h.bf16 %v288_v7  ;;  %v408_v21 = vmul.f32 %v1516_v26, %v332_v11  ;;  %s962_s10 = sshll.u32 %s1707_s7, 4  ;;  %s1774_s10 = int_to_ptr.vmem [resolvable:$true] %s962_s10 }
  0x4f   : > { %819 = vmatmul.mubr.bf16.gmra.mrb[16].mxu0 %v595_v54  ;;  %883 = vmatmul.mubr.bf16.gmra.mrb[16].mxu1 %v611_v63  ;;  %v614_v22 = vpack.c.bf16 %v578_v14, %v576_v8  ;;  %v545_v23 = vmax.f32 %v481_v15, 0.0  ;;  %v513_v24 = vadd.f32 %v1518_v27, %v437_v16  ;;  %v364_v29 = vunpack.c.h.bf16 %v303_v12  ;;  %s1297_s14 = scalar_lea.vmem %s1774_s10, 4096  ;;  %p1304_p1 = scmp.lt.s32.totalorder %s1774_s10, %s1302_s16 }
  0x50   : > { %826 = vmatprep.mubr.bf16.mxu0 %v598_v13  ;;  %v575_v30 = vmax.f32 %v511_v19, 0.0  ;;  %v410_v31 = vmul.f32 %v1516_v26, %v334_v20  ;;  %v484_v32 = vadd.f32 %v1520_v28, %v408_v21  ;;  %v366_v33 = vunpack.c.h.bf16 %v304_v17  ;;  %p1298_p12 = scmp.ne.s32.totalorder %s1774_s10, %s1297_s14  ;;  %p1305_p2 = scmp.lt.s32.totalorder %s1303_s17, %s1297_s14 }
  0x51   : > { %890 = vmatprep.mubr.bf16.mxu1 %v614_v22  ;;  %v597_v34 = vpack.c.bf16 %v545_v23, %v543_v18  ;;  %v577_v35 = vmax.f32 %v513_v24, 0.0  ;;  %v440_v36 = vmul.f32 %v1516_v26, %v364_v29  ;;  %v331_v37 = vunpack.c.l.bf16 %v287_v62 }
  0x52   : > { %v486_v38 = vadd.f32 %v1520_v28, %v410_v31  ;;  %v548_v39 = vmax.f32 %v484_v32, 0.0  ;;  %v442_v40 = vmul.f32 %v1516_v26, %v366_v33  ;;  %v333_v41 = vunpack.c.l.bf16 %v288_v7  ;;  %p1299_p13 = pnand %p1298_p12, %p1450_p4  ;;  %p1306_p3 = por %p1305_p2, %p1304_p1 }
  0x53   : > { %v613_v43 = vpack.c.bf16 %v577_v35, %v575_v30  ;;  %v516_v44 = vadd.f32 %v1520_v28, %v440_v36  ;;  %v407_v45 = vmul.f32 %v1514_v25, %v331_v37  ;;  %v363_v46 = vunpack.c.l.bf16 %v303_v12 }
  0x54   : > { %v550_v47 = vmax.f32 %v486_v38, 0.0  ;;  %v518_v48 = vadd.f32 %v1520_v28, %v442_v40  ;;  %v409_v49 = vmul.f32 %v1514_v25, %v333_v41  ;;  %v365_v50 = vunpack.c.l.bf16 %v304_v17  ;;  %p1300_p0 = pneg %p1299_p13 }
  0x55   : > { %v580_v52 = vmax.f32 %v516_v44, 0.0  ;;  %v483_v53 = vadd.f32 %v1518_v27, %v407_v45  ;;  %v439_v54 = vmul.f32 %v1514_v25, %v363_v46  ;;  %v336_v55 = vunpack.c.h.bf16 %v289_v42 }
  0x56   : > { %v600_v57 = vpack.c.bf16 %v550_v47, %v548_v39  ;;  %v582_v58 = vmax.f32 %v518_v48, 0.0  ;;  %v485_v59 = vadd.f32 %v1518_v27, %v409_v49  ;;  %v441_v60 = vmul.f32 %v1514_v25, %v365_v50  ;;  %p1307_p5 = pnand %p1306_p3, %p1300_p0 }
  0x57   : > { %827 = vmatmul.mubr.bf16.gmra.mrb[20].mxu0 %v597_v34  ;;  %891 = vmatmul.mubr.bf16.gmra.mrb[20].mxu1 %v613_v43  ;;  %v547_v62 = vmax.f32 %v483_v53, 0.0  ;;  %v515_v63 = vadd.f32 %v1518_v27, %v439_v54  ;;  %v338_v0 = vunpack.c.h.bf16 %v290_v51  ;;  %v412_v1 = vmul.f32 %v1516_v26, %v336_v55 }
  0x58   : > { %834 = vmatprep.mubr.bf16.mxu0 %v600_v57  ;;  %v616_v2 = vpack.c.bf16 %v582_v58, %v580_v52  ;;  %v549_v3 = vmax.f32 %v485_v59, 0.0  ;;  %v517_v4 = vadd.f32 %v1518_v27, %v441_v60  ;;  %v368_v5 = vunpack.c.h.bf16 %v305_v56 }
  0x59   : > { %v579_v6 = vmax.f32 %v515_v63, 0.0  ;;  %v414_v7 = vmul.f32 %v1516_v26, %v338_v0  ;;  %v488_v8 = vadd.f32 %v1520_v28, %v412_v1  ;;  %v370_v9 = vunpack.c.h.bf16 %v306_v61 }
  0x5a   : > { %898 = vmatprep.mubr.bf16.mxu1 %v616_v2  ;;  %v599_v10 = vpack.c.bf16 %v549_v3, %v547_v62  ;;  %v581_v11 = vmax.f32 %v517_v4, 0.0  ;;  %v444_v12 = vmul.f32 %v1516_v26, %v368_v5  ;;  %v335_v13 = vunpack.c.l.bf16 %v289_v42 }
  0x5b   : > { %v490_v14 = vadd.f32 %v1520_v28, %v414_v7  ;;  %v552_v15 = vmax.f32 %v488_v8, 0.0  ;;  %v446_v16 = vmul.f32 %v1516_v26, %v370_v9  ;;  %v337_v17 = vunpack.c.l.bf16 %v290_v51 }
  0x5c   : > { %v615_v18 = vpack.c.bf16 %v581_v11, %v579_v6  ;;  %v520_v19 = vadd.f32 %v1520_v28, %v444_v12  ;;  %v411_v20 = vmul.f32 %v1514_v25, %v335_v13  ;;  %v367_v21 = vunpack.c.l.bf16 %v305_v56 }
  0x5d   : > { %v554_v22 = vmax.f32 %v490_v14, 0.0  ;;  %v522_v23 = vadd.f32 %v1520_v28, %v446_v16  ;;  %v413_v24 = vmul.f32 %v1514_v25, %v337_v17  ;;  %v369_v29 = vunpack.c.l.bf16 %v306_v61 }
  0x5e   : > { %v584_v30 = vmax.f32 %v520_v19, 0.0  ;;  %v487_v31 = vadd.f32 %v1518_v27, %v411_v20  ;;  %v443_v26 = vmul.f32 %v1514_v25, %v367_v21 }
  0x5f   : > { %835 = vmatmul.mubr.bf16.gmra.mrb[24].mxu0 %v599_v10  ;;  %899 = vmatmul.mubr.bf16.gmra.mrb[24].mxu1 %v615_v18  ;;  %v602_v32 = vpack.c.bf16 %v554_v22, %v552_v15  ;;  %v586_v33 = vmax.f32 %v522_v23, 0.0  ;;  %v489_v34 = vadd.f32 %v1518_v27, %v413_v24  ;;  %v445_v35 = vmul.f32 %v1514_v25, %v369_v29  ;;  %v1703_v25 = vld [vmem:[%s1832_s4] ss:$0 sm:$0xff] }
  0x60   : > { %v551_v36 = vmax.f32 %v487_v31, 0.0  ;;  %v519_v28 = vadd.f32 %v1518_v27, %v443_v26 }
  0x61   : > { %842 = vmatprep.mubr.bf16.mxu0 %v602_v32  ;;  %v618_v37 = vpack.c.bf16 %v586_v33, %v584_v30  ;;  %v553_v38 = vmax.f32 %v489_v34, 0.0  ;;  %v521_v39 = vadd.f32 %v1518_v27, %v445_v35 }
  0x62   : > { %v583_v40 = vmax.f32 %v519_v28, 0.0 }
  0x63   : > { %906 = vmatprep.mubr.bf16.mxu1 %v618_v37  ;;  %v601_v41 = vpack.c.bf16 %v553_v38, %v551_v36  ;;  %v585_v42 = vmax.f32 %v521_v39, 0.0 }
  0x65   : > { %v617_v43 = vpack.c.bf16 %v585_v42, %v583_v40 }
  0x67   : > { %843 = vmatmul.mubr.bf16.gmra.mrb[28].mxu0 %v601_v41  ;;  %907 = vmatmul.mubr.bf16.gmra.mrb[28].mxu1 %v617_v43 }
 0x102   : > { %v1112_v44 = vpop.f32.mrb[0].mxu0  ;;  %v1160_v45 = vpop.f32.mrb[0].mxu1 }
 0x103   : > { %v1113_v46 = vpop.f32.mrb[1].mxu0  ;;  %v1161_v47 = vpop.f32.mrb[1].mxu1 }
 0x104   : > { %v1114_v27 = vadd.f32 %v1113_v46, %v1112_v44  ;;  %v1162_v48 = vadd.f32 %v1161_v47, %v1160_v45  ;;  %v1115_v49 = vpop.f32.mrb[2].mxu0  ;;  %v1163_v50 = vpop.f32.mrb[2].mxu1 }
 0x105   : > { %v1116_v51 = vpop.f32.mrb[3].mxu0  ;;  %v1164_v52 = vpop.f32.mrb[3].mxu1 }
 0x106   : > { %v789_v53 = vadd.f32 %v1114_v27, %v1703_v25  ;;  %v853_v54 = vadd.f32 %v1162_v48, %v1703_v25  ;;  %v1117_v55 = vadd.f32 %v1116_v51, %v1115_v49  ;;  %v1165_v56 = vadd.f32 %v1164_v52, %v1163_v50 }
 0x108   : > { %915 = vst [vmem:[%s1707_s7] sm:$0xff] %v789_v53  ;;  %931 = vst [vmem:[%s1707_s7 + $0x80] sm:$0xff] %v853_v54  ;;  %v792_v57 = vadd.f32 %v1117_v55, %v1703_v25  ;;  %v856_v58 = vadd.f32 %v1165_v56, %v1703_v25 }
 0x10a   : > { %916 = vst [vmem:[%s1707_s7 + $0x8] sm:$0xff] %v792_v57  ;;  %932 = vst [vmem:[%s1707_s7 + $0x88] sm:$0xff] %v856_v58  ;;  %v1118_v59 = vpop.f32.mrb[4].mxu0  ;;  %v1166_v60 = vpop.f32.mrb[4].mxu1 }
 0x10b   : > { %v1119_v61 = vpop.f32.mrb[5].mxu0  ;;  %v1167_v62 = vpop.f32.mrb[5].mxu1 }
 0x10c   : > { %v1120_v63 = vadd.f32 %v1119_v61, %v1118_v59  ;;  %v1168_v0 = vadd.f32 %v1167_v62, %v1166_v60  ;;  %v1121_v1 = vpop.f32.mrb[6].mxu0  ;;  %v1169_v2 = vpop.f32.mrb[6].mxu1 }
 0x10d   : > { %v1122_v3 = vpop.f32.mrb[7].mxu0  ;;  %v1170_v4 = vpop.f32.mrb[7].mxu1 }
 0x10e   : > { %v797_v5 = vadd.f32 %v1120_v63, %v1703_v25  ;;  %v861_v6 = vadd.f32 %v1168_v0, %v1703_v25  ;;  %v1123_v7 = vadd.f32 %v1122_v3, %v1121_v1  ;;  %v1171_v8 = vadd.f32 %v1170_v4, %v1169_v2 }
 0x110   : > { %917 = vst [vmem:[%s1707_s7 + $0x10] sm:$0xff] %v797_v5  ;;  %933 = vst [vmem:[%s1707_s7 + $0x90] sm:$0xff] %v861_v6  ;;  %v800_v9 = vadd.f32 %v1123_v7, %v1703_v25  ;;  %v864_v10 = vadd.f32 %v1171_v8, %v1703_v25 }
 0x112   : > { %918 = vst [vmem:[%s1707_s7 + $0x18] sm:$0xff] %v800_v9  ;;  %934 = vst [vmem:[%s1707_s7 + $0x98] sm:$0xff] %v864_v10  ;;  %v1124_v11 = vpop.f32.mrb[8].mxu0  ;;  %v1172_v12 = vpop.f32.mrb[8].mxu1 }
 0x113   : > { %v1125_v13 = vpop.f32.mrb[9].mxu0  ;;  %v1173_v14 = vpop.f32.mrb[9].mxu1 }
 0x114   : > { %v1126_v15 = vadd.f32 %v1125_v13, %v1124_v11  ;;  %v1174_v16 = vadd.f32 %v1173_v14, %v1172_v12  ;;  %v1127_v17 = vpop.f32.mrb[10].mxu0  ;;  %v1175_v18 = vpop.f32.mrb[10].mxu1 }
 0x115   : > { %v1128_v19 = vpop.f32.mrb[11].mxu0  ;;  %v1176_v20 = vpop.f32.mrb[11].mxu1 }
 0x116   : > { %v805_v21 = vadd.f32 %v1126_v15, %v1703_v25  ;;  %v869_v22 = vadd.f32 %v1174_v16, %v1703_v25  ;;  %v1129_v23 = vadd.f32 %v1128_v19, %v1127_v17  ;;  %v1177_v24 = vadd.f32 %v1176_v20, %v1175_v18 }
 0x118   : > { %919 = vst [vmem:[%s1707_s7 + $0x20] sm:$0xff] %v805_v21  ;;  %935 = vst [vmem:[%s1707_s7 + $0xa0] sm:$0xff] %v869_v22  ;;  %v808_v29 = vadd.f32 %v1129_v23, %v1703_v25  ;;  %v872_v30 = vadd.f32 %v1177_v24, %v1703_v25 }
 0x11a   : > { %920 = vst [vmem:[%s1707_s7 + $0x28] sm:$0xff] %v808_v29  ;;  %936 = vst [vmem:[%s1707_s7 + $0xa8] sm:$0xff] %v872_v30  ;;  %v1130_v31 = vpop.f32.mrb[12].mxu0  ;;  %v1178_v26 = vpop.f32.mrb[12].mxu1 }
 0x11b   : > { %v1131_v32 = vpop.f32.mrb[13].mxu0  ;;  %v1179_v34 = vpop.f32.mrb[13].mxu1 }
 0x11c   : > { %v1132_v33 = vadd.f32 %v1131_v32, %v1130_v31  ;;  %v1133_v35 = vpop.f32.mrb[14].mxu0  ;;  %v1180_v36 = vadd.f32 %v1179_v34, %v1178_v26  ;;  %v1181_v28 = vpop.f32.mrb[14].mxu1 }
 0x11d   : > { %v1134_v37 = vpop.f32.mrb[15].mxu0  ;;  %v1182_v40 = vpop.f32.mrb[15].mxu1 }
 0x11e   : > { %v813_v38 = vadd.f32 %v1132_v33, %v1703_v25  ;;  %v1135_v39 = vadd.f32 %v1134_v37, %v1133_v35  ;;  %v877_v41 = vadd.f32 %v1180_v36, %v1703_v25  ;;  %v1183_v42 = vadd.f32 %v1182_v40, %v1181_v28 }
 0x120   : > { %921 = vst [vmem:[%s1707_s7 + $0x30] sm:$0xff] %v813_v38  ;;  %v816_v43 = vadd.f32 %v1135_v39, %v1703_v25  ;;  %937 = vst [vmem:[%s1707_s7 + $0xb0] sm:$0xff] %v877_v41  ;;  %v880_v44 = vadd.f32 %v1183_v42, %v1703_v25 }
 0x122   : > { %922 = vst [vmem:[%s1707_s7 + $0x38] sm:$0xff] %v816_v43  ;;  %v1136_v45 = vpop.f32.mrb[16].mxu0  ;;  %938 = vst [vmem:[%s1707_s7 + $0xb8] sm:$0xff] %v880_v44  ;;  %v1184_v47 = vpop.f32.mrb[16].mxu1 }
 0x123   : > { %v1137_v46 = vpop.f32.mrb[17].mxu0  ;;  %v1185_v49 = vpop.f32.mrb[17].mxu1 }
 0x124   : > { %v1138_v27 = vadd.f32 %v1137_v46, %v1136_v45  ;;  %v1139_v48 = vpop.f32.mrb[18].mxu0  ;;  %v1186_v52 = vadd.f32 %v1185_v49, %v1184_v47  ;;  %v1187_v53 = vpop.f32.mrb[18].mxu1 }
 0x125   : > { %v1140_v50 = vpop.f32.mrb[19].mxu0  ;;  %v1188_v55 = vpop.f32.mrb[19].mxu1 }
 0x126   : > { %v821_v51 = vadd.f32 %v1138_v27, %v1703_v25  ;;  %v1141_v54 = vadd.f32 %v1140_v50, %v1139_v48  ;;  %v885_v56 = vadd.f32 %v1186_v52, %v1703_v25  ;;  %v1189_v58 = vadd.f32 %v1188_v55, %v1187_v53 }
 0x128   : > { %923 = vst [vmem:[%s1707_s7 + $0x40] sm:$0xff] %v821_v51  ;;  %v824_v57 = vadd.f32 %v1141_v54, %v1703_v25  ;;  %939 = vst [vmem:[%s1707_s7 + $0xc0] sm:$0xff] %v885_v56  ;;  %v888_v59 = vadd.f32 %v1189_v58, %v1703_v25 }
 0x12a   : > { %924 = vst [vmem:[%s1707_s7 + $0x48] sm:$0xff] %v824_v57  ;;  %v1142_v60 = vpop.f32.mrb[20].mxu0  ;;  %940 = vst [vmem:[%s1707_s7 + $0xc8] sm:$0xff] %v888_v59  ;;  %v1190_v62 = vpop.f32.mrb[20].mxu1 }
 0x12b   : > { %v1143_v61 = vpop.f32.mrb[21].mxu0  ;;  %v1191_v1 = vpop.f32.mrb[21].mxu1 }
 0x12c   : > { %v1144_v63 = vadd.f32 %v1143_v61, %v1142_v60  ;;  %v1145_v0 = vpop.f32.mrb[22].mxu0  ;;  %v1192_v4 = vadd.f32 %v1191_v1, %v1190_v62  ;;  %v1193_v5 = vpop.f32.mrb[22].mxu1 }
 0x12d   : > { %v1146_v2 = vpop.f32.mrb[23].mxu0  ;;  %v1194_v7 = vpop.f32.mrb[23].mxu1 }
 0x12e   : > { %v829_v3 = vadd.f32 %v1144_v63, %v1703_v25  ;;  %v1147_v6 = vadd.f32 %v1146_v2, %v1145_v0  ;;  %v893_v8 = vadd.f32 %v1192_v4, %v1703_v25  ;;  %v1195_v10 = vadd.f32 %v1194_v7, %v1193_v5 }
 0x130   : > { %925 = vst [vmem:[%s1707_s7 + $0x50] sm:$0xff] %v829_v3  ;;  %v832_v9 = vadd.f32 %v1147_v6, %v1703_v25  ;;  %941 = vst [vmem:[%s1707_s7 + $0xd0] sm:$0xff] %v893_v8  ;;  %v896_v11 = vadd.f32 %v1195_v10, %v1703_v25 }
 0x132   : > { %926 = vst [vmem:[%s1707_s7 + $0x58] sm:$0xff] %v832_v9  ;;  %v1148_v12 = vpop.f32.mrb[24].mxu0  ;;  %942 = vst [vmem:[%s1707_s7 + $0xd8] sm:$0xff] %v896_v11  ;;  %v1196_v14 = vpop.f32.mrb[24].mxu1 }
 0x133   : > { %v1149_v13 = vpop.f32.mrb[25].mxu0  ;;  %v1197_v17 = vpop.f32.mrb[25].mxu1 }
 0x134   : > { %v1150_v15 = vadd.f32 %v1149_v13, %v1148_v12  ;;  %v1151_v16 = vpop.f32.mrb[26].mxu0  ;;  %v1198_v20 = vadd.f32 %v1197_v17, %v1196_v14  ;;  %v1199_v21 = vpop.f32.mrb[26].mxu1 }
 0x135   : > { %v1152_v18 = vpop.f32.mrb[27].mxu0  ;;  %v1200_v23 = vpop.f32.mrb[27].mxu1 }
 0x136   : > { %v837_v19 = vadd.f32 %v1150_v15, %v1703_v25  ;;  %v1153_v22 = vadd.f32 %v1152_v18, %v1151_v16  ;;  %v901_v24 = vadd.f32 %v1198_v20, %v1703_v25  ;;  %v1201_v30 = vadd.f32 %v1200_v23, %v1199_v21 }
 0x138   : > { %927 = vst [vmem:[%s1707_s7 + $0x60] sm:$0xff] %v837_v19  ;;  %v840_v29 = vadd.f32 %v1153_v22, %v1703_v25  ;;  %943 = vst [vmem:[%s1707_s7 + $0xe0] sm:$0xff] %v901_v24  ;;  %v904_v31 = vadd.f32 %v1201_v30, %v1703_v25 }
 0x13a   : > { %928 = vst [vmem:[%s1707_s7 + $0x68] sm:$0xff] %v840_v29  ;;  %v1154_v26 = vpop.f32.mrb[28].mxu0  ;;  %944 = vst [vmem:[%s1707_s7 + $0xe8] sm:$0xff] %v904_v31  ;;  %v1202_v33 = vpop.f32.mrb[28].mxu1 }
 0x13b   : > { %v1155_v32 = vpop.f32.mrb[29].mxu0  ;;  %v1203_v36 = vpop.f32.mrb[29].mxu1 }
 0x13c   : > { %v1156_v34 = vadd.f32 %v1155_v32, %v1154_v26  ;;  %v1157_v35 = vpop.f32.mrb[30].mxu0  ;;  %v1204_v38 = vadd.f32 %v1203_v36, %v1202_v33  ;;  %v1205_v39 = vpop.f32.mrb[30].mxu1 }
 0x13d   : > { %v1158_v28 = vpop.f32.mrb[31].mxu0  ;;  %v1206_v41 = vpop.f32.mrb[31].mxu1 }
 0x13e   : > { %v845_v37 = vadd.f32 %v1156_v34, %v1703_v25  ;;  %v1159_v40 = vadd.f32 %v1158_v28, %v1157_v35  ;;  %v909_v42 = vadd.f32 %v1204_v38, %v1703_v25  ;;  %v1207_v44 = vadd.f32 %v1206_v41, %v1205_v39 }
 0x140   : > { %929 = vst [vmem:[%s1707_s7 + $0x70] sm:$0xff] %v845_v37  ;;  %v848_v43 = vadd.f32 %v1159_v40, %v1703_v25  ;;  %945 = vst [vmem:[%s1707_s7 + $0xf0] sm:$0xff] %v909_v42  ;;  %v912_v45 = vadd.f32 %v1207_v44, %v1703_v25 }
 0x142   : > { %930 = vst [vmem:[%s1707_s7 + $0x78] sm:$0xff] %v848_v43  ;;  %946 = vst [vmem:[%s1707_s7 + $0xf8] sm:$0xff] %v912_v45 }
 0x143   : > { %1310 = shalt.err (!%p1307_p5)
}
 0x144   : > { %s1311_s24 = scalar_lea.hbm %s1772_s13, 4096  ;;  %s1315_s27 = scalar_lea.hbm %s1833_s5, 8192 }
 0x145   : > { %p1312_p6 = scmp.ne.s32.totalorder %s1772_s13, %s1311_s24  ;;  %p1316_p10 = scmp.lt.u32.totalorder %s1772_s13, %s1833_s5 }
 0x146   : > { %p1317_p11 = scmp.lt.u32.totalorder %s1315_s27, %s1311_s24  ;;  %p1319_p13 = scmp.lt.u32.totalorder %s1311_s24, %s1772_s13 }
 0x147   : > { %p1313_p7 = pnand %p1312_p6, %p1450_p4 }
 0x148   : > { %p1318_p12 = por %p1317_p11, %p1316_p10 }
 0x149   : > { %p1314_p9 = pneg %p1313_p7 }
 0x14a   : > { %p1320_p0 = por %p1319_p13, %p1318_p12 }
 0x14c   : > { %p1321_p1 = pnand %p1320_p0, %p1314_p9 }
 0x14e   : > { %1324 = shalt.err (!%p1321_p1)
}
 0x14f   : > { %s1378_s8 = smov 128   ;;  %s1379_s11 = smov 8  }
 0x150   : > { %1224 = dma.vmem_to_hbm [thread:$0]  (%p1450_p4), %s1774_s10, 4096, %s1772_s13, %s1782_s21, %s1378_s8, %s1378_s8, %s1379_s11  }
 0x151 PF: > { %p1230_p2 = scmp.ge.s32.totalorder %s1375_s23, 2  ;;  %s977_s12 = sand.u32 1, %s1355_s18  }
 0x152   : > { %s978_s14 = scalar_lea.sflag [#allocation3], %s977_s12 }
 0x153   : > { %p1227_p3 = pnand %p1230_p2, %p1457_p8 }
 0x155   : > { %1350 = dma.done.wait (!%p1227_p3), %s978_s14, 4096  }
 0x156   : > { %1352 = vsyncadd (!%p1227_p3), %s978_s14, 4294963200  ;;  %s18_s23 = sadd.s32 1, %s1375_s23   ;;  %s1836_s18 = smov %s1359_s19 }
 0x157   : > { %p15_p5 = scmp.ge.s32.totalorder %s18_s23, 4   ;;  %s1837_s19 = smov %s1363_s20 }
 0x158   : > { %s1838_s20 = smov %s1463_s6  ;;  %s1839_s21 = smov %s1371_s22 }
 0x159   : > { %s1840_s22 = smov %s1842_s26  ;;  %17 = sbr.rel (!%p15_p5) target bundleno = 4 (0x4), region = 81 }
 0x160   :  { %983 = vsyncpa [#allocation3], 1 }
 0x161   :  { %985 = vsyncpa [#allocation3 + $0x1], 1 }

</bundles_post_ra>
